<compile_context>
chip_gen: v5e
topology: v5e:2x2
jax: 0.10.0
libtpu: 0.0.40
codegen_flags: <defaults>
</compile_context>

<pallas_src>
import functools

import jax
import jax.numpy as jnp
from jax.experimental import pallas as pl
from jax.experimental.pallas import tpu as pltpu

_SQRT2 = 1.4142135623730951


def _erf_approx(x):
    # Abramowitz & Stegun 7.1.26 rational approximation (max abs err ~1.5e-7);
    # guaranteed Mosaic lowering (exp + mul/add only).
    p = 0.3275911
    a1, a2, a3, a4, a5 = 0.254829592, -0.284496736, 1.421413741, -1.453152027, 1.061405429
    sgn = jnp.where(x >= 0.0, 1.0, -1.0)
    ax = jnp.abs(x)
    den = 1.0 + p * ax
    t = pl.reciprocal(den, approx=True)   # EUP slot, frees the VALU
    t = t * (2.0 - den * t)               # one Newton step -> ~f32 exact
    poly = ((((a5 * t + a4) * t + a3) * t + a2) * t + a1) * t
    return sgn * (1.0 - poly * jnp.exp(-ax * ax))


def _gelu_exact(x):
    # PyTorch nn.GELU() default (erf form).
    return 0.5 * x * (1.0 + _erf_approx(x / _SQRT2))


def _softplus(x):
    # matches torch.nn.functional.softplus(beta=1, threshold=20)
    return jnp.where(x > 20.0, x, jnp.log1p(jnp.exp(jnp.minimum(x, 20.0))))


def _ln_ffn(x, g, b, w1, b1, w2, b2):
    # LayerNorm over the last dim + Linear -> GELU -> Linear, 2-D f32 on VMEM.
    mean = jnp.mean(x, axis=-1, keepdims=True)
    var = jnp.mean(jnp.square(x - mean), axis=-1, keepdims=True)
    xn = (x - mean) * jax.lax.rsqrt(var + 1e-5) * g + b
    h = jnp.dot(xn, w1, preferred_element_type=jnp.float32) + b1
    h = _gelu_exact(h)
    return jnp.dot(h, w2, preferred_element_type=jnp.float32) + b2


# --------------------------- fused MixerBlock kernel -------------------------
def _mixer_kernel(x1_ref, x2_ref,
                  g1_ref, be1_ref, w11_ref, b11_ref, w12_ref, b12_ref,
                  g2_ref, be2_ref, w21_ref, b21_ref, w22_ref, b22_ref,
                  wout_ref, wres_ref,
                  o_ref, *, b_blk, H, CW):
    # x1: (B_BLK*H, ch*W)  -- branch-1 / residual layout, rows = (batch, h)
    # x2: (B_BLK*ch*W, H)  -- branch-2 layout, rows = (batch, c, w)
    a1 = x1_ref[...]

    # branch 1: LayerNorm(ch*W) + FFN(ch*W -> 4*dim -> ch*W); M = B_BLK*H rows.
    y1 = _ln_ffn(a1, g1_ref[...], be1_ref[...],
                 w11_ref[...], b11_ref[...], w12_ref[...], b12_ref[...])

    # branch 2: LayerNorm(H) + FFN(H -> 4*H -> H); M = B_BLK*ch*W rows.
    y2 = _ln_ffn(x2_ref[...], g2_ref[...], be2_ref[...],
                 w21_ref[...], b21_ref[...], w22_ref[...], b22_ref[...])

    # per-batch minor-dims transpose back into the branch-1 layout (XLU work,
    # the only in-kernel layout change left).
    y2a = jnp.transpose(y2.reshape(b_blk, CW, H), (0, 2, 1)).reshape(b_blk * H, CW)

    h_a = y1 + y2a                                           # (B_BLK*H, ch*W)

    # fused 1x1 output_conv(h) + 1x1 res_conv(x): two lane-dense MXU matmuls
    # against kron(conv_w, I_W) (columns stay (d, w)-interleaved, N = dim_out*W).
    out = (jnp.dot(h_a, wout_ref[...], preferred_element_type=jnp.float32)
           + jnp.dot(a1, wres_ref[...], preferred_element_type=jnp.float32))

    o_ref[...] = out.astype(o_ref.dtype)   # single lane-dense full-tile store


def _pick_b_blk(bs, H, target_rows=128):
    cap = max(1, target_rows // max(H, 1))
    for cand in range(min(bs, cap), 0, -1):
        if bs % cand == 0:
            return cand
    return 1


# ------------------------------- full forward --------------------------------
def mixer_block_forward(x, time_emb, p, *, b_blk=None):
    bs, ch, H, W = x.shape
    dim_out = p["out_w"].shape[1]
    CW, DW = ch * W, dim_out * W
    Hd1 = p["blk1_w1"].shape[1]
    Hd2 = p["blk2_w1"].shape[1]

    if b_blk is None:
        b_blk = _pick_b_blk(bs, H)
    assert bs % b_blk == 0, (bs, b_blk)

    # ---- wrapper-side activation layout prep (HBM transposes done by XLA) ----
    x1 = jnp.transpose(x, (0, 2, 1, 3)).reshape(bs * H, CW).astype(jnp.float32)
    x2 = jnp.transpose(x, (0, 1, 3, 2)).reshape(bs * CW, H).astype(jnp.float32)

    # ---- weight-side prep (tiny; constant-folded under jit) ----
    eye_w = jnp.eye(W, dtype=jnp.float32)
    wout = jnp.kron(p["out_w"].astype(jnp.float32), eye_w)    # (ch*W, dim_out*W)
    wres = jnp.kron(p["res_w"].astype(jnp.float32), eye_w)    # (ch*W, dim_out*W)
    # TODO(synk): at production W, drop the kron and do a pixel-major combine
    # (keeps v7x's 64 MiB VMEM budget and avoids the W-fold combine-FLOP blowup).

    row = lambda a: a.reshape(1, -1).astype(jnp.float32)
    params = [
        row(p["ln1_g"]), row(p["ln1_b"]),
        p["blk1_w1"].astype(jnp.float32), row(p["blk1_b1"]),
        p["blk1_w2"].astype(jnp.float32), row(p["blk1_b2"]),
        row(p["ln2_g"]), row(p["ln2_b"]),
        p["blk2_w1"].astype(jnp.float32), row(p["blk2_b1"]),
        p["blk2_w2"].astype(jnp.float32), row(p["blk2_b2"]),
        wout, wres,
    ]

    kernel = functools.partial(_mixer_kernel, b_blk=b_blk, H=H, CW=CW)

    in_specs = [
        pl.BlockSpec((b_blk * H, CW), lambda b: (b, 0)),      # branch-1 input block
        pl.BlockSpec((b_blk * CW, H), lambda b: (b, 0)),      # branch-2 input block
    ] + [pl.BlockSpec(a.shape, lambda b: (0, 0)) for a in params]  # VMEM-resident weights

    cost = pl.CostEstimate(
        flops=int(bs * (4 * H * CW * Hd1 + 4 * CW * H * Hd2 + 4 * H * CW * DW)),
        transcendentals=int(2 * bs * (H * Hd1 + CW * Hd2)),
        bytes_accessed=int(4 * (x1.size + x2.size + bs * H * DW)
                           + sum(4 * a.size for a in params)),
    )

    out_flat = pl.pallas_call(
        kernel,
        out_shape=jax.ShapeDtypeStruct((bs * H, DW), jnp.float32),
        grid=(bs // b_blk,),
        in_specs=in_specs,
        out_specs=pl.BlockSpec((b_blk * H, DW), lambda b: (b, 0)),
        compiler_params=pltpu.CompilerParams(
            # TODO(synk): verify dual-TC sharding on v7x; switch to
            # pltpu.CORE_PARALLEL if the Mosaic dump shows a single-core loop.
            dimension_semantics=("parallel",),
            vmem_limit_bytes=32 * 1024 * 1024,
        ),
        cost_estimate=cost,
    )(x1, x2, *params)

    # ---- wrapper-side epilogue: NCHW layout + per-channel / per-batch biases ----
    out = out_flat.reshape(bs, H, dim_out, W).transpose(0, 2, 1, 3)   # (bs, dim_out, H, W)
    mish = time_emb * jnp.tanh(_softplus(time_emb))                   # hoisted time MLP
    t = mish.astype(jnp.float32) @ p["t_w"].astype(jnp.float32) + p["t_b"]
    out = out + (p["out_b"] + p["res_b"])[None, :, None, None] + t[:, :, None, None]
    return out.astype(x.dtype)


# ---------------------------- pure-JAX reference -----------------------------
def reference(x, time_emb, p):
    bs, ch, H, W = x.shape

    def ln(v, g, b):
        m = v.mean(-1, keepdims=True)
        var = ((v - m) ** 2).mean(-1, keepdims=True)
        return (v - m) / jnp.sqrt(var + 1e-5) * g + b

    def gelu(v):  # exact erf GELU, like torch.nn.GELU()
        return 0.5 * v * (1.0 + jax.scipy.special.erf(v / _SQRT2))

    def ffn(v, w1, b1, w2, b2):
        return gelu(v @ w1 + b1) @ w2 + b2

    x1 = jnp.transpose(x, (0, 2, 1, 3)).reshape(bs, H, ch * W)
    y1 = ffn(ln(x1, p["ln1_g"], p["ln1_b"]),
             p["blk1_w1"], p["blk1_b1"], p["blk1_w2"], p["blk1_b2"])
    h = jnp.transpose(y1.reshape(bs, H, ch, W), (0, 2, 1, 3))
    x2 = jnp.transpose(x, (0, 1, 3, 2))
    y2 = ffn(ln(x2, p["ln2_g"], p["ln2_b"]),
             p["blk2_w1"], p["blk2_b1"], p["blk2_w2"], p["blk2_b2"])
    h = h + jnp.transpose(y2, (0, 1, 3, 2))
    hc = jnp.einsum("bchw,cd->bdhw", h, p["out_w"]) + p["out_b"][None, :, None, None]
    mish = time_emb * jnp.tanh(_softplus(time_emb))
    t = mish @ p["t_w"] + p["t_b"]
    hc = hc + t[:, :, None, None]
    res = jnp.einsum("bchw,cd->bdhw", x, p["res_w"]) + p["res_b"][None, :, None, None]
    return hc + res


def init_params(key, dim, dim_out, H, W, time_emb_dim):
    D1, Hd1 = dim * W, 4 * dim
    D2, Hd2 = H, 4 * H
    ks = jax.random.split(key, 16)
    n = lambda k, shape, s: s * jax.random.normal(k, shape, jnp.float32)
    return {
        "ln1_g": 1.0 + n(ks[0], (D1,), 0.1), "ln1_b": n(ks[1], (D1,), 0.1),
        "blk1_w1": n(ks[2], (D1, Hd1), 0.05), "blk1_b1": n(ks[3], (Hd1,), 0.01),
        "blk1_w2": n(ks[4], (Hd1, D1), 0.05), "blk1_b2": n(ks[5], (D1,), 0.01),
        "ln2_g": 1.0 + n(ks[6], (D2,), 0.1), "ln2_b": n(ks[7], (D2,), 0.1),
        "blk2_w1": n(ks[8], (D2, Hd2), 0.05), "blk2_b1": n(ks[9], (Hd2,), 0.01),
        "blk2_w2": n(ks[10], (Hd2, D2), 0.05), "blk2_b2": n(ks[11], (D2,), 0.01),
        "out_w": n(ks[12], (dim, dim_out), 0.05), "out_b": n(ks[13], (dim_out,), 0.01),
        "res_w": n(ks[14], (dim, dim_out), 0.05), "res_b": n(ks[15], (dim_out,), 0.01),
        "t_w": n(jax.random.PRNGKey(123), (time_emb_dim, dim_out), 0.05),
        "t_b": n(jax.random.PRNGKey(124), (dim_out,), 0.01),
    }


if __name__ == "__main__":
    # bs=16 so batch-blocking (B_BLK=8 -> M=128 matmul rows, grid=(2,)) is exercised.
    bs, dim, dim_out, H, W, time_emb_dim = 16, 4, 8, 16, 16, 32
    key = jax.random.PRNGKey(0)
    kx, kt, kp = jax.random.split(key, 3)
    x = jax.random.normal(kx, (bs, dim, H, W), jnp.float32)
    time_emb = jax.random.normal(kt, (bs, time_emb_dim), jnp.float32)
    params = init_params(kp, dim, dim_out, H, W, time_emb_dim)

    fwd = jax.jit(mixer_block_forward)
    out = jax.block_until_ready(fwd(x, time_emb, params))
    ref = reference(x, time_emb, params)

    assert out.shape == (bs, dim_out, H, W), out.shape
    assert jnp.allclose(out, ref, atol=2e-4, rtol=1e-3), float(jnp.max(jnp.abs(out - ref)))
    print("KERNEL_OK")
</pallas_src>

<mosaic_0001>
module attributes {stable_mosaic.version = 11 : i64} {
  func.func @_mixer_kernel(%arg0: i32, %arg1: memref<128x64xf32, #tpu.memory_space<vmem>>, %arg2: memref<512x16xf32, #tpu.memory_space<vmem>>, %arg3: memref<1x64xf32, #tpu.memory_space<vmem>>, %arg4: memref<1x64xf32, #tpu.memory_space<vmem>>, %arg5: memref<64x16xf32, #tpu.memory_space<vmem>>, %arg6: memref<1x16xf32, #tpu.memory_space<vmem>>, %arg7: memref<16x64xf32, #tpu.memory_space<vmem>>, %arg8: memref<1x64xf32, #tpu.memory_space<vmem>>, %arg9: memref<1x16xf32, #tpu.memory_space<vmem>>, %arg10: memref<1x16xf32, #tpu.memory_space<vmem>>, %arg11: memref<16x64xf32, #tpu.memory_space<vmem>>, %arg12: memref<1x64xf32, #tpu.memory_space<vmem>>, %arg13: memref<64x16xf32, #tpu.memory_space<vmem>>, %arg14: memref<1x16xf32, #tpu.memory_space<vmem>>, %arg15: memref<64x128xf32, #tpu.memory_space<vmem>>, %arg16: memref<64x128xf32, #tpu.memory_space<vmem>>, %arg17: memref<128x128xf32, #tpu.memory_space<vmem>>) attributes {dimension_semantics = [#tpu.dimension_semantics<parallel>], iteration_bounds = array<i64: 2>, scalar_prefetch = 0 : i64, scratch_operands = 0 : i64, tpu.core_type = #tpu.core_type<tc>, window_params = [{transform_indices = @transform_0, window_bounds = array<i64: 128, 64>}, {transform_indices = @transform_1, window_bounds = array<i64: 512, 16>}, {pipeline_mode = #tpu.pipeline_mode<synchronous>, transform_indices = @transform_2, window_bounds = array<i64: 1, 64>}, {pipeline_mode = #tpu.pipeline_mode<synchronous>, transform_indices = @transform_3, window_bounds = array<i64: 1, 64>}, {pipeline_mode = #tpu.pipeline_mode<synchronous>, transform_indices = @transform_4, window_bounds = array<i64: 64, 16>}, {pipeline_mode = #tpu.pipeline_mode<synchronous>, transform_indices = @transform_5, window_bounds = array<i64: 1, 16>}, {pipeline_mode = #tpu.pipeline_mode<synchronous>, transform_indices = @transform_6, window_bounds = array<i64: 16, 64>}, {pipeline_mode = #tpu.pipeline_mode<synchronous>, transform_indices = @transform_7, window_bounds = array<i64: 1, 64>}, {pipeline_mode = #tpu.pipeline_mode<synchronous>, transform_indices = @transform_8, window_bounds = array<i64: 1, 16>}, {pipeline_mode = #tpu.pipeline_mode<synchronous>, transform_indices = @transform_9, window_bounds = array<i64: 1, 16>}, {pipeline_mode = #tpu.pipeline_mode<synchronous>, transform_indices = @transform_10, window_bounds = array<i64: 16, 64>}, {pipeline_mode = #tpu.pipeline_mode<synchronous>, transform_indices = @transform_11, window_bounds = array<i64: 1, 64>}, {pipeline_mode = #tpu.pipeline_mode<synchronous>, transform_indices = @transform_12, window_bounds = array<i64: 64, 16>}, {pipeline_mode = #tpu.pipeline_mode<synchronous>, transform_indices = @transform_13, window_bounds = array<i64: 1, 16>}, {pipeline_mode = #tpu.pipeline_mode<synchronous>, transform_indices = @transform_14, window_bounds = array<i64: 64, 128>}, {pipeline_mode = #tpu.pipeline_mode<synchronous>, transform_indices = @transform_15, window_bounds = array<i64: 64, 128>}, {transform_indices = @transform_16, window_bounds = array<i64: 128, 128>}]} {
    %c0 = arith.constant 0 : index
    %c0_0 = arith.constant 0 : index
    %0 = vector.load %arg1[%c0, %c0_0] : memref<128x64xf32, #tpu.memory_space<vmem>>, vector<128x64xf32>
    %c0_1 = arith.constant 0 : index
    %c0_2 = arith.constant 0 : index
    %1 = vector.load %arg3[%c0_1, %c0_2] : memref<1x64xf32, #tpu.memory_space<vmem>>, vector<1x64xf32>
    %c0_3 = arith.constant 0 : index
    %c0_4 = arith.constant 0 : index
    %2 = vector.load %arg4[%c0_3, %c0_4] : memref<1x64xf32, #tpu.memory_space<vmem>>, vector<1x64xf32>
    %c0_5 = arith.constant 0 : index
    %c0_6 = arith.constant 0 : index
    %3 = vector.load %arg5[%c0_5, %c0_6] : memref<64x16xf32, #tpu.memory_space<vmem>>, vector<64x16xf32>
    %c0_7 = arith.constant 0 : index
    %c0_8 = arith.constant 0 : index
    %4 = vector.load %arg6[%c0_7, %c0_8] : memref<1x16xf32, #tpu.memory_space<vmem>>, vector<1x16xf32>
    %c0_9 = arith.constant 0 : index
    %c0_10 = arith.constant 0 : index
    %5 = vector.load %arg7[%c0_9, %c0_10] : memref<16x64xf32, #tpu.memory_space<vmem>>, vector<16x64xf32>
    %c0_11 = arith.constant 0 : index
    %c0_12 = arith.constant 0 : index
    %6 = vector.load %arg8[%c0_11, %c0_12] : memref<1x64xf32, #tpu.memory_space<vmem>>, vector<1x64xf32>
    %cst = arith.constant dense<0.000000e+00> : vector<128xf32>
    %7 = vector.multi_reduction <add>, %0, %cst [1] : vector<128x64xf32> to vector<128xf32>
    %8 = vector.shape_cast %7 : vector<128xf32> to vector<128x1xf32>
    %cst_13 = arith.constant 6.400000e+01 : f32
    %9 = vector.broadcast %cst_13 : f32 to vector<128x1xf32>
    %10 = arith.divf %8, %9 : vector<128x1xf32>
    %11 = vector.broadcast %10 : vector<128x1xf32> to vector<128x64xf32>
    %12 = arith.subf %0, %11 : vector<128x64xf32>
    %13 = arith.mulf %12, %12 : vector<128x64xf32>
    %cst_14 = arith.constant dense<0.000000e+00> : vector<128xf32>
    %14 = vector.multi_reduction <add>, %13, %cst_14 [1] : vector<128x64xf32> to vector<128xf32>
    %15 = vector.shape_cast %14 : vector<128xf32> to vector<128x1xf32>
    %cst_15 = arith.constant 6.400000e+01 : f32
    %16 = vector.broadcast %cst_15 : f32 to vector<128x1xf32>
    %17 = arith.divf %15, %16 : vector<128x1xf32>
    %18 = vector.broadcast %10 : vector<128x1xf32> to vector<128x64xf32>
    %19 = arith.subf %0, %18 : vector<128x64xf32>
    %cst_16 = arith.constant 9.99999974E-6 : f32
    %20 = vector.broadcast %cst_16 : f32 to vector<128x1xf32>
    %21 = arith.addf %17, %20 : vector<128x1xf32>
    %22 = math.rsqrt %21 : vector<128x1xf32>
    %23 = vector.broadcast %22 : vector<128x1xf32> to vector<128x64xf32>
    %24 = arith.mulf %19, %23 : vector<128x64xf32>
    %25 = vector.broadcast %1 : vector<1x64xf32> to vector<128x64xf32>
    %26 = arith.mulf %24, %25 : vector<128x64xf32>
    %27 = vector.broadcast %2 : vector<1x64xf32> to vector<128x64xf32>
    %28 = arith.addf %26, %27 : vector<128x64xf32>
    %cst_17 = arith.constant dense<0.000000e+00> : vector<128x16xf32>
    %29 = tpu.matmul %28, %3, %cst_17 {dimension_numbers = #tpu.dot_dimension_numbers<[1], [0], [0], [1], [0, 0, 1, 1], [], []>} : vector<128x64xf32>, vector<64x16xf32>, vector<128x16xf32> -> vector<128x16xf32>
    %30 = vector.broadcast %4 : vector<1x16xf32> to vector<128x16xf32>
    %31 = arith.addf %29, %30 : vector<128x16xf32>
    %cst_18 = arith.constant 5.000000e-01 : f32
    %32 = vector.broadcast %cst_18 : f32 to vector<128x16xf32>
    %33 = arith.mulf %32, %31 : vector<128x16xf32>
    %cst_19 = arith.constant 1.41421354 : f32
    %34 = vector.broadcast %cst_19 : f32 to vector<128x16xf32>
    %35 = arith.divf %31, %34 : vector<128x16xf32>
    %cst_20 = arith.constant 0.000000e+00 : f32
    %36 = vector.broadcast %cst_20 : f32 to vector<128x16xf32>
    %37 = arith.cmpf oge, %35, %36 : vector<128x16xf32>
    %cst_21 = arith.constant 1.000000e+00 : f32
    %cst_22 = arith.constant -1.000000e+00 : f32
    %38 = vector.broadcast %cst_21 : f32 to vector<128x16xf32>
    %39 = vector.broadcast %cst_22 : f32 to vector<128x16xf32>
    %40 = arith.select %37, %38, %39 : vector<128x16xi1>, vector<128x16xf32>
    %41 = math.absf %35 : vector<128x16xf32>
    %cst_23 = arith.constant 0.327591091 : f32
    %42 = vector.broadcast %cst_23 : f32 to vector<128x16xf32>
    %43 = arith.mulf %42, %41 : vector<128x16xf32>
    %cst_24 = arith.constant 1.000000e+00 : f32
    %44 = vector.broadcast %cst_24 : f32 to vector<128x16xf32>
    %45 = arith.addf %44, %43 : vector<128x16xf32>
    %46 = tpu.reciprocal %45 {approx = true} : vector<128x16xf32> -> vector<128x16xf32>
    %47 = arith.mulf %45, %46 : vector<128x16xf32>
    %cst_25 = arith.constant 2.000000e+00 : f32
    %48 = vector.broadcast %cst_25 : f32 to vector<128x16xf32>
    %49 = arith.subf %48, %47 : vector<128x16xf32>
    %50 = arith.mulf %46, %49 : vector<128x16xf32>
    %cst_26 = arith.constant 1.06140542 : f32
    %51 = vector.broadcast %cst_26 : f32 to vector<128x16xf32>
    %52 = arith.mulf %51, %50 : vector<128x16xf32>
    %cst_27 = arith.constant -1.45315206 : f32
    %53 = vector.broadcast %cst_27 : f32 to vector<128x16xf32>
    %54 = arith.addf %52, %53 : vector<128x16xf32>
    %55 = arith.mulf %54, %50 : vector<128x16xf32>
    %cst_28 = arith.constant 1.42141378 : f32
    %56 = vector.broadcast %cst_28 : f32 to vector<128x16xf32>
    %57 = arith.addf %55, %56 : vector<128x16xf32>
    %58 = arith.mulf %57, %50 : vector<128x16xf32>
    %cst_29 = arith.constant -0.284496725 : f32
    %59 = vector.broadcast %cst_29 : f32 to vector<128x16xf32>
    %60 = arith.addf %58, %59 : vector<128x16xf32>
    %61 = arith.mulf %60, %50 : vector<128x16xf32>
    %cst_30 = arith.constant 0.254829586 : f32
    %62 = vector.broadcast %cst_30 : f32 to vector<128x16xf32>
    %63 = arith.addf %61, %62 : vector<128x16xf32>
    %64 = arith.mulf %63, %50 : vector<128x16xf32>
    %cst_31 = arith.constant 0.000000e+00 : f32
    %65 = vector.broadcast %cst_31 : f32 to vector<128x16xf32>
    %66 = arith.subf %65, %41 : vector<128x16xf32>
    %67 = arith.mulf %66, %41 : vector<128x16xf32>
    %68 = math.exp %67 : vector<128x16xf32>
    %69 = arith.mulf %64, %68 : vector<128x16xf32>
    %cst_32 = arith.constant 1.000000e+00 : f32
    %70 = vector.broadcast %cst_32 : f32 to vector<128x16xf32>
    %71 = arith.subf %70, %69 : vector<128x16xf32>
    %72 = arith.mulf %40, %71 : vector<128x16xf32>
    %cst_33 = arith.constant 1.000000e+00 : f32
    %73 = vector.broadcast %cst_33 : f32 to vector<128x16xf32>
    %74 = arith.addf %73, %72 : vector<128x16xf32>
    %75 = arith.mulf %33, %74 : vector<128x16xf32>
    %cst_34 = arith.constant dense<0.000000e+00> : vector<128x64xf32>
    %76 = tpu.matmul %75, %5, %cst_34 {dimension_numbers = #tpu.dot_dimension_numbers<[1], [0], [0], [1], [0, 0, 1, 1], [], []>} : vector<128x16xf32>, vector<16x64xf32>, vector<128x64xf32> -> vector<128x64xf32>
    %77 = vector.broadcast %6 : vector<1x64xf32> to vector<128x64xf32>
    %78 = arith.addf %76, %77 : vector<128x64xf32>
    %c0_35 = arith.constant 0 : index
    %c0_36 = arith.constant 0 : index
    %79 = vector.load %arg2[%c0_35, %c0_36] : memref<512x16xf32, #tpu.memory_space<vmem>>, vector<512x16xf32>
    %c0_37 = arith.constant 0 : index
    %c0_38 = arith.constant 0 : index
    %80 = vector.load %arg9[%c0_37, %c0_38] : memref<1x16xf32, #tpu.memory_space<vmem>>, vector<1x16xf32>
    %c0_39 = arith.constant 0 : index
    %c0_40 = arith.constant 0 : index
    %81 = vector.load %arg10[%c0_39, %c0_40] : memref<1x16xf32, #tpu.memory_space<vmem>>, vector<1x16xf32>
    %c0_41 = arith.constant 0 : index
    %c0_42 = arith.constant 0 : index
    %82 = vector.load %arg11[%c0_41, %c0_42] : memref<16x64xf32, #tpu.memory_space<vmem>>, vector<16x64xf32>
    %c0_43 = arith.constant 0 : index
    %c0_44 = arith.constant 0 : index
    %83 = vector.load %arg12[%c0_43, %c0_44] : memref<1x64xf32, #tpu.memory_space<vmem>>, vector<1x64xf32>
    %c0_45 = arith.constant 0 : index
    %c0_46 = arith.constant 0 : index
    %84 = vector.load %arg13[%c0_45, %c0_46] : memref<64x16xf32, #tpu.memory_space<vmem>>, vector<64x16xf32>
    %c0_47 = arith.constant 0 : index
    %c0_48 = arith.constant 0 : index
    %85 = vector.load %arg14[%c0_47, %c0_48] : memref<1x16xf32, #tpu.memory_space<vmem>>, vector<1x16xf32>
    %cst_49 = arith.constant dense<0.000000e+00> : vector<512xf32>
    %86 = vector.multi_reduction <add>, %79, %cst_49 [1] : vector<512x16xf32> to vector<512xf32>
    %87 = vector.shape_cast %86 : vector<512xf32> to vector<512x1xf32>
    %cst_50 = arith.constant 1.600000e+01 : f32
    %88 = vector.broadcast %cst_50 : f32 to vector<512x1xf32>
    %89 = arith.divf %87, %88 : vector<512x1xf32>
    %90 = vector.broadcast %89 : vector<512x1xf32> to vector<512x16xf32>
    %91 = arith.subf %79, %90 : vector<512x16xf32>
    %92 = arith.mulf %91, %91 : vector<512x16xf32>
    %cst_51 = arith.constant dense<0.000000e+00> : vector<512xf32>
    %93 = vector.multi_reduction <add>, %92, %cst_51 [1] : vector<512x16xf32> to vector<512xf32>
    %94 = vector.shape_cast %93 : vector<512xf32> to vector<512x1xf32>
    %cst_52 = arith.constant 1.600000e+01 : f32
    %95 = vector.broadcast %cst_52 : f32 to vector<512x1xf32>
    %96 = arith.divf %94, %95 : vector<512x1xf32>
    %97 = vector.broadcast %89 : vector<512x1xf32> to vector<512x16xf32>
    %98 = arith.subf %79, %97 : vector<512x16xf32>
    %cst_53 = arith.constant 9.99999974E-6 : f32
    %99 = vector.broadcast %cst_53 : f32 to vector<512x1xf32>
    %100 = arith.addf %96, %99 : vector<512x1xf32>
    %101 = math.rsqrt %100 : vector<512x1xf32>
    %102 = vector.broadcast %101 : vector<512x1xf32> to vector<512x16xf32>
    %103 = arith.mulf %98, %102 : vector<512x16xf32>
    %104 = vector.broadcast %80 : vector<1x16xf32> to vector<512x16xf32>
    %105 = arith.mulf %103, %104 : vector<512x16xf32>
    %106 = vector.broadcast %81 : vector<1x16xf32> to vector<512x16xf32>
    %107 = arith.addf %105, %106 : vector<512x16xf32>
    %cst_54 = arith.constant dense<0.000000e+00> : vector<512x64xf32>
    %108 = tpu.matmul %107, %82, %cst_54 {dimension_numbers = #tpu.dot_dimension_numbers<[1], [0], [0], [1], [0, 0, 1, 1], [], []>} : vector<512x16xf32>, vector<16x64xf32>, vector<512x64xf32> -> vector<512x64xf32>
    %109 = vector.broadcast %83 : vector<1x64xf32> to vector<512x64xf32>
    %110 = arith.addf %108, %109 : vector<512x64xf32>
    %cst_55 = arith.constant 5.000000e-01 : f32
    %111 = vector.broadcast %cst_55 : f32 to vector<512x64xf32>
    %112 = arith.mulf %111, %110 : vector<512x64xf32>
    %cst_56 = arith.constant 1.41421354 : f32
    %113 = vector.broadcast %cst_56 : f32 to vector<512x64xf32>
    %114 = arith.divf %110, %113 : vector<512x64xf32>
    %cst_57 = arith.constant 0.000000e+00 : f32
    %115 = vector.broadcast %cst_57 : f32 to vector<512x64xf32>
    %116 = arith.cmpf oge, %114, %115 : vector<512x64xf32>
    %cst_58 = arith.constant 1.000000e+00 : f32
    %cst_59 = arith.constant -1.000000e+00 : f32
    %117 = vector.broadcast %cst_58 : f32 to vector<512x64xf32>
    %118 = vector.broadcast %cst_59 : f32 to vector<512x64xf32>
    %119 = arith.select %116, %117, %118 : vector<512x64xi1>, vector<512x64xf32>
    %120 = math.absf %114 : vector<512x64xf32>
    %cst_60 = arith.constant 0.327591091 : f32
    %121 = vector.broadcast %cst_60 : f32 to vector<512x64xf32>
    %122 = arith.mulf %121, %120 : vector<512x64xf32>
    %cst_61 = arith.constant 1.000000e+00 : f32
    %123 = vector.broadcast %cst_61 : f32 to vector<512x64xf32>
    %124 = arith.addf %123, %122 : vector<512x64xf32>
    %125 = tpu.reciprocal %124 {approx = true} : vector<512x64xf32> -> vector<512x64xf32>
    %126 = arith.mulf %124, %125 : vector<512x64xf32>
    %cst_62 = arith.constant 2.000000e+00 : f32
    %127 = vector.broadcast %cst_62 : f32 to vector<512x64xf32>
    %128 = arith.subf %127, %126 : vector<512x64xf32>
    %129 = arith.mulf %125, %128 : vector<512x64xf32>
    %cst_63 = arith.constant 1.06140542 : f32
    %130 = vector.broadcast %cst_63 : f32 to vector<512x64xf32>
    %131 = arith.mulf %130, %129 : vector<512x64xf32>
    %cst_64 = arith.constant -1.45315206 : f32
    %132 = vector.broadcast %cst_64 : f32 to vector<512x64xf32>
    %133 = arith.addf %131, %132 : vector<512x64xf32>
    %134 = arith.mulf %133, %129 : vector<512x64xf32>
    %cst_65 = arith.constant 1.42141378 : f32
    %135 = vector.broadcast %cst_65 : f32 to vector<512x64xf32>
    %136 = arith.addf %134, %135 : vector<512x64xf32>
    %137 = arith.mulf %136, %129 : vector<512x64xf32>
    %cst_66 = arith.constant -0.284496725 : f32
    %138 = vector.broadcast %cst_66 : f32 to vector<512x64xf32>
    %139 = arith.addf %137, %138 : vector<512x64xf32>
    %140 = arith.mulf %139, %129 : vector<512x64xf32>
    %cst_67 = arith.constant 0.254829586 : f32
    %141 = vector.broadcast %cst_67 : f32 to vector<512x64xf32>
    %142 = arith.addf %140, %141 : vector<512x64xf32>
    %143 = arith.mulf %142, %129 : vector<512x64xf32>
    %cst_68 = arith.constant 0.000000e+00 : f32
    %144 = vector.broadcast %cst_68 : f32 to vector<512x64xf32>
    %145 = arith.subf %144, %120 : vector<512x64xf32>
    %146 = arith.mulf %145, %120 : vector<512x64xf32>
    %147 = math.exp %146 : vector<512x64xf32>
    %148 = arith.mulf %143, %147 : vector<512x64xf32>
    %cst_69 = arith.constant 1.000000e+00 : f32
    %149 = vector.broadcast %cst_69 : f32 to vector<512x64xf32>
    %150 = arith.subf %149, %148 : vector<512x64xf32>
    %151 = arith.mulf %119, %150 : vector<512x64xf32>
    %cst_70 = arith.constant 1.000000e+00 : f32
    %152 = vector.broadcast %cst_70 : f32 to vector<512x64xf32>
    %153 = arith.addf %152, %151 : vector<512x64xf32>
    %154 = arith.mulf %112, %153 : vector<512x64xf32>
    %cst_71 = arith.constant dense<0.000000e+00> : vector<512x16xf32>
    %155 = tpu.matmul %154, %84, %cst_71 {dimension_numbers = #tpu.dot_dimension_numbers<[1], [0], [0], [1], [0, 0, 1, 1], [], []>} : vector<512x64xf32>, vector<64x16xf32>, vector<512x16xf32> -> vector<512x16xf32>
    %156 = vector.broadcast %85 : vector<1x16xf32> to vector<512x16xf32>
    %157 = arith.addf %155, %156 : vector<512x16xf32>
    %158 = vector.shape_cast %157 : vector<512x16xf32> to vector<8x64x16xf32>
    %159 = tpu.transpose %158, [0, 2, 1] : vector<8x64x16xf32> -> vector<8x16x64xf32>
    %160 = vector.shape_cast %159 : vector<8x16x64xf32> to vector<128x64xf32>
    %161 = arith.addf %78, %160 : vector<128x64xf32>
    %c0_72 = arith.constant 0 : index
    %c0_73 = arith.constant 0 : index
    %162 = vector.load %arg15[%c0_72, %c0_73] : memref<64x128xf32, #tpu.memory_space<vmem>>, vector<64x128xf32>
    %cst_74 = arith.constant dense<0.000000e+00> : vector<128x128xf32>
    %163 = tpu.matmul %161, %162, %cst_74 {dimension_numbers = #tpu.dot_dimension_numbers<[1], [0], [0], [1], [0, 0, 1, 1], [], []>} : vector<128x64xf32>, vector<64x128xf32>, vector<128x128xf32> -> vector<128x128xf32>
    %c0_75 = arith.constant 0 : index
    %c0_76 = arith.constant 0 : index
    %164 = vector.load %arg16[%c0_75, %c0_76] : memref<64x128xf32, #tpu.memory_space<vmem>>, vector<64x128xf32>
    %cst_77 = arith.constant dense<0.000000e+00> : vector<128x128xf32>
    %165 = tpu.matmul %0, %164, %cst_77 {dimension_numbers = #tpu.dot_dimension_numbers<[1], [0], [0], [1], [0, 0, 1, 1], [], []>} : vector<128x64xf32>, vector<64x128xf32>, vector<128x128xf32> -> vector<128x128xf32>
    %166 = arith.addf %163, %165 : vector<128x128xf32>
    %c0_78 = arith.constant 0 : index
    %c0_79 = arith.constant 0 : index
    %167 = vector.load %arg17[%c0_78, %c0_79] : memref<128x128xf32, #tpu.memory_space<vmem>>, vector<128x128xf32>
    tpu.vector_store %arg17[%c0_78, %c0_79], %166 {strides = array<i32>} : memref<128x128xf32, #tpu.memory_space<vmem>>, vector<128x128xf32>,
    return
  }
  func.func @transform_0(%arg0: i32) -> (i32, i32) {
    %c0_i32 = arith.constant 0 : i32
    %c0_i32_0 = arith.constant 0 : i32
    return %arg0, %c0_i32 : i32, i32
  }
  func.func @transform_1(%arg0: i32) -> (i32, i32) {
    %c0_i32 = arith.constant 0 : i32
    %c0_i32_0 = arith.constant 0 : i32
    return %arg0, %c0_i32 : i32, i32
  }
  func.func @transform_2(%arg0: i32) -> (i32, i32) {
    %c0_i32 = arith.constant 0 : i32
    %c0_i32_0 = arith.constant 0 : i32
    %c0_i32_1 = arith.constant 0 : i32
    return %c0_i32, %c0_i32_0 : i32, i32
  }
  func.func @transform_3(%arg0: i32) -> (i32, i32) {
    %c0_i32 = arith.constant 0 : i32
    %c0_i32_0 = arith.constant 0 : i32
    %c0_i32_1 = arith.constant 0 : i32
    return %c0_i32, %c0_i32_0 : i32, i32
  }
  func.func @transform_4(%arg0: i32) -> (i32, i32) {
    %c0_i32 = arith.constant 0 : i32
    %c0_i32_0 = arith.constant 0 : i32
    %c0_i32_1 = arith.constant 0 : i32
    return %c0_i32, %c0_i32_0 : i32, i32
  }
  func.func @transform_5(%arg0: i32) -> (i32, i32) {
    %c0_i32 = arith.constant 0 : i32
    %c0_i32_0 = arith.constant 0 : i32
    %c0_i32_1 = arith.constant 0 : i32
    return %c0_i32, %c0_i32_0 : i32, i32
  }
  func.func @transform_6(%arg0: i32) -> (i32, i32) {
    %c0_i32 = arith.constant 0 : i32
    %c0_i32_0 = arith.constant 0 : i32
    %c0_i32_1 = arith.constant 0 : i32
    return %c0_i32, %c0_i32_0 : i32, i32
  }
  func.func @transform_7(%arg0: i32) -> (i32, i32) {
    %c0_i32 = arith.constant 0 : i32
    %c0_i32_0 = arith.constant 0 : i32
    %c0_i32_1 = arith.constant 0 : i32
    return %c0_i32, %c0_i32_0 : i32, i32
  }
  func.func @transform_8(%arg0: i32) -> (i32, i32) {
    %c0_i32 = arith.constant 0 : i32
    %c0_i32_0 = arith.constant 0 : i32
    %c0_i32_1 = arith.constant 0 : i32
    return %c0_i32, %c0_i32_0 : i32, i32
  }
  func.func @transform_9(%arg0: i32) -> (i32, i32) {
    %c0_i32 = arith.constant 0 : i32
    %c0_i32_0 = arith.constant 0 : i32
    %c0_i32_1 = arith.constant 0 : i32
    return %c0_i32, %c0_i32_0 : i32, i32
  }
  func.func @transform_10(%arg0: i32) -> (i32, i32) {
    %c0_i32 = arith.constant 0 : i32
    %c0_i32_0 = arith.constant 0 : i32
    %c0_i32_1 = arith.constant 0 : i32
    return %c0_i32, %c0_i32_0 : i32, i32
  }
  func.func @transform_11(%arg0: i32) -> (i32, i32) {
    %c0_i32 = arith.constant 0 : i32
    %c0_i32_0 = arith.constant 0 : i32
    %c0_i32_1 = arith.constant 0 : i32
    return %c0_i32, %c0_i32_0 : i32, i32
  }
  func.func @transform_12(%arg0: i32) -> (i32, i32) {
    %c0_i32 = arith.constant 0 : i32
    %c0_i32_0 = arith.constant 0 : i32
    %c0_i32_1 = arith.constant 0 : i32
    return %c0_i32, %c0_i32_0 : i32, i32
  }
  func.func @transform_13(%arg0: i32) -> (i32, i32) {
    %c0_i32 = arith.constant 0 : i32
    %c0_i32_0 = arith.constant 0 : i32
    %c0_i32_1 = arith.constant 0 : i32
    return %c0_i32, %c0_i32_0 : i32, i32
  }
  func.func @transform_14(%arg0: i32) -> (i32, i32) {
    %c0_i32 = arith.constant 0 : i32
    %c0_i32_0 = arith.constant 0 : i32
    %c0_i32_1 = arith.constant 0 : i32
    return %c0_i32, %c0_i32_0 : i32, i32
  }
  func.func @transform_15(%arg0: i32) -> (i32, i32) {
    %c0_i32 = arith.constant 0 : i32
    %c0_i32_0 = arith.constant 0 : i32
    %c0_i32_1 = arith.constant 0 : i32
    return %c0_i32, %c0_i32_0 : i32, i32
  }
  func.func @transform_16(%arg0: i32) -> (i32, i32) {
    %c0_i32 = arith.constant 0 : i32
    %c0_i32_0 = arith.constant 0 : i32
    return %arg0, %c0_i32 : i32, i32
  }
}

</mosaic_0001>

<bundles_post_ra>
// kernel: mixer_block_forward.1
= control target key start
LH: loop header
LB: loop body
LE: loop exit
PB: predicated region body
PF: predicated region fallthrough
CT: control target
= control target key end

     0   :  { %s7469_s21 = smov 0   ;;  %s13590_s0 = inlined_call_operand.vmem [shape: f32[256,64], index: 0, kind: input, shape index: {}]   ;;  %s13591_s1 = inlined_call_operand.vmem [shape: f32[1024,16], index: 1, kind: input, shape index: {}]   ;;  %s13592_s2 = inlined_call_operand.vmem [shape: f32[1,64], index: 2, kind: input, shape index: {}]   ;;  %s13593_s3 = inlined_call_operand.vmem [shape: f32[1,64], index: 3, kind: input, shape index: {}]   ;;  %s13594_s4 = inlined_call_operand.vmem [shape: f32[64,16], index: 4, kind: input, shape index: {}]   ;;  %s13595_s5 = inlined_call_operand.vmem [shape: f32[1,16], index: 5, kind: input, shape index: {}]   ;;  %s13596_s6 = inlined_call_operand.vmem [shape: f32[16,64], index: 6, kind: input, shape index: {}]   ;;  %s13597_s7 = inlined_call_operand.vmem [shape: f32[1,64], index: 7, kind: input, shape index: {}]   ;;  %s13598_s8 = inlined_call_operand.vmem [shape: f32[1,16], index: 8, kind: input, shape index: {}]   ;;  %s13599_s9 = inlined_call_operand.vmem [shape: f32[1,16], index: 9, kind: input, shape index: {}]   ;;  %s13600_s10 = inlined_call_operand.vmem [shape: f32[16,64], index: 10, kind: input, shape index: {}]   ;;  %s13601_s11 = inlined_call_operand.vmem [shape: f32[1,64], index: 11, kind: input, shape index: {}]   ;;  %s13602_s12 = inlined_call_operand.vmem [shape: f32[64,16], index: 12, kind: input, shape index: {}]   ;;  %s13603_s13 = inlined_call_operand.vmem [shape: f32[1,16], index: 13, kind: input, shape index: {}]   ;;  %s13604_s14 = inlined_call_operand.vmem [shape: f32[64,128], index: 14, kind: input, shape index: {}]   ;;  %s13605_s15 = inlined_call_operand.vmem [shape: f32[64,128], index: 15, kind: input, shape index: {}]   ;;  %s13606_s16 = inlined_call_operand.vmem [shape: f32[256,128], index: 16, kind: output, shape index: {}]  }
   0x1   :  { %13680 = sst [smem:[#allocation51_spill]] %s13590_s0 }
   0x2 LB: > { %s6568_s22 = sadd.s32 4294967295, %s7378_s21   ;;  %p6572_p0 = scmp.ge.s32.totalorder %s7378_s21, 1  ;;  %s7378_s21 = sphi %s7469_s21, %s26_s21  }
   0x3   : > { %p474_p1 = scmp.lt.s32.totalorder %s7378_s21, 3 }
   0x5   : > { %p475_p2 = pnand %p6572_p0, %p474_p1 }
   0x7   : > { %478 = sbr.rel (%p475_p2) target bundleno = 1776 (0x6f0), region = 84 }
   0xc   : > { %s6575_s23 = sshll.u32 %s6568_s22, 6  ;;  %s6573_s24 = sshll.u32 %s6568_s22, 4  ;;  %vm1565_vm0 = vcmask 130048   ;;  %vm577_vm1 = vcmask 523264   ;;  %v7380_v58 = vmov 16.0  }
   0xd   : > { %p536_p3 = scmp.lt.s32.totalorder %s6575_s23, 127  ;;  %p530_p4 = scmp.lt.s32.totalorder %s6573_s24, 31  ;;  %6804 = vrcp.f32 %v7380_v58 }
   0xe   : > { %s13681_s17 = sld [smem:[#allocation51_spill]] }
   0xf   : > { %s14120_s23 = smov (!%p536_p3, %s6575_s23), 127  ;;  %s14122_s24 = smov (!%p530_p4, %s6573_s24), 31 }
  0x10   : > { %s6576_s25 = sshll.u32 %s14120_s23, 3  ;;  %s6574_s29 = sshll.u32 %s14122_s24, 3 }
  0x11   : > { %s7480_s28 = scalar_lea.vmem %s13591_s1, %s6576_s25 }
  0x12   : > { %v7483_v0 = vld [vmem:[%s7480_s28 + $0x98] sm:$0xff]  ;;  %v7486_v1 = vld [vmem:[%s7480_s28 + $0x88] sm:$0xff]  ;;  %v7500_v6 = vld [vmem:[%s7480_s28 + $0xa0] sm:$0xff] }
  0x13   : > { %v7489_v2 = vld [vmem:[%s7480_s28 + $0x78] sm:$0xff]  ;;  %v1814_v3 = vsel %vm1565_vm0, %v7483_v0, 0.0  ;;  %v1808_v4 = vsel %vm1565_vm0, %v7486_v1, 0.0  ;;  %v7503_v7 = vld [vmem:[%s7480_s28 + $0x90] sm:$0xff]  ;;  %v7506_v8 = vld [vmem:[%s7480_s28 + $0x80] sm:$0xff]  ;;  %v1817_v9 = vsel %vm1565_vm0, %v7500_v6, 0.0  ;;  %v6805_v59 = vpop.eup %6804 }
  0x14   : > { %v1802_v5 = vsel %vm1565_vm0, %v7489_v2, 0.0  ;;  %1815 = vadd.xlane.f32.xlu2 %v1814_v3  ;;  %1809 = vadd.xlane.f32.xlu1 %v1808_v4  ;;  %v1811_v10 = vsel %vm1565_vm0, %v7503_v7, 0.0  ;;  %v1805_v11 = vsel %vm1565_vm0, %v7506_v8, 0.0  ;;  %s7520_s18 = scalar_lea.vmem %s13681_s17, %s6574_s29  ;;  %v7523_v12 = vld [vmem:[%s7480_s28 + $0xa8] sm:$0xff]  ;;  %v7533_v16 = vld [vmem:[%s7480_s28 + $0xb0] sm:$0xff]  ;;  %v7548_v22 = vld [vmem:[%s7480_s28 + $0xb8] sm:$0xff]  ;;  %vm1954_vm2 = vweird.f32 %v6805_v59  ;;  %s13516_s17 = scalar_lea.vmem %s13606_s16, %s6574_s29 }
  0x15   : > { %1803 = vadd.xlane.f32.xlu0 %v1802_v5  ;;  %v7526_v13 = vld [vmem:[%s7520_s18] sm:$0xff]  ;;  %v1820_v14 = vsel %vm1565_vm0, %v7523_v12, 0.0  ;;  %v7536_v17 = vld [vmem:[%s7520_s18 + $0x8] sm:$0xff]  ;;  %v1823_v18 = vsel %vm1565_vm0, %v7533_v16, 0.0  ;;  %v7543_v20 = vld [vmem:[%s7520_s18 + $0x30] sm:$0xff]  ;;  %v1826_v24 = vsel %vm1565_vm0, %v7548_v22, 0.0 }
  0x16   : > { %v578_v15 = vsel %vm577_vm1, %v7526_v13, 0.0  ;;  %v581_v19 = vsel %vm577_vm1, %v7536_v17, 0.0  ;;  %v596_v21 = vsel %vm577_vm1, %v7543_v20, 0.0  ;;  %v7551_v23 = vld [vmem:[%s7520_s18 + $0x10] sm:$0xff]  ;;  %v7558_v26 = vld [vmem:[%s7480_s28 + $0xe8] sm:$0xff]  ;;  %v7563_v28 = vld [vmem:[%s7480_s28 + $0xc0] sm:$0xff] }
  0x17   : > { %v584_v25 = vsel %vm577_vm1, %v7551_v23, 0.0  ;;  %v1844_v27 = vsel %vm1565_vm0, %v7558_v26, 0.0  ;;  %v7566_v29 = vld [vmem:[%s7520_s18 + $0x18] sm:$0xff]  ;;  %v1829_v30 = vsel %vm1565_vm0, %v7563_v28, 0.0  ;;  %v7573_v32 = vld [vmem:[%s7520_s18 + $0x48] sm:$0xff]  ;;  %v7581_v35 = vld [vmem:[%s7520_s18 + $0x20] sm:$0xff] }
  0x18   : > { %v587_v31 = vsel %vm577_vm1, %v7566_v29, 0.0  ;;  %v605_v33 = vsel %vm577_vm1, %v7573_v32, 0.0  ;;  %v7578_v34 = vld [vmem:[%s7480_s28 + $0xc8] sm:$0xff]  ;;  %v590_v37 = vsel %vm577_vm1, %v7581_v35, 0.0  ;;  %v7588_v38 = vld [vmem:[%s7480_s28 + $0x100] sm:$0xff]  ;;  %v7593_v40 = vld [vmem:[%s7480_s28 + $0xd0] sm:$0xff] }
  0x19   : > { %v1832_v36 = vsel %vm1565_vm0, %v7578_v34, 0.0  ;;  %v1853_v39 = vsel %vm1565_vm0, %v7588_v38, 0.0  ;;  %v7596_v41 = vld [vmem:[%s7520_s18 + $0x28] sm:$0xff]  ;;  %v1835_v42 = vsel %vm1565_vm0, %v7593_v40, 0.0  ;;  %v7603_v44 = vld [vmem:[%s7480_s28 + $0xe0] sm:$0xff]  ;;  %v7606_v45 = vld [vmem:[%s7480_s28 + $0xd8] sm:$0xff] }
  0x1a   : > { %v593_v43 = vsel %vm577_vm1, %v7596_v41, 0.0  ;;  %v1841_v46 = vsel %vm1565_vm0, %v7603_v44, 0.0  ;;  %v1838_v47 = vsel %vm1565_vm0, %v7606_v45, 0.0  ;;  %v7613_v48 = vld [vmem:[%s7520_s18 + $0x40] sm:$0xff]  ;;  %v7616_v49 = vld [vmem:[%s7520_s18 + $0x38] sm:$0xff]  ;;  %v7626_v53 = vld [vmem:[%s7480_s28 + $0xf0] sm:$0xff] }
  0x1b   : > { %v602_v50 = vsel %vm577_vm1, %v7613_v48, 0.0  ;;  %v599_v51 = vsel %vm577_vm1, %v7616_v49, 0.0  ;;  %v7623_v52 = vld [vmem:[%s7480_s28 + $0xf8] sm:$0xff]  ;;  %v1847_v55 = vsel %vm1565_vm0, %v7626_v53, 0.0  ;;  %v7638_v60 = vld [vmem:[%s7520_s18 + $0x50] sm:$0xff]  ;;  %v1950_v62 = vmul.f32 16.0, %v6805_v59 }
  0x1c   : > { %1818 = vadd.xlane.f32.xlu2 %v1817_v9  ;;  %1812 = vadd.xlane.f32.xlu1 %v1811_v10  ;;  %v1850_v54 = vsel %vm1565_vm0, %v7623_v52, 0.0  ;;  %v7633_v56 = vld [vmem:[%s7520_s18 + $0x58] sm:$0xff]  ;;  %v608_v61 = vsel %vm577_vm1, %v7638_v60, 0.0  ;;  %v7381_v3 = vmov 64.0   ;;  %v7643_v5 = vld [vmem:[%s7480_s28 + $0x108] sm:$0xff] }
  0x1d   : > { %1806 = vadd.xlane.f32.xlu0 %v1805_v11  ;;  %v611_v57 = vsel %vm577_vm1, %v7633_v56, 0.0  ;;  %v1951_v63 = vsub.f32 1.0, %v1950_v62  ;;  %6806 = vrcp.f32 %v7381_v3  ;;  %v1856_v9 = vsel %vm1565_vm0, %v7643_v5, 0.0 }
  0x1f   : > { %v1952_v4 = vmul.f32 %v6805_v59, %v1951_v63 }
  0x21   : > { %v1953_v11 = vadd.f32 %v6805_v59, %v1952_v4 }
  0x23   : > { %v6807_v10 = vpop.eup %6806 }
  0x24   : > { %1821 = vadd.xlane.f32.xlu1 %v1820_v14  ;;  %579 = vadd.xlane.f32.xlu2 %v578_v15  ;;  %v627_v14 = vmul.f32 64.0, %v6807_v10  ;;  %v7647_v15 = vsel %vm1954_vm2, %v6805_v59, %v1953_v11  ;;  %vm631_vm3 = vweird.f32 %v6807_v10 }
  0x25   : > { %597 = vadd.xlane.f32.xlu0 %v596_v21 }
  0x2c   : > { %1824 = vadd.xlane.f32.xlu1 %v1823_v18  ;;  %582 = vadd.xlane.f32.xlu2 %v581_v19 }
  0x2d   : > { %1845 = vadd.xlane.f32.xlu0 %v1844_v27 }
  0x34   : > { %1827 = vadd.xlane.f32.xlu1 %v1826_v24  ;;  %585 = vadd.xlane.f32.xlu2 %v584_v25  ;;  %v628_v25 = vsub.f32 1.0, %v627_v14 }
  0x35   : > { %606 = vadd.xlane.f32.xlu0 %v605_v33 }
  0x3c   : > { %1830 = vadd.xlane.f32.xlu1 %v1829_v30  ;;  %588 = vadd.xlane.f32.xlu2 %v587_v31  ;;  %v629_v31 = vmul.f32 %v6807_v10, %v628_v25 }
  0x3d   : > { %1854 = vadd.xlane.f32.xlu0 %v1853_v39 }
  0x44   : > { %1833 = vadd.xlane.f32.xlu1 %v1832_v36  ;;  %591 = vadd.xlane.f32.xlu2 %v590_v37 }
  0x4c   : > { %1836 = vadd.xlane.f32.xlu1 %v1835_v42  ;;  %594 = vadd.xlane.f32.xlu2 %v593_v43 }
  0x54   : > { %1842 = vadd.xlane.f32.xlu2 %v1841_v46  ;;  %1839 = vadd.xlane.f32.xlu1 %v1838_v47  ;;  %v630_v46 = vadd.f32 %v6807_v10, %v629_v31 }
  0x5c   : > { %603 = vadd.xlane.f32.xlu2 %v602_v50  ;;  %600 = vadd.xlane.f32.xlu1 %v599_v51  ;;  %v7666_v51 = vsel %vm631_vm3, %v6807_v10, %v630_v46 }
  0x64   : > { %1851 = vadd.xlane.f32.xlu2 %v1850_v54  ;;  %1848 = vadd.xlane.f32.xlu1 %v1847_v55 }
  0x6c   : > { %612 = vadd.xlane.f32.xlu2 %v611_v57  ;;  %609 = vadd.xlane.f32.xlu1 %v608_v61 }
  0x74   : > { %1857 = vadd.xlane.f32.xlu1 %v1856_v9 }
  0x87   : > { %v1816_v18 = vpop.xlane.xlu2 %1815  ;;  %v1810_v19 = vpop.xlane.xlu1 %1809 }
  0x88   : > { %v1804_v21 = vpop.xlane.xlu0 %1803  ;;  %v1973_v42 = vmul.f32 %v7647_v15, %v1810_v19  ;;  %v1975_v14 = vmul.f32 %v7647_v15, %v1816_v18 }
  0x89   : > { %v1971_v24 = vmul.f32 %v7647_v15, %v1804_v21 }
  0x8b   : > { %v7651_v27 = vsub.f32 %v7489_v2, %v1971_v24  ;;  %v7662_v2 = vsub.f32 %v7486_v1, %v1973_v42  ;;  %v7695_v24 = vsub.f32 %v7483_v0, %v1975_v14 }
  0x8d   : > { %v2099_v30 = vmul.f32 %v7651_v27, %v7651_v27  ;;  %v2103_v0 = vmul.f32 %v7695_v24, %v7695_v24 }
  0x8f   : > { %v1819_v33 = vpop.xlane.xlu2 %1818  ;;  %v1813_v36 = vpop.xlane.xlu1 %1812  ;;  %v2193_v37 = vsel %vm1565_vm0, %v2099_v30, 0.0 }
  0x90   : > { %v1807_v39 = vpop.xlane.xlu0 %1806  ;;  %2194 = vadd.xlane.f32.xlu0 %v2193_v37  ;;  %v1974_v59 = vmul.f32 %v7647_v15, %v1813_v36  ;;  %v1976_v37 = vmul.f32 %v7647_v15, %v1819_v33 }
  0x91   : > { %v1972_v43 = vmul.f32 %v7647_v15, %v1807_v39 }
  0x92   : > { %v7679_v62 = vsub.f32 %v7503_v7, %v1974_v59 }
  0x93   : > { %v7659_v47 = vsub.f32 %v7506_v8, %v1972_v43  ;;  %v2101_v8 = vmul.f32 %v7662_v2, %v7662_v2 }
  0x95   : > { %v2100_v50 = vmul.f32 %v7659_v47, %v7659_v47  ;;  %v2199_v63 = vsel %vm1565_vm0, %v2101_v8, 0.0 }
  0x97   : > { %v1822_v54 = vpop.xlane.xlu1 %1821  ;;  %v2196_v55 = vsel %vm1565_vm0, %v2100_v50, 0.0  ;;  %v580_v57 = vpop.xlane.xlu2 %579  ;;  %v2205_v50 = vsel %vm1565_vm0, %v2103_v0, 0.0 }
  0x98   : > { %2197 = vadd.xlane.f32.xlu0 %v2196_v55  ;;  %v633_v58 = vmul.f32 %v7666_v51, %v580_v57  ;;  %v598_v14 = vpop.xlane.xlu0 %597 }
  0x9a   : > { %v7674_v1 = vsub.f32 %v7526_v13, %v633_v58  ;;  %v2102_v13 = vmul.f32 %v7679_v62, %v7679_v62  ;;  %v1977_v58 = vmul.f32 %v7647_v15, %v1822_v54 }
  0x9c   : > { %v665_v61 = vmul.f32 %v7674_v1, %v7674_v1  ;;  %v2202_v19 = vsel %vm1565_vm0, %v2102_v13, 0.0 }
  0x9e   : > { %v681_v3 = vsel %vm577_vm1, %v665_v61, 0.0  ;;  %v7729_v61 = vsub.f32 %v7523_v12, %v1977_v58 }
  0x9f   : > { %v1825_v4 = vpop.xlane.xlu1 %1824  ;;  %682 = vadd.xlane.f32.xlu2 %v681_v3  ;;  %v583_v9 = vpop.xlane.xlu2 %582 }
  0xa0   : > { %v1978_v10 = vmul.f32 %v7647_v15, %v1825_v4  ;;  %2200 = vadd.xlane.f32.xlu0 %v2199_v63  ;;  %v2105_v13 = vmul.f32 %v7729_v61, %v7729_v61 }
  0xa2   : > { %v7687_v11 = vsub.f32 %v7533_v16, %v1978_v10  ;;  %v634_v10 = vmul.f32 %v7666_v51, %v583_v9 }
  0xa4   : > { %v2106_v7 = vmul.f32 %v7687_v11, %v7687_v11 }
  0xa6   : > { %v2214_v21 = vsel %vm1565_vm0, %v2106_v7, 0.0 }
  0xa7   : > { %v1828_v25 = vpop.xlane.xlu1 %1827  ;;  %2215 = vadd.xlane.f32.xlu1 %v2214_v21  ;;  %v586_v30 = vpop.xlane.xlu2 %585 }
  0xa8   : > { %v1979_v31 = vmul.f32 %v7647_v15, %v1828_v25  ;;  %2203 = vadd.xlane.f32.xlu0 %v2202_v19  ;;  %v635_v16 = vmul.f32 %v7666_v51, %v586_v30  ;;  %v7743_v19 = vsub.f32 %v7536_v17, %v634_v10  ;;  %v2211_v25 = vsel %vm1565_vm0, %v2105_v13, 0.0 }
  0xaa   : > { %v7700_v18 = vsub.f32 %v7548_v22, %v1979_v31  ;;  %v7703_v36 = vsub.f32 %v7551_v23, %v635_v16  ;;  %v7715_v22 = vsub.f32 %v7500_v6, %v1976_v37  ;;  %v639_v31 = vmul.f32 %v7666_v51, %v598_v14  ;;  %v7792_v14 = vld [vmem:[%s7480_s28 + $0x110] sm:$0xff] }
  0xab   : > { %v666_v0 = vmul.f32 %v7743_v19, %v7743_v19 }
  0xac   : > { %v2107_v39 = vmul.f32 %v7700_v18, %v7700_v18  ;;  %v667_v42 = vmul.f32 %v7703_v36, %v7703_v36  ;;  %v2104_v59 = vmul.f32 %v7715_v22, %v7715_v22 }
  0xae   : > { %v2217_v43 = vsel %vm1565_vm0, %v2107_v39, 0.0  ;;  %v687_v46 = vsel %vm577_vm1, %v667_v42, 0.0  ;;  %v2208_v3 = vsel %vm1565_vm0, %v2104_v59, 0.0  ;;  %v7759_v39 = vsub.f32 %v7543_v20, %v639_v31 }
  0xaf   : > { %v1831_v23 = vpop.xlane.xlu1 %1830  ;;  %2218 = vadd.xlane.f32.xlu2 %v2217_v43  ;;  %688 = vadd.xlane.f32.xlu1 %v687_v46  ;;  %v589_v33 = vpop.xlane.xlu2 %588 }
  0xb0   : > { %2206 = vadd.xlane.f32.xlu0 %v2205_v50  ;;  %v636_v55 = vmul.f32 %v7666_v51, %v589_v33  ;;  %v1980_v17 = vmul.f32 %v7647_v15, %v1831_v23  ;;  %v684_v23 = vsel %vm577_vm1, %v666_v0, 0.0  ;;  %v671_v33 = vmul.f32 %v7759_v39, %v7759_v39 }
  0xb2   : > { %v7720_v57 = vsub.f32 %v7566_v29, %v636_v55  ;;  %v699_v59 = vsel %vm577_vm1, %v671_v33, 0.0  ;;  %v7826_v33 = vld [vmem:[%s7520_s18 + $0x70] sm:$0xff] }
  0xb4   : > { %v668_v6 = vmul.f32 %v7720_v57, %v7720_v57 }
  0xb6   : > { %v690_v8 = vsel %vm577_vm1, %v668_v6, 0.0 }
  0xb7   : > { %v1834_v63 = vpop.xlane.xlu1 %1833  ;;  %691 = vadd.xlane.f32.xlu2 %v690_v8  ;;  %v592_v4 = vpop.xlane.xlu2 %591 }
  0xb8   : > { %v1981_v29 = vmul.f32 %v7647_v15, %v1834_v63  ;;  %2209 = vadd.xlane.f32.xlu0 %v2208_v3  ;;  %v637_v55 = vmul.f32 %v7666_v51, %v592_v4  ;;  %v1846_v63 = vpop.xlane.xlu0 %1845 }
  0xb9   : > { %v1985_v10 = vmul.f32 %v7647_v15, %v1846_v63 }
  0xba   : > { %v7734_v54 = vsub.f32 %v7578_v34, %v1981_v29  ;;  %v7784_v8 = vsub.f32 %v7581_v35, %v637_v55  ;;  %v7829_v55 = vld [vmem:[%s7480_s28 + $0x120] sm:$0xff] }
  0xbb   : > { %v1865_v63 = vsel %vm1565_vm0, %v7829_v55, 0.0 }
  0xbc   : > { %v2109_v12 = vmul.f32 %v7734_v54, %v7734_v54  ;;  %v669_v35 = vmul.f32 %v7784_v8, %v7784_v8 }
  0xbe   : > { %v2223_v7 = vsel %vm1565_vm0, %v2109_v12, 0.0  ;;  %v693_v31 = vsel %vm577_vm1, %v669_v35, 0.0 }
  0xbf   : > { %v1837_v21 = vpop.xlane.xlu1 %1836  ;;  %2224 = vadd.xlane.f32.xlu1 %v2223_v7  ;;  %v595_v34 = vpop.xlane.xlu2 %594  ;;  %v7797_v7 = vld [vmem:[%s7520_s18 + $0x68] sm:$0xff] }
  0xc0   : > { %v1982_v30 = vmul.f32 %v7647_v15, %v1837_v21  ;;  %2212 = vadd.xlane.f32.xlu0 %v2211_v25  ;;  %v638_v9 = vmul.f32 %v7666_v51, %v595_v34  ;;  %v7800_v21 = vsub.f32 %v7558_v26, %v1985_v10  ;;  %v1859_v25 = vsel %vm1565_vm0, %v7792_v14, 0.0 }
  0xc1   : > { %v617_v34 = vsel %vm577_vm1, %v7797_v7, 0.0 }
  0xc2   : > { %v7750_v16 = vsub.f32 %v7593_v40, %v1982_v30  ;;  %v7753_v37 = vsub.f32 %v7596_v41, %v638_v9  ;;  %v7768_v41 = vsub.f32 %v7563_v28, %v1980_v17  ;;  %13682 = vst [vmem:[#allocation2_spill] sm:$0xff] %v7800_v21  ;;  %v2113_v26 = vmul.f32 %v7800_v21, %v7800_v21 }
  0xc4   : > { %v2110_v42 = vmul.f32 %v7750_v16, %v7750_v16  ;;  %v670_v43 = vmul.f32 %v7753_v37, %v7753_v37  ;;  %v2108_v28 = vmul.f32 %v7768_v41, %v7768_v41 }
  0xc6   : > { %v2226_v40 = vsel %vm1565_vm0, %v2110_v42, 0.0  ;;  %v696_v46 = vsel %vm577_vm1, %v670_v43, 0.0  ;;  %v607_v43 = vpop.xlane.xlu0 %606 }
  0xc7   : > { %2227 = vadd.xlane.f32.xlu2 %v2226_v40  ;;  %697 = vadd.xlane.f32.xlu1 %v696_v46  ;;  %v1843_v50 = vpop.xlane.xlu2 %1842  ;;  %v1840_v4 = vpop.xlane.xlu1 %1839 }
  0xc8   : > { %685 = vadd.xlane.f32.xlu0 %v684_v23  ;;  %v1984_v20 = vmul.f32 %v7647_v15, %v1843_v50  ;;  %v1983_v12 = vmul.f32 %v7647_v15, %v1840_v4  ;;  %v642_v23 = vmul.f32 %v7666_v51, %v607_v43 }
  0xca   : > { %v7776_v58 = vsub.f32 %v7603_v44, %v1984_v20  ;;  %v2220_v44 = vsel %vm1565_vm0, %v2108_v28, 0.0  ;;  %v7810_v9 = vsub.f32 %v7606_v45, %v1983_v12  ;;  %v2235_v45 = vsel %vm1565_vm0, %v2113_v26, 0.0  ;;  %v7832_v28 = vld [vmem:[%s7520_s18 + $0x60] sm:$0xff] }
  0xcc   : > { %v2112_v6 = vmul.f32 %v7776_v58, %v7776_v58 }
  0xce   : > { %v2232_v3 = vsel %vm1565_vm0, %v2112_v6, 0.0  ;;  %v620_v6 = vsel %vm577_vm1, %v7826_v33, 0.0  ;;  %v1855_v12 = vpop.xlane.xlu0 %1854 }
  0xcf   : > { %700 = vadd.xlane.f32.xlu2 %v699_v59  ;;  %2233 = vadd.xlane.f32.xlu1 %v2232_v3  ;;  %v604_v29 = vpop.xlane.xlu2 %603  ;;  %v601_v46 = vpop.xlane.xlu1 %600  ;;  %v7835_v59 = vsub.f32 %v7573_v32, %v642_v23 }
  0xd0   : > { %2221 = vadd.xlane.f32.xlu0 %v2220_v44  ;;  %v641_v13 = vmul.f32 %v7666_v51, %v604_v29  ;;  %v640_v20 = vmul.f32 %v7666_v51, %v601_v46  ;;  %v614_v44 = vsel %vm577_vm1, %v7832_v28, 0.0 }
  0xd1   : > { %13684 = vst [vmem:[#allocation4_spill] sm:$0xff] %v7835_v59  ;;  %v674_v32 = vmul.f32 %v7835_v59, %v7835_v59 }
  0xd2   : > { %v7807_v30 = vsub.f32 %v7613_v48, %v641_v13  ;;  %v2111_v48 = vmul.f32 %v7810_v9, %v7810_v9  ;;  %v7845_v4 = vsub.f32 %v7616_v49, %v640_v20 }
  0xd3   : > { %v708_v49 = vsel %vm577_vm1, %v674_v32, 0.0  ;;  %v1745_v32 = vld [vmem:[%s13600_s10] sm:$0xff] }
  0xd4   : > { %13683 = vst [vmem:[#allocation3_spill] sm:$0xff] %v7807_v30  ;;  %v673_v17 = vmul.f32 %v7807_v30, %v7807_v30  ;;  %v2229_v42 = vsel %vm1565_vm0, %v2111_v48, 0.0  ;;  %v7865_v48 = vld [vmem:[%s7480_s28] sm:$0xff] }
  0xd5   : > { %13686 = vst [vmem:[#allocation6_spill] sm:$0xff] %v7845_v4  ;;  %v1757_v43 = vsel %vm1565_vm0, %v7865_v48, 0.0 }
  0xd6   : > { %v705_v0 = vsel %vm577_vm1, %v673_v17, 0.0  ;;  %v7862_v17 = vld [vmem:[%s7480_s28 + $0x128] sm:$0xff] }
  0xd7   : > { %1860 = vadd.xlane.f32.xlu2 %v1859_v25  ;;  %618 = vadd.xlane.f32.xlu1 %v617_v34  ;;  %v1852_v40 = vpop.xlane.xlu2 %1851  ;;  %v1849_v25 = vpop.xlane.xlu1 %1848  ;;  %v1988_v34 = vmul.f32 %v7647_v15, %v1855_v12  ;;  %v571_v12 = vld [vmem:[%s13594_s4 + $0x30] sm:$0xff] }
  0xd8   : > { %694 = vadd.xlane.f32.xlu0 %v693_v31  ;;  %v1987_v50 = vmul.f32 %v7647_v15, %v1852_v40  ;;  %v1986_v26 = vmul.f32 %v7647_v15, %v1849_v25 }
  0xda   : > { %v7842_v3 = vsub.f32 %v7623_v52, %v1987_v50  ;;  %v672_v52 = vmul.f32 %v7845_v4, %v7845_v4  ;;  %v7881_v46 = vsub.f32 %v7626_v53, %v1986_v26 }
  0xdc   : > { %13685 = vst [vmem:[#allocation5_spill] sm:$0xff] %v7842_v3  ;;  %v2115_v29 = vmul.f32 %v7842_v3, %v7842_v3  ;;  %v702_v13 = vsel %vm577_vm1, %v672_v52, 0.0 }
  0xdd   : > { %13689 = vst [vmem:[#allocation9_spill] sm:$0xff] %v7881_v46 }
  0xde   : > { %v2241_v10 = vsel %vm1565_vm0, %v2115_v29, 0.0  ;;  %v572_v29 = vld [vmem:[%s13594_s4 + $0x38] sm:$0xff] }
  0xdf   : > { %2236 = vadd.xlane.f32.xlu2 %v2235_v45  ;;  %706 = vadd.xlane.f32.xlu1 %v705_v0  ;;  %v613_v35 = vpop.xlane.xlu2 %612  ;;  %v7868_v45 = vld [vmem:[%s7480_s28 + $0x118] sm:$0xff]  ;;  %v7871_v0 = vsub.f32 %v7588_v38, %v1988_v34 }
  0xe0   : > { %2230 = vadd.xlane.f32.xlu0 %v2229_v42  ;;  %v644_v31 = vmul.f32 %v7666_v51, %v613_v35  ;;  %v1868_v42 = vsel %vm1565_vm0, %v7862_v17, 0.0  ;;  %v1862_v23 = vsel %vm1565_vm0, %v7868_v45, 0.0  ;;  %1034 = vmatpush.msra.mxu0 %v572_v29  ;;  %v567_v29 = vld [vmem:[%s13594_s4 + $0x10] sm:$0xff] }
  0xe1   : > { %13687 = vst [vmem:[#allocation7_spill] sm:$0xff] %v7871_v0  ;;  %v2116_v38 = vmul.f32 %v7871_v0, %v7871_v0 }
  0xe2   : > { %v7878_v40 = vsub.f32 %v7633_v56, %v644_v31  ;;  %v2114_v56 = vmul.f32 %v7881_v46, %v7881_v46  ;;  %1035 = vmatpush.msra.mxu0 %v571_v12 }
  0xe3   : > { %v2244_v53 = vsel %vm1565_vm0, %v2116_v38, 0.0  ;;  %v569_v38 = vld [vmem:[%s13594_s4 + $0x20] sm:$0xff] }
  0xe4   : > { %13688 = vst [vmem:[#allocation8_spill] sm:$0xff] %v7878_v40  ;;  %v676_v50 = vmul.f32 %v7878_v40, %v7878_v40 }
  0xe6   : > { %v714_v20 = vsel %vm577_vm1, %v676_v50, 0.0 }
  0xe7   : > { %621 = vadd.xlane.f32.xlu2 %v620_v6  ;;  %1866 = vadd.xlane.f32.xlu1 %v1865_v63  ;;  %v1746_v6 = vld [vmem:[%s13600_s10 + $0x8] sm:$0xff]  ;;  %v2238_v63 = vsel %vm1565_vm0, %v2114_v56, 0.0 }
  0xe8   : > { %615 = vadd.xlane.f32.xlu0 %v614_v44  ;;  %6773 = vmatpush.msra.mxu2 %v1746_v6  ;;  %v610_v44 = vpop.xlane.xlu1 %609 }
  0xe9   : > { %v643_v52 = vmul.f32 %v7666_v51, %v610_v44 }
  0xea   : > { %6774 = vmatpush.msra.mxu2 %v1745_v32 }
  0xeb   : > { %v7914_v26 = vsub.f32 %v7638_v60, %v643_v52 }
  0xed   : > { %13690 = vst [vmem:[#allocation10_spill] sm:$0xff] %v7914_v26  ;;  %v675_v60 = vmul.f32 %v7914_v26, %v7914_v26 }
  0xef   : > { %709 = vadd.xlane.f32.xlu2 %v708_v49  ;;  %2242 = vadd.xlane.f32.xlu1 %v2241_v10  ;;  %v1680_v49 = vld [vmem:[%s7480_s28 + $0x8] sm:$0xff]  ;;  %v1718_v10 = vld [vmem:[%s7480_s28 + $0x138] sm:$0xff] }
  0xf0   : > { %703 = vadd.xlane.f32.xlu0 %v702_v13  ;;  %v562_v13 = vld [vmem:[%s7520_s18 + $0x78] sm:$0xff]  ;;  %v1760_v34 = vsel %vm1565_vm0, %v1680_v49, 0.0  ;;  %v1874_v31 = vsel %vm1565_vm0, %v1718_v10, 0.0  ;;  %v1858_v49 = vpop.xlane.xlu1 %1857  ;;  %v566_v10 = vld [vmem:[%s13594_s4 + $0x8] sm:$0xff] }
  0xf1   : > { %v1989_v12 = vmul.f32 %v7647_v15, %v1858_v49 }
  0xf7   : > { %1869 = vadd.xlane.f32.xlu2 %v1868_v42  ;;  %1758 = vadd.xlane.f32.xlu1 %v1757_v43  ;;  %v623_v42 = vsel %vm577_vm1, %v562_v13, 0.0  ;;  %v570_v43 = vld [vmem:[%s13594_s4 + $0x28] sm:$0xff] }
  0xf8   : > { %1863 = vadd.xlane.f32.xlu0 %v1862_v23  ;;  %1036 = vmatpush.msra.mxu0 %v570_v43 }
  0xfa   : > { %1037 = vmatpush.msra.mxu0 %v569_v38 }
  0xff   : > { %2245 = vadd.xlane.f32.xlu2 %v2244_v53  ;;  %715 = vadd.xlane.f32.xlu1 %v714_v20  ;;  %v568_v53 = vld [vmem:[%s13594_s4 + $0x18] sm:$0xff]  ;;  %v711_v20 = vsel %vm577_vm1, %v675_v60, 0.0 }
 0x100   : > { %2239 = vadd.xlane.f32.xlu0 %v2238_v63  ;;  %1038 = vmatpush.msra.mxu0 %v568_v53 }
 0x102   : > { %1039 = vmatpush.msra.mxu0 %v567_v29 }
 0x103   : > { %v2195_v35 = vpop.xlane.xlu0 %2194 }
 0x104   : > { %v2355_v25 = vmul.f32 %v2195_v35, %v7647_v15  ;;  %v1717_v35 = vld [vmem:[%s7480_s28 + $0x130] sm:$0xff]  ;;  %1040 = vmatpush.msra.mxu0 %v566_v10 }
 0x105   : > { %v1871_v60 = vsel %vm1565_vm0, %v1717_v35, 0.0 }
 0x106   : > { %v2419_v23 = vadd.f32 1e-05, %v2355_v25 }
 0x107   : > { %1761 = vadd.xlane.f32.xlu2 %v1760_v34  ;;  %1875 = vadd.xlane.f32.xlu1 %v1874_v31  ;;  %v565_v34 = vld [vmem:[%s13594_s4] sm:$0xff] }
 0x108   : > { %6808 = vrsqrt.f32 %v2419_v23  ;;  %624 = vadd.xlane.f32.xlu0 %v623_v42  ;;  %1041 = vmatpush.msra.mxu0 %v565_v34  ;;  %vm2624_vm5 = vweird.f32 %v2419_v23 }
 0x10a   : > { %3515 = vmatpush.msrb.mxu0 %v1746_v6  ;;  %v7953_v6 = vld [vmem:[%s13598_s8] ss:$0 sm:$0xff] }
 0x10b   : > { %v2198_v50 = vpop.xlane.xlu0 %2197 }
 0x10c   : > { %v2356_v56 = vmul.f32 %v2198_v50, %v7647_v15  ;;  %3516 = vmatpush.msrb.mxu0 %v1745_v32 }
 0x10e   : > { %v6809_v63 = vpop.eup %6808  ;;  %v2420_v44 = vadd.f32 1e-05, %v2356_v56  ;;  %v7945_v56 = vsub.f32 %v7643_v5, %v1989_v12 }
 0x10f   : > { %v2619_v52 = vmul.f32 %v6809_v63, %v2419_v23  ;;  %vm2625_vm4 = vweird.f32 %v6809_v63  ;;  %v7961_v23 = vld [vmem:[%s13599_s9] ss:$0 sm:$0xff] }
 0x110   : > { %6810 = vrsqrt.f32 %v2420_v44  ;;  %712 = vadd.xlane.f32.xlu0 %v711_v20  ;;  %13691 = vst [vmem:[#allocation11_spill] sm:$0xff] %v7945_v56  ;;  %vm2626_vm6 = vmor %vm2624_vm5, %vm2625_vm4  ;;  %vm2634_vm8 = vweird.f32 %v2420_v44 }
 0x111   : > { %v2620_v13 = vmul.f32 %v6809_v63, %v2619_v52 }
 0x112   : > { %v683_v25 = vpop.xlane.xlu2 %682 }
 0x113   : > { %v2621_v31 = vmul.f32 0.5, %v2620_v13  ;;  %v2201_v42 = vpop.xlane.xlu0 %2200  ;;  %v729_v43 = vmul.f32 %v683_v25, %v7666_v51  ;;  %v2117_v13 = vmul.f32 %v7945_v56, %v7945_v56 }
 0x114   : > { %v2357_v38 = vmul.f32 %v2201_v42, %v7647_v15 }
 0x115   : > { %v2622_v50 = vsub.f32 1.5, %v2621_v31  ;;  %v745_v53 = vadd.f32 1e-05, %v729_v43  ;;  %v2247_v43 = vsel %vm1565_vm0, %v2117_v13, 0.0 }
 0x116   : > { %v6811_v20 = vpop.eup %6810  ;;  %v7947_v29 = vadd.f32 1e-05, %v2357_v38 }
 0x117   : > { %v2623_v52 = vmul.f32 %v6809_v63, %v2622_v50  ;;  %v2629_v49 = vmul.f32 %v6811_v20, %v2420_v44  ;;  %6812 = vrsqrt.f32 %v745_v53  ;;  %vm2635_vm7 = vweird.f32 %v6811_v20 }
 0x118   : > { %6814 = vrsqrt.f32 %v7947_v29  ;;  %1872 = vadd.xlane.f32.xlu0 %v1871_v60  ;;  %vm2636_vm9 = vmor %vm2634_vm8, %vm2635_vm7  ;;  %vm767_vm10 = vweird.f32 %v745_v53  ;;  %vm2644_vm14 = vweird.f32 %v7947_v29 }
 0x119   : > { %v2630_v5 = vmul.f32 %v6811_v20, %v2629_v49  ;;  %v2627_v10 = vsel %vm2626_vm6, %v6809_v63, %v2623_v52 }
 0x11a   : > { %v3123_v32 = vmul.f32 %v2627_v10, %v7651_v27  ;;  %v2216_v63 = vpop.xlane.xlu1 %2215 }
 0x11b   : > { %v2631_v12 = vmul.f32 0.5, %v2630_v5  ;;  %v2204_v35 = vpop.xlane.xlu0 %2203 }
 0x11c   : > { %v2358_v25 = vmul.f32 %v2204_v35, %v7647_v15  ;;  %v3190_v34 = vmul.f32 %v7953_v6, %v3123_v32  ;;  %v1681_v35 = vld [vmem:[%s7480_s28 + $0x10] sm:$0xff] }
 0x11d   : > { %v6813_v31 = vpop.eup %6812  ;;  %v2632_v42 = vsub.f32 1.5, %v2631_v12 }
 0x11e   : > { %v6815_v38 = vpop.eup %6814  ;;  %v762_v60 = vmul.f32 %v6813_v31, %v745_v53  ;;  %v7966_v27 = vadd.f32 1e-05, %v2358_v25  ;;  %v3257_v50 = vadd.f32 %v7961_v23, %v3190_v34  ;;  %vm768_vm11 = vweird.f32 %v6813_v31 }
 0x11f   : > { %v2633_v52 = vmul.f32 %v6811_v20, %v2632_v42  ;;  %v2639_v49 = vmul.f32 %v6815_v38, %v7947_v29  ;;  %vm7975_vm12 = vmor %vm767_vm10, %vm768_vm11  ;;  %vm2645_vm13 = vweird.f32 %v6815_v38  ;;  %v7997_v29 = vld [vmem:[%s13592_s2] ss:$0 sm:$0xff] }
 0x120   : > { %v763_v5 = vmul.f32 %v6813_v31, %v762_v60  ;;  %6816 = vrsqrt.f32 %v7966_v27  ;;  %6626 = vmatmul.msk.f32.vlgmr.msra.gmra.mxu2 %vm1565_vm0, %v3257_v50  ;;  %2248 = vadd.xlane.f32.xlu0 %v2247_v43  ;;  %v2362_v43 = vmul.f32 %v2216_v63, %v7647_v15  ;;  %vm2646_vm15 = vmor %vm2644_vm14, %vm2645_vm13  ;;  %vm2654_vm3 = vweird.f32 %v7966_v27 }
 0x121   : > { %v2637_v10 = vsel %vm2636_vm9, %v6811_v20, %v2633_v52  ;;  %v2640_v13 = vmul.f32 %v6815_v38, %v2639_v49  ;;  %v1763_v20 = vsel %vm1565_vm0, %v1681_v35, 0.0 }
 0x122   : > { %v764_v32 = vmul.f32 0.5, %v763_v5  ;;  %v3124_v12 = vmul.f32 %v2637_v10, %v7659_v47  ;;  %v689_v10 = vpop.xlane.xlu1 %688  ;;  %v7989_v63 = vadd.f32 1e-05, %v2362_v43 }
 0x123   : > { %v2641_v25 = vmul.f32 0.5, %v2640_v13  ;;  %v2207_v34 = vpop.xlane.xlu0 %2206  ;;  %v2219_v13 = vpop.xlane.xlu2 %2218 }
 0x124   : > { %v765_v44 = vsub.f32 1.5, %v764_v32  ;;  %v2359_v42 = vmul.f32 %v2207_v34, %v7647_v15  ;;  %v3191_v47 = vmul.f32 %v7953_v6, %v3124_v12  ;;  %vm2694_vm11 = vweird.f32 %v7989_v63 }
 0x125   : > { %v2642_v56 = vsub.f32 1.5, %v2641_v25  ;;  %v731_v25 = vmul.f32 %v689_v10, %v7666_v51  ;;  %v2363_v10 = vmul.f32 %v2219_v13, %v7647_v15 }
 0x126   : > { %v6817_v50 = vpop.eup %6816  ;;  %v766_v53 = vmul.f32 %v6813_v31, %v765_v44  ;;  %v7981_v52 = vadd.f32 1e-05, %v2359_v42 }
 0x127   : > { %v2643_v49 = vmul.f32 %v6815_v38, %v2642_v56  ;;  %v2649_v5 = vmul.f32 %v6817_v50, %v7966_v27  ;;  %v3258_v56 = vadd.f32 %v7961_v23, %v3191_v47  ;;  %vm2655_vm2 = vweird.f32 %v6817_v50 }
 0x128   : > { %v770_v32 = vsel %vm7975_vm12, %v6813_v31, %v766_v53  ;;  %6818 = vrsqrt.f32 %v7981_v52  ;;  %1764 = vadd.xlane.f32.xlu0 %v1763_v20  ;;  %vm2656_vm4 = vmor %vm2654_vm3, %vm2655_vm2  ;;  %vm2664_vm6 = vweird.f32 %v7981_v52 }
 0x129   : > { %v2650_v35 = vmul.f32 %v6817_v50, %v2649_v5  ;;  %v921_v12 = vmul.f32 %v770_v32, %v7674_v1  ;;  %v2647_v34 = vsel %vm2646_vm15, %v6815_v38, %v2643_v49  ;;  %6627 = vmatmul.msk.f32.gmra.mxu2 %vm1565_vm0, %v3258_v56  ;;  %6820 = vrsqrt.f32 %v7989_v63  ;;  %v8011_v38 = vld [vmem:[%s13593_s3] ss:$0 sm:$0xff] }
 0x12a   : > { %v3125_v42 = vmul.f32 %v2647_v34, %v7662_v2  ;;  %v8003_v1 = vadd.f32 1e-05, %v731_v25 }
 0x12b   : > { %v2651_v31 = vmul.f32 0.5, %v2650_v35  ;;  %v2210_v44 = vpop.xlane.xlu0 %2209  ;;  %v940_v47 = vmul.f32 %v7997_v29, %v921_v12  ;;  %v692_v25 = vpop.xlane.xlu2 %691 }
 0x12c   : > { %v2360_v60 = vmul.f32 %v2210_v44, %v7647_v15  ;;  %v3192_v5 = vmul.f32 %v7953_v6, %v3125_v42  ;;  %vm787_vm15 = vweird.f32 %v8003_v1 }
 0x12d   : > { %v2652_v43 = vsub.f32 1.5, %v2651_v31  ;;  %v959_v56 = vadd.f32 %v8011_v38, %v940_v47 }
 0x12e   : > { %v6819_v20 = vpop.eup %6818  ;;  %v8005_v53 = vadd.f32 1e-05, %v2360_v60  ;;  %v3259_v31 = vadd.f32 %v7961_v23, %v3192_v5  ;;  %v8024_v60 = vadd.f32 1e-05, %v2363_v10 }
 0x12f   : > { %v2653_v2 = vmul.f32 %v6817_v50, %v2652_v43  ;;  %v2659_v49 = vmul.f32 %v6819_v20, %v7981_v52  ;;  %v8020_v34 = vpop.eup %6820  ;;  %6579 = vmatmul.msk.f32.vlgmr.msra.gmra.mxu0 %vm577_vm1, %v959_v56  ;;  %vm2665_vm5 = vweird.f32 %v6819_v20 }
 0x130   : > { %6822 = vrsqrt.f32 %v8005_v53  ;;  %vm2666_vm7 = vmor %vm2664_vm6, %vm2665_vm5  ;;  %vm2674_vm9 = vweird.f32 %v8005_v53  ;;  %vm2695_vm12 = vweird.f32 %v8020_v34 }
 0x131   : > { %v2657_v32 = vsel %vm2656_vm4, %v6817_v50, %v2653_v2  ;;  %v2660_v35 = vmul.f32 %v6819_v20, %v2659_v49  ;;  %6824 = vrsqrt.f32 %v8003_v1  ;;  %v732_v50 = vmul.f32 %v692_v25, %v7666_v51  ;;  %6628 = vmatmul.msk.f32.gmra.mxu2 %vm1565_vm0, %v3259_v31  ;;  %vm8089_vm14 = vmor %vm2694_vm11, %vm2695_vm12 }
 0x132   : > { %v2225_v12 = vpop.xlane.xlu1 %2224  ;;  %v3126_v42 = vmul.f32 %v2657_v32, %v7679_v62  ;;  %v2689_v2 = vmul.f32 %v8020_v34, %v7989_v63  ;;  %6826 = vrsqrt.f32 %v8024_v60  ;;  %vm2704_vm4 = vweird.f32 %v8024_v60 }
 0x133   : > { %v2661_v27 = vmul.f32 0.5, %v2660_v35  ;;  %v2213_v44 = vpop.xlane.xlu0 %2212  ;;  %v8040_v35 = vadd.f32 1e-05, %v732_v50  ;;  %v2365_v50 = vmul.f32 %v2225_v12, %v7647_v15 }
 0x134   : > { %v2361_v13 = vmul.f32 %v2213_v44, %v7647_v15  ;;  %v3193_v47 = vmul.f32 %v7953_v6, %v3126_v42  ;;  %v2690_v56 = vmul.f32 %v8020_v34, %v2689_v2 }
 0x135   : > { %v2662_v43 = vsub.f32 1.5, %v2661_v27 }
 0x136   : > { %v6823_v49 = vpop.eup %6822  ;;  %v8033_v62 = vadd.f32 1e-05, %v2361_v13  ;;  %v3260_v25 = vadd.f32 %v7961_v23, %v3193_v47 }
 0x137   : > { %v2663_v5 = vmul.f32 %v6819_v20, %v2662_v43  ;;  %v8035_v10 = vpop.eup %6824  ;;  %v2669_v32 = vmul.f32 %v6823_v49, %v8005_v53  ;;  %vm2675_vm8 = vweird.f32 %v6823_v49 }
 0x138   : > { %6828 = vrsqrt.f32 %v8033_v62  ;;  %v782_v52 = vmul.f32 %v8035_v10, %v8003_v1  ;;  %v8053_v2 = vpop.eup %6826  ;;  %vm2676_vm10 = vmor %vm2674_vm9, %vm2675_vm8  ;;  %vm2684_vm2 = vweird.f32 %v8033_v62  ;;  %vm788_vm3 = vweird.f32 %v8035_v10 }
 0x139   : > { %v2670_v27 = vmul.f32 %v6823_v49, %v2669_v32  ;;  %v2667_v42 = vsel %vm2666_vm7, %v6819_v20, %v2663_v5  ;;  %6830 = vrsqrt.f32 %v8040_v35  ;;  %6629 = vmatmul.msk.f32.gmra.mxu2 %vm1565_vm0, %v3260_v25  ;;  %v2691_v20 = vmul.f32 0.5, %v2690_v56  ;;  %vm8140_vm6 = vmor %vm787_vm15, %vm788_vm3 }
 0x13a   : > { %v698_v31 = vpop.xlane.xlu1 %697  ;;  %v2228_v44 = vpop.xlane.xlu2 %2227  ;;  %v3127_v43 = vmul.f32 %v2667_v42, %v7695_v24  ;;  %v783_v24 = vmul.f32 %v8035_v10, %v782_v52  ;;  %v8063_v25 = vadd.f32 1e-05, %v2365_v50  ;;  %v2699_v42 = vmul.f32 %v8053_v2, %v8024_v60 }
 0x13b   : > { %v686_v13 = vpop.xlane.xlu0 %685  ;;  %v2671_v40 = vmul.f32 0.5, %v2670_v27  ;;  %vm2705_vm7 = vweird.f32 %v8053_v2  ;;  %vm797_vm8 = vweird.f32 %v8040_v35 }
 0x13c   : > { %v730_v0 = vmul.f32 %v686_v13, %v7666_v51  ;;  %v3194_v47 = vmul.f32 %v7953_v6, %v3127_v43  ;;  %v784_v50 = vmul.f32 0.5, %v783_v24  ;;  %vm8190_vm11 = vmor %vm2704_vm4, %vm2705_vm7  ;;  %vm2724_vm15 = vweird.f32 %v8063_v25 }
 0x13d   : > { %v2672_v5 = vsub.f32 1.5, %v2671_v40 }
 0x13e   : > { %v8055_v32 = vadd.f32 1e-05, %v730_v0  ;;  %v8057_v26 = vpop.eup %6828  ;;  %v3261_v40 = vadd.f32 %v7961_v23, %v3194_v47  ;;  %v2692_v0 = vsub.f32 1.5, %v2691_v20 }
 0x13f   : > { %v2673_v27 = vmul.f32 %v6823_v49, %v2672_v5  ;;  %v2679_v12 = vmul.f32 %v8057_v26, %v8033_v62  ;;  %v8067_v56 = vpop.eup %6830  ;;  %v734_v5 = vmul.f32 %v698_v31, %v7666_v51  ;;  %v2700_v31 = vmul.f32 %v8053_v2, %v2699_v42 }
 0x140   : > { %6832 = vrsqrt.f32 %v8055_v32  ;;  %v2693_v24 = vmul.f32 %v8020_v34, %v2692_v0  ;;  %vm2685_vm13 = vweird.f32 %v8057_v26  ;;  %vm798_vm9 = vweird.f32 %v8067_v56 }
 0x141   : > { %v2677_v52 = vsel %vm2676_vm10, %v6823_v49, %v2673_v27  ;;  %v2680_v13 = vmul.f32 %v8057_v26, %v2679_v12  ;;  %6834 = vrsqrt.f32 %v8063_v25  ;;  %v792_v49 = vmul.f32 %v8067_v56, %v8040_v35  ;;  %6630 = vmatmul.msk.f32.gmra.mxu2 %vm1565_vm0, %v3261_v40  ;;  %vm8106_vm5 = vmor %vm2684_vm2, %vm2685_vm13 }
 0x142   : > { %v2234_v53 = vpop.xlane.xlu1 %2233  ;;  %v701_v43 = vpop.xlane.xlu2 %700  ;;  %v3128_v59 = vmul.f32 %v2677_v52, %v7715_v22  ;;  %v2366_v27 = vmul.f32 %v2228_v44, %v7647_v15  ;;  %v785_v52 = vsub.f32 1.5, %v784_v50  ;;  %v2697_v62 = vsel %vm8089_vm14, %v8020_v34, %v2693_v24  ;;  %vm8209_vm13 = vmor %vm797_vm8, %vm798_vm9 }
 0x143   : > { %v2222_v3 = vpop.xlane.xlu0 %2221  ;;  %v2681_v47 = vmul.f32 0.5, %v2680_v13  ;;  %v8093_v13 = vadd.f32 1e-05, %v734_v5  ;;  %v793_v42 = vmul.f32 %v8067_v56, %v792_v49  ;;  %v2368_v30 = vmul.f32 %v2234_v53, %v7647_v15 }
 0x144   : > { %v2364_v20 = vmul.f32 %v2222_v3, %v7647_v15  ;;  %v3195_v40 = vmul.f32 %v7953_v6, %v3128_v59  ;;  %v8110_v59 = vadd.f32 1e-05, %v2366_v27  ;;  %v8123_v27 = vmul.f32 %v8035_v10, %v785_v52 }
 0x145   : > { %v2682_v12 = vsub.f32 1.5, %v2681_v47  ;;  %v2701_v47 = vmul.f32 0.5, %v2700_v31  ;;  %vm777_vm12 = vweird.f32 %v8055_v32 }
 0x146   : > { %v8085_v22 = vpop.eup %6832  ;;  %v8095_v44 = vadd.f32 1e-05, %v2364_v20  ;;  %v3262_v21 = vadd.f32 %v7961_v23, %v3195_v40  ;;  %vm2734_vm7 = vweird.f32 %v8110_v59 }
 0x147   : > { %v2683_v0 = vmul.f32 %v8057_v26, %v2682_v12  ;;  %v772_v63 = vmul.f32 %v8085_v22, %v8055_v32  ;;  %v8113_v5 = vpop.eup %6834  ;;  %v2702_v40 = vsub.f32 1.5, %v2701_v47  ;;  %vm778_vm10 = vweird.f32 %v8085_v22 }
 0x148   : > { %6836 = vrsqrt.f32 %v8095_v44  ;;  %vm8228_vm14 = vmor %vm777_vm12, %vm778_vm10  ;;  %vm2725_vm2 = vweird.f32 %v8113_v5  ;;  %vm2714_vm4 = vweird.f32 %v8095_v44 }
 0x149   : > { %v2687_v20 = vsel %vm8106_vm5, %v8057_v26, %v2683_v0  ;;  %v773_v49 = vmul.f32 %v8085_v22, %v772_v63  ;;  %6838 = vrsqrt.f32 %v8093_v13  ;;  %v794_v0 = vmul.f32 0.5, %v793_v42  ;;  %6631 = vmatmul.msk.f32.gmra.mxu2 %vm1565_vm0, %v3262_v21  ;;  %vm8332_vm9 = vmor %vm2724_vm15, %vm2725_vm2 }
 0x14a   : > { %v619_v12 = vpop.xlane.xlu1 %618  ;;  %v1861_v46 = vpop.xlane.xlu2 %1860  ;;  %v3129_v26 = vmul.f32 %v2687_v20, %v7729_v61  ;;  %v2719_v63 = vmul.f32 %v8113_v5, %v8063_v25  ;;  %6840 = vrsqrt.f32 %v8110_v59  ;;  %v3130_v42 = vmul.f32 %v2697_v62, %v7687_v11 }
 0x14b   : > { %v695_v3 = vpop.xlane.xlu0 %694  ;;  %v774_v34 = vmul.f32 0.5, %v773_v49  ;;  %v646_v31 = vmul.f32 %v7666_v51, %v619_v12  ;;  %v1990_v53 = vmul.f32 %v7647_v15, %v1861_v46  ;;  %v8151_v21 = vadd.f32 1e-05, %v2368_v30 }
 0x14c   : > { %v733_v24 = vmul.f32 %v695_v3, %v7666_v51  ;;  %v735_v46 = vmul.f32 %v701_v43, %v7666_v51  ;;  %v3196_v1 = vmul.f32 %v7953_v6, %v3129_v26  ;;  %v790_v30 = vsel %vm8140_vm6, %v8035_v10, %v8123_v27 }
 0x14d   : > { %v775_v20 = vsub.f32 1.5, %v774_v34  ;;  %v8159_v49 = vsub.f32 %v7797_v7, %v646_v31  ;;  %v795_v62 = vsub.f32 1.5, %v794_v0  ;;  %v2720_v43 = vmul.f32 %v8113_v5, %v2719_v63 }
 0x14e   : > { %v8145_v61 = vadd.f32 1e-05, %v733_v24  ;;  %v8148_v50 = vpop.eup %6836  ;;  %v8169_v12 = vsub.f32 %v7792_v14, %v1990_v53  ;;  %v2703_v3 = vmul.f32 %v8053_v2, %v2702_v40  ;;  %v3197_v31 = vmul.f32 %v7953_v6, %v3130_v42 }
 0x14f   : > { %v2709_v47 = vmul.f32 %v8148_v50, %v8095_v44  ;;  %13700 = vst [vmem:[#allocation12_spill] sm:$0xff] %v8159_v49  ;;  %v8161_v11 = vpop.eup %6838  ;;  %v8183_v14 = vadd.f32 1e-05, %v735_v46  ;;  %v3263_v10 = vadd.f32 %v7961_v23, %v3196_v1  ;;  %v776_v63 = vmul.f32 %v8085_v22, %v775_v20 }
 0x150   : > { %13701 = vst [vmem:[#allocation13_spill] sm:$0xff] %v8169_v12  ;;  %6842 = vrsqrt.f32 %v8145_v61  ;;  %v8179_v26 = vpop.eup %6840  ;;  %v678_v40 = vmul.f32 %v8159_v49, %v8159_v49  ;;  %v8199_v42 = vmul.f32 %v8067_v56, %v795_v62  ;;  %v2721_v46 = vmul.f32 0.5, %v2720_v43  ;;  %v8221_v43 = vld [vmem:[%s7480_s28 + $0x148] sm:$0xff] }
 0x151   : > { %v2710_v34 = vmul.f32 %v8148_v50, %v2709_v47  ;;  %6844 = vrsqrt.f32 %v8151_v21  ;;  %6632 = vmatmul.msk.f32.gmra.mxu2 %vm1565_vm0, %v3263_v10  ;;  %v2118_v60 = vmul.f32 %v8169_v12, %v8169_v12  ;;  %v812_v20 = vmul.f32 %v8161_v11, %v8093_v13  ;;  %13706 = vst [vmem:[#allocation14_spill] sm:$0xff] %v8221_v43 }
 0x152   : > { %v8174_v7 = vpop.xlane.xlu1 %706  ;;  %v8176_v24 = vpop.xlane.xlu2 %2236  ;;  %v2729_v47 = vmul.f32 %v8179_v26, %v8110_v59  ;;  %v720_v62 = vsel %vm577_vm1, %v678_v40, 0.0  ;;  %v2707_v35 = vsel %vm8190_vm11, %v8053_v2, %v2703_v3  ;;  %v780_v0 = vsel %vm8228_vm14, %v8085_v22, %v776_v63 }
 0x153   : > { %v2231_v27 = vpop.xlane.xlu0 %2230  ;;  %v2711_v53 = vmul.f32 0.5, %v2710_v34  ;;  %721 = vadd.xlane.f32.xlu0 %v720_v62  ;;  %v2250_v10 = vsel %vm1565_vm0, %v2118_v60, 0.0  ;;  %6846 = vrsqrt.f32 %v8183_v14  ;;  %v923_v3 = vmul.f32 %v790_v30, %v7703_v36 }
 0x154   : > { %v2367_v52 = vmul.f32 %v2231_v27, %v7647_v15  ;;  %v3264_v27 = vadd.f32 %v7961_v23, %v3197_v31  ;;  %2251 = vadd.xlane.f32.xlu1 %v2250_v10  ;;  %v2722_v60 = vsub.f32 1.5, %v2721_v46  ;;  %v1880_v22 = vsel %vm1565_vm0, %v8221_v43, 0.0 }
 0x155   : > { %v2712_v2 = vsub.f32 1.5, %v2711_v53  ;;  %v813_v36 = vmul.f32 %v8161_v11, %v812_v20  ;;  %v2730_v30 = vmul.f32 %v8179_v26, %v2729_v47  ;;  %vm2715_vm3 = vweird.f32 %v8148_v50 }
 0x156   : > { %v8217_v32 = vadd.f32 1e-05, %v2367_v52  ;;  %v8235_v52 = vld [vmem:[%s7480_s28 + $0x18] sm:$0xff]  ;;  %v8237_v40 = vpop.eup %6842  ;;  %v922_v10 = vmul.f32 %v780_v0, %v7743_v19  ;;  %v3131_v4 = vmul.f32 %v2707_v35, %v7700_v18  ;;  %v942_v19 = vmul.f32 %v7997_v29, %v923_v3  ;;  %vm8292_vm6 = vmor %vm2714_vm4, %vm2715_vm3 }
 0x157   : > { %13709 = vst [vmem:[#allocation15_spill] sm:$0xff] %v8235_v52  ;;  %v8244_v49 = vpop.eup %6844  ;;  %v802_v62 = vmul.f32 %v8237_v40, %v8145_v61  ;;  %v1766_v53 = vsel %vm1565_vm0, %v8235_v52, 0.0  ;;  %v2713_v20 = vmul.f32 %v8148_v50, %v2712_v2  ;;  %v8287_v44 = vmul.f32 %v8113_v5, %v2722_v60 }
 0x158   : > { %6848 = vrsqrt.f32 %v8217_v32  ;;  %v2749_v52 = vmul.f32 %v8244_v49, %v8151_v21  ;;  %vm817_vm5 = vweird.f32 %v8093_v13  ;;  %vm818_vm8 = vweird.f32 %v8161_v11  ;;  %v1721_v13 = vld [vmem:[%s7480_s28 + $0x150] sm:$0xff] }
 0x159   : > { %v803_v34 = vmul.f32 %v8237_v40, %v802_v62  ;;  %v941_v62 = vmul.f32 %v7997_v29, %v922_v10  ;;  %6633 = vmatmul.msk.f32.gmra.mxu2 %vm1565_vm0, %v3264_v27  ;;  %v8275_v0 = vpop.eup %6846  ;;  %v2731_v27 = vmul.f32 0.5, %v2730_v30  ;;  %v2717_v3 = vsel %vm8292_vm6, %v8148_v50, %v2713_v20  ;;  %vm8385_vm14 = vmor %vm817_vm5, %vm818_vm8 }
 0x15a   : > { %v1867_v63 = vpop.xlane.xlu1 %1866  ;;  %v622_v46 = vpop.xlane.xlu2 %621  ;;  %vm808_vm10 = vweird.f32 %v8237_v40  ;;  %v13716_v25 = vsel %vm8209_vm13, %v8067_v56, %v8199_v42  ;;  %v2727_v1 = vsel %vm8332_vm9, %v8113_v5, %v8287_v44  ;;  %vm2735_vm11 = vweird.f32 %v8179_v26 }
 0x15b   : > { %v616_v31 = vpop.xlane.xlu0 %615  ;;  %v1992_v12 = vmul.f32 %v7647_v15, %v1867_v63  ;;  %v647_v43 = vmul.f32 %v7666_v51, %v622_v46  ;;  %v804_v2 = vmul.f32 0.5, %v803_v34  ;;  %1881 = vadd.xlane.f32.xlu0 %v1880_v22  ;;  %v2369_v22 = vmul.f32 %v8176_v24, %v7647_v15  ;;  %vm8403_vm3 = vmor %vm2734_vm7, %vm2735_vm11 }
 0x15c   : > { %v645_v47 = vmul.f32 %v7666_v51, %v616_v31  ;;  %1767 = vadd.xlane.f32.xlu1 %v1766_v53  ;;  %vm807_vm12 = vweird.f32 %v8145_v61  ;;  %v1684_v61 = vld [vmem:[%s7480_s28 + $0x28] sm:$0xff]  ;;  %vm2754_vm15 = vweird.f32 %v8151_v21  ;;  %vm2755_vm2 = vweird.f32 %v8244_v49 }
 0x15d   : > { %v8281_v63 = vsub.f32 %v7829_v55, %v1992_v12  ;;  %v8284_v18 = vsub.f32 %v7826_v33, %v647_v43  ;;  %v960_v55 = vadd.f32 %v8011_v38, %v941_v62  ;;  %v3198_v33 = vmul.f32 %v7953_v6, %v3131_v4  ;;  %vm8373_vm13 = vmor %vm807_vm12, %vm808_vm10 }
 0x15e   : > { %v8278_v31 = vsub.f32 %v7832_v28, %v645_v47  ;;  %v737_v28 = vmul.f32 %v8174_v7, %v7666_v51  ;;  %v8300_v12 = vpop.eup %6848  ;;  %v814_v43 = vmul.f32 0.5, %v813_v36  ;;  %v2750_v7 = vmul.f32 %v8244_v49, %v2749_v52  ;;  %vm8480_vm7 = vmor %vm2754_vm15, %vm2755_vm2 }
 0x15f   : > { %13710 = vst [vmem:[#allocation16_spill] sm:$0xff] %v8281_v63  ;;  %v822_v4 = vmul.f32 %v8275_v0, %v8183_v14  ;;  %6580 = vmatmul.msk.f32.gmra.mxu0 %vm577_vm1, %v960_v55  ;;  %v805_v36 = vsub.f32 1.5, %v804_v2  ;;  %v2120_v50 = vmul.f32 %v8281_v63, %v8281_v63  ;;  %v679_v46 = vmul.f32 %v8284_v18, %v8284_v18 }
 0x160   : > { %13711 = vst [vmem:[#allocation17_spill] sm:$0xff] %v8284_v18  ;;  %v677_v60 = vmul.f32 %v8278_v31, %v8278_v31  ;;  %v2739_v52 = vmul.f32 %v8300_v12, %v8217_v32  ;;  %v8322_v10 = vadd.f32 1e-05, %v737_v28  ;;  %v3265_v24 = vadd.f32 %v7961_v23, %v3198_v33 }
 0x161   : > { %v3132_v47 = vmul.f32 %v2717_v3, %v7768_v41  ;;  %v815_v62 = vsub.f32 1.5, %v814_v43  ;;  %v2732_v2 = vsub.f32 1.5, %v2731_v27  ;;  %v2256_v55 = vsel %vm1565_vm0, %v2120_v50, 0.0 }
 0x162   : > { %v717_v30 = vsel %vm577_vm1, %v677_v60, 0.0  ;;  %v2243_v53 = vpop.xlane.xlu1 %2242  ;;  %v710_v34 = vpop.xlane.xlu2 %709  ;;  %v8336_v33 = vmul.f32 0.5, %v2750_v7  ;;  %v823_v60 = vmul.f32 %v8275_v0, %v822_v4  ;;  %6634 = vmatmul.msk.f32.gmra.mxu2 %vm1565_vm0, %v3265_v24  ;;  %v723_v41 = vsel %vm577_vm1, %v679_v46, 0.0  ;;  %v1719_v7 = vld [vmem:[%s7480_s28 + $0x140] sm:$0xff] }
 0x163   : > { %718 = vadd.xlane.f32.xlu2 %v717_v30  ;;  %v704_v20 = vpop.xlane.xlu0 %703  ;;  %v8339_v30 = vadd.f32 1e-05, %v2369_v22  ;;  %v806_v43 = vmul.f32 %v8237_v40, %v805_v36  ;;  %v924_v3 = vmul.f32 %v13716_v25, %v7720_v57  ;;  %v2740_v4 = vmul.f32 %v8300_v12, %v2739_v52  ;;  %2257 = vadd.xlane.f32.xlu0 %v2256_v55 }
 0x164   : > { %v736_v35 = vmul.f32 %v704_v20, %v7666_v51  ;;  %6850 = vrsqrt.f32 %v8322_v10  ;;  %v961_v22 = vadd.f32 %v8011_v38, %v942_v19  ;;  %v3199_v36 = vmul.f32 %v7953_v6, %v3132_v47  ;;  %724 = vadd.xlane.f32.xlu1 %v723_v41 }
 0x165   : > { %v8366_v57 = vmul.f32 %v8161_v11, %v815_v62  ;;  %v8369_v56 = vmul.f32 %v8179_v26, %v2732_v2  ;;  %v1877_v5 = vsel %vm1565_vm0, %v1719_v7, 0.0  ;;  %v2752_v44 = vsub.f32 1.5, %v8336_v33 }
 0x166   : > { %v8345_v27 = vadd.f32 1e-05, %v736_v35  ;;  %v8392_v50 = vmul.f32 0.5, %v823_v60  ;;  %v810_v46 = vsel %vm8373_vm13, %v8237_v40, %v806_v43  ;;  %v943_v52 = vmul.f32 %v7997_v29, %v924_v3 }
 0x167   : > { %6581 = vmatmul.msk.f32.gmra.mxu0 %vm577_vm1, %v961_v22  ;;  %vm827_vm4 = vweird.f32 %v8183_v14  ;;  %v2741_v62 = vmul.f32 0.5, %v2740_v4  ;;  %v3266_v2 = vadd.f32 %v7961_v23, %v3199_v36  ;;  %v2371_v28 = vmul.f32 %v2243_v53, %v7647_v15 }
 0x168   : > { %6852 = vrsqrt.f32 %v8345_v27  ;;  %v1772_v59 = vsel %vm1565_vm0, %v1684_v61, 0.0  ;;  %v3133_v60 = vmul.f32 %v2727_v1, %v7734_v54  ;;  %v738_v43 = vmul.f32 %v710_v34, %v7666_v51 }
 0x169   : > { %6854 = vrsqrt.f32 %v8339_v30  ;;  %v1883_v3 = vsel %vm1565_vm0, %v1721_v13, 0.0  ;;  %v820_v54 = vsel %vm8385_vm14, %v8161_v11, %v8366_v57  ;;  %v2737_v34 = vsel %vm8403_vm3, %v8179_v26, %v8369_v56 }
 0x16a   : > { %v1759_v24 = vpop.xlane.xlu1 %1758  ;;  %v1870_v20 = vpop.xlane.xlu2 %1869  ;;  %6635 = vmatmul.msk.f32.gmra.mxu2 %vm1565_vm0, %v3266_v2  ;;  %vm828_vm5 = vweird.f32 %v8275_v0  ;;  %v962_v22 = vadd.f32 %v8011_v38, %v943_v52  ;;  %v925_v36 = vmul.f32 %v810_v46, %v7784_v8  ;;  %v3200_v11 = vmul.f32 %v7953_v6, %v3133_v60 }
 0x16b   : > { %1878 = vadd.xlane.f32.xlu2 %v1877_v5  ;;  %v1864_v40 = vpop.xlane.xlu0 %1863  ;;  %v1956_v35 = vmul.f32 %v7647_v15, %v1759_v24  ;;  %v1993_v55 = vmul.f32 %v7647_v15, %v1870_v20  ;;  %v8415_v41 = vpop.eup %6850  ;;  %1773 = vadd.xlane.f32.xlu0 %v1772_v59  ;;  %v8447_v57 = vadd.f32 1e-05, %v2371_v28  ;;  %v8454_v56 = vmul.f32 %v8244_v49, %v2752_v44  ;;  %v1683_v28 = vld [vmem:[%s7480_s28 + $0x20] sm:$0xff]  ;;  %vm8496_vm9 = vmor %vm827_vm4, %vm828_vm5 }
 0x16c   : > { %v1991_v33 = vmul.f32 %v7647_v15, %v1864_v40  ;;  %1884 = vadd.xlane.f32.xlu1 %v1883_v3  ;;  %v825_v42 = vsub.f32 1.5, %v8392_v50  ;;  %v8457_v8 = vadd.f32 1e-05, %v738_v43  ;;  %vm2745_vm6 = vweird.f32 %v8300_v12 }
 0x16d   : > { %v8420_v25 = vsub.f32 %v7865_v48, %v1956_v35  ;;  %v8424_v7 = vsub.f32 %v7862_v17, %v1993_v55  ;;  %v2742_v17 = vsub.f32 1.5, %v2741_v62  ;;  %v842_v61 = vmul.f32 %v8415_v41, %v8322_v10 }
 0x16e   : > { %v8426_v53 = vpop.eup %6852  ;;  %v8438_v48 = vsub.f32 %v7868_v45, %v1991_v33  ;;  %v944_v24 = vmul.f32 %v7997_v29, %v925_v36  ;;  %v3267_v13 = vadd.f32 %v7961_v23, %v3200_v11  ;;  %v3134_v47 = vmul.f32 %v2737_v34, %v7750_v16  ;;  %v1723_v36 = vld [vmem:[%s7480_s28 + $0x160] sm:$0xff] }
 0x16f   : > { %13723 = vst [vmem:[#allocation18_spill] sm:$0xff] %v8420_v25  ;;  %v8440_v4 = vpop.eup %6854  ;;  %v832_v1 = vmul.f32 %v8426_v53, %v8345_v27  ;;  %v2084_v26 = vmul.f32 %v8420_v25, %v8420_v25  ;;  %6582 = vmatmul.msk.f32.gmra.mxu0 %vm577_vm1, %v962_v22  ;;  %v2121_v5 = vmul.f32 %v8424_v7, %v8424_v7  ;;  %6856 = vrsqrt.f32 %v8447_v57 }
 0x170   : > { %13724 = vst [vmem:[#allocation19_spill] sm:$0xff] %v8424_v7  ;;  %v2119_v45 = vmul.f32 %v8438_v48, %v8438_v48  ;;  %v2759_v19 = vmul.f32 %v8440_v4, %v8339_v30  ;;  %v2743_v50 = vmul.f32 %v8300_v12, %v2742_v17  ;;  %v8485_v55 = vmul.f32 %v8275_v0, %v825_v42 }
 0x171   : > { %13725 = vst [vmem:[#allocation20_spill] sm:$0xff] %v8438_v48  ;;  %v833_v62 = vmul.f32 %v8426_v53, %v832_v1  ;;  %v2148_v40 = vsel %vm1565_vm0, %v2084_v26, 0.0  ;;  %vm2744_vm8 = vweird.f32 %v8217_v32  ;;  %6858 = vrsqrt.f32 %v8457_v8 }
 0x172   : > { %v2253_v44 = vsel %vm1565_vm0, %v2119_v45, 0.0  ;;  %v716_v46 = vpop.xlane.xlu1 %715  ;;  %v2246_v52 = vpop.xlane.xlu2 %2245  ;;  %6636 = vmatmul.msk.f32.gmra.mxu2 %vm1565_vm0, %v3267_v13  ;;  %v2259_v16 = vsel %vm1565_vm0, %v2121_v5, 0.0  ;;  %v843_v33 = vmul.f32 %v8415_v41, %v842_v61  ;;  %v2760_v59 = vmul.f32 %v8440_v4, %v2759_v19  ;;  %vm8507_vm10 = vmor %vm2744_vm8, %vm2745_vm6  ;;  %v1685_v5 = vld [vmem:[%s7480_s28 + $0x30] sm:$0xff] }
 0x173   : > { %2254 = vadd.xlane.f32.xlu2 %v2253_v44  ;;  %v2240_v20 = vpop.xlane.xlu0 %2239  ;;  %v926_v60 = vmul.f32 %v820_v54, %v7753_v37  ;;  %v963_v14 = vadd.f32 %v8011_v38, %v944_v24  ;;  %2149 = vadd.xlane.f32.xlu0 %v2148_v40  ;;  %v3201_v3 = vmul.f32 %v7953_v6, %v3134_v47  ;;  %v834_v17 = vmul.f32 0.5, %v833_v62  ;;  %v7290_v40 = vld [vmem:[%s7480_s28 + $0x138] sm:$0xff] }
 0x174   : > { %v2370_v2 = vmul.f32 %v2240_v20, %v7647_v15  ;;  %v2747_v34 = vsel %vm8507_vm10, %v8300_v12, %v2743_v50  ;;  %2260 = vadd.xlane.f32.xlu1 %v2259_v16  ;;  %v1769_v37 = vsel %vm1565_vm0, %v1683_v28, 0.0  ;;  %v2757_v54 = vsel %vm8480_vm7, %v8244_v49, %v8454_v56  ;;  %v7291_v16 = vld [vmem:[%s7480_s28 + $0x8] sm:$0xff] }
 0x175   : > { %v830_v22 = vsel %vm8496_vm9, %v8275_v0, %v8485_v55  ;;  %v2372_v12 = vmul.f32 %v2246_v52, %v7647_v15  ;;  %v8529_v11 = vpop.eup %6856  ;;  %v8531_v1 = vmul.f32 0.5, %v843_v33  ;;  %v2761_v45 = vmul.f32 0.5, %v2760_v59 }
 0x176   : > { %v8502_v32 = vadd.f32 1e-05, %v2370_v2  ;;  %vm2764_vm11 = vweird.f32 %v8339_v30  ;;  %vm2765_vm12 = vweird.f32 %v8440_v4  ;;  %v945_v26 = vmul.f32 %v7997_v29, %v926_v60  ;;  %v7292_v60 = vld [vmem:[%s7520_s18 + $0x78] sm:$0xff] }
 0x177   : > { %6583 = vmatmul.msk.f32.gmra.mxu0 %vm577_vm1, %v963_v14  ;;  %v8537_v0 = vpop.eup %6858  ;;  %v3268_v19 = vadd.f32 %v7961_v23, %v3201_v3  ;;  %v3135_v24 = vmul.f32 %v2747_v34, %v7810_v9  ;;  %vm847_vm13 = vweird.f32 %v8322_v10  ;;  %vm848_vm14 = vweird.f32 %v8415_v41  ;;  %vm8611_vm4 = vmor %vm2764_vm11, %vm2765_vm12 }
 0x178   : > { %6860 = vrsqrt.f32 %v8502_v32  ;;  %v835_v13 = vsub.f32 1.5, %v834_v17  ;;  %v740_v20 = vmul.f32 %v716_v46, %v7666_v51  ;;  %v1889_v62 = vsel %vm1565_vm0, %v1723_v36, 0.0  ;;  %vm8629_vm5 = vmor %vm847_vm13, %vm848_vm14 }
 0x179   : > { %v8548_v2 = vadd.f32 1e-05, %v2372_v12  ;;  %v1775_v9 = vsel %vm1565_vm0, %v1685_v5, 0.0  ;;  %v2762_v33 = vsub.f32 1.5, %v2761_v45  ;;  %v2779_v46 = vmul.f32 %v8529_v11, %v8447_v57 }
 0x17a   : > { %v1876_v42 = vpop.xlane.xlu1 %1875  ;;  %v1762_v61 = vpop.xlane.xlu2 %1761  ;;  %6637 = vmatmul.msk.f32.gmra.mxu2 %vm1565_vm0, %v3268_v19  ;;  %v852_v59 = vmul.f32 %v8537_v0, %v8457_v8  ;;  %v964_v3 = vadd.f32 %v8011_v38, %v945_v26  ;;  %v927_v34 = vmul.f32 %v830_v22, %v7759_v39  ;;  %v3202_v17 = vmul.f32 %v7953_v6, %v3135_v24 }
 0x17b   : > { %1770 = vadd.xlane.f32.xlu2 %v1769_v37  ;;  %v625_v44 = vpop.xlane.xlu0 %624  ;;  %v1995_v52 = vmul.f32 %v7647_v15, %v1876_v42  ;;  %v1957_v50 = vmul.f32 %v7647_v15, %v1762_v61  ;;  %1890 = vadd.xlane.f32.xlu0 %v1889_v62  ;;  %v836_v37 = vmul.f32 %v8426_v53, %v835_v13  ;;  %vm838_vm15 = vweird.f32 %v8426_v53  ;;  %v13741_v62 = vld [vmem:[#allocation6_spill] sm:$0xff] }
 0x17c   : > { %v648_v47 = vmul.f32 %v7666_v51, %v625_v44  ;;  %1776 = vadd.xlane.f32.xlu1 %v1775_v9  ;;  %v8579_v42 = vadd.f32 1e-05, %v740_v20  ;;  %6862 = vrsqrt.f32 %v8548_v2  ;;  %v845_v6 = vsub.f32 1.5, %v8531_v1  ;;  %v8638_v9 = vld [vmem:[%s13598_s8] ss:$0 sm:$0xff] }
 0x17d   : > { %v8552_v55 = vsub.f32 %v7290_v40, %v1995_v52  ;;  %v8556_v28 = vsub.f32 %v7291_v16, %v1957_v50  ;;  %vm837_vm2 = vweird.f32 %v8345_v27  ;;  %v853_v22 = vmul.f32 %v8537_v0, %v852_v59 }
 0x17e   : > { %v8558_v21 = vpop.eup %6860  ;;  %v8565_v43 = vsub.f32 %v7292_v60, %v648_v47  ;;  %v2763_v5 = vmul.f32 %v8440_v4, %v2762_v33  ;;  %vm8590_vm3 = vmor %vm837_vm2, %vm838_vm15  ;;  %v946_v19 = vmul.f32 %v7997_v29, %v927_v34  ;;  %v3269_v44 = vadd.f32 %v7961_v23, %v3202_v17  ;;  %v1687_v60 = vld [vmem:[%s7480_s28 + $0x40] sm:$0xff]  ;;  %v1724_v34 = vld [vmem:[%s7480_s28 + $0x168] sm:$0xff] }
 0x17f   : > { %13732 = vst [vmem:[#allocation21_spill] sm:$0xff] %v8552_v55  ;;  %v2769_v14 = vmul.f32 %v8558_v21, %v8502_v32  ;;  %v2123_v36 = vmul.f32 %v8552_v55, %v8552_v55  ;;  %6584 = vmatmul.msk.f32.gmra.mxu0 %vm577_vm1, %v964_v3  ;;  %v2085_v39 = vmul.f32 %v8556_v28, %v8556_v28  ;;  %6864 = vrsqrt.f32 %v8579_v42 }
 0x180   : > { %13733 = vst [vmem:[#allocation22_spill] sm:$0xff] %v8556_v28  ;;  %v680_v12 = vmul.f32 %v8565_v43, %v8565_v43  ;;  %v3136_v27 = vmul.f32 %v2757_v54, %v7776_v58  ;;  %v840_v1 = vsel %vm8590_vm3, %v8426_v53, %v836_v37  ;;  %v2780_v49 = vmul.f32 %v8529_v11, %v2779_v46  ;;  %v1722_v53 = vld [vmem:[%s7480_s28 + $0x158] sm:$0xff] }
 0x181   : > { %13734 = vst [vmem:[#allocation23_spill] sm:$0xff] %v8565_v43  ;;  %v2770_v45 = vmul.f32 %v8558_v21, %v2769_v14  ;;  %v2265_v13 = vsel %vm1565_vm0, %v2123_v36, 0.0  ;;  %v2151_v58 = vsel %vm1565_vm0, %v2085_v39, 0.0  ;;  %v846_v56 = vmul.f32 %v8415_v41, %v845_v6 }
 0x182   : > { %v726_v26 = vsel %vm577_vm1, %v680_v12, 0.0  ;;  %6638 = vmatmul.msk.f32.gmra.mxu2 %vm1565_vm0, %v3269_v44  ;;  %v854_v35 = vmul.f32 0.5, %v853_v22  ;;  %v8623_v30 = vpop.eup %6862  ;;  %v965_v47 = vadd.f32 %v8011_v38, %v946_v19  ;;  %v928_v40 = vmul.f32 %v840_v1, %v13741_v62  ;;  %v8663_v12 = vld [vmem:[%s13599_s9] ss:$0 sm:$0xff] }
 0x183   : > { %727 = vadd.xlane.f32.xlu2 %v726_v26  ;;  %v713_v52 = vpop.xlane.xlu0 %712  ;;  %v2771_v50 = vmul.f32 0.5, %v2770_v45  ;;  %2266 = vadd.xlane.f32.xlu0 %v2265_v13  ;;  %v3203_v16 = vmul.f32 %v8638_v9, %v3136_v27  ;;  %v2767_v10 = vsel %vm8611_vm4, %v8440_v4, %v2763_v5  ;;  %v1886_v46 = vsel %vm1565_vm0, %v1722_v53, 0.0  ;;  %v13742_v45 = vld [vmem:[#allocation2_spill] sm:$0xff]  ;;  %v7295_v27 = vld [vmem:[%s7480_s28 + $0x130] sm:$0xff]  ;;  %v13746_v13 = vld [vmem:[#allocation3_spill] sm:$0xff] }
 0x184   : > { %v739_v24 = vmul.f32 %v713_v52, %v7666_v51  ;;  %2152 = vadd.xlane.f32.xlu1 %v2151_v58  ;;  %v2781_v59 = vmul.f32 0.5, %v2780_v49  ;;  %vm2784_vm6 = vweird.f32 %v8447_v57  ;;  %v850_v14 = vsel %vm8629_vm5, %v8415_v41, %v846_v56 }
 0x185   : > { %v2772_v33 = vsub.f32 1.5, %v2771_v50  ;;  %v855_v3 = vsub.f32 1.5, %v854_v35  ;;  %vm857_vm7 = vweird.f32 %v8457_v8  ;;  %v2789_v4 = vmul.f32 %v8623_v30, %v8548_v2  ;;  %v8656_v17 = vpop.eup %6864 }
 0x186   : > { %v8621_v54 = vadd.f32 1e-05, %v739_v24  ;;  %vm2785_vm8 = vweird.f32 %v8529_v11  ;;  %v947_v37 = vmul.f32 %v7997_v29, %v928_v40  ;;  %v3270_v41 = vadd.f32 %v8663_v12, %v3203_v16  ;;  %v8725_v16 = vld [vmem:[%s13592_s2] ss:$0 sm:$0xff] }
 0x187   : > { %6585 = vmatmul.msk.f32.gmra.mxu0 %vm577_vm1, %v965_v47  ;;  %v3137_v39 = vmul.f32 %v2767_v10, %v13742_v45  ;;  %v2773_v6 = vmul.f32 %v8558_v21, %v2772_v33  ;;  %vm2775_vm9 = vweird.f32 %v8558_v21  ;;  %v1781_v29 = vsel %vm1565_vm0, %v1687_v60, 0.0  ;;  %vm8713_vm14 = vmor %vm2784_vm6, %vm2785_vm8 }
 0x188   : > { %6866 = vrsqrt.f32 %v8621_v54  ;;  %v2782_v26 = vsub.f32 1.5, %v2781_v59  ;;  %vm858_vm10 = vweird.f32 %v8537_v0  ;;  %vm2774_vm11 = vweird.f32 %v8502_v32 }
 0x189   : > { %v1892_v5 = vsel %vm1565_vm0, %v1724_v34, 0.0  ;;  %v856_v19 = vmul.f32 %v8537_v0, %v855_v3  ;;  %v872_v44 = vmul.f32 %v8656_v17, %v8579_v42  ;;  %v2790_v52 = vmul.f32 %v8623_v30, %v2789_v4  ;;  %vm8684_vm12 = vmor %vm2774_vm11, %vm2775_vm9  ;;  %v1686_v3 = vld [vmem:[%s7480_s28 + $0x38] sm:$0xff] }
 0x18a   : > { %6639 = vmatmul.msk.f32.gmra.mxu2 %vm1565_vm0, %v3270_v41  ;;  %v966_v24 = vadd.f32 %v8011_v38, %v947_v37  ;;  %v929_v23 = vmul.f32 %v850_v14, %v13746_v13  ;;  %v3204_v49 = vmul.f32 %v8638_v9, %v3137_v39  ;;  %v2777_v58 = vsel %vm8684_vm12, %v8558_v21, %v2773_v6  ;;  %vm8703_vm13 = vmor %vm857_vm7, %vm858_vm10  ;;  %v13752_v37 = vld [vmem:[#allocation4_spill] sm:$0xff]  ;;  %v8742_v39 = vld [vmem:[%s13593_s3] ss:$0 sm:$0xff] }
 0x18b   : > { %1887 = vadd.xlane.f32.xlu2 %v1886_v46  ;;  %v1873_v36 = vpop.xlane.xlu0 %1872  ;;  %1782 = vadd.xlane.f32.xlu0 %v1781_v29  ;;  %v2783_v56 = vmul.f32 %v8529_v11, %v2782_v26  ;;  %v860_v8 = vsel %vm8703_vm13, %v8537_v0, %v856_v19  ;;  %v873_v20 = vmul.f32 %v8656_v17, %v872_v44  ;;  %v2791_v47 = vmul.f32 0.5, %v2790_v52  ;;  %v13751_v46 = vld [vmem:[#allocation9_spill] sm:$0xff]  ;;  %v7298_v38 = vld [vmem:[%s7480_s28 + $0x10] sm:$0xff] }
 0x18c   : > { %v1994_v22 = vmul.f32 %v7647_v15, %v1873_v36  ;;  %1893 = vadd.xlane.f32.xlu1 %v1892_v5  ;;  %v948_v57 = vmul.f32 %v8725_v16, %v929_v23  ;;  %v3271_v10 = vadd.f32 %v8663_v12, %v3204_v49  ;;  %v3138_v59 = vmul.f32 %v2777_v58, %v13751_v46  ;;  %v13753_v44 = vld [vmem:[#allocation5_spill] sm:$0xff] }
 0x18d   : > { %v2787_v60 = vsel %vm8713_vm14, %v8529_v11, %v2783_v56  ;;  %v874_v4 = vmul.f32 0.5, %v873_v20  ;;  %v930_v41 = vmul.f32 %v860_v8, %v13752_v37  ;;  %v2792_v36 = vsub.f32 1.5, %v2791_v47 }
 0x18e   : > { %v8675_v61 = vpop.eup %6866  ;;  %v8682_v1 = vsub.f32 %v7295_v27, %v1994_v22  ;;  %v967_v11 = vadd.f32 %v8742_v39, %v948_v57  ;;  %v3205_v6 = vmul.f32 %v8638_v9, %v3138_v59  ;;  %vm867_vm2 = vweird.f32 %v8621_v54 }
 0x18f   : > { %v862_v32 = vmul.f32 %v8675_v61, %v8621_v54  ;;  %6586 = vmatmul.msk.f32.gmra.mxu0 %vm577_vm1, %v966_v24  ;;  %vm868_vm15 = vweird.f32 %v8675_v61  ;;  %v1778_v22 = vsel %vm1565_vm0, %v1686_v3, 0.0  ;;  %v949_v26 = vmul.f32 %v8725_v16, %v930_v41 }
 0x190   : > { %13743 = vst [vmem:[#allocation6_spill] sm:$0xff] %v8682_v1  ;;  %v2122_v53 = vmul.f32 %v8682_v1, %v8682_v1  ;;  %vm869_vm3 = vmor %vm867_vm2, %vm868_vm15  ;;  %v3272_v5 = vadd.f32 %v8663_v12, %v3205_v6  ;;  %v3139_v52 = vmul.f32 %v2787_v60, %v13753_v44  ;;  %v7382_v27 = vmov 1.4142135   ;;  %v13761_v6 = vld [vmem:[#allocation11_spill] sm:$0xff] }
 0x191   : > { %v863_v35 = vmul.f32 %v8675_v61, %v862_v32  ;;  %v875_v50 = vsub.f32 1.5, %v874_v4  ;;  %v2793_v54 = vmul.f32 %v8623_v30, %v2792_v36  ;;  %vm2795_vm4 = vweird.f32 %v8623_v30 }
 0x192   : > { %v2262_v62 = vsel %vm1565_vm0, %v2122_v53, 0.0  ;;  %6640 = vmatmul.msk.f32.gmra.mxu2 %vm1565_vm0, %v3271_v10  ;;  %vm877_vm5 = vweird.f32 %v8579_v42  ;;  %vm878_vm6 = vweird.f32 %v8656_v17  ;;  %vm2794_vm7 = vweird.f32 %v8548_v2  ;;  %v8845_v42 = vld [vmem:[%s13602_s12 + $0x30] sm:$0xff] }
 0x193   : > { %v864_v40 = vmul.f32 0.5, %v863_v35  ;;  %2263 = vadd.xlane.f32.xlu2 %v2262_v62  ;;  %v2249_v33 = vpop.xlane.xlu0 %2248  ;;  %vm2796_vm8 = vmor %vm2794_vm7, %vm2795_vm4  ;;  %v968_v49 = vadd.f32 %v8742_v39, %v949_v26  ;;  %v3206_v58 = vmul.f32 %v8638_v9, %v3139_v52  ;;  %v876_v53 = vmul.f32 %v8656_v17, %v875_v50  ;;  %v13758_v62 = vld [vmem:[#allocation7_spill] sm:$0xff] }
 0x194   : > { %v2373_v0 = vmul.f32 %v2249_v33, %v7647_v15  ;;  %v2797_v56 = vsel %vm2796_vm8, %v8623_v30, %v2793_v54  ;;  %vm8768_vm9 = vmor %vm877_vm5, %vm878_vm6 }
 0x195   : > { %v865_v14 = vsub.f32 1.5, %v864_v40  ;;  %v3273_v47 = vadd.f32 %v8663_v12, %v3206_v58  ;;  %v3140_v40 = vmul.f32 %v2797_v56, %v13758_v62  ;;  %v880_v30 = vsel %vm8768_vm9, %v8656_v17, %v876_v53 }
 0x196   : > { %v2437_v34 = vadd.f32 1e-05, %v2373_v0 }
 0x197   : > { %v866_v45 = vmul.f32 %v8675_v61, %v865_v14  ;;  %6587 = vmatmul.msk.f32.gmra.mxu0 %vm577_vm1, %v967_v11  ;;  %v13760_v14 = vld [vmem:[#allocation8_spill] sm:$0xff]  ;;  %v3207_v3 = vmul.f32 %v8638_v9, %v3140_v40 }
 0x198   : > { %6868 = vrsqrt.f32 %v2437_v34  ;;  %vm2804_vm10 = vweird.f32 %v2437_v34  ;;  %v932_v17 = vmul.f32 %v880_v30, %v13760_v14 }
 0x199   : > { %v870_v29 = vsel %vm869_vm3, %v8675_v61, %v866_v45  ;;  %6870 = vrcp.f32 %v7382_v27  ;;  %v13754_v61 = vld [vmem:[#allocation10_spill] sm:$0xff]  ;;  %v3274_v41 = vadd.f32 %v8663_v12, %v3207_v3  ;;  %v1725_v45 = vld [vmem:[%s7480_s28 + $0x170] sm:$0xff] }
 0x19a   : > { %6641 = vmatmul.msk.f32.gmra.mxu2 %vm1565_vm0, %v3272_v5  ;;  %v931_v24 = vmul.f32 %v870_v29, %v13754_v61  ;;  %v951_v37 = vmul.f32 %v8725_v16, %v932_v17  ;;  %v1895_v11 = vsel %vm1565_vm0, %v1725_v45, 0.0  ;;  %v8799_v5 = vld [vmem:[%s13601_s11] ss:$0 sm:$0xff] }
 0x19b   : > { %1779 = vadd.xlane.f32.xlu2 %v1778_v22  ;;  %v1765_v19 = vpop.xlane.xlu0 %1764 }
 0x19c   : > { %v1958_v32 = vmul.f32 %v7647_v15, %v1765_v19  ;;  %v950_v2 = vmul.f32 %v8725_v16, %v931_v24  ;;  %v970_v29 = vadd.f32 %v8742_v39, %v951_v37 }
 0x19e   : > { %v6869_v13 = vpop.eup %6868  ;;  %v8766_v35 = vsub.f32 %v7298_v38, %v1958_v32  ;;  %v969_v46 = vadd.f32 %v8742_v39, %v950_v2  ;;  %v8818_v32 = vld [vmem:[%s13595_s5] ss:$0 sm:$0xff] }
 0x19f   : > { %v2799_v23 = vmul.f32 %v6869_v13, %v2437_v34  ;;  %v6871_v21 = vpop.eup %6870  ;;  %6588 = vmatmul.msk.f32.gmra.mxu0 %vm577_vm1, %v968_v49  ;;  %vm2805_vm11 = vweird.f32 %v6869_v13 }
 0x1a0   : > { %13755 = vst [vmem:[#allocation2_spill] sm:$0xff] %v8766_v35  ;;  %v1108_v57 = vmul.f32 1.4142135, %v6871_v21  ;;  %v2086_v10 = vmul.f32 %v8766_v35, %v8766_v35  ;;  %vm2806_vm12 = vmor %vm2804_vm10, %vm2805_vm11  ;;  %vm1112_vm13 = vweird.f32 %v6871_v21 }
 0x1a1   : > { %v2800_v8 = vmul.f32 %v6869_v13, %v2799_v23 }
 0x1a2   : > { %6642 = vmatmul.msk.f32.gmra.mxu2 %vm1565_vm0, %v3273_v47  ;;  %v2154_v0 = vsel %vm1565_vm0, %v2086_v10, 0.0  ;;  %v1109_v4 = vsub.f32 1.0, %v1108_v57 }
 0x1a3   : > { %v2801_v20 = vmul.f32 0.5, %v2800_v8  ;;  %v8783_v59 = vpop.f32.mrf.mxu2  ;;  %2155 = vadd.xlane.f32.xlu2 %v2154_v0 }
 0x1a4   : > { %13759 = vst [vmem:[#allocation3_spill] sm:$0xff] %v8783_v59  ;;  %v1110_v36 = vmul.f32 %v6871_v21, %v1109_v4 }
 0x1a5   : > { %v2802_v33 = vsub.f32 1.5, %v2801_v20 }
 0x1a6   : > { %v1111_v19 = vadd.f32 %v6871_v21, %v1110_v36 }
 0x1a7   : > { %v2803_v60 = vmul.f32 %v6869_v13, %v2802_v33  ;;  %6589 = vmatmul.msk.f32.gmra.mxu0 %vm577_vm1, %v969_v46  ;;  %v8861_v46 = vld [vmem:[%s13602_s12 + $0x28] sm:$0xff] }
 0x1a8   : > { %v8807_v27 = vsel %vm1112_vm13, %v6871_v21, %v1111_v19  ;;  %v8840_v21 = vld [vmem:[%s13602_s12 + $0x38] sm:$0xff] }
 0x1a9   : > { %v2807_v34 = vsel %vm2806_vm12, %v6869_v13, %v2803_v60  ;;  %6775 = vmatpush.msra.mxu3 %v8840_v21 }
 0x1aa   : > { %6643 = vmatmul.msk.f32.gmra.mxu2 %vm1565_vm0, %v3274_v41  ;;  %v3141_v22 = vmul.f32 %v2807_v34, %v13761_v6 }
 0x1ab   : > { %1896 = vadd.xlane.f32.xlu2 %v1895_v11  ;;  %6776 = vmatpush.msra.mxu3 %v8845_v42 }
 0x1ac   : > { %v3566_v26 = vpop.f32.mrf.mxu2  ;;  %v3208_v16 = vmul.f32 %v8638_v9, %v3141_v22  ;;  %v1043_v61 = vpop.f32.mrf.mxu0 }
 0x1ad   : > { %v8804_v44 = vadd.f32 %v8799_v5, %v3566_v26  ;;  %v8821_v13 = vadd.f32 %v8818_v32, %v1043_v61  ;;  %6777 = vmatpush.msra.mxu3 %v8861_v46 }
 0x1ae   : > { %v3275_v52 = vadd.f32 %v8663_v12, %v3208_v16 }
 0x1af   : > { %6590 = vmatmul.msk.f32.gmra.mxu0 %vm577_vm1, %v970_v29  ;;  %v8812_v39 = vmul.f32 %v8804_v44, %v8807_v27  ;;  %v8828_v53 = vmul.f32 %v8807_v27, %v8821_v13 }
 0x1b1   : > { %v3982_v54 = vand.u32 2147483647, %v8812_v39  ;;  %v1162_v8 = vand.u32 2147483647, %v8828_v53  ;;  %vm3854_vm14 = vcmp.ge.f32.partialorder %v8812_v39, 0.0  ;;  %vm1130_vm15 = vcmp.ge.f32.partialorder %v8828_v53, 0.0 }
 0x1b2   : > { %6644 = vmatmul.msk.f32.gmra.mxu2 %vm1565_vm0, %v3275_v52  ;;  %v8944_v53 = vld [vmem:[%s13602_s12 + $0x8] sm:$0xff] }
 0x1b3   : > { %v4046_v24 = vmul.f32 0.3275911, %v3982_v54  ;;  %v1178_v57 = vmul.f32 0.3275911, %v1162_v8  ;;  %v5006_v41 = vsub.f32 0.0, %v3982_v54  ;;  %v1418_v11 = vsub.f32 0.0, %v1162_v8 }
 0x1b4   : > { %v3569_v50 = vpop.f32.mrf.mxu2 }
 0x1b5   : > { %v8824_v49 = vadd.f32 %v8799_v5, %v3569_v50  ;;  %v4110_v58 = vadd.f32 1.0, %v4046_v24  ;;  %v1194_v14 = vadd.f32 1.0, %v1178_v57  ;;  %v8888_v50 = vld [vmem:[%s13602_s12 + $0x20] sm:$0xff]  ;;  %v5070_v61 = vmul.f32 %v5006_v41, %v3982_v54  ;;  %v8908_v54 = vld [vmem:[%s13602_s12 + $0x18] sm:$0xff] }
 0x1b6   : > { %6778 = vmatpush.msra.mxu3 %v8888_v50 }
 0x1b7   : > { %v8832_v56 = vmul.f32 %v8824_v49, %v8807_v27  ;;  %6872 = vrcp.f32 %v4110_v58  ;;  %v5150_v41 = vmul.f32 1.442695, %v5070_v61 }
 0x1b8   : > { %6874 = vrcp.f32 %v1194_v14  ;;  %6779 = vmatpush.msra.mxu3 %v8908_v54 }
 0x1b9   : > { %v3983_v20 = vand.u32 2147483647, %v8832_v56  ;;  %vm3855_vm2 = vcmp.ge.f32.partialorder %v8832_v56, 0.0 }
 0x1bb   : > { %v4047_v10 = vmul.f32 0.3275911, %v3983_v20 }
 0x1bc   : > { %v3572_v23 = vpop.f32.mrf.mxu2 }
 0x1bd   : > { %v8835_v38 = vadd.f32 %v8799_v5, %v3572_v23  ;;  %v6873_v30 = vpop.eup %6872  ;;  %v4111_v3 = vadd.f32 1.0, %v4047_v10  ;;  %v1434_v23 = vmul.f32 %v1418_v11, %v1162_v8  ;;  %v8913_v8 = vld [vmem:[%s13602_s12 + $0x10] sm:$0xff] }
 0x1be   : > { %v4238_v0 = vmul.f32 %v6873_v30, %v4110_v58  ;;  %v5007_v58 = vsub.f32 0.0, %v3983_v20  ;;  %6780 = vmatpush.msra.mxu3 %v8913_v8 }
 0x1bf   : > { %v8853_v62 = vmul.f32 %v8835_v38, %v8807_v27  ;;  %6876 = vrcp.f32 %v4111_v3 }
 0x1c0   : > { %v4302_v45 = vsub.f32 2.0, %v4238_v0  ;;  %v5071_v11 = vmul.f32 %v5007_v58, %v3983_v20  ;;  %6781 = vmatpush.msra.mxu3 %v8944_v53 }
 0x1c1   : > { %v8864_v60 = vand.u32 2147483647, %v8853_v62  ;;  %vm3856_vm3 = vcmp.ge.f32.partialorder %v8853_v62, 0.0 }
 0x1c2   : > { %v8892_v24 = vmul.f32 %v6873_v30, %v4302_v45  ;;  %v8916_v30 = vmul.f32 0.5, %v8804_v44  ;;  %v1450_v45 = vmul.f32 1.442695, %v1434_v23 }
 0x1c3   : > { %v4048_v6 = vmul.f32 0.3275911, %v8864_v60 }
 0x1c4   : > { %v3575_v2 = vpop.f32.mrf.mxu2  ;;  %v4430_v20 = vmul.f32 1.0614054, %v8892_v24 }
 0x1c5   : > { %v8856_v33 = vadd.f32 %v8799_v5, %v3575_v2  ;;  %v8894_v2 = vadd.f32 1.0, %v4048_v6  ;;  %v5008_v6 = vsub.f32 0.0, %v8864_v60 }
 0x1c6   : > { %v722_v47 = vpop.xlane.xlu0 %721 }
 0x1c7   : > { %v2252_v40 = vpop.xlane.xlu1 %2251  ;;  %v742_v17 = vmul.f32 %v722_v47, %v7666_v51  ;;  %v8870_v4 = vmul.f32 %v8856_v33, %v8807_v27 }
 0x1c8   : > { %v2374_v34 = vmul.f32 %v2252_v40, %v7647_v15  ;;  %v13762_v40 = vld [vmem:[#allocation14_spill] sm:$0xff] }
 0x1c9   : > { %v8874_v22 = vadd.f32 1e-05, %v742_v17  ;;  %v8881_v16 = vand.u32 2147483647, %v8870_v4  ;;  %v6875_v17 = vpop.eup %6874  ;;  %vm3857_vm4 = vcmp.ge.f32.partialorder %v8870_v4, 0.0 }
 0x1ca   : > { %v8883_v19 = vadd.f32 1e-05, %v2374_v34  ;;  %v13623_v34 = vmov -1.0   ;;  %v6877_v44 = vpop.eup %6876  ;;  %v1226_v58 = vmul.f32 %v6875_v17, %v1194_v14  ;;  %v5072_v14 = vmul.f32 %v5008_v6, %v8864_v60  ;;  %v575_v60 = vld [vmem:[%s13596_s6 + $0x8] sm:$0xff] }
 0x1cb   : > { %6878 = vrsqrt.f32 %v8874_v22  ;;  %v4049_v0 = vmul.f32 0.3275911, %v8881_v16  ;;  %v8948_v23 = vsel %vm1130_vm15, 1.0, %v13623_v34  ;;  %1628 = vmatpush.msra.mxu1 %v575_v60  ;;  %vm897_vm5 = vweird.f32 %v8874_v22 }
 0x1cc   : > { %v3578_v37 = vpop.f32.mrf.mxu2  ;;  %6880 = vrsqrt.f32 %v8883_v19  ;;  %v1242_v1 = vsub.f32 2.0, %v1226_v58  ;;  %v5154_v7 = vmul.f32 1.442695, %v5072_v14  ;;  %vm2814_vm6 = vweird.f32 %v8883_v19 }
 0x1cd   : > { %v8877_v29 = vadd.f32 %v8799_v5, %v3578_v37  ;;  %v8924_v37 = vsel %vm3854_vm14, 1.0, %v13623_v34  ;;  %6882 = vrcp.f32 %v8894_v2 }
 0x1ce   : > { %v1882_v36 = vpop.xlane.xlu0 %1881  ;;  %6884 = vpow2.f32 %v5150_v41  ;;  %v9007_v63 = vmul.f32 %v6875_v17, %v1242_v1 }
 0x1cf   : > { %v1997_v26 = vmul.f32 %v7647_v15, %v1882_v36  ;;  %v1768_v52 = vpop.xlane.xlu1 %1767  ;;  %v8899_v47 = vmul.f32 %v8877_v29, %v8807_v27  ;;  %v8927_v36 = vmul.f32 0.5, %v8821_v13  ;;  %v13764_v13 = vld [vmem:[#allocation15_spill] sm:$0xff]  ;;  %6886 = vpow2.f32 %v1450_v45  ;;  %v8980_v45 = vld [vmem:[%s13602_s12] sm:$0xff] }
 0x1d0   : > { %v1959_v10 = vmul.f32 %v7647_v15, %v1768_v52  ;;  %6782 = vmatpush.msra.mxu3 %v8980_v45 }
 0x1d1   : > { %v8902_v57 = vsub.f32 %v13762_v40, %v1997_v26  ;;  %v8936_v39 = vand.u32 2147483647, %v8899_v47  ;;  %v8950_v40 = vadd.f32 1.0, %v4049_v0  ;;  %v8954_v59 = vpop.eup %6878  ;;  %v5009_v0 = vsub.f32 0.0, %v8881_v16 }
 0x1d2   : > { %v8939_v61 = vsub.f32 %v13764_v13, %v1959_v10  ;;  %v8957_v10 = vmul.f32 0.5, %v8824_v49  ;;  %v4239_v13 = vmul.f32 %v6877_v44, %v4111_v3  ;;  %v8962_v34 = vpop.eup %6880  ;;  %v4494_v3 = vadd.f32 -1.4531521, %v4430_v20 }
 0x1d3   : > { %13763 = vst [vmem:[#allocation9_spill] sm:$0xff] %v8902_v57  ;;  %v2125_v52 = vmul.f32 %v8902_v57, %v8902_v57  ;;  %v4050_v41 = vmul.f32 0.3275911, %v8936_v39  ;;  %6888 = vrcp.f32 %v8950_v40  ;;  %v5073_v43 = vmul.f32 %v5009_v0, %v8881_v16 }
 0x1d4   : > { %v3581_v26 = vpop.f32.mrf.mxu2  ;;  %13765 = vst [vmem:[#allocation4_spill] sm:$0xff] %v8939_v61  ;;  %v2087_v49 = vmul.f32 %v8939_v61, %v8939_v61  ;;  %v4303_v6 = vsub.f32 2.0, %v4239_v13  ;;  %v13766_v61 = vmov -1.0   ;;  %v8996_v13 = vmul.f32 0.5, %v8835_v38 }
 0x1d5   : > { %v2271_v57 = vsel %vm1565_vm0, %v2125_v52, 0.0  ;;  %v8960_v35 = vadd.f32 %v8799_v5, %v3581_v26  ;;  %v5152_v52 = vmul.f32 1.442695, %v5071_v11  ;;  %v6883_v11 = vpop.eup %6882  ;;  %v2809_v26 = vmul.f32 %v8962_v34, %v8883_v19 }
 0x1d6   : > { %2272 = vadd.xlane.f32.xlu2 %v2271_v57  ;;  %v892_v57 = vmul.f32 %v8954_v59, %v8874_v22  ;;  %v2157_v58 = vsel %vm1565_vm0, %v2087_v49, 0.0  ;;  %v8993_v28 = vsel %vm3855_vm2, 1.0, %v13766_v61  ;;  %13767 = vst [vmem:[#allocation5_spill] sm:$0xff] %v8996_v13  ;;  %v8999_v55 = vpop.eup %6884  ;;  %v9002_v49 = vadd.f32 1.0, %v4050_v41  ;;  %v2258_v17 = vpop.xlane.xlu0 %2257 }
 0x1d7   : > { %v8986_v20 = vmul.f32 %v8960_v35, %v8807_v27  ;;  %2158 = vadd.xlane.f32.xlu0 %v2157_v58  ;;  %6890 = vpow2.f32 %v5152_v52  ;;  %v4558_v60 = vmul.f32 %v4494_v3, %v8892_v24  ;;  %v9005_v56 = vpop.eup %6886  ;;  %v9012_v38 = vsel %vm3856_vm3, 1.0, %v13766_v61  ;;  %v1689_v52 = vld [vmem:[%s7480_s28 + $0x50] sm:$0xff] }
 0x1d8   : > { %13768 = vst [vmem:[#allocation10_spill] sm:$0xff] %v9012_v38  ;;  %v4240_v16 = vmul.f32 %v6883_v11, %v8894_v2  ;;  %v893_v14 = vmul.f32 %v8954_v59, %v892_v57  ;;  %v9017_v58 = vmul.f32 %v6877_v44, %v4303_v6  ;;  %v9020_v41 = vmul.f32 0.5, %v8856_v33 }
 0x1d9   : > { %v2810_v3 = vmul.f32 %v8962_v34, %v2809_v26  ;;  %v3987_v1 = vand.u32 2147483647, %v8986_v20  ;;  %v6889_v48 = vpop.eup %6888  ;;  %6892 = vpow2.f32 %v5154_v7  ;;  %v9027_v62 = vsel %vm3857_vm4, 1.0, %v13766_v61  ;;  %v574_v7 = vld [vmem:[%s13596_s6] sm:$0xff] }
 0x1da   : > { %13769 = vst [vmem:[#allocation7_spill] sm:$0xff] %v9020_v41  ;;  %v5156_v2 = vmul.f32 1.442695, %v5073_v43  ;;  %v5010_v57 = vsub.f32 0.0, %v8936_v39  ;;  %6894 = vrcp.f32 %v9002_v49  ;;  %v1787_v44 = vsel %vm1565_vm0, %v1689_v52, 0.0  ;;  %v725_v52 = vpop.xlane.xlu1 %724  ;;  %1629 = vmatpush.msra.mxu1 %v574_v7 }
 0x1db   : > { %13770 = vst [vmem:[#allocation8_spill] sm:$0xff] %v9027_v62  ;;  %v4622_v6 = vadd.f32 1.4214138, %v4558_v60  ;;  %v4304_v26 = vsub.f32 2.0, %v4240_v16  ;;  %v894_v41 = vmul.f32 0.5, %v893_v14  ;;  %v4241_v4 = vmul.f32 %v6889_v48, %v8950_v40 }
 0x1dc   : > { %v1046_v0 = vpop.f32.mrf.mxu0  ;;  %v4051_v18 = vmul.f32 0.3275911, %v3987_v1  ;;  %v5011_v62 = vsub.f32 0.0, %v3987_v1  ;;  %6896 = vpow2.f32 %v5156_v2  ;;  %v9044_v60 = vmul.f32 0.5, %v8877_v29  ;;  %5769 = vmatpush.msrb.mxu1 %v8840_v21 }
 0x1dd   : > { %v9032_v33 = vadd.f32 %v8818_v32, %v1046_v0  ;;  %v9040_v43 = vpop.eup %6890  ;;  %v2811_v0 = vmul.f32 0.5, %v2810_v3  ;;  %v5074_v16 = vmul.f32 %v5010_v57, %v8936_v39  ;;  %v9048_v14 = vmul.f32 1.0614054, %v9007_v63  ;;  %v1726_v57 = vld [vmem:[%s7480_s28 + $0x178] sm:$0xff] }
 0x1de   : > { %1788 = vadd.xlane.f32.xlu2 %v1787_v44  ;;  %13771 = vst [vmem:[#allocation11_spill] sm:$0xff] %v9044_v60  ;;  %vm3858_vm7 = vcmp.ge.f32.partialorder %v8899_v47, 0.0  ;;  %v2376_v3 = vmul.f32 %v2258_v17, %v7647_v15  ;;  %v719_v44 = vpop.xlane.xlu2 %718  ;;  %v4686_v2 = vmul.f32 %v4622_v6, %v8892_v24  ;;  %v9060_v7 = vmul.f32 %v6883_v11, %v4304_v26 }
 0x1df   : > { %v9054_v40 = vmul.f32 %v8807_v27, %v9032_v33  ;;  %v9058_v29 = vpop.eup %6892  ;;  %v895_v39 = vsub.f32 1.5, %v894_v41  ;;  %vm898_vm8 = vweird.f32 %v8954_v59  ;;  %v743_v21 = vmul.f32 %v725_v52, %v7666_v51  ;;  %5770 = vmatpush.msrb.mxu1 %v8845_v42  ;;  %v3584_v52 = vpop.f32.mrf.mxu2 }
 0x1e0   : > { %v6895_v60 = vpop.eup %6894  ;;  %v4305_v13 = vsub.f32 2.0, %v4241_v4  ;;  %v2812_v25 = vsub.f32 1.5, %v2811_v0  ;;  %v9066_v38 = vadd.f32 1.0, %v4051_v18  ;;  %v5075_v17 = vmul.f32 %v5011_v62, %v3987_v1  ;;  %v1774_v18 = vpop.xlane.xlu0 %1773  ;;  %vm9099_vm11 = vmor %vm897_vm5, %vm898_vm8 }
 0x1e1   : > { %vm2815_vm9 = vweird.f32 %v8962_v34  ;;  %v9072_v11 = vsel %vm3858_vm7, 1.0, %v13766_v61  ;;  %v5158_v41 = vmul.f32 1.442695, %v5074_v16  ;;  %v741_v6 = vmul.f32 %v719_v44, %v7666_v51  ;;  %5771 = vmatpush.msrb.mxu1 %v8861_v46 }
 0x1e2   : > { %vm3859_vm10 = vcmp.ge.f32.partialorder %v8986_v20, 0.0  ;;  %v1163_v42 = vand.u32 2147483647, %v9054_v40  ;;  %v9078_v26 = vadd.f32 1e-05, %v2376_v3  ;;  %v1898_v1 = vsel %vm1565_vm0, %v1726_v57, 0.0  ;;  %v9081_v62 = vpop.eup %6896  ;;  %vm9109_vm12 = vmor %vm2814_vm6, %vm2815_vm9 }
 0x1e3   : > { %v9084_v47 = vmul.f32 %v8954_v59, %v895_v39  ;;  %v4242_v4 = vmul.f32 %v6895_v60, %v9002_v49  ;;  %v9088_v0 = vmul.f32 0.5, %v8960_v35  ;;  %v9090_v46 = vadd.f32 1e-05, %v743_v21  ;;  %1899 = vadd.xlane.f32.xlu0 %v1898_v1  ;;  %5772 = vmatpush.msrb.mxu1 %v8888_v50 }
 0x1e4   : > { %v9093_v16 = vmul.f32 %v6889_v48, %v4305_v13  ;;  %v2813_v49 = vmul.f32 %v8962_v34, %v2812_v25  ;;  %6898 = vrcp.f32 %v9066_v38  ;;  %v5160_v35 = vmul.f32 1.442695, %v5075_v17  ;;  %v1049_v25 = vpop.f32.mrf.mxu0 }
 0x1e5   : > { %13772 = vst [vmem:[#allocation14_spill] sm:$0xff] %v9088_v0  ;;  %6900 = vpow2.f32 %v5158_v41  ;;  %v9116_v22 = vsel %vm3859_vm10, 1.0, %v13766_v61  ;;  %v9118_v50 = vadd.f32 1e-05, %v741_v6  ;;  %v1961_v13 = vmul.f32 %v7647_v15, %v1774_v18  ;;  %5773 = vmatpush.msrb.mxu1 %v8908_v54  ;;  %v7299_v41 = vld [vmem:[%s7480_s28 + $0x28] sm:$0xff] }
 0x1e6   : > { %13777 = vst [vmem:[#allocation15_spill] sm:$0xff] %v9116_v22  ;;  %v1179_v44 = vmul.f32 0.3275911, %v1163_v42  ;;  %v1419_v19 = vsub.f32 0.0, %v1163_v42  ;;  %6902 = vrsqrt.f32 %v9078_v26  ;;  %v3585_v39 = vadd.f32 %v8799_v5, %v3584_v52 }
 0x1e7   : > { %v4306_v21 = vsub.f32 2.0, %v4242_v4  ;;  %vm1131_vm13 = vcmp.ge.f32.partialorder %v9054_v40, 0.0  ;;  %6904 = vrsqrt.f32 %v9090_v46  ;;  %5774 = vmatpush.msrb.mxu1 %v8913_v8  ;;  %v2817_v54 = vsel %vm9109_vm12, %v8962_v34, %v2813_v49  ;;  %v1885_v40 = vpop.xlane.xlu1 %1884  ;;  %v3587_v20 = vpop.f32.mrf.mxu2 }
 0x1e8   : > { %6906 = vpow2.f32 %v5160_v35  ;;  %v9135_v57 = vmul.f32 0.5, %v9032_v33  ;;  %v1050_v17 = vadd.f32 %v8818_v32, %v1049_v25  ;;  %v9140_v6 = vsub.f32 %v7299_v41, %v1961_v13 }
 0x1e9   : > { %6908 = vrsqrt.f32 %v9118_v50  ;;  %v4750_v18 = vadd.f32 -0.28449672, %v4686_v2  ;;  %v1290_v1 = vadd.f32 -1.4531521, %v9048_v14  ;;  %5775 = vmatpush.msrb.mxu1 %v8944_v53  ;;  %v9147_v34 = vsel %vm1131_vm13, 1.0, %v13766_v61 }
 0x1ea   : > { %13778 = vst [vmem:[#allocation24_spill] sm:$0xff] %v9135_v57  ;;  %v9144_v8 = vpop.eup %6898  ;;  %v9149_v33 = vadd.f32 1.0, %v1179_v44  ;;  %v1435_v4 = vmul.f32 %v1419_v19, %v1163_v42  ;;  %v9152_v52 = vmul.f32 %v3585_v39, %v8807_v27  ;;  %v9156_v35 = vmul.f32 %v6895_v60, %v4306_v21  ;;  %v13783_v44 = vld [vmem:[#allocation13_spill] sm:$0xff] }
 0x1eb   : > { %13779 = vst [vmem:[#allocation25_spill] sm:$0xff] %v9140_v6  ;;  %v9154_v49 = vpop.eup %6900  ;;  %v9158_v2 = vmul.f32 0.5, %v3585_v39  ;;  %v4814_v14 = vmul.f32 %v4750_v18, %v8892_v24  ;;  %v1306_v53 = vmul.f32 %v1290_v1, %v9007_v63  ;;  %5776 = vmatpush.msrb.mxu1 %v8980_v45  ;;  %v9165_v25 = vmul.f32 0.5, %v1050_v17 }
 0x1ec   : > { %13780 = vst [vmem:[#allocation26_spill] sm:$0xff] %v9147_v34  ;;  %v9163_v48 = vpop.eup %6902  ;;  %v9168_v42 = vmul.f32 %v8807_v27, %v1050_v17  ;;  %v1998_v13 = vmul.f32 %v7647_v15, %v1885_v40  ;;  %v3142_v60 = vmul.f32 %v2817_v54, %v13783_v44  ;;  %v9176_v39 = vmul.f32 %v9144_v8, %v9066_v38  ;;  %v1879_v54 = vpop.xlane.xlu2 %1878 }
 0x1ed   : > { %13781 = vst [vmem:[#allocation27_spill] sm:$0xff] %v9158_v2  ;;  %v9172_v19 = vpop.eup %6904  ;;  %v4878_v21 = vadd.f32 0.2548296, %v4814_v14  ;;  %v1322_v41 = vadd.f32 1.4214138, %v1306_v53  ;;  %v2089_v45 = vmul.f32 %v9140_v6, %v9140_v6  ;;  %6910 = vrcp.f32 %v9149_v33 }
 0x1ee   : > { %13782 = vst [vmem:[#allocation28_spill] sm:$0xff] %v9165_v25  ;;  %v9180_v18 = vpop.eup %6906  ;;  %v1452_v17 = vmul.f32 1.442695, %v1435_v4  ;;  %v3988_v40 = vand.u32 2147483647, %v9152_v52  ;;  %v3209_v1 = vmul.f32 %v8638_v9, %v3142_v60  ;;  %v2829_v38 = vmul.f32 %v9163_v48, %v9078_v26  ;;  %v7300_v25 = vld [vmem:[%s7480_s28 + $0x150] sm:$0xff] }
 0x1ef   : > { %v9185_v44 = vpop.eup %6908  ;;  %vm3860_vm14 = vcmp.ge.f32.partialorder %v9152_v52, 0.0  ;;  %v4942_v14 = vmul.f32 %v4878_v21, %v8892_v24  ;;  %v1338_v53 = vmul.f32 %v1322_v41, %v9007_v63  ;;  %v902_v4 = vmul.f32 %v9172_v19, %v9090_v46  ;;  %v1052_v24 = vpop.f32.mrf.mxu0 }
 0x1f0   : > { %v9195_v6 = vand.u32 2147483647, %v9168_v42  ;;  %v9198_v9 = vsub.f32 %v7300_v25, %v1998_v13  ;;  %v3276_v60 = vadd.f32 %v8663_v12, %v3209_v1  ;;  %v1996_v2 = vmul.f32 %v7647_v15, %v1879_v54 }
 0x1f1   : > { %v5262_v57 = vmul.f32 %v8999_v55, %v4942_v14  ;;  %v1354_v0 = vadd.f32 -0.28449672, %v1338_v53  ;;  %v2163_v21 = vsel %vm1565_vm0, %v2089_v45, 0.0  ;;  %v882_v34 = vmul.f32 %v9185_v44, %v9118_v50 }
 0x1f2   : > { %13784 = vst [vmem:[#allocation13_spill] sm:$0xff] %v9198_v9  ;;  %v4052_v22 = vmul.f32 0.3275911, %v3988_v40  ;;  %v9208_v25 = vadd.f32 %v8799_v5, %v3587_v20  ;;  %6645 = vmatmul.msk.f32.gmra.mxu2 %vm1565_vm0, %v3276_v60  ;;  %2164 = vadd.xlane.f32.xlu2 %v2163_v21  ;;  %v2830_v12 = vmul.f32 %v9163_v48, %v2829_v38  ;;  %v5012_v55 = vsub.f32 0.0, %v3988_v40  ;;  %v7301_v20 = vld [vmem:[%s7480_s28 + $0x140] sm:$0xff] }
 0x1f3   : > { %v5326_v13 = vsub.f32 1.0, %v5262_v57  ;;  %v1370_v54 = vmul.f32 %v1354_v0, %v9007_v63  ;;  %v9213_v45 = vpop.eup %6910  ;;  %6912 = vpow2.f32 %v1452_v17  ;;  %v903_v1 = vmul.f32 %v9172_v19, %v902_v4 }
 0x1f4   : > { %v1180_v14 = vmul.f32 0.3275911, %v9195_v6  ;;  %v9218_v53 = vadd.f32 %v8818_v32, %v1052_v24  ;;  %v9221_v41 = vsub.f32 %v7301_v20, %v1996_v2  ;;  %v2126_v57 = vmul.f32 %v9198_v9, %v9198_v9 }
 0x1f5   : > { %v5390_v60 = vmul.f32 %v5326_v13, %v8924_v37  ;;  %v1386_v38 = vadd.f32 0.2548296, %v1370_v54  ;;  %vm2834_vm15 = vweird.f32 %v9078_v26  ;;  %vm2835_vm2 = vweird.f32 %v9163_v48 }
 0x1f6   : > { %13785 = vst [vmem:[#allocation29_spill] sm:$0xff] %v9221_v41  ;;  %v883_v0 = vmul.f32 %v9185_v44, %v882_v34  ;;  %v9232_v17 = vsel %vm3860_vm14, 1.0, %v13766_v61  ;;  %v9234_v4 = vadd.f32 1.0, %v4052_v22  ;;  %v9238_v37 = vmul.f32 %v9208_v25, %v8807_v27  ;;  %vm9293_vm8 = vmor %vm2834_vm15, %vm2835_vm2 }
 0x1f7   : > { %13786 = vst [vmem:[#allocation30_spill] sm:$0xff] %v9232_v17  ;;  %v2831_v2 = vmul.f32 0.5, %v2830_v12  ;;  %vm907_vm3 = vweird.f32 %v9090_v46  ;;  %v5076_v24 = vmul.f32 %v5012_v55, %v3988_v40  ;;  %v5454_v21 = vadd.f32 1.0, %v5390_v60 }
 0x1f8   : > { %v1402_v13 = vmul.f32 %v1386_v38, %v9007_v63  ;;  %v904_v34 = vmul.f32 0.5, %v903_v1  ;;  %v1420_v54 = vsub.f32 0.0, %v9195_v6  ;;  %v9245_v52 = vmul.f32 %v8807_v27, %v9218_v53 }
 0x1f9   : > { %v2274_v22 = vsel %vm1565_vm0, %v2126_v57, 0.0  ;;  %v9248_v20 = vadd.f32 1.0, %v1180_v14  ;;  %v5518_v12 = vmul.f32 %v5454_v21, %v8916_v30  ;;  %v2124_v40 = vmul.f32 %v9221_v41, %v9221_v41  ;;  %v9254_v63 = vpop.eup %6912  ;;  %v1728_v14 = vld [vmem:[%s7480_s28 + $0x188] sm:$0xff] }
 0x1fa   : > { %v1482_v9 = vmul.f32 %v9005_v56, %v1402_v13  ;;  %2275 = vadd.xlane.f32.xlu0 %v2274_v22  ;;  %13787 = vst [vmem:[#allocation31_spill] sm:$0xff] %v9254_v63  ;;  %v884_v55 = vmul.f32 0.5, %v883_v0  ;;  %6914 = vrcp.f32 %v9234_v4  ;;  %v9258_v1 = vand.u32 2147483647, %v9238_v37  ;;  %v2150_v13 = vpop.xlane.xlu0 %2149 }
 0x1fb   : > { %v4431_v60 = vmul.f32 1.0614054, %v9017_v58  ;;  %v1227_v30 = vmul.f32 %v9213_v45, %v9149_v33  ;;  %vm1132_vm4 = vcmp.ge.f32.partialorder %v9168_v42, 0.0  ;;  %6691 = vmatmul.msk.f32.vlgmr.msra.gmra.mxu3 %vm577_vm1, %v5518_v12  ;;  %v2268_v38 = vsel %vm1565_vm0, %v2124_v40, 0.0 }
 0x1fc   : > { %v1498_v56 = vsub.f32 1.0, %v1482_v9  ;;  %v2832_v57 = vsub.f32 1.5, %v2831_v2  ;;  %v905_v0 = vsub.f32 1.5, %v904_v34  ;;  %vm887_vm5 = vweird.f32 %v9118_v50  ;;  %2269 = vadd.xlane.f32.xlu1 %v2268_v38 }
 0x1fd   : > { %v9269_v21 = vand.u32 2147483647, %v9245_v52  ;;  %v4495_v22 = vadd.f32 -1.4531521, %v4431_v60  ;;  %6916 = vrcp.f32 %v9248_v20  ;;  %v1436_v33 = vmul.f32 %v1420_v54, %v9195_v6 }
 0x1fe   : > { %v1514_v41 = vmul.f32 %v1498_v56, %v8948_v23  ;;  %v1904_v9 = vsel %vm1565_vm0, %v1728_v14, 0.0  ;;  %vm908_vm6 = vweird.f32 %v9172_v19  ;;  %v885_v2 = vsub.f32 1.5, %v884_v55  ;;  %v2261_v14 = vpop.xlane.xlu1 %2260 }
 0x1ff   : > { %v5162_v34 = vmul.f32 1.442695, %v5076_v24  ;;  %v4053_v12 = vmul.f32 0.3275911, %v9258_v1  ;;  %1905 = vadd.xlane.f32.xlu2 %v1904_v9  ;;  %v1243_v40 = vsub.f32 2.0, %v1227_v30  ;;  %v2340_v38 = vmul.f32 %v2150_v13, %v7647_v15  ;;  %vm9305_vm9 = vmor %vm907_vm3, %vm908_vm6 }
 0x200   : > { %v1530_v17 = vadd.f32 1.0, %v1514_v41  ;;  %v4559_v60 = vmul.f32 %v4495_v22, %v9017_v58  ;;  %v6915_v63 = vpop.eup %6914  ;;  %v13788_v6 = vsub.f32 2.0, %v9176_v39  ;;  %v9285_v54 = vmul.f32 %v9163_v48, %v2832_v57 }
 0x201   : > { %vm888_vm7 = vweird.f32 %v9185_v44  ;;  %v1181_v24 = vmul.f32 0.3275911, %v9269_v21  ;;  %v9298_v39 = vmul.f32 %v9172_v19, %v905_v0  ;;  %v9310_v26 = vmul.f32 %v9185_v44, %v885_v2 }
 0x202   : > { %v9282_v23 = vmul.f32 %v9144_v8, %v13788_v6  ;;  %v1454_v8 = vmul.f32 1.442695, %v1436_v33  ;;  %v1546_v55 = vmul.f32 %v1530_v17, %v8927_v36  ;;  %v4623_v30 = vadd.f32 1.4214138, %v4559_v60  ;;  %v2255_v17 = vpop.xlane.xlu2 %2254  ;;  %vm9343_vm10 = vmor %vm887_vm5, %vm888_vm7  ;;  %v3590_v6 = vpop.f32.mrf.mxu2 }
 0x203   : > { %6918 = vpow2.f32 %v5162_v34  ;;  %v9315_v57 = vsel %vm1132_vm4, 1.0, %v13766_v61  ;;  %v9317_v36 = vadd.f32 1.0, %v4053_v12  ;;  %v6917_v0 = vpop.eup %6916  ;;  %v9320_v13 = vmul.f32 %v9213_v45, %v1243_v40 }
 0x204   : > { %13793 = vst [vmem:[#allocation32_spill] sm:$0xff] %v9315_v57  ;;  %v4244_v46 = vmul.f32 %v6915_v63, %v9234_v4  ;;  %6595 = vmatmul.msk.f32.vlgmr.msra.gmra.mxu1 %vm1565_vm0, %v1546_v55  ;;  %v9324_v22 = vadd.f32 1e-05, %v2340_v38  ;;  %v4687_v33 = vmul.f32 %v4623_v30, %v9017_v58  ;;  %v5013_v9 = vsub.f32 0.0, %v9258_v1  ;;  %v1055_v30 = vpop.f32.mrf.mxu0 }
 0x205   : > { %v9332_v2 = vadd.f32 1.0, %v1181_v24  ;;  %v2377_v45 = vmul.f32 %v2261_v14, %v7647_v15  ;;  %6920 = vpow2.f32 %v1454_v8  ;;  %v2375_v12 = vmul.f32 %v2255_v17, %v7647_v15  ;;  %v1891_v24 = vpop.xlane.xlu0 %1890  ;;  %v1690_v17 = vld [vmem:[%s7480_s28 + $0x58] sm:$0xff] }
 0x206   : > { %v4751_v40 = vadd.f32 -0.28449672, %v4687_v33  ;;  %v890_v38 = vsel %vm9343_vm10, %v9185_v44, %v9310_v26  ;;  %v1228_v60 = vmul.f32 %v6917_v0, %v9248_v20  ;;  %6922 = vrcp.f32 %v9317_v36 }
 0x207   : > { %v1421_v50 = vsub.f32 0.0, %v9269_v21  ;;  %v4308_v55 = vsub.f32 2.0, %v4244_v46  ;;  %v9356_v8 = vmul.f32 0.5, %v9208_v25  ;;  %6924 = vrsqrt.f32 %v9324_v22  ;;  %v1688_v46 = vld [vmem:[%s7480_s28 + $0x48] sm:$0xff] }
 0x208   : > { %v4815_v14 = vmul.f32 %v4751_v40, %v9017_v58  ;;  %vm3861_vm12 = vcmp.ge.f32.partialorder %v9238_v37, 0.0  ;;  %v5077_v20 = vmul.f32 %v5013_v9, %v9258_v1  ;;  %6926 = vrcp.f32 %v9332_v2 }
 0x209   : > { %13796 = vst [vmem:[#allocation33_spill] sm:$0xff] %v9356_v8  ;;  %v9361_v44 = vpop.eup %6918  ;;  %v9366_v26 = vadd.f32 1e-05, %v2377_v45  ;;  %v9369_v33 = vadd.f32 1e-05, %v2375_v12  ;;  %v9372_v34 = vadd.f32 %v8799_v5, %v3590_v6  ;;  %v2000_v40 = vmul.f32 %v7647_v15, %v1891_v24  ;;  %v7304_v8 = vld [vmem:[%s7480_s28 + $0x30] sm:$0xff] }
 0x20a   : > { %13797 = vst [vmem:[#allocation34_spill] sm:$0xff] %v9361_v44  ;;  %v4879_v25 = vadd.f32 0.2548296, %v4815_v14  ;;  %v1244_v42 = vsub.f32 2.0, %v1228_v60  ;;  %v1437_v4 = vmul.f32 %v1421_v50, %v9269_v21  ;;  %v9377_v37 = vadd.f32 %v8818_v32, %v1055_v30  ;;  %v7302_v30 = vld [vmem:[%s7480_s28 + $0x160] sm:$0xff] }
 0x20b   : > { %v1790_v1 = vsel %vm1565_vm0, %v1690_v17, 0.0  ;;  %v9380_v9 = vpop.eup %6920  ;;  %v9382_v45 = vmul.f32 %v6915_v63, %v4308_v55  ;;  %v9385_v12 = vsel %vm3861_vm12, 1.0, %v13766_v61  ;;  %v1784_v60 = vsel %vm1565_vm0, %v1688_v46, 0.0  ;;  %v1777_v63 = vpop.xlane.xlu1 %1776 }
 0x20c   : > { %13798 = vst [vmem:[#allocation35_spill] sm:$0xff] %v9380_v9  ;;  %v4943_v6 = vmul.f32 %v4879_v25, %v9017_v58  ;;  %1791 = vadd.xlane.f32.xlu0 %v1790_v1  ;;  %v9389_v24 = vpop.eup %6922  ;;  %v5164_v21 = vmul.f32 1.442695, %v5077_v20  ;;  %v9392_v50 = vmul.f32 0.5, %v9218_v53  ;;  %vm1133_vm13 = vcmp.ge.f32.partialorder %v9245_v52, 0.0  ;;  %1785 = vadd.xlane.f32.xlu1 %v1784_v60 }
 0x20d   : > { %13799 = vst [vmem:[#allocation36_spill] sm:$0xff] %v9385_v12  ;;  %6928 = vrsqrt.f32 %v9366_v26  ;;  %v9396_v55 = vpop.eup %6924  ;;  %v9402_v14 = vmul.f32 %v9372_v34, %v8807_v27  ;;  %v9405_v17 = vsub.f32 %v7302_v30, %v2000_v40  ;;  %v9409_v52 = vmul.f32 %v6917_v0, %v1244_v42 }
 0x20e   : > { %13800 = vst [vmem:[#allocation37_spill] sm:$0xff] %v9392_v50  ;;  %6930 = vrsqrt.f32 %v9369_v33  ;;  %v5263_v58 = vmul.f32 %v9040_v43, %v4943_v6  ;;  %v9407_v53 = vpop.eup %6926  ;;  %v1456_v20 = vmul.f32 1.442695, %v1437_v4  ;;  %v9413_v46 = vmul.f32 %v8807_v27, %v9377_v37  ;;  %v1771_v50 = vpop.xlane.xlu2 %1770 }
 0x20f   : > { %13801 = vst [vmem:[#allocation38_spill] sm:$0xff] %v9405_v17  ;;  %v4432_v25 = vmul.f32 1.0614054, %v9060_v7  ;;  %v9417_v43 = vsel %vm1133_vm13, 1.0, %v13766_v61  ;;  %v1962_v6 = vmul.f32 %v7647_v15, %v1777_v63  ;;  %v933_v40 = vmul.f32 %v890_v38, %v8278_v31  ;;  %v9432_v63 = vld [vmem:[%s13592_s2] ss:$0 sm:$0xff] }
 0x210   : > { %13802 = vst [vmem:[#allocation39_spill] sm:$0xff] %v9417_v43  ;;  %v5327_v1 = vsub.f32 1.0, %v5263_v58  ;;  %v4245_v60 = vmul.f32 %v9389_v24, %v9317_v36  ;;  %6932 = vpow2.f32 %v5164_v21  ;;  %v2469_v0 = vmul.f32 %v9396_v55, %v9324_v22 }
 0x211   : > { %v4496_v42 = vadd.f32 -1.4531521, %v4432_v25  ;;  %v9427_v30 = vand.u32 2147483647, %v9402_v14  ;;  %v952_v31 = vmul.f32 %v9432_v63, %v933_v40  ;;  %v2128_v36 = vmul.f32 %v9405_v17, %v9405_v17  ;;  %v9453_v40 = vld [vmem:[%s13593_s3] ss:$0 sm:$0xff] }
 0x212   : > { %v5391_v4 = vmul.f32 %v5327_v1, %v8993_v28  ;;  %v1229_v21 = vmul.f32 %v9407_v53, %v9332_v2  ;;  %6934 = vpow2.f32 %v1456_v20  ;;  %v9442_v28 = vand.u32 2147483647, %v9413_v46  ;;  %v3593_v2 = vpop.f32.mrf.mxu2 }
 0x213   : > { %v9437_v38 = vpop.eup %6928  ;;  %v4560_v58 = vmul.f32 %v4496_v42, %v9060_v7  ;;  %v9448_v43 = vsub.f32 %v7304_v8, %v1962_v6  ;;  %v971_v17 = vadd.f32 %v9453_v40, %v952_v31  ;;  %v2280_v20 = vsel %vm1565_vm0, %v2128_v36, 0.0 }
 0x214   : > { %v9445_v25 = vpop.eup %6930  ;;  %v5455_v1 = vadd.f32 1.0, %v5391_v4  ;;  %v4309_v12 = vsub.f32 2.0, %v4245_v60  ;;  %v2470_v57 = vmul.f32 %v9396_v55, %v2469_v0  ;;  %v1960_v42 = vmul.f32 %v7647_v15, %v1771_v50  ;;  %v1058_v4 = vpop.f32.mrf.mxu0  ;;  %2281 = vadd.xlane.f32.xlu2 %v2280_v20 }
 0x215   : > { %13803 = vst [vmem:[#allocation40_spill] sm:$0xff] %v9448_v43  ;;  %v4624_v9 = vadd.f32 1.4214138, %v4560_v58  ;;  %v2839_v8 = vmul.f32 %v9437_v38, %v9366_v26  ;;  %v9463_v44 = vmul.f32 0.5, %v9372_v34  ;;  %v4054_v31 = vmul.f32 0.3275911, %v9427_v30  ;;  %6591 = vmatmul.msk.f32.gmra.mxu0 %vm577_vm1, %v971_v17 }
 0x216   : > { %v5519_v6 = vmul.f32 %v5455_v1, %v8957_v10  ;;  %v9467_v60 = vpop.eup %6932  ;;  %v2819_v50 = vmul.f32 %v9445_v25, %v9369_v33  ;;  %vm3862_vm14 = vcmp.ge.f32.partialorder %v9402_v14, 0.0  ;;  %v9474_v36 = vadd.f32 %v8799_v5, %v3593_v2 }
 0x217   : > { %13804 = vst [vmem:[#allocation41_spill] sm:$0xff] %v9463_v44  ;;  %v4688_v0 = vmul.f32 %v4624_v9, %v9060_v7  ;;  %v1245_v10 = vsub.f32 2.0, %v1229_v21  ;;  %vm2474_vm15 = vweird.f32 %v9324_v22  ;;  %vm2475_vm2 = vweird.f32 %v9396_v55  ;;  %v7306_v21 = vld [vmem:[%s7480_s28 + $0x20] sm:$0xff] }
 0x218   : > { %13805 = vst [vmem:[#allocation42_spill] sm:$0xff] %v9467_v60  ;;  %6692 = vmatmul.msk.f32.gmra.mxu3 %vm577_vm1, %v5519_v6  ;;  %v1182_v34 = vmul.f32 0.3275911, %v9442_v28  ;;  %v9481_v17 = vadd.f32 %v8818_v32, %v1058_v4  ;;  %v2090_v58 = vmul.f32 %v9448_v43, %v9448_v43  ;;  %v9485_v1 = vpop.eup %6934  ;;  %v9488_v5 = vmul.f32 %v9389_v24, %v4309_v12  ;;  %v2267_v43 = vpop.xlane.xlu0 %2266  ;;  %v13816_v22 = vld [vmem:[#allocation10_spill] sm:$0xff]  ;;  %v13820_v60 = vld [vmem:[#allocation5_spill] sm:$0xff] }
 0x219   : > { %13806 = vst [vmem:[#allocation43_spill] sm:$0xff] %v9485_v1  ;;  %v2471_v9 = vmul.f32 0.5, %v2470_v57  ;;  %v9491_v2 = vsub.f32 %v7306_v21, %v1960_v42  ;;  %v4752_v20 = vadd.f32 -0.28449672, %v4688_v0  ;;  %v2840_v6 = vmul.f32 %v9437_v38, %v2839_v8 }
 0x21a   : > { %v9494_v44 = vadd.f32 1.0, %v4054_v31  ;;  %v5014_v32 = vsub.f32 0.0, %v9427_v30  ;;  %v9498_v4 = vmul.f32 0.5, %v9377_v37  ;;  %v2820_v1 = vmul.f32 %v9445_v25, %v2819_v50 }
 0x21b   : > { %13807 = vst [vmem:[#allocation44_spill] sm:$0xff] %v9491_v2  ;;  %v9504_v57 = vsel %vm3862_vm14, 1.0, %v13766_v61  ;;  %v4816_v12 = vmul.f32 %v4752_v20, %v9060_v7  ;;  %v9509_v24 = vmul.f32 %v9474_v36, %v8807_v27  ;;  %v9512_v42 = vmul.f32 %v9407_v53, %v1245_v10 }
 0x21c   : > { %13808 = vst [vmem:[#allocation45_spill] sm:$0xff] %v9498_v4  ;;  %vm2844_vm3 = vweird.f32 %v9366_v26  ;;  %vm2845_vm4 = vweird.f32 %v9437_v38  ;;  %v1198_v37 = vadd.f32 1.0, %v1182_v34  ;;  %v9518_v8 = vmul.f32 %v8807_v27, %v9481_v17  ;;  %v13819_v26 = vld [vmem:[#allocation18_spill] sm:$0xff] }
 0x21d   : > { %13809 = vst [vmem:[#allocation46_spill] sm:$0xff] %v9504_v57  ;;  %v2166_v14 = vsel %vm1565_vm0, %v2090_v58, 0.0  ;;  %v2472_v31 = vsub.f32 1.5, %v2471_v9  ;;  %v4880_v50 = vadd.f32 0.2548296, %v4816_v12  ;;  %v2379_v0 = vmul.f32 %v2267_v43, %v7647_v15  ;;  %vm9577_vm10 = vmor %vm2844_vm3, %vm2845_vm4 }
 0x21e   : > { %13810 = vst [vmem:[#allocation47_spill] sm:$0xff] %v9512_v42  ;;  %2167 = vadd.xlane.f32.xlu0 %v2166_v14  ;;  %v2088_v53 = vmul.f32 %v9491_v2, %v9491_v2  ;;  %v2841_v10 = vmul.f32 0.5, %v2840_v6  ;;  %6936 = vrcp.f32 %v9494_v44  ;;  %v5078_v21 = vmul.f32 %v5014_v32, %v9427_v30  ;;  %v13811_v6 = vld [vmem:[#allocation12_spill] sm:$0xff] }
 0x21f   : > { %v4433_v34 = vmul.f32 1.0614054, %v9093_v16  ;;  %v2821_v20 = vmul.f32 0.5, %v2820_v1  ;;  %v4944_v4 = vmul.f32 %v4880_v50, %v9060_v7  ;;  %v3991_v58 = vand.u32 2147483647, %v9509_v24 }
 0x220   : > { %v2160_v9 = vsel %vm1565_vm0, %v2088_v53, 0.0  ;;  %6938 = vrcp.f32 %v1198_v37  ;;  %v9531_v43 = vand.u32 2147483647, %v9518_v8  ;;  %v13812_v30 = vsel %vm9099_vm11, %v8954_v59, %v9084_v47  ;;  %v2153_v53 = vpop.xlane.xlu1 %2152  ;;  %vm9552_vm11 = vmor %vm2474_vm15, %vm2475_vm2 }
 0x221   : > { %2161 = vadd.xlane.f32.xlu1 %v2160_v9  ;;  %v4497_v12 = vadd.f32 -1.4531521, %v4433_v34  ;;  %v934_v32 = vmul.f32 %v13812_v30, %v13811_v6  ;;  %v2473_v1 = vmul.f32 %v9396_v55, %v2472_v31  ;;  %vm2825_vm5 = vweird.f32 %v9445_v25 }
 0x222   : > { %v5264_v7 = vmul.f32 %v9058_v29, %v4944_v4  ;;  %v9542_v14 = vadd.f32 1e-05, %v2379_v0  ;;  %v2842_v50 = vsub.f32 1.5, %v2841_v10  ;;  %vm2824_vm6 = vweird.f32 %v9369_v33 }
 0x223   : > { %vm1134_vm7 = vcmp.ge.f32.partialorder %v9413_v46, 0.0  ;;  %v4561_v3 = vmul.f32 %v4497_v12, %v9093_v16  ;;  %v953_v34 = vmul.f32 %v9432_v63, %v934_v32  ;;  %v5166_v29 = vmul.f32 1.442695, %v5078_v21  ;;  %v728_v32 = vpop.xlane.xlu2 %727  ;;  %vm9608_vm12 = vmor %vm2824_vm6, %vm2825_vm5 }
 0x224   : > { %v1422_v47 = vsub.f32 0.0, %v9442_v28  ;;  %v5328_v4 = vsub.f32 1.0, %v5264_v7  ;;  %v4055_v31 = vmul.f32 0.3275911, %v3991_v58  ;;  %v6937_v0 = vpop.eup %6936  ;;  %v2822_v46 = vsub.f32 1.5, %v2821_v20 }
 0x225   : > { %v1183_v10 = vmul.f32 0.3275911, %v9531_v43  ;;  %v4625_v9 = vadd.f32 1.4214138, %v4561_v3  ;;  %v972_v12 = vadd.f32 %v9453_v40, %v953_v34  ;;  %v9560_v6 = vsel %vm1134_vm7, 1.0, %v13766_v61 }
 0x226   : > { %13815 = vst [vmem:[#allocation12_spill] sm:$0xff] %v9560_v6  ;;  %v5392_v30 = vmul.f32 %v5328_v4, %v13816_v22  ;;  %6940 = vrsqrt.f32 %v9542_v14  ;;  %v2341_v21 = vmul.f32 %v2153_v53, %v7647_v15  ;;  %v6939_v2 = vpop.eup %6938  ;;  %v2477_v20 = vsel %vm9552_vm11, %v9396_v55, %v2473_v1 }
 0x227   : > { %v9569_v7 = vmul.f32 %v9437_v38, %v2842_v50  ;;  %v5015_v3 = vsub.f32 0.0, %v3991_v58  ;;  %v4689_v34 = vmul.f32 %v4625_v9, %v9093_v16  ;;  %6592 = vmatmul.msk.f32.gmra.mxu0 %vm577_vm1, %v972_v12  ;;  %v4246_v4 = vmul.f32 %v6937_v0, %v9494_v44 }
 0x228   : > { %v1438_v55 = vmul.f32 %v1422_v47, %v9442_v28  ;;  %v5456_v1 = vadd.f32 1.0, %v5392_v30  ;;  %v9583_v50 = vadd.f32 1.0, %v4055_v31  ;;  %v9586_v59 = vmul.f32 %v9445_v25, %v2822_v46  ;;  %v3596_v46 = vpop.f32.mrf.mxu2 }
 0x229   : > { %v9588_v9 = vadd.f32 1.0, %v1183_v10  ;;  %v744_v12 = vmul.f32 %v728_v32, %v7666_v51  ;;  %v4753_v22 = vadd.f32 -0.28449672, %v4689_v34  ;;  %v9592_v6 = vmul.f32 %v2477_v20, %v13819_v26  ;;  %v1061_v26 = vpop.f32.mrf.mxu0 }
 0x22a   : > { %v1230_v57 = vmul.f32 %v6939_v2, %v1198_v37  ;;  %v5520_v42 = vmul.f32 %v5456_v1, %v13820_v60  ;;  %v9595_v44 = vadd.f32 1e-05, %v2341_v21  ;;  %6942 = vpow2.f32 %v5166_v29  ;;  %v1729_v1 = vld [vmem:[%s7480_s28 + $0x190] sm:$0xff] }
 0x22b   : > { %v5079_v47 = vmul.f32 %v5015_v3, %v3991_v58  ;;  %v4817_v31 = vmul.f32 %v4753_v22, %v9093_v16  ;;  %v4310_v37 = vsub.f32 2.0, %v4246_v4  ;;  %v1458_v10 = vmul.f32 1.442695, %v1438_v55 }
 0x22c   : > { %v9602_v51 = vpop.eup %6940  ;;  %6693 = vmatmul.msk.f32.gmra.mxu3 %vm577_vm1, %v5520_v42  ;;  %6944 = vrcp.f32 %v9583_v50  ;;  %v1423_v58 = vsub.f32 0.0, %v9531_v43  ;;  %v2827_v29 = vsel %vm9608_vm12, %v9445_v25, %v9586_v59  ;;  %v9620_v33 = vadd.f32 1e-05, %v744_v12  ;;  %v9627_v42 = vld [vmem:[%s13601_s11] ss:$0 sm:$0xff]  ;;  %v1692_v25 = vld [vmem:[%s7480_s28 + $0x68] sm:$0xff] }
 0x22d   : > { %6946 = vrcp.f32 %v9588_v9  ;;  %v4881_v30 = vadd.f32 0.2548296, %v4817_v31  ;;  %v1246_v21 = vsub.f32 2.0, %v1230_v57  ;;  %vm3863_vm13 = vcmp.ge.f32.partialorder %v9509_v24, 0.0 }
 0x22e   : > { %6948 = vrsqrt.f32 %v9595_v44  ;;  %v9630_v32 = vadd.f32 %v9627_v42, %v3596_v46  ;;  %v5168_v20 = vmul.f32 1.442695, %v5079_v47  ;;  %vm1135_vm14 = vcmp.ge.f32.partialorder %v9518_v8, 0.0  ;;  %v1727_v47 = vld [vmem:[%s7480_s28 + $0x180] sm:$0xff]  ;;  %v1894_v46 = vpop.xlane.xlu1 %1893 }
 0x22f   : > { %v2859_v57 = vmul.f32 %v9602_v51, %v9542_v14  ;;  %v4945_v3 = vmul.f32 %v4881_v30, %v9093_v16  ;;  %v9637_v34 = vmul.f32 %v6937_v0, %v4310_v37  ;;  %6950 = vpow2.f32 %v1458_v10  ;;  %v1783_v0 = vpop.xlane.xlu0 %1782  ;;  %v9680_v8 = vld [vmem:[%s13595_s5] ss:$0 sm:$0xff] }
 0x230   : > { %v9640_v4 = vmul.f32 0.5, %v9474_v36  ;;  %v1439_v55 = vmul.f32 %v1423_v58, %v9531_v43  ;;  %v9644_v59 = vpop.eup %6942  ;;  %v9647_v12 = vmul.f32 0.5, %v9481_v17  ;;  %6952 = vrsqrt.f32 %v9620_v33 }
 0x231   : > { %v5265_v22 = vmul.f32 %v9081_v62, %v4945_v3  ;;  %v1796_v16 = vsel %vm1565_vm0, %v1692_v25, 0.0  ;;  %v9655_v36 = vmul.f32 %v6939_v2, %v1246_v21  ;;  %v9660_v43 = vsel %vm3863_vm13, 1.0, %v13766_v61 }
 0x232   : > { %13823 = vst [vmem:[#allocation10_spill] sm:$0xff] %v9640_v4  ;;  %v9653_v31 = vpop.eup %6944  ;;  %v9665_v17 = vsel %vm1135_vm14, 1.0, %v13766_v61  ;;  %v9669_v62 = vmul.f32 %v9630_v32, %v8807_v27  ;;  %1797 = vadd.xlane.f32.xlu2 %v1796_v16  ;;  %6954 = vpow2.f32 %v5168_v20  ;;  %v2860_v2 = vmul.f32 %v9602_v51, %v2859_v57  ;;  %v13827_v57 = vld [vmem:[#allocation8_spill] sm:$0xff]  ;;  %v7309_v4 = vld [vmem:[%s7480_s28 + $0x40] sm:$0xff] }
 0x233   : > { %13824 = vst [vmem:[#allocation18_spill] sm:$0xff] %v9647_v12  ;;  %v9671_v60 = vpop.eup %6946  ;;  %v5329_v37 = vsub.f32 1.0, %v5265_v22  ;;  %v1907_v24 = vsel %vm1565_vm0, %v1729_v1, 0.0  ;;  %v1460_v58 = vmul.f32 1.442695, %v1439_v55  ;;  %v9683_v30 = vadd.f32 %v9680_v8, %v1061_v26 }
 0x234   : > { %13825 = vst [vmem:[#allocation5_spill] sm:$0xff] %v9660_v43  ;;  %v9675_v10 = vpop.eup %6948  ;;  %v1964_v21 = vmul.f32 %v7647_v15, %v1783_v0  ;;  %1908 = vadd.xlane.f32.xlu0 %v1907_v24  ;;  %v1901_v25 = vsel %vm1565_vm0, %v1727_v47, 0.0  ;;  %v4247_v20 = vmul.f32 %v9653_v31, %v9583_v50  ;;  %v2001_v55 = vmul.f32 %v7647_v15, %v1894_v46  ;;  %v1888_v0 = vpop.xlane.xlu2 %1887  ;;  %v13828_v47 = vld [vmem:[#allocation17_spill] sm:$0xff] }
 0x235   : > { %13826 = vst [vmem:[#allocation48_spill] sm:$0xff] %v9665_v17  ;;  %v5393_v3 = vmul.f32 %v5329_v37, %v13827_v57  ;;  %1902 = vadd.xlane.f32.xlu1 %v1901_v25  ;;  %v4434_v1 = vmul.f32 1.0614054, %v9156_v35  ;;  %v9692_v22 = vpop.eup %6950  ;;  %v9696_v26 = vmul.f32 %v9671_v60, %v9588_v9  ;;  %v9699_v16 = vand.u32 2147483647, %v9669_v62  ;;  %v13830_v37 = vld [vmem:[#allocation20_spill] sm:$0xff] }
 0x236   : > { %v13829_v50 = vsel %vm9305_vm9, %v9172_v19, %v9298_v39  ;;  %v3143_v24 = vmul.f32 %v2827_v29, %v13830_v37  ;;  %v9708_v25 = vpop.eup %6952  ;;  %v2861_v57 = vmul.f32 0.5, %v2860_v2  ;;  %vm2864_vm15 = vweird.f32 %v9542_v14  ;;  %v9724_v29 = vld [vmem:[%s13598_s8] ss:$0 sm:$0xff] }
 0x237   : > { %v935_v46 = vmul.f32 %v13829_v50, %v13828_v47  ;;  %v2479_v9 = vmul.f32 %v9675_v10, %v9595_v44  ;;  %v5457_v28 = vadd.f32 1.0, %v5393_v3  ;;  %v4498_v12 = vadd.f32 -1.4531521, %v4434_v1  ;;  %v13832_v3 = vld [vmem:[#allocation7_spill] sm:$0xff] }
 0x238   : > { %v9715_v56 = vmul.f32 %v8807_v27, %v9683_v30  ;;  %v9718_v19 = vsub.f32 %v7309_v4, %v1964_v21  ;;  %v3210_v2 = vmul.f32 %v9724_v29, %v3143_v24  ;;  %v9727_v47 = vpop.eup %6954  ;;  %v7311_v50 = vld [vmem:[%s7480_s28 + $0x168] sm:$0xff]  ;;  %v1999_v17 = vmul.f32 %v7647_v15, %v1888_v0  ;;  %v9742_v24 = vld [vmem:[%s13599_s9] ss:$0 sm:$0xff] }
 0x239   : > { %v954_v39 = vmul.f32 %v9432_v63, %v935_v46  ;;  %v5521_v1 = vmul.f32 %v5457_v28, %v13832_v3  ;;  %v9731_v37 = vsub.f32 %v7311_v50, %v2001_v55  ;;  %v4562_v4 = vmul.f32 %v4498_v12, %v9156_v35  ;;  %v7313_v50 = vld [vmem:[%s7480_s28 + $0x158] sm:$0xff] }
 0x23a   : > { %13831 = vst [vmem:[#allocation8_spill] sm:$0xff] %v9718_v19  ;;  %v912_v21 = vmul.f32 %v9708_v25, %v9620_v33  ;;  %v4056_v46 = vmul.f32 0.3275911, %v9699_v16  ;;  %v3277_v28 = vadd.f32 %v9742_v24, %v3210_v2  ;;  %v4311_v55 = vsub.f32 2.0, %v4247_v20 }
 0x23b   : > { %13833 = vst [vmem:[#allocation17_spill] sm:$0xff] %v9731_v37  ;;  %v973_v43 = vadd.f32 %v9453_v40, %v954_v39  ;;  %6956 = vpow2.f32 %v1460_v58  ;;  %v2480_v0 = vmul.f32 %v9675_v10, %v2479_v9  ;;  %6694 = vmatmul.msk.f32.gmra.mxu3 %vm577_vm1, %v5521_v1  ;;  %v4626_v12 = vadd.f32 1.4214138, %v4562_v4 }
 0x23c   : > { %v2862_v3 = vsub.f32 1.5, %v2861_v57  ;;  %vm2865_vm9 = vweird.f32 %v9602_v51  ;;  %vm3864_vm2 = vcmp.ge.f32.partialorder %v9669_v62, 0.0  ;;  %v1168_v39 = vand.u32 2147483647, %v9715_v56  ;;  %6646 = vmatmul.msk.f32.gmra.mxu2 %vm1565_vm0, %v3277_v28 }
 0x23d   : > { %6593 = vmatmul.msk.f32.gmra.mxu0 %vm577_vm1, %v973_v43  ;;  %v9753_v2 = vsub.f32 %v7313_v50, %v1999_v17  ;;  %v4690_v58 = vmul.f32 %v4626_v12, %v9156_v35  ;;  %v2092_v20 = vmul.f32 %v9718_v19, %v9718_v19  ;;  %v2129_v57 = vmul.f32 %v9731_v37, %v9731_v37  ;;  %vm9791_vm5 = vmor %vm2864_vm15, %vm2865_vm9 }
 0x23e   : > { %v1247_v9 = vsub.f32 2.0, %v9696_v26  ;;  %v913_v1 = vmul.f32 %v9708_v25, %v912_v21  ;;  %v9763_v4 = vmul.f32 0.5, %v9630_v32  ;;  %v4120_v43 = vadd.f32 1.0, %v4056_v46 }
 0x23f   : > { %13834 = vst [vmem:[#allocation20_spill] sm:$0xff] %v9753_v2  ;;  %v9766_v28 = vmul.f32 %v9653_v31, %v4311_v55  ;;  %v2481_v17 = vmul.f32 0.5, %v2480_v0  ;;  %vm2484_vm3 = vweird.f32 %v9595_v44  ;;  %v4754_v12 = vadd.f32 -0.28449672, %v4690_v58 }
 0x240   : > { %13835 = vst [vmem:[#allocation7_spill] sm:$0xff] %v9763_v4  ;;  %v2172_v50 = vsel %vm1565_vm0, %v2092_v20, 0.0  ;;  %v2863_v19 = vmul.f32 %v9602_v51, %v2862_v3  ;;  %vm2485_vm4 = vweird.f32 %v9675_v10  ;;  %v9775_v26 = vsel %vm3864_vm2, 1.0, %v13766_v61  ;;  %v3599_v20 = vpop.f32.mrf.mxu2 }
 0x241   : > { %13836 = vst [vmem:[#allocation49_spill] sm:$0xff] %v9775_v26  ;;  %v5016_v32 = vsub.f32 0.0, %v9699_v16  ;;  %2173 = vadd.xlane.f32.xlu2 %v2172_v50  ;;  %v9778_v31 = vpop.eup %6956  ;;  %v1184_v21 = vmul.f32 0.3275911, %v1168_v39  ;;  %v4818_v46 = vmul.f32 %v4754_v12, %v9156_v35  ;;  %v2283_v55 = vsel %vm1565_vm0, %v2129_v57, 0.0 }
 0x242   : > { %v2127_v0 = vmul.f32 %v9753_v2, %v9753_v2  ;;  %v9785_v3 = vmul.f32 %v9671_v60, %v1247_v9  ;;  %v914_v58 = vmul.f32 0.5, %v913_v1  ;;  %vm918_vm6 = vweird.f32 %v9708_v25  ;;  %2284 = vadd.xlane.f32.xlu0 %v2283_v55  ;;  %v1064_v1 = vpop.f32.mrf.mxu0 }
 0x243   : > { %6958 = vrcp.f32 %v4120_v43  ;;  %v4435_v57 = vmul.f32 1.0614054, %v9282_v23  ;;  %v2482_v12 = vsub.f32 1.5, %v2481_v17  ;;  %v9798_v60 = vmul.f32 0.5, %v9683_v30 }
 0x244   : > { %v4882_v9 = vadd.f32 0.2548296, %v4818_v46  ;;  %v2277_v50 = vsel %vm1565_vm0, %v2127_v0, 0.0  ;;  %vm917_vm7 = vweird.f32 %v9620_v33  ;;  %v5080_v14 = vmul.f32 %v5016_v32, %v9699_v16  ;;  %v1691_v33 = vld [vmem:[%s7480_s28 + $0x60] sm:$0xff] }
 0x245   : > { %13839 = vst [vmem:[#allocation50_spill] sm:$0xff] %v9798_v60  ;;  %v1424_v37 = vsub.f32 0.0, %v1168_v39  ;;  %2278 = vadd.xlane.f32.xlu1 %v2277_v50  ;;  %v4499_v2 = vadd.f32 -1.4531521, %v4435_v57  ;;  %v1275_v4 = vmul.f32 1.0614054, %v9320_v13  ;;  %v2867_v17 = vsel %vm9791_vm5, %v9602_v51, %v2863_v19  ;;  %vm9860_vm12 = vmor %vm917_vm7, %vm918_vm6 }
 0x246   : > { %v1200_v55 = vadd.f32 1.0, %v1184_v21  ;;  %v4946_v30 = vmul.f32 %v4882_v9, %v9156_v35  ;;  %v3600_v46 = vadd.f32 %v9627_v42, %v3599_v20  ;;  %v915_v0 = vsub.f32 1.5, %v914_v58  ;;  %v13840_v51 = vld [vmem:[#allocation16_spill] sm:$0xff]  ;;  %v13842_v9 = vld [vmem:[#allocation21_spill] sm:$0xff] }
 0x247   : > { %vm1136_vm11 = vcmp.ge.f32.partialorder %v9715_v56, 0.0  ;;  %v4563_v16 = vmul.f32 %v4499_v2, %v9282_v23  ;;  %v1291_v32 = vadd.f32 -1.4531521, %v1275_v4  ;;  %v9812_v50 = vmul.f32 %v9675_v10, %v2482_v12 }
 0x248   : > { %v5266_v57 = vmul.f32 %v9154_v49, %v4946_v30  ;;  %v9816_v60 = vadd.f32 %v9680_v8, %v1064_v1  ;;  %v13841_v35 = vsel %vm9293_vm8, %v9163_v48, %v9285_v54  ;;  %v5170_v62 = vmul.f32 1.442695, %v5080_v14  ;;  %vm9834_vm8 = vmor %vm2484_vm3, %vm2485_vm4  ;;  %v2264_v30 = vpop.xlane.xlu2 %2263 }
 0x249   : > { %v3144_v19 = vmul.f32 %v13841_v35, %v13840_v51  ;;  %v6959_v21 = vpop.eup %6958  ;;  %v1440_v58 = vmul.f32 %v1424_v37, %v1168_v39  ;;  %v4627_v2 = vadd.f32 1.4214138, %v4563_v16  ;;  %v1307_v4 = vmul.f32 %v1291_v32, %v9320_v13 }
 0x24a   : > { %6960 = vrcp.f32 %v1200_v55  ;;  %v5330_v20 = vsub.f32 1.0, %v5266_v57  ;;  %v3801_v49 = vmul.f32 %v3600_v46, %v8807_v27  ;;  %v9828_v1 = vmul.f32 %v2867_v17, %v13842_v9  ;;  %v3602_v57 = vpop.f32.mrf.mxu2 }
 0x24b   : > { %v3211_v12 = vmul.f32 %v9724_v29, %v3144_v19  ;;  %v916_v54 = vmul.f32 %v9708_v25, %v915_v0  ;;  %v4691_v41 = vmul.f32 %v4627_v2, %v9282_v23  ;;  %v1323_v37 = vadd.f32 1.4214138, %v1307_v4 }
 0x24c   : > { %v4248_v39 = vmul.f32 %v6959_v21, %v4120_v43  ;;  %v5394_v14 = vmul.f32 %v5330_v20, %v9072_v11  ;;  %v9843_v17 = vmul.f32 %v8807_v27, %v9816_v60  ;;  %v9849_v44 = vsel %vm1136_vm11, 1.0, %v13766_v61  ;;  %v1731_v20 = vld [vmem:[%s7480_s28 + $0x1a0] sm:$0xff] }
 0x24d   : > { %v3278_v16 = vadd.f32 %v9742_v24, %v3211_v12  ;;  %13845 = vst [vmem:[#allocation16_spill] sm:$0xff] %v9849_v44  ;;  %v1462_v0 = vmul.f32 1.442695, %v1440_v58  ;;  %v4755_v32 = vadd.f32 -0.28449672, %v4691_v41  ;;  %v1339_v43 = vmul.f32 %v1323_v37, %v9320_v13  ;;  %v13848_v41 = vld [vmem:[#allocation11_spill] sm:$0xff] }
 0x24e   : > { %6962 = vpow2.f32 %v5170_v62  ;;  %v5458_v51 = vadd.f32 1.0, %v5394_v14  ;;  %v3993_v35 = vand.u32 2147483647, %v3801_v49  ;;  %v920_v19 = vsel %vm9860_vm12, %v9708_v25, %v916_v54  ;;  %v13854_v44 = vld [vmem:[#allocation26_spill] sm:$0xff] }
 0x24f   : > { %6647 = vmatmul.msk.f32.gmra.mxu2 %vm1565_vm0, %v3278_v16  ;;  %v2378_v58 = vmul.f32 %v2264_v30, %v7647_v15  ;;  %v4819_v2 = vmul.f32 %v4755_v32, %v9282_v23  ;;  %v1355_v4 = vadd.f32 -0.28449672, %v1339_v43  ;;  %v4312_v9 = vsub.f32 2.0, %v4248_v39 }
 0x250   : > { %v9872_v12 = vpop.eup %6960  ;;  %v5522_v62 = vmul.f32 %v5458_v51, %v13848_v41  ;;  %v9876_v37 = vand.u32 2147483647, %v9843_v17  ;;  %v9879_v14 = vadd.f32 %v9627_v42, %v3602_v57  ;;  %6964 = vpow2.f32 %v1462_v0 }
 0x251   : > { %v9881_v25 = vmul.f32 0.5, %v3600_v46  ;;  %v4883_v54 = vadd.f32 0.2548296, %v4819_v2  ;;  %v1371_v30 = vmul.f32 %v1355_v4, %v9320_v13  ;;  %vm3865_vm13 = vcmp.ge.f32.partialorder %v3801_v49, 0.0 }
 0x252   : > { %6695 = vmatmul.msk.f32.gmra.mxu3 %vm577_vm1, %v5522_v62  ;;  %v4057_v16 = vmul.f32 0.3275911, %v3993_v35  ;;  %v1913_v39 = vsel %vm1565_vm0, %v1731_v20, 0.0  ;;  %v1793_v32 = vsel %vm1565_vm0, %v1691_v33, 0.0  ;;  %v9888_v43 = vmul.f32 %v9872_v12, %v1200_v55  ;;  %v13851_v62 = vld [vmem:[#allocation23_spill] sm:$0xff] }
 0x253   : > { %13849 = vst [vmem:[#allocation21_spill] sm:$0xff] %v9881_v25  ;;  %v9890_v56 = vadd.f32 1e-05, %v2378_v58  ;;  %v4947_v0 = vmul.f32 %v4883_v54, %v9282_v23  ;;  %v1387_v46 = vadd.f32 0.2548296, %v1371_v30  ;;  %1914 = vadd.xlane.f32.xlu2 %v1913_v39  ;;  %1794 = vadd.xlane.f32.xlu1 %v1793_v32  ;;  %v9895_v51 = vmul.f32 %v6959_v21, %v4312_v9  ;;  %v13852_v32 = vld [vmem:[#allocation31_spill] sm:$0xff] }
 0x254   : > { %v9893_v57 = vpop.eup %6962  ;;  %v1185_v2 = vmul.f32 0.3275911, %v9876_v37  ;;  %v9900_v4 = vmul.f32 %v9879_v14, %v8807_v27  ;;  %v4436_v55 = vmul.f32 1.0614054, %v9382_v45  ;;  %v5017_v20 = vsub.f32 0.0, %v3993_v35 }
 0x255   : > { %v5267_v58 = vmul.f32 %v9180_v18, %v4947_v0  ;;  %v1403_v23 = vmul.f32 %v1387_v46, %v9320_v13  ;;  %v1276_v33 = vmul.f32 1.0614054, %v9409_v52  ;;  %v9908_v41 = vsel %vm3865_vm13, 1.0, %v13766_v61  ;;  %v1067_v46 = vpop.f32.mrf.mxu0 }
 0x256   : > { %13850 = vst [vmem:[#allocation11_spill] sm:$0xff] %v9908_v41  ;;  %v9910_v21 = vadd.f32 1.0, %v4057_v16  ;;  %v4500_v9 = vadd.f32 -1.4531521, %v4436_v55  ;;  %v936_v54 = vmul.f32 %v920_v19, %v13851_v62  ;;  %v9913_v30 = vpop.eup %6964  ;;  %v1248_v39 = vsub.f32 2.0, %v9888_v43  ;;  %v13853_v19 = vld [vmem:[#allocation15_spill] sm:$0xff] }
 0x257   : > { %6966 = vrsqrt.f32 %v9890_v56  ;;  %v5331_v18 = vsub.f32 1.0, %v5267_v58  ;;  %v1483_v13 = vmul.f32 %v13852_v32, %v1403_v23  ;;  %v9918_v0 = vadd.f32 1.0, %v1185_v2  ;;  %v1780_v23 = vpop.xlane.xlu2 %1779 }
 0x258   : > { %v9921_v49 = vand.u32 2147483647, %v9900_v4  ;;  %v4564_v16 = vmul.f32 %v4500_v9, %v9382_v45  ;;  %v1292_v55 = vadd.f32 -1.4531521, %v1276_v33  ;;  %v5081_v11 = vmul.f32 %v5017_v20, %v3993_v35 }
 0x259   : > { %v5395_v62 = vmul.f32 %v5331_v18, %v13853_v19  ;;  %v1499_v25 = vsub.f32 1.0, %v1483_v13  ;;  %v955_v43 = vmul.f32 %v9432_v63, %v936_v54  ;;  %6968 = vrcp.f32 %v9910_v21  ;;  %v13855_v18 = vld [vmem:[#allocation14_spill] sm:$0xff] }
 0x25a   : > { %v1425_v58 = vsub.f32 0.0, %v9876_v37  ;;  %v4628_v2 = vadd.f32 1.4214138, %v4564_v16  ;;  %v1308_v32 = vmul.f32 %v1292_v55, %v9409_v52  ;;  %v9931_v9 = vadd.f32 %v9680_v8, %v1067_v46 }
 0x25b   : > { %v5459_v41 = vadd.f32 1.0, %v5395_v62  ;;  %v1515_v26 = vmul.f32 %v1499_v25, %v13854_v44  ;;  %v974_v35 = vadd.f32 %v9453_v40, %v955_v43  ;;  %6970 = vrcp.f32 %v9918_v0  ;;  %v13856_v44 = vld [vmem:[#allocation19_spill] sm:$0xff]  ;;  %v13858_v62 = vld [vmem:[#allocation24_spill] sm:$0xff] }
 0x25c   : > { %v4058_v63 = vmul.f32 0.3275911, %v9921_v49  ;;  %v4692_v20 = vmul.f32 %v4628_v2, %v9382_v45  ;;  %v1324_v33 = vadd.f32 1.4214138, %v1308_v32  ;;  %v1963_v55 = vmul.f32 %v7647_v15, %v1780_v23  ;;  %v1732_v2 = vld [vmem:[%s7480_s28 + $0x1a8] sm:$0xff] }
 0x25d   : > { %v9937_v54 = vpop.eup %6966  ;;  %v5523_v13 = vmul.f32 %v5459_v41, %v13855_v18  ;;  %v1531_v16 = vadd.f32 1.0, %v1515_v26  ;;  %6594 = vmatmul.msk.f32.gmra.mxu0 %vm577_vm1, %v974_v35  ;;  %v13857_v40 = vsel %vm9577_vm10, %v9437_v38, %v9569_v7  ;;  %vm1137_vm14 = vcmp.ge.f32.partialorder %v9843_v17, 0.0 }
 0x25e   : > { %v3145_v25 = vmul.f32 %v13857_v40, %v13856_v44  ;;  %v1441_v46 = vmul.f32 %v1425_v58, %v9876_v37  ;;  %v4756_v19 = vadd.f32 -0.28449672, %v4692_v20  ;;  %v1340_v26 = vmul.f32 %v1324_v33, %v9409_v52  ;;  %v7314_v20 = vld [vmem:[%s7480_s28 + $0x38] sm:$0xff] }
 0x25f   : > { %v5172_v41 = vmul.f32 1.442695, %v5081_v11  ;;  %6696 = vmatmul.msk.f32.gmra.mxu3 %vm577_vm1, %v5523_v13  ;;  %v1547_v43 = vmul.f32 %v1531_v16, %v13858_v62  ;;  %v9955_v53 = vmul.f32 %v8807_v27, %v9931_v9  ;;  %v9958_v7 = vpop.eup %6968  ;;  %v2849_v37 = vmul.f32 %v9937_v54, %v9890_v56  ;;  %v13863_v62 = vld [vmem:[#allocation34_spill] sm:$0xff] }
 0x260   : > { %v3212_v38 = vmul.f32 %v9724_v29, %v3145_v25  ;;  %v9962_v58 = vadd.f32 1.0, %v4058_v63  ;;  %v4820_v23 = vmul.f32 %v4756_v19, %v9382_v45  ;;  %v1356_v11 = vadd.f32 -0.28449672, %v1340_v26 }
 0x261   : > { %v9967_v32 = vmul.f32 %v9872_v12, %v1248_v39  ;;  %v9970_v35 = vmul.f32 0.5, %v9816_v60  ;;  %6596 = vmatmul.msk.f32.gmra.mxu1 %vm1565_vm0, %v1547_v43  ;;  %v9974_v33 = vsub.f32 %v7314_v20, %v1963_v55  ;;  %v9977_v13 = vpop.eup %6970  ;;  %v9982_v63 = vsel %vm1137_vm14, 1.0, %v13766_v61  ;;  %v3605_v60 = vpop.f32.mrf.mxu2 }
 0x262   : > { %v3279_v18 = vadd.f32 %v9742_v24, %v3212_v38  ;;  %13861 = vst [vmem:[#allocation15_spill] sm:$0xff] %v9982_v63  ;;  %v1464_v16 = vmul.f32 1.442695, %v1441_v46  ;;  %v4884_v12 = vadd.f32 0.2548296, %v4820_v23  ;;  %v1372_v39 = vmul.f32 %v1356_v11, %v9409_v52 }
 0x263   : > { %13859 = vst [vmem:[#allocation23_spill] sm:$0xff] %v9970_v35  ;;  %v9987_v44 = vmul.f32 %v9958_v7, %v9910_v21  ;;  %6972 = vpow2.f32 %v5172_v41  ;;  %v1170_v55 = vand.u32 2147483647, %v9955_v53  ;;  %v1916_v40 = vsel %vm1565_vm0, %v1732_v2, 0.0  ;;  %v13864_v2 = vld [vmem:[#allocation35_spill] sm:$0xff]  ;;  %v13868_v35 = vld [vmem:[#allocation32_spill] sm:$0xff] }
 0x264   : > { %13860 = vst [vmem:[#allocation31_spill] sm:$0xff] %v9974_v33  ;;  %6648 = vmatmul.msk.f32.gmra.mxu2 %vm1565_vm0, %v3279_v18  ;;  %v2850_v17 = vmul.f32 %v9937_v54, %v2849_v37  ;;  %6974 = vrcp.f32 %v9962_v58  ;;  %v4948_v25 = vmul.f32 %v4884_v12, %v9382_v45  ;;  %v1388_v46 = vadd.f32 0.2548296, %v1372_v39  ;;  %1917 = vadd.xlane.f32.xlu2 %v1916_v40  ;;  %v13866_v39 = vld [vmem:[#allocation47_spill] sm:$0xff]  ;;  %v13867_v40 = vld [vmem:[#allocation30_spill] sm:$0xff] }
 0x265   : > { %v9997_v19 = vmul.f32 %v9977_v13, %v9918_v0  ;;  %v10000_v21 = vmul.f32 0.5, %v9879_v14  ;;  %v10003_v26 = vadd.f32 %v9627_v42, %v3605_v60  ;;  %v2091_v41 = vmul.f32 %v9974_v33, %v9974_v33 }
 0x266   : > { %6976 = vpow2.f32 %v1464_v16  ;;  %vm3866_vm10 = vcmp.ge.f32.partialorder %v9900_v4, 0.0  ;;  %v5268_v45 = vmul.f32 %v13863_v62, %v4948_v25  ;;  %v1404_v43 = vmul.f32 %v1388_v46, %v9409_v52  ;;  %v1070_v46 = vpop.f32.mrf.mxu0 }
 0x267   : > { %13862 = vst [vmem:[#allocation26_spill] sm:$0xff] %v10000_v21  ;;  %v4313_v38 = vsub.f32 2.0, %v9987_v44  ;;  %v5018_v0 = vsub.f32 0.0, %v9921_v49  ;;  %v1186_v37 = vmul.f32 0.3275911, %v1170_v55  ;;  %v2169_v14 = vsel %vm1565_vm0, %v2091_v41, 0.0 }
 0x268   : > { %v2851_v23 = vmul.f32 0.5, %v2850_v17  ;;  %v5332_v11 = vsub.f32 1.0, %v5268_v45  ;;  %v1484_v20 = vmul.f32 %v13864_v2, %v1404_v43  ;;  %2170 = vadd.xlane.f32.xlu1 %v2169_v14  ;;  %v4437_v18 = vmul.f32 1.0614054, %v9488_v5 }
 0x269   : > { %v10015_v16 = vpop.eup %6972  ;;  %v1249_v4 = vsub.f32 2.0, %v9997_v19  ;;  %v10019_v52 = vsel %vm3866_vm10, 1.0, %v13766_v61  ;;  %v10023_v12 = vmul.f32 %v10003_v26, %v8807_v27  ;;  %v1277_v60 = vmul.f32 1.0614054, %v13866_v39 }
 0x26a   : > { %13865 = vst [vmem:[#allocation14_spill] sm:$0xff] %v10019_v52  ;;  %v6975_v44 = vpop.eup %6974  ;;  %v5396_v17 = vmul.f32 %v5332_v11, %v13867_v40  ;;  %v1500_v25 = vsub.f32 1.0, %v1484_v20  ;;  %v4501_v41 = vadd.f32 -1.4531521, %v4437_v18  ;;  %v3175_v62 = vmul.f32 %v9724_v29, %v9592_v6  ;;  %v1733_v18 = vld [vmem:[%s7480_s28 + $0x1b0] sm:$0xff]  ;;  %v2156_v52 = vpop.xlane.xlu2 %2155 }
 0x26b   : > { %vm2854_vm15 = vweird.f32 %v9890_v56  ;;  %v5082_v19 = vmul.f32 %v5018_v0, %v9921_v49  ;;  %v10031_v45 = vadd.f32 1.0, %v1186_v37  ;;  %v1426_v43 = vsub.f32 0.0, %v1170_v55  ;;  %v13869_v37 = vld [vmem:[#allocation27_spill] sm:$0xff] }
 0x26c   : > { %v1293_v14 = vadd.f32 -1.4531521, %v1277_v60  ;;  %v10033_v2 = vpop.eup %6976  ;;  %v2852_v33 = vsub.f32 1.5, %v2851_v23  ;;  %v5460_v21 = vadd.f32 1.0, %v5396_v17  ;;  %v1516_v11 = vmul.f32 %v1500_v25, %v13868_v35 }
 0x26d   : > { %v4565_v20 = vmul.f32 %v4501_v41, %v9488_v5  ;;  %v4250_v40 = vmul.f32 %v6975_v44, %v9962_v58  ;;  %v1071_v6 = vadd.f32 %v9680_v8, %v1070_v46  ;;  %v3242_v0 = vadd.f32 %v9742_v24, %v3175_v62  ;;  %v13870_v41 = vld [vmem:[#allocation28_spill] sm:$0xff] }
 0x26e   : > { %v1309_v49 = vmul.f32 %v1293_v14, %v13866_v39  ;;  %v5524_v60 = vmul.f32 %v5460_v21, %v13869_v37  ;;  %v1532_v63 = vadd.f32 1.0, %v1516_v11  ;;  %v10044_v23 = vand.u32 2147483647, %v10023_v12 }
 0x26f   : > { %v4629_v17 = vadd.f32 1.4214138, %v4565_v20  ;;  %6978 = vrcp.f32 %v10031_v45  ;;  %v1442_v35 = vmul.f32 %v1426_v43, %v1170_v55  ;;  %6611 = vmatmul.msk.f32.vlgmr.msrb.gmra.mxu0 %vm1565_vm0, %v3242_v0  ;;  %v1919_v58 = vsel %vm1565_vm0, %v1733_v18, 0.0  ;;  %v1693_v0 = vld [vmem:[%s7480_s28 + $0x70] sm:$0xff] }
 0x270   : > { %v1325_v25 = vadd.f32 1.4214138, %v1309_v49  ;;  %v5174_v46 = vmul.f32 1.442695, %v5082_v19  ;;  %6697 = vmatmul.msk.f32.gmra.mxu3 %vm577_vm1, %v5524_v60  ;;  %v1548_v62 = vmul.f32 %v1532_v63, %v13870_v41  ;;  %v2342_v21 = vmul.f32 %v2156_v52, %v7647_v15  ;;  %1920 = vadd.xlane.f32.xlu2 %v1919_v58 }
 0x271   : > { %v4693_v14 = vmul.f32 %v4629_v17, %v9488_v5  ;;  %v10054_v11 = vmul.f32 %v9937_v54, %v2852_v33  ;;  %vm2855_vm9 = vweird.f32 %v9937_v54  ;;  %v10058_v55 = vmul.f32 %v8807_v27, %v1071_v6 }
 0x272   : > { %v1341_v19 = vmul.f32 %v1325_v25, %v13866_v39  ;;  %v4314_v43 = vsub.f32 2.0, %v4250_v40  ;;  %vm1138_vm2 = vcmp.ge.f32.partialorder %v9955_v53, 0.0  ;;  %6597 = vmatmul.msk.f32.gmra.mxu1 %vm1565_vm0, %v1548_v62  ;;  %v4059_v63 = vmul.f32 0.3275911, %v10044_v23  ;;  %vm10076_vm3 = vmor %vm2854_vm15, %vm2855_vm9  ;;  %v3608_v62 = vpop.f32.mrf.mxu2 }
 0x273   : > { %v4757_v52 = vadd.f32 -0.28449672, %v4693_v14  ;;  %v10065_v20 = vmul.f32 %v9958_v7, %v4313_v38  ;;  %v10068_v33 = vmul.f32 0.5, %v9931_v9  ;;  %v1466_v18 = vmul.f32 1.442695, %v1442_v35  ;;  %v1730_v38 = vld [vmem:[%s7480_s28 + $0x198] sm:$0xff] }
 0x274   : > { %v1357_v49 = vadd.f32 -0.28449672, %v1341_v19  ;;  %v10072_v37 = vmul.f32 %v9977_v13, %v1249_v4  ;;  %6980 = vpow2.f32 %v5174_v46  ;;  %v10080_v60 = vadd.f32 1e-05, %v2342_v21 }
 0x275   : > { %v4821_v7 = vmul.f32 %v4757_v52, %v9488_v5  ;;  %v10084_v9 = vpop.eup %6978  ;;  %v2857_v13 = vsel %vm10076_vm3, %v9937_v54, %v10054_v11  ;;  %v10093_v56 = vsel %vm1138_vm2, 1.0, %v13766_v61  ;;  %v1171_v4 = vand.u32 2147483647, %v10058_v55 }
 0x276   : > { %v1373_v17 = vmul.f32 %v1357_v49, %v13866_v39  ;;  %v10097_v35 = vmul.f32 %v6975_v44, %v4314_v43  ;;  %v4123_v25 = vadd.f32 1.0, %v4059_v63  ;;  %v1799_v46 = vsel %vm1565_vm0, %v1693_v0, 0.0 }
 0x277   : > { %v4885_v58 = vadd.f32 0.2548296, %v4821_v7  ;;  %6982 = vpow2.f32 %v1466_v18  ;;  %v10101_v41 = vmul.f32 0.5, %v10003_v26  ;;  %1800 = vadd.xlane.f32.xlu0 %v1799_v46  ;;  %v1910_v53 = vsel %vm1565_vm0, %v1730_v38, 0.0  ;;  %v1073_v38 = vpop.f32.mrf.mxu0 }
 0x278   : > { %v1389_v54 = vadd.f32 0.2548296, %v1373_v17  ;;  %v10106_v21 = vmul.f32 %v10084_v9, %v10031_v45  ;;  %v5019_v44 = vsub.f32 0.0, %v10044_v23  ;;  %6984 = vrsqrt.f32 %v10080_v60  ;;  %1911 = vadd.xlane.f32.xlu1 %v1910_v53  ;;  %v13874_v45 = vld [vmem:[#allocation42_spill] sm:$0xff] }
 0x279   : > { %v4949_v14 = vmul.f32 %v4885_v58, %v9488_v5  ;;  %v10111_v11 = vmul.f32 0.5, %v1071_v6  ;;  %v1187_v26 = vmul.f32 0.3275911, %v1171_v4  ;;  %v4438_v43 = vmul.f32 1.0614054, %v9637_v34  ;;  %v13875_v5 = vld [vmem:[#allocation43_spill] sm:$0xff] }
 0x27a   : > { %v1405_v19 = vmul.f32 %v1389_v54, %v13866_v39  ;;  %v10115_v63 = vpop.eup %6980  ;;  %6986 = vrcp.f32 %v4123_v25  ;;  %v1427_v52 = vsub.f32 0.0, %v1171_v4  ;;  %v10119_v49 = vadd.f32 %v9627_v42, %v3608_v62  ;;  %v1897_v62 = vpop.xlane.xlu2 %1896 }
 0x27b   : > { %13873 = vst [vmem:[#allocation19_spill] sm:$0xff] %v10111_v11  ;;  %v5269_v18 = vmul.f32 %v13874_v45, %v4949_v14  ;;  %vm3867_vm4 = vcmp.ge.f32.partialorder %v10023_v12, 0.0  ;;  %vm1139_vm5 = vcmp.ge.f32.partialorder %v10058_v55, 0.0  ;;  %v4502_v0 = vadd.f32 -1.4531521, %v4438_v43  ;;  %v13876_v14 = vld [vmem:[#allocation22_spill] sm:$0xff] }
 0x27c   : > { %v1485_v6 = vmul.f32 %v13875_v5, %v1405_v19  ;;  %v1250_v39 = vsub.f32 2.0, %v10106_v21  ;;  %v5083_v40 = vmul.f32 %v5019_v44, %v10044_v23  ;;  %v1278_v17 = vmul.f32 1.0614054, %v9655_v36  ;;  %v13878_v43 = vld [vmem:[#allocation36_spill] sm:$0xff]  ;;  %v13879_v5 = vld [vmem:[#allocation39_spill] sm:$0xff] }
 0x27d   : > { %v5333_v7 = vsub.f32 1.0, %v5269_v18  ;;  %v10127_v58 = vpop.eup %6982  ;;  %v10129_v46 = vadd.f32 1.0, %v1187_v26  ;;  %v4566_v53 = vmul.f32 %v4502_v0, %v9637_v34  ;;  %v13877_v21 = vsel %vm9834_vm8, %v9675_v10, %v9812_v50 }
 0x27e   : > { %v1501_v54 = vsub.f32 1.0, %v1485_v6  ;;  %v3109_v19 = vmul.f32 %v13877_v21, %v13876_v14  ;;  %v10138_v23 = vpop.eup %6984  ;;  %v1443_v44 = vmul.f32 %v1427_v52, %v1171_v4  ;;  %v10143_v26 = vmul.f32 %v10119_v49, %v8807_v27  ;;  %v13880_v52 = vld [vmem:[#allocation6_spill] sm:$0xff] }
 0x27f   : > { %v5397_v45 = vmul.f32 %v5333_v7, %v13878_v43  ;;  %v1294_v18 = vadd.f32 -1.4531521, %v1278_v17  ;;  %v10147_v0 = vadd.f32 %v9680_v8, %v1073_v38  ;;  %v4630_v48 = vadd.f32 1.4214138, %v4566_v53 }
 0x280   : > { %v1517_v6 = vmul.f32 %v1501_v54, %v13879_v5  ;;  %v3176_v11 = vmul.f32 %v9724_v29, %v3109_v19  ;;  %v6987_v10 = vpop.eup %6986  ;;  %v2002_v14 = vmul.f32 %v7647_v15, %v1897_v62  ;;  %v3146_v7 = vmul.f32 %v2857_v13, %v13880_v52  ;;  %v13881_v19 = vld [vmem:[#allocation33_spill] sm:$0xff] }
 0x281   : > { %v5461_v50 = vadd.f32 1.0, %v5397_v45  ;;  %v1310_v4 = vmul.f32 %v1294_v18, %v9655_v36  ;;  %v2489_v21 = vmul.f32 %v10138_v23, %v10080_v60  ;;  %v4694_v54 = vmul.f32 %v4630_v48, %v9637_v34  ;;  %v13882_v18 = vld [vmem:[#allocation37_spill] sm:$0xff] }
 0x282   : > { %v1533_v17 = vadd.f32 1.0, %v1517_v6  ;;  %v3243_v38 = vadd.f32 %v9742_v24, %v3176_v11  ;;  %v5176_v53 = vmul.f32 1.442695, %v5083_v40  ;;  %6988 = vrcp.f32 %v10129_v46  ;;  %v7315_v40 = vld [vmem:[%s7480_s28 + $0x170] sm:$0xff] }
 0x283   : > { %v5525_v43 = vmul.f32 %v5461_v50, %v13881_v19  ;;  %v1326_v62 = vadd.f32 1.4214138, %v1310_v4  ;;  %v4251_v45 = vmul.f32 %v6987_v10, %v4123_v25  ;;  %v4758_v13 = vadd.f32 -0.28449672, %v4694_v54  ;;  %v1734_v4 = vld [vmem:[%s7480_s28 + $0x1b8] sm:$0xff] }
 0x284   : > { %v1549_v5 = vmul.f32 %v1533_v17, %v13882_v18  ;;  %6612 = vmatmul.msk.f32.gmra.mxu0 %vm1565_vm0, %v3243_v38  ;;  %v3213_v52 = vmul.f32 %v9724_v29, %v3146_v7  ;;  %v1468_v6 = vmul.f32 1.442695, %v1443_v44  ;;  %v10164_v11 = vand.u32 2147483647, %v10143_v26 }
 0x285   : > { %6698 = vmatmul.msk.f32.gmra.mxu3 %vm577_vm1, %v5525_v43  ;;  %v10167_v48 = vsub.f32 %v7315_v40, %v2002_v14  ;;  %v1342_v50 = vmul.f32 %v1326_v62, %v9655_v36  ;;  %v2490_v25 = vmul.f32 %v10138_v23, %v2489_v21  ;;  %v10175_v17 = vmul.f32 %v8807_v27, %v10147_v0 }
 0x286   : > { %6598 = vmatmul.msk.f32.gmra.mxu1 %vm1565_vm0, %v1549_v5  ;;  %v4822_v44 = vmul.f32 %v4758_v13, %v9637_v34  ;;  %v3280_v7 = vadd.f32 %v9742_v24, %v3213_v52  ;;  %v10180_v54 = vmul.f32 %v10084_v9, %v1250_v39  ;;  %v10185_v14 = vsel %vm3867_vm4, 1.0, %v13766_v61 }
 0x287   : > { %13883 = vst [vmem:[#allocation24_spill] sm:$0xff] %v10167_v48  ;;  %v10190_v21 = vsel %vm1139_vm5, 1.0, %v13766_v61  ;;  %v1358_v38 = vadd.f32 -0.28449672, %v1342_v50  ;;  %v4315_v19 = vsub.f32 2.0, %v4251_v45  ;;  %6990 = vpow2.f32 %v5176_v53 }
 0x288   : > { %v4886_v43 = vadd.f32 0.2548296, %v4822_v44  ;;  %6649 = vmatmul.msk.f32.gmra.mxu2 %vm1565_vm0, %v3280_v7  ;;  %v1922_v62 = vsel %vm1565_vm0, %v1734_v4, 0.0  ;;  %v10194_v9 = vpop.eup %6988  ;;  %6992 = vpow2.f32 %v1468_v6  ;;  %v4060_v12 = vmul.f32 0.3275911, %v10164_v11  ;;  %v3611_v44 = vpop.f32.mrf.mxu2 }
 0x289   : > { %v1374_v39 = vmul.f32 %v1358_v38, %v9655_v36  ;;  %1923 = vadd.xlane.f32.xlu2 %v1922_v62  ;;  %v2130_v55 = vmul.f32 %v10167_v48, %v10167_v48  ;;  %v2491_v18 = vmul.f32 0.5, %v2490_v25  ;;  %v10201_v45 = vand.u32 2147483647, %v10175_v17  ;;  %v1076_v62 = vpop.f32.mrf.mxu0 }
 0x28a   : > { %v4950_v53 = vmul.f32 %v4886_v43, %v9637_v34  ;;  %v4439_v5 = vmul.f32 1.0614054, %v9766_v28  ;;  %vm2494_vm6 = vweird.f32 %v10080_v60  ;;  %v10207_v13 = vmul.f32 0.5, %v10119_v49 }
 0x28b   : > { %vm3868_vm7 = vcmp.ge.f32.partialorder %v10143_v26, 0.0  ;;  %v1390_v52 = vadd.f32 0.2548296, %v1374_v39  ;;  %v10210_v6 = vmul.f32 %v6987_v10, %v4315_v19  ;;  %v1235_v40 = vmul.f32 %v10194_v9, %v10129_v46 }
 0x28c   : > { %v5270_v50 = vmul.f32 %v9644_v59, %v4950_v53  ;;  %v2286_v4 = vsel %vm1565_vm0, %v2130_v55, 0.0  ;;  %v10216_v34 = vadd.f32 1.0, %v4060_v12  ;;  %v4503_v49 = vadd.f32 -1.4531521, %v4439_v5 }
 0x28d   : > { %v1406_v25 = vmul.f32 %v1390_v52, %v9655_v36  ;;  %2287 = vadd.xlane.f32.xlu1 %v2286_v4  ;;  %v1279_v7 = vmul.f32 1.0614054, %v9785_v3  ;;  %v10220_v26 = vpop.eup %6990  ;;  %v2492_v10 = vsub.f32 1.5, %v2491_v18  ;;  %v10223_v38 = vsel %vm3868_vm7, 1.0, %v13766_v61  ;;  %v13884_v18 = vld [vmem:[#allocation46_spill] sm:$0xff] }
 0x28e   : > { %v1188_v46 = vmul.f32 0.3275911, %v10201_v45  ;;  %v5334_v59 = vsub.f32 1.0, %v5270_v50  ;;  %v10226_v19 = vpop.eup %6992  ;;  %v4567_v36 = vmul.f32 %v4503_v49, %v9766_v28  ;;  %v3214_v39 = vmul.f32 %v9724_v29, %v9828_v1 }
 0x28f   : > { %v1486_v43 = vmul.f32 %v9692_v22, %v1406_v25  ;;  %v1295_v12 = vadd.f32 -1.4531521, %v1279_v7  ;;  %v1251_v55 = vsub.f32 2.0, %v1235_v40  ;;  %vm2495_vm11 = vweird.f32 %v10138_v23  ;;  %v1735_v40 = vld [vmem:[%s7480_s28 + $0x1c0] sm:$0xff]  ;;  %v13887_v7 = vld [vmem:[#allocation12_spill] sm:$0xff] }
 0x290   : > { %v5398_v53 = vmul.f32 %v5334_v59, %v13884_v18  ;;  %v10235_v5 = vadd.f32 %v9627_v42, %v3611_v44  ;;  %6994 = vrcp.f32 %v10216_v34  ;;  %v4631_v22 = vadd.f32 1.4214138, %v4567_v36  ;;  %vm10247_vm8 = vmor %vm2494_vm6, %vm2495_vm11 }
 0x291   : > { %v1502_v52 = vsub.f32 1.0, %v1486_v43  ;;  %v1311_v50 = vmul.f32 %v1295_v12, %v9785_v3  ;;  %v2493_v4 = vmul.f32 %v10138_v23, %v2492_v10  ;;  %v10241_v49 = vadd.f32 %v9680_v8, %v1076_v62  ;;  %v13888_v62 = vld [vmem:[#allocation41_spill] sm:$0xff] }
 0x292   : > { %v5462_v25 = vadd.f32 1.0, %v5398_v53  ;;  %v3281_v1 = vadd.f32 %v9742_v24, %v3214_v39  ;;  %v1204_v44 = vadd.f32 1.0, %v1188_v46  ;;  %v4695_v43 = vmul.f32 %v4631_v22, %v9766_v28 }
 0x293   : > { %v1518_v59 = vmul.f32 %v1502_v52, %v13887_v7  ;;  %v1327_v36 = vadd.f32 1.4214138, %v1311_v50  ;;  %v5020_v10 = vsub.f32 0.0, %v10164_v11  ;;  %v10255_v8 = vmul.f32 0.5, %v10147_v0 }
 0x294   : > { %v5526_v12 = vmul.f32 %v5462_v25, %v13888_v62  ;;  %v10260_v60 = vmul.f32 %v10235_v5, %v8807_v27  ;;  %6650 = vmatmul.msk.f32.gmra.mxu2 %vm1565_vm0, %v3281_v1  ;;  %v4759_v46 = vadd.f32 -0.28449672, %v4695_v43  ;;  %v1925_v53 = vsel %vm1565_vm0, %v1735_v40, 0.0  ;;  %v13889_v1 = vld [vmem:[#allocation45_spill] sm:$0xff] }
 0x295   : > { %v1534_v39 = vadd.f32 1.0, %v1518_v59  ;;  %v1343_v18 = vmul.f32 %v1327_v36, %v9785_v3  ;;  %v2497_v52 = vsel %vm10247_vm8, %v10138_v23, %v2493_v4  ;;  %v1428_v0 = vsub.f32 0.0, %v10201_v45  ;;  %1926 = vadd.xlane.f32.xlu2 %v1925_v53  ;;  %v1736_v53 = vld [vmem:[%s7480_s28 + $0x1c8] sm:$0xff] }
 0x296   : > { %6699 = vmatmul.msk.f32.gmra.mxu3 %vm577_vm1, %v5526_v12  ;;  %v10272_v22 = vmul.f32 %v8807_v27, %v10241_v49  ;;  %v4440_v50 = vmul.f32 1.0614054, %v9895_v51  ;;  %v6995_v25 = vpop.eup %6994  ;;  %6996 = vrcp.f32 %v1204_v44  ;;  %v4823_v40 = vmul.f32 %v4759_v46, %v9766_v28  ;;  %v13890_v12 = vld [vmem:[#allocation2_spill] sm:$0xff] }
 0x297   : > { %v1550_v7 = vmul.f32 %v1534_v39, %v13889_v1  ;;  %v1359_v42 = vadd.f32 -0.28449672, %v1343_v18  ;;  %v10278_v23 = vmul.f32 %v10194_v9, %v1251_v55  ;;  %v10281_v4 = vand.u32 2147483647, %v10260_v60 }
 0x298   : > { %v4504_v59 = vadd.f32 -1.4531521, %v4440_v50  ;;  %v1280_v43 = vmul.f32 1.0614054, %v9967_v32  ;;  %vm1140_vm12 = vcmp.ge.f32.partialorder %v10175_v17, 0.0  ;;  %v3110_v39 = vmul.f32 %v2497_v52, %v13890_v12  ;;  %v13891_v17 = vld [vmem:[#allocation5_spill] sm:$0xff] }
 0x299   : > { %6599 = vmatmul.msk.f32.gmra.mxu1 %vm1565_vm0, %v1550_v7  ;;  %v4887_v36 = vadd.f32 0.2548296, %v4823_v40  ;;  %v1375_v62 = vmul.f32 %v1359_v42, %v9785_v3  ;;  %v4252_v46 = vmul.f32 %v6995_v25, %v10216_v34  ;;  %v10290_v9 = vand.u32 2147483647, %v10272_v22 }
 0x29a   : > { %v4568_v55 = vmul.f32 %v4504_v59, %v9895_v51  ;;  %v1296_v18 = vadd.f32 -1.4531521, %v1280_v43  ;;  %v5084_v50 = vmul.f32 %v5020_v10, %v10164_v11  ;;  %v3177_v7 = vmul.f32 %v9724_v29, %v3110_v39 }
 0x29b   : > { %v4951_v1 = vmul.f32 %v4887_v36, %v9766_v28  ;;  %v1391_v48 = vadd.f32 0.2548296, %v1375_v62  ;;  %v1444_v40 = vmul.f32 %v1428_v0, %v10201_v45  ;;  %v4061_v52 = vmul.f32 0.3275911, %v10281_v4 }
 0x29c   : > { %v4632_v42 = vadd.f32 1.4214138, %v4568_v55  ;;  %v1312_v34 = vmul.f32 %v1296_v18, %v9967_v32  ;;  %v10300_v12 = vpop.eup %6996  ;;  %v3244_v11 = vadd.f32 %v9742_v24, %v3177_v7  ;;  %v1928_v28 = vsel %vm1565_vm0, %v1736_v53, 0.0  ;;  %v3614_v7 = vpop.f32.mrf.mxu2 }
 0x29d   : > { %v5271_v59 = vmul.f32 %v9727_v47, %v4951_v1  ;;  %v1407_v43 = vmul.f32 %v1391_v48, %v9785_v3  ;;  %v4316_v10 = vsub.f32 2.0, %v4252_v46  ;;  %v1189_v29 = vmul.f32 0.3275911, %v10290_v9  ;;  %1929 = vadd.xlane.f32.xlu2 %v1928_v28 }
 0x29e   : > { %v4696_v45 = vmul.f32 %v4632_v42, %v9895_v51  ;;  %v1328_v0 = vadd.f32 1.4214138, %v1312_v34  ;;  %v10311_v36 = vsel %vm1140_vm12, 1.0, %v13766_v61  ;;  %6613 = vmatmul.msk.f32.gmra.mxu0 %vm1565_vm0, %v3244_v11  ;;  %v4441_v24 = vmul.f32 1.0614054, %v10065_v20 }
 0x29f   : > { %v5335_v62 = vsub.f32 1.0, %v5271_v59  ;;  %v1487_v47 = vmul.f32 %v9778_v31, %v1407_v43  ;;  %v10316_v3 = vmul.f32 1.442695, %v5084_v50  ;;  %v1236_v48 = vmul.f32 %v10300_v12, %v1204_v44  ;;  %v13892_v44 = vld [vmem:[#allocation48_spill] sm:$0xff] }
 0x2a0   : > { %v4760_v39 = vadd.f32 -0.28449672, %v4696_v45  ;;  %v1344_v46 = vmul.f32 %v1328_v0, %v9967_v32  ;;  %v10320_v55 = vmul.f32 1.442695, %v1444_v40  ;;  %v10322_v18 = vadd.f32 1.0, %v4061_v52  ;;  %v13894_v45 = vld [vmem:[#allocation10_spill] sm:$0xff] }
 0x2a1   : > { %v5399_v53 = vmul.f32 %v5335_v62, %v13891_v17  ;;  %v1503_v1 = vsub.f32 1.0, %v1487_v47  ;;  %v10325_v31 = vmul.f32 %v6995_v25, %v4316_v10  ;;  %v10327_v42 = vadd.f32 1.0, %v1189_v29  ;;  %v10335_v52 = vld [vmem:[%s13601_s11] ss:$0 sm:$0xff] }
 0x2a2   : > { %v4824_v50 = vmul.f32 %v4760_v39, %v9895_v51  ;;  %v1360_v34 = vadd.f32 -0.28449672, %v1344_v46  ;;  %v4505_v11 = vadd.f32 -1.4531521, %v4441_v24  ;;  %v1281_v40 = vmul.f32 1.0614054, %v10072_v37 }
 0x2a3   : > { %v5463_v59 = vadd.f32 1.0, %v5399_v53  ;;  %v1519_v43 = vmul.f32 %v1503_v1, %v13892_v44  ;;  %v1252_v28 = vsub.f32 2.0, %v1236_v48  ;;  %v10338_v25 = vadd.f32 %v10335_v52, %v3614_v7  ;;  %v13895_v46 = vld [vmem:[#allocation18_spill] sm:$0xff] }
 0x2a4   : > { %v4888_v10 = vadd.f32 0.2548296, %v4824_v50  ;;  %v1376_v29 = vmul.f32 %v1360_v34, %v9967_v32  ;;  %6998 = vrcp.f32 %v10322_v18  ;;  %v4569_v47 = vmul.f32 %v4505_v11, %v10065_v20 }
 0x2a5   : > { %13893 = vst [vmem:[#allocation34_spill] sm:$0xff] %v10338_v25  ;;  %v5527_v0 = vmul.f32 %v5463_v59, %v13894_v45  ;;  %v1535_v62 = vadd.f32 1.0, %v1519_v43  ;;  %7000 = vrcp.f32 %v10327_v42  ;;  %v1297_v1 = vadd.f32 -1.4531521, %v1281_v40  ;;  %v1737_v40 = vld [vmem:[%s7480_s28 + $0x1d0] sm:$0xff] }
 0x2a6   : > { %v4952_v48 = vmul.f32 %v4888_v10, %v9895_v51  ;;  %v1392_v39 = vadd.f32 0.2548296, %v1376_v29  ;;  %v4633_v53 = vadd.f32 1.4214138, %v4569_v47  ;;  %v4442_v7 = vmul.f32 1.0614054, %v10097_v35 }
 0x2a7   : > { %6700 = vmatmul.msk.f32.gmra.mxu3 %vm577_vm1, %v5527_v0  ;;  %v1551_v17 = vmul.f32 %v1535_v62, %v13895_v46  ;;  %v10352_v50 = vmul.f32 %v10338_v25, %v8807_v27  ;;  %v1282_v44 = vmul.f32 1.0614054, %v10180_v54  ;;  %v1313_v43 = vmul.f32 %v1297_v1, %v10072_v37 }
 0x2a8   : > { %v5272_v34 = vmul.f32 %v9893_v57, %v4952_v48  ;;  %v1408_v59 = vmul.f32 %v1392_v39, %v9967_v32  ;;  %v4697_v51 = vmul.f32 %v4633_v53, %v10065_v20  ;;  %v4506_v11 = vadd.f32 -1.4531521, %v4442_v7  ;;  %v13896_v53 = vld [vmem:[#allocation49_spill] sm:$0xff] }
 0x2a9   : > { %6600 = vmatmul.msk.f32.gmra.mxu1 %vm1565_vm0, %v1551_v17  ;;  %v4443_v10 = vmul.f32 1.0614054, %v10210_v6  ;;  %v1298_v0 = vadd.f32 -1.4531521, %v1282_v44  ;;  %v1931_v57 = vsel %vm1565_vm0, %v1737_v40, 0.0  ;;  %v10370_v17 = vmul.f32 %v10300_v12, %v1252_v28  ;;  %v3617_v28 = vpop.f32.mrf.mxu2 }
 0x2aa   : > { %v5336_v29 = vsub.f32 1.0, %v5272_v34  ;;  %v1488_v45 = vmul.f32 %v9913_v30, %v1408_v59  ;;  %v10364_v62 = vpop.eup %6998  ;;  %v4761_v32 = vadd.f32 -0.28449672, %v4697_v51  ;;  %v1329_v47 = vadd.f32 1.4214138, %v1313_v43  ;;  %1932 = vadd.xlane.f32.xlu2 %v1931_v57 }
 0x2ab   : > { %v4570_v48 = vmul.f32 %v4506_v11, %v10097_v35  ;;  %v4507_v39 = vadd.f32 -1.4531521, %v4443_v10  ;;  %v10367_v46 = vpop.eup %7000  ;;  %v1314_v30 = vmul.f32 %v1298_v0, %v10180_v54  ;;  %v10375_v34 = vand.u32 2147483647, %v10352_v50  ;;  %v13897_v11 = vld [vmem:[#allocation16_spill] sm:$0xff] }
 0x2ac   : > { %v5400_v1 = vmul.f32 %v5336_v29, %v13896_v53  ;;  %v1504_v7 = vsub.f32 1.0, %v1488_v45  ;;  %v4825_v59 = vmul.f32 %v4761_v32, %v10065_v20  ;;  %v1345_v44 = vmul.f32 %v1329_v47, %v10072_v37  ;;  %v13898_v53 = vld [vmem:[#allocation7_spill] sm:$0xff] }
 0x2ad   : > { %v4634_v51 = vadd.f32 1.4214138, %v4570_v48  ;;  %v1330_v10 = vadd.f32 1.4214138, %v1314_v30  ;;  %v4571_v12 = vmul.f32 %v4507_v39, %v10210_v6  ;;  %v1283_v0 = vmul.f32 1.0614054, %v10278_v23 }
 0x2ae   : > { %v5464_v43 = vadd.f32 1.0, %v5400_v1  ;;  %v1520_v40 = vmul.f32 %v1504_v7, %v13897_v11  ;;  %v4889_v57 = vadd.f32 0.2548296, %v4825_v59  ;;  %v1361_v29 = vadd.f32 -0.28449672, %v1345_v44  ;;  %v13899_v30 = vld [vmem:[#allocation50_spill] sm:$0xff] }
 0x2af   : > { %v4698_v45 = vmul.f32 %v4634_v51, %v10097_v35  ;;  %v1346_v32 = vmul.f32 %v1330_v10, %v10180_v54  ;;  %v4635_v47 = vadd.f32 1.4214138, %v4571_v12  ;;  %v10387_v48 = vmul.f32 %v10364_v62, %v10322_v18  ;;  %v2159_v10 = vpop.xlane.xlu0 %2158 }
 0x2b0   : > { %v5528_v24 = vmul.f32 %v5464_v43, %v13898_v53  ;;  %v1536_v25 = vadd.f32 1.0, %v1520_v40  ;;  %v4953_v1 = vmul.f32 %v4889_v57, %v10065_v20  ;;  %v1377_v39 = vmul.f32 %v1361_v29, %v10072_v37 }
 0x2b1   : > { %v4762_v7 = vadd.f32 -0.28449672, %v4698_v45  ;;  %v10394_v44 = vadd.f32 %v10335_v52, %v3617_v28  ;;  %v1362_v51 = vadd.f32 -0.28449672, %v1346_v32  ;;  %v4699_v43 = vmul.f32 %v4635_v47, %v10210_v6  ;;  %v13900_v47 = vld [vmem:[#allocation11_spill] sm:$0xff] }
 0x2b2   : > { %6701 = vmatmul.msk.f32.gmra.mxu3 %vm577_vm1, %v5528_v24  ;;  %v1552_v59 = vmul.f32 %v1536_v25, %v13899_v30  ;;  %v5273_v11 = vmul.f32 %v10015_v16, %v4953_v1  ;;  %v1393_v40 = vadd.f32 0.2548296, %v1377_v39  ;;  %v1299_v20 = vadd.f32 -1.4531521, %v1283_v0 }
 0x2b3   : > { %v4826_v18 = vmul.f32 %v4762_v7, %v10097_v35  ;;  %v10401_v12 = vmul.f32 %v10367_v46, %v10327_v42  ;;  %v4062_v24 = vmul.f32 0.3275911, %v10375_v34  ;;  %v1378_v25 = vmul.f32 %v1362_v51, %v10180_v54 }
 0x2b4   : > { %6601 = vmatmul.msk.f32.gmra.mxu1 %vm1565_vm0, %v1552_v59  ;;  %v4763_v28 = vadd.f32 -0.28449672, %v4699_v43  ;;  %v5337_v57 = vsub.f32 1.0, %v5273_v11  ;;  %v1409_v29 = vmul.f32 %v1393_v40, %v10072_v37  ;;  %v1315_v45 = vmul.f32 %v1299_v20, %v10278_v23 }
 0x2b5   : > { %v4890_v16 = vadd.f32 0.2548296, %v4826_v18  ;;  %v10410_v0 = vmul.f32 %v10394_v44, %v8807_v27  ;;  %v1394_v53 = vadd.f32 0.2548296, %v1378_v25  ;;  %v2343_v32 = vmul.f32 %v2159_v10, %v7647_v15  ;;  %v13901_v25 = vld [vmem:[#allocation21_spill] sm:$0xff] }
 0x2b6   : > { %v4827_v42 = vmul.f32 %v4763_v28, %v10210_v6  ;;  %v5401_v1 = vmul.f32 %v5337_v57, %v13900_v47  ;;  %v1489_v39 = vmul.f32 %v10033_v2, %v1409_v29  ;;  %v1331_v30 = vadd.f32 1.4214138, %v1315_v45  ;;  %v13902_v28 = vld [vmem:[#allocation15_spill] sm:$0xff] }
 0x2b7   : > { %v4954_v7 = vmul.f32 %v4890_v16, %v10097_v35  ;;  %v10417_v37 = vadd.f32 1.0, %v4062_v24  ;;  %v1410_v59 = vmul.f32 %v1394_v53, %v10180_v54  ;;  %v4444_v43 = vmul.f32 1.0614054, %v10325_v31 }
 0x2b8   : > { %v4891_v51 = vadd.f32 0.2548296, %v4827_v42  ;;  %v5465_v11 = vadd.f32 1.0, %v5401_v1  ;;  %v1505_v40 = vsub.f32 1.0, %v1489_v39  ;;  %v1347_v10 = vmul.f32 %v1331_v30, %v10278_v23 }
 0x2b9   : > { %v5274_v18 = vmul.f32 %v10115_v63, %v4954_v7  ;;  %v10424_v20 = vand.u32 2147483647, %v10410_v0  ;;  %v1490_v2 = vmul.f32 %v10127_v58, %v1410_v59  ;;  %v10428_v24 = vadd.f32 1e-05, %v2343_v32 }
 0x2ba   : > { %v4955_v35 = vmul.f32 %v4891_v51, %v10210_v6  ;;  %v5529_v54 = vmul.f32 %v5465_v11, %v13901_v25  ;;  %v1521_v57 = vmul.f32 %v1505_v40, %v13902_v28  ;;  %v1363_v16 = vadd.f32 -0.28449672, %v1347_v10  ;;  %v13903_v6 = vld [vmem:[#allocation14_spill] sm:$0xff] }
 0x2bb   : > { %v5338_v29 = vsub.f32 1.0, %v5274_v18  ;;  %v4317_v45 = vsub.f32 2.0, %v10387_v48  ;;  %v1506_v63 = vsub.f32 1.0, %v1490_v2  ;;  %v4508_v42 = vadd.f32 -1.4531521, %v4444_v43  ;;  %v13906_v10 = vld [vmem:[#allocation26_spill] sm:$0xff] }
 0x2bc   : > { %v5275_v53 = vmul.f32 %v10220_v26, %v4955_v35  ;;  %v1253_v47 = vsub.f32 2.0, %v10401_v12  ;;  %7002 = vrcp.f32 %v10417_v37  ;;  %6702 = vmatmul.msk.f32.gmra.mxu3 %vm577_vm1, %v5529_v54  ;;  %v1537_v58 = vadd.f32 1.0, %v1521_v57  ;;  %v13904_v26 = vld [vmem:[#allocation23_spill] sm:$0xff]  ;;  %v2273_v12 = vpop.xlane.xlu2 %2272 }
 0x2bd   : > { %v5402_v32 = vmul.f32 %v5338_v29, %v13903_v6  ;;  %v1522_v1 = vmul.f32 %v1506_v63, %v10093_v56  ;;  %v1379_v7 = vmul.f32 %v1363_v16, %v10278_v23  ;;  %v4572_v48 = vmul.f32 %v4508_v42, %v10325_v31 }
 0x2be   : > { %v5339_v39 = vsub.f32 1.0, %v5275_v53  ;;  %v4063_v30 = vmul.f32 0.3275911, %v10424_v20  ;;  %v1553_v59 = vmul.f32 %v1537_v58, %v13904_v26  ;;  %7004 = vrsqrt.f32 %v10428_v24 }
 0x2bf   : > { %v5466_v51 = vadd.f32 1.0, %v5402_v32  ;;  %v10445_v43 = vmul.f32 %v10364_v62, %v4317_v45  ;;  %v13905_v11 = vsub.f32 0.0, %v10281_v4  ;;  %v1395_v40 = vadd.f32 0.2548296, %v1379_v7 }
 0x2c0   : > { %v4636_v18 = vadd.f32 1.4214138, %v4572_v48  ;;  %7006 = vpow2.f32 %v10316_v3  ;;  %6602 = vmatmul.msk.f32.gmra.mxu1 %vm1565_vm0, %v1553_v59  ;;  %v1538_v35 = vadd.f32 1.0, %v1522_v1  ;;  %v5403_v25 = vmul.f32 %v5339_v39, %v10185_v14  ;;  %v2270_v48 = vpop.xlane.xlu1 %2269 }
 0x2c1   : > { %v5085_v56 = vmul.f32 %v13905_v11, %v10281_v4  ;;  %v5530_v2 = vmul.f32 %v5466_v51, %v13906_v10  ;;  %7008 = vpow2.f32 %v10320_v55  ;;  %v1429_v62 = vsub.f32 0.0, %v10290_v9  ;;  %v1900_v4 = vpop.xlane.xlu0 %1899  ;;  %v7317_v11 = vld [vmem:[%s7480_s28 + $0x178] sm:$0xff] }
 0x2c2   : > { %v1411_v54 = vmul.f32 %v1395_v40, %v10278_v23  ;;  %v4700_v28 = vmul.f32 %v4636_v18, %v10325_v31  ;;  %v7003_v57 = vpop.eup %7002  ;;  %v10459_v29 = vmul.f32 0.5, %v10235_v5  ;;  %v10462_v3 = vmul.f32 %v10367_v46, %v1253_v47 }
 0x2c3   : > { %v10464_v16 = vadd.f32 1.0, %v4063_v30  ;;  %v1284_v14 = vmul.f32 1.0614054, %v10370_v17  ;;  %v5180_v45 = vmul.f32 1.442695, %v5085_v56  ;;  %v1554_v5 = vmul.f32 %v1538_v35, %v10068_v33 }
 0x2c4   : > { %v1491_v55 = vmul.f32 %v10226_v19, %v1411_v54  ;;  %v4764_v63 = vadd.f32 -0.28449672, %v4700_v28  ;;  %v4445_v23 = vmul.f32 1.0614054, %v10445_v43  ;;  %v10469_v53 = vpop.eup %7004  ;;  %6703 = vmatmul.msk.f32.gmra.mxu3 %vm577_vm1, %v5530_v2  ;;  %v5467_v42 = vadd.f32 1.0, %v5403_v25  ;;  %v10491_v18 = vpop.xlane.xlu2 %1788 }
 0x2c5   : > { %v2003_v46 = vmul.f32 %v7647_v15, %v1900_v4  ;;  %v1300_v47 = vadd.f32 -1.4531521, %v1284_v14  ;;  %v1445_v58 = vmul.f32 %v1429_v62, %v10290_v9  ;;  %v4254_v39 = vmul.f32 %v7003_v57, %v10417_v37 }
 0x2c6   : > { %v1507_v6 = vsub.f32 1.0, %v1491_v55  ;;  %v4828_v32 = vmul.f32 %v4764_v63, %v10325_v31  ;;  %v4509_v19 = vadd.f32 -1.4531521, %v4445_v23  ;;  %v7007_v1 = vpop.eup %7006  ;;  %7010 = vrcp.f32 %v10464_v16 }
 0x2c7   : > { %v1316_v7 = vmul.f32 %v1300_v47, %v10370_v17  ;;  %v1285_v33 = vmul.f32 1.0614054, %v10462_v3  ;;  %v10480_v30 = vpop.eup %7008  ;;  %v2499_v9 = vmul.f32 %v10469_v53, %v10428_v24  ;;  %v5531_v37 = vmul.f32 %v5467_v42, %v10101_v41 }
 0x2c8   : > { %v1523_v26 = vmul.f32 %v1507_v6, %v10190_v21  ;;  %v4892_v59 = vadd.f32 0.2548296, %v4828_v32  ;;  %v4573_v51 = vmul.f32 %v4509_v19, %v10445_v43  ;;  %6603 = vmatmul.msk.f32.gmra.mxu1 %vm1565_vm0, %v1554_v5  ;;  %v10489_v56 = vsub.f32 %v7317_v11, %v2003_v46 }
 0x2c9   : > { %v1332_v40 = vadd.f32 1.4214138, %v1316_v7  ;;  %v1301_v10 = vadd.f32 -1.4531521, %v1285_v33  ;;  %v2380_v21 = vmul.f32 %v2270_v48, %v7647_v15  ;;  %v4318_v62 = vsub.f32 2.0, %v4254_v39  ;;  %v2276_v42 = vpop.xlane.xlu0 %2275 }
 0x2ca   : > { %13907 = vst [vmem:[#allocation35_spill] sm:$0xff] %v10489_v56  ;;  %v1539_v2 = vadd.f32 1.0, %v1523_v26  ;;  %v4956_v35 = vmul.f32 %v4892_v59, %v10325_v31  ;;  %v4637_v25 = vadd.f32 1.4214138, %v4573_v51  ;;  %v2381_v54 = vmul.f32 %v2273_v12, %v7647_v15  ;;  %v13908_v31 = vld [vmem:[#allocation19_spill] sm:$0xff] }
 0x2cb   : > { %v1348_v28 = vmul.f32 %v1332_v40, %v10370_v17  ;;  %v1317_v41 = vmul.f32 %v1301_v10, %v10462_v3  ;;  %vm3869_vm13 = vcmp.ge.f32.partialorder %v10260_v60, 0.0  ;;  %v1472_v4 = vmul.f32 1.442695, %v1445_v58 }
 0x2cc   : > { %v2500_v14 = vmul.f32 %v10469_v53, %v2499_v9  ;;  %v5276_v55 = vmul.f32 %v7007_v1, %v4956_v35  ;;  %v4701_v63 = vmul.f32 %v4637_v25, %v10445_v43  ;;  %v10501_v23 = vpop.eup %7010  ;;  %vm1141_vm14 = vcmp.ge.f32.partialorder %v10272_v22, 0.0  ;;  %6704 = vmatmul.msk.f32.gmra.mxu3 %vm577_vm1, %v5531_v37 }
 0x2cd   : > { %v1555_v12 = vmul.f32 %v1539_v2, %v13908_v31  ;;  %v1364_v5 = vadd.f32 -0.28449672, %v1348_v28  ;;  %v1333_v46 = vadd.f32 1.4214138, %v1317_v41  ;;  %v2131_v47 = vmul.f32 %v10489_v56, %v10489_v56  ;;  %v2165_v2 = vpop.xlane.xlu2 %2164 }
 0x2ce   : > { %7012 = vpow2.f32 %v5180_v45  ;;  %v5340_v58 = vsub.f32 1.0, %v5276_v55  ;;  %v4765_v6 = vadd.f32 -0.28449672, %v4701_v63  ;;  %v10508_v32 = vadd.f32 1e-05, %v2380_v21 }
 0x2cf   : > { %v10510_v19 = vmul.f32 %v7003_v57, %v4318_v62  ;;  %v10512_v1 = vadd.f32 1e-05, %v2381_v54  ;;  %v1380_v39 = vmul.f32 %v1364_v5, %v10370_v17  ;;  %v1349_v7 = vmul.f32 %v1333_v46, %v10462_v3 }
 0x2d0   : > { %v2501_v33 = vmul.f32 0.5, %v2500_v14  ;;  %v5404_v48 = vmul.f32 %v5340_v58, %v10223_v38  ;;  %v4829_v9 = vmul.f32 %v4765_v6, %v10445_v43  ;;  %v2289_v26 = vsel %vm1565_vm0, %v2131_v47, 0.0  ;;  %6604 = vmatmul.msk.f32.gmra.mxu1 %vm1565_vm0, %v1555_v12  ;;  %v1786_v47 = vpop.xlane.xlu1 %1785 }
 0x2d1   : > { %7014 = vpow2.f32 %v1472_v4  ;;  %v1396_v45 = vadd.f32 0.2548296, %v1380_v39  ;;  %v2382_v57 = vmul.f32 %v2276_v42, %v7647_v15  ;;  %v1365_v59 = vadd.f32 -0.28449672, %v1349_v7  ;;  %2290 = vadd.xlane.f32.xlu1 %v2289_v26  ;;  %v10543_v31 = vpop.xlane.xlu0 %1791 }
 0x2d2   : > { %v5022_v51 = vsub.f32 0.0, %v10375_v34  ;;  %v5468_v37 = vadd.f32 1.0, %v5404_v48  ;;  %v4893_v11 = vadd.f32 0.2548296, %v4829_v9  ;;  %7016 = vrsqrt.f32 %v10508_v32 }
 0x2d3   : > { %v4255_v38 = vmul.f32 %v10501_v23, %v10464_v16  ;;  %v1412_v40 = vmul.f32 %v1396_v45, %v10370_v17  ;;  %v1381_v10 = vmul.f32 %v1365_v59, %v10462_v3  ;;  %v4446_v35 = vmul.f32 1.0614054, %v10510_v19 }
 0x2d4   : > { %v7013_v25 = vpop.eup %7012  ;;  %v2502_v21 = vsub.f32 1.5, %v2501_v33  ;;  %7018 = vrsqrt.f32 %v10512_v1  ;;  %v5532_v62 = vmul.f32 %v5468_v37, %v10207_v13  ;;  %v4957_v54 = vmul.f32 %v4893_v11, %v10445_v43 }
 0x2d5   : > { %v1492_v28 = vmul.f32 %v10480_v30, %v1412_v40  ;;  %v10532_v41 = vadd.f32 1e-05, %v2382_v57  ;;  %v1397_v16 = vadd.f32 0.2548296, %v1381_v10  ;;  %v4510_v4 = vadd.f32 -1.4531521, %v4446_v35  ;;  %v10579_v10 = vpop.xlane.xlu2 %1905 }
 0x2d6   : > { %v5086_v17 = vmul.f32 %v5022_v51, %v10375_v34  ;;  %vm2504_vm10 = vweird.f32 %v10428_v24  ;;  %vm2505_vm15 = vweird.f32 %v10469_v53  ;;  %6705 = vmatmul.msk.f32.gmra.mxu3 %vm577_vm1, %v5532_v62  ;;  %v5277_v14 = vmul.f32 %v7013_v25, %v4957_v54 }
 0x2d7   : > { %v7015_v55 = vpop.eup %7014  ;;  %v3933_v13 = vsel %vm3869_vm13, 1.0, %v13766_v61  ;;  %v1508_v43 = vsub.f32 1.0, %v1492_v28  ;;  %v1413_v30 = vmul.f32 %v1397_v16, %v10462_v3  ;;  %v4574_v63 = vmul.f32 %v4510_v4, %v10510_v19  ;;  %vm10556_vm9 = vmor %vm2504_vm10, %vm2505_vm15 }
 0x2d8   : > { %v10545_v34 = vpop.eup %7016  ;;  %v1157_v12 = vsel %vm1141_vm14, 1.0, %v13766_v61  ;;  %v4319_v5 = vsub.f32 2.0, %v4255_v38  ;;  %v2503_v42 = vmul.f32 %v10469_v53, %v2502_v21  ;;  %v5341_v46 = vsub.f32 1.0, %v5277_v14  ;;  %v7318_v21 = vld [vmem:[%s7480_s28 + $0x48] sm:$0xff]  ;;  %v10600_v14 = vld [vmem:[%s13598_s8] ss:$0 sm:$0xff] }
 0x2d9   : > { %v5023_v60 = vsub.f32 0.0, %v10424_v20  ;;  %v1524_v58 = vmul.f32 %v1508_v43, %v10311_v36  ;;  %7020 = vrsqrt.f32 %v10532_v41  ;;  %v1493_v22 = vmul.f32 %v7015_v55, %v1413_v30 }
 0x2da   : > { %v10562_v6 = vpop.eup %7018  ;;  %v5182_v39 = vmul.f32 1.442695, %v5086_v17  ;;  %v5405_v7 = vmul.f32 %v5341_v46, %v3933_v13  ;;  %v2345_v33 = vmul.f32 %v2165_v2, %v7647_v15  ;;  %v4638_v48 = vadd.f32 1.4214138, %v4574_v63  ;;  %v2168_v13 = vpop.xlane.xlu0 %2167 }
 0x2db   : > { %v1540_v9 = vadd.f32 1.0, %v1524_v58  ;;  %v1509_v26 = vsub.f32 1.0, %v1493_v22  ;;  %v2869_v24 = vmul.f32 %v10545_v34, %v10508_v32  ;;  %v1965_v45 = vmul.f32 %v7647_v15, %v1786_v47 }
 0x2dc   : > { %v10569_v57 = vmul.f32 %v10501_v23, %v4319_v5  ;;  %v2507_v36 = vsel %vm10556_vm9, %v10469_v53, %v2503_v42  ;;  %v5469_v59 = vadd.f32 1.0, %v5405_v7  ;;  %v4702_v51 = vmul.f32 %v4638_v48, %v10510_v19  ;;  %v10609_v42 = vld [vmem:[%s13599_s9] ss:$0 sm:$0xff]  ;;  %v3620_v7 = vpop.f32.mrf.mxu2 }
 0x2dd   : > { %v5087_v37 = vmul.f32 %v5023_v60, %v10424_v20  ;;  %v2879_v11 = vmul.f32 %v10562_v6, %v10512_v1  ;;  %v1556_v38 = vmul.f32 %v1540_v9, %v10255_v8  ;;  %v1525_v40 = vmul.f32 %v1509_v26, %v1157_v12  ;;  %v13912_v8 = vld [vmem:[#allocation4_spill] sm:$0xff]  ;;  %v2162_v12 = vpop.xlane.xlu1 %2161  ;;  %v13913_v48 = vld [vmem:[#allocation34_spill] sm:$0xff] }
 0x2de   : > { %7022 = vpow2.f32 %v5182_v39  ;;  %v5533_v23 = vmul.f32 %v5469_v59, %v10459_v29  ;;  %v10582_v2 = vadd.f32 1e-05, %v2345_v33  ;;  %v4766_v53 = vadd.f32 -0.28449672, %v4702_v51 }
 0x2df   : > { %v10584_v35 = vpop.eup %7020  ;;  %6605 = vmatmul.msk.f32.gmra.mxu1 %vm1565_vm0, %v1556_v38  ;;  %v1541_v25 = vadd.f32 1.0, %v1525_v40  ;;  %v2870_v20 = vmul.f32 %v10545_v34, %v2869_v24  ;;  %v10589_v62 = vsub.f32 %v7318_v21, %v1965_v45  ;;  %v3111_v54 = vmul.f32 %v2507_v36, %v13912_v8  ;;  %v2282_v36 = vpop.xlane.xlu2 %2281  ;;  %v7321_v40 = vld [vmem:[%s7480_s28 + $0x50] sm:$0xff] }
 0x2e0   : > { %6706 = vmatmul.msk.f32.gmra.mxu3 %vm577_vm1, %v5533_v23  ;;  %v4830_v28 = vmul.f32 %v4766_v53, %v10510_v19  ;;  %v4447_v29 = vmul.f32 1.0614054, %v10569_v57  ;;  %v1102_v16 = vmul.f32 0.5, %v10241_v49  ;;  %v5184_v4 = vmul.f32 1.442695, %v5087_v37 }
 0x2e1   : > { %13911 = vst [vmem:[#allocation47_spill] sm:$0xff] %v10589_v62  ;;  %v2880_v17 = vmul.f32 %v10562_v6, %v2879_v11  ;;  %v3178_v55 = vmul.f32 %v10600_v14, %v3111_v54  ;;  %v2889_v43 = vmul.f32 %v10584_v35, %v10532_v41  ;;  %7024 = vrsqrt.f32 %v10582_v2 }
 0x2e2   : > { %v4894_v30 = vadd.f32 0.2548296, %v4830_v28  ;;  %v4511_v63 = vadd.f32 -1.4531521, %v4447_v29  ;;  %v1557_v49 = vmul.f32 %v1541_v25, %v1102_v16  ;;  %v2871_v5 = vmul.f32 0.5, %v2870_v20  ;;  %v10645_v29 = vpop.xlane.xlu0 %1908 }
 0x2e3   : > { %v3245_v46 = vadd.f32 %v10609_v42, %v3178_v55  ;;  %v2093_v47 = vmul.f32 %v10589_v62, %v10589_v62  ;;  %vm3870_vm2 = vcmp.ge.f32.partialorder %v10352_v50, 0.0  ;;  %v2881_v22 = vmul.f32 0.5, %v2880_v17 }
 0x2e4   : > { %v7023_v60 = vpop.eup %7022  ;;  %v4958_v3 = vmul.f32 %v4894_v30, %v10510_v19  ;;  %v4575_v58 = vmul.f32 %v4511_v63, %v10569_v57  ;;  %v1966_v39 = vmul.f32 %v7647_v15, %v10491_v18  ;;  %v3742_v9 = vmul.f32 0.5, %v13913_v48  ;;  %v13915_v63 = vld [vmem:[#allocation3_spill] sm:$0xff] }
 0x2e5   : > { %6614 = vmatmul.msk.f32.gmra.mxu0 %vm1565_vm0, %v3245_v46  ;;  %v2175_v33 = vsel %vm1565_vm0, %v2093_v47, 0.0  ;;  %v2890_v26 = vmul.f32 %v10584_v35, %v2889_v43  ;;  %v3934_v19 = vsel %vm3870_vm2, 1.0, %v13766_v61  ;;  %7026 = vpow2.f32 %v5184_v4  ;;  %v1903_v43 = vpop.xlane.xlu1 %1902 }
 0x2e6   : > { %v5278_v24 = vmul.f32 %v7023_v60, %v4958_v3  ;;  %v4639_v50 = vadd.f32 1.4214138, %v4575_v58  ;;  %2176 = vadd.xlane.f32.xlu0 %v2175_v33  ;;  %v2872_v45 = vsub.f32 1.5, %v2871_v5  ;;  %v2344_v18 = vmul.f32 %v2162_v12, %v7647_v15  ;;  %v7324_v58 = vld [vmem:[%s7480_s28 + $0x180] sm:$0xff] }
 0x2e7   : > { %6606 = vmatmul.msk.f32.gmra.mxu1 %vm1565_vm0, %v1557_v49  ;;  %v10626_v59 = vpop.eup %7024  ;;  %vm2884_vm3 = vweird.f32 %v10512_v1  ;;  %v10630_v37 = vadd.f32 %v10335_v52, %v3620_v7  ;;  %v2882_v38 = vsub.f32 1.5, %v2881_v22  ;;  %vm2885_vm4 = vweird.f32 %v10562_v6  ;;  %v10680_v1 = vld [vmem:[%s13595_s5] ss:$0 sm:$0xff] }
 0x2e8   : > { %v5342_v51 = vsub.f32 1.0, %v5278_v24  ;;  %v4703_v11 = vmul.f32 %v4639_v50, %v10569_v57  ;;  %v10635_v23 = vsub.f32 %v7321_v40, %v1966_v39  ;;  %v10637_v53 = vadd.f32 1e-05, %v2344_v18  ;;  %vm10663_vm7 = vmor %vm2884_vm3, %vm2885_vm4  ;;  %v10706_v50 = vpop.xlane.xlu2 %1797  ;;  %v13921_v18 = vld [vmem:[#allocation29_spill] sm:$0xff] }
 0x2e9   : > { %v2891_v25 = vmul.f32 0.5, %v2890_v26  ;;  %v2346_v8 = vmul.f32 %v2168_v13, %v7647_v15  ;;  %v2873_v54 = vmul.f32 %v10545_v34, %v2872_v45  ;;  %vm2875_vm5 = vweird.f32 %v10545_v34  ;;  %v1079_v13 = vpop.f32.mrf.mxu0 }
 0x2ea   : > { %13914 = vst [vmem:[#allocation30_spill] sm:$0xff] %v10635_v23  ;;  %v5406_v20 = vmul.f32 %v5342_v51, %v3934_v19  ;;  %v4767_v21 = vadd.f32 -0.28449672, %v4703_v11  ;;  %v2519_v28 = vmul.f32 %v10626_v59, %v10582_v2  ;;  %7028 = vrsqrt.f32 %v10637_v53 }
 0x2eb   : > { %v10649_v4 = vmul.f32 %v10630_v37, %v8807_v27  ;;  %v2384_v55 = vmul.f32 %v2282_v36, %v7647_v15  ;;  %v7027_v30 = vpop.eup %7026  ;;  %v10655_v12 = vadd.f32 %v10335_v52, %v13915_v63  ;;  %v2883_v49 = vmul.f32 %v10562_v6, %v2882_v38 }
 0x2ec   : > { %v5470_v16 = vadd.f32 1.0, %v5406_v20  ;;  %v4831_v17 = vmul.f32 %v4767_v21, %v10569_v57  ;;  %vm2874_vm6 = vweird.f32 %v10508_v32  ;;  %v2892_v46 = vsub.f32 1.5, %v2891_v25  ;;  %v13924_v21 = vld [vmem:[#allocation9_spill] sm:$0xff] }
 0x2ed   : > { %13916 = vst [vmem:[#allocation32_spill] sm:$0xff] %v10655_v12  ;;  %v10667_v3 = vadd.f32 1e-05, %v2346_v8  ;;  %vm3871_vm11 = vcmp.ge.f32.partialorder %v10410_v0, 0.0  ;;  %vm10672_vm8 = vmor %vm2874_vm6, %vm2875_vm5  ;;  %v2520_v32 = vmul.f32 %v10626_v59, %v2519_v28  ;;  %v10683_v22 = vadd.f32 %v10680_v1, %v1079_v13  ;;  %v2285_v28 = vpop.xlane.xlu0 %2284 }
 0x2ee   : > { %v5534_v47 = vmul.f32 %v5470_v16, %v3742_v9  ;;  %v4895_v60 = vadd.f32 0.2548296, %v4831_v17  ;;  %v2094_v39 = vmul.f32 %v10635_v23, %v10635_v23  ;;  %v2877_v7 = vsel %vm10672_vm8, %v10545_v34, %v2873_v54  ;;  %v7323_v16 = vld [vmem:[%s7480_s28 + $0x58] sm:$0xff] }
 0x2ef   : > { %v10692_v33 = vand.u32 2147483647, %v10649_v4  ;;  %v10695_v9 = vadd.f32 1e-05, %v2384_v55  ;;  %v2887_v24 = vsel %vm10663_vm7, %v10562_v6, %v2883_v49  ;;  %vm2894_vm12 = vweird.f32 %v10532_v41 }
 0x2f0   : > { %6707 = vmatmul.msk.f32.gmra.mxu3 %vm577_vm1, %v5534_v47  ;;  %v4959_v48 = vmul.f32 %v4895_v60, %v10569_v57  ;;  %v10697_v26 = vpop.eup %7028  ;;  %vm2895_vm13 = vweird.f32 %v10584_v35  ;;  %v1967_v34 = vmul.f32 %v7647_v15, %v10543_v31  ;;  %v2893_v19 = vmul.f32 %v10584_v35, %v2892_v46  ;;  %v2174_v51 = vpop.xlane.xlu2 %2173 }
 0x2f1   : > { %7030 = vrsqrt.f32 %v10667_v3  ;;  %v2509_v45 = vmul.f32 %v10697_v26, %v10637_v53  ;;  %v3148_v36 = vmul.f32 %v2877_v7, %v13921_v18  ;;  %v2521_v6 = vmul.f32 0.5, %v2520_v32  ;;  %vm10718_vm14 = vmor %vm2894_vm12, %vm2895_vm13  ;;  %v1082_v13 = vpop.f32.mrf.mxu0  ;;  %v7325_v18 = vld [vmem:[%s7480_s28 + $0x188] sm:$0xff] }
 0x2f2   : > { %v5279_v57 = vmul.f32 %v7027_v30, %v4959_v48  ;;  %v10715_v41 = vmul.f32 %v8807_v27, %v10683_v22  ;;  %v2178_v31 = vsel %vm1565_vm0, %v2094_v39, 0.0  ;;  %v4064_v11 = vmul.f32 0.3275911, %v10692_v33  ;;  %v2279_v30 = vpop.xlane.xlu1 %2278  ;;  %v13927_v48 = vld [vmem:[#allocation13_spill] sm:$0xff] }
 0x2f3   : > { %v2510_v40 = vmul.f32 %v10697_v26, %v2509_v45  ;;  %7032 = vrsqrt.f32 %v10695_v9  ;;  %2179 = vadd.xlane.f32.xlu0 %v2178_v31  ;;  %v3743_v25 = vmul.f32 0.5, %v10394_v44  ;;  %v3935_v20 = vsel %vm3871_vm11, 1.0, %v13766_v61 }
 0x2f4   : > { %v5343_v38 = vsub.f32 1.0, %v5279_v57  ;;  %v10730_v8 = vmul.f32 %v2887_v24, %v13924_v21  ;;  %v2004_v54 = vmul.f32 %v7647_v15, %v1903_v43  ;;  %vm2524_vm10 = vweird.f32 %v10582_v2 }
 0x2f5   : > { %v10735_v17 = vsub.f32 %v7323_v16, %v1967_v34  ;;  %v2005_v55 = vmul.f32 %v7647_v15, %v10579_v10  ;;  %v2897_v0 = vsel %vm10718_vm14, %v10584_v35, %v2893_v19  ;;  %v2522_v63 = vsub.f32 1.5, %v2521_v6 }
 0x2f6   : > { %v5407_v44 = vmul.f32 %v5343_v38, %v3935_v20  ;;  %v10743_v43 = vand.u32 2147483647, %v10715_v41  ;;  %v3215_v49 = vmul.f32 %v10600_v14, %v3148_v36  ;;  %v10748_v46 = vadd.f32 1.0, %v4064_v11 }
 0x2f7   : > { %13925 = vst [vmem:[#allocation27_spill] sm:$0xff] %v10735_v17  ;;  %v10746_v5 = vpop.eup %7030  ;;  %v2511_v10 = vmul.f32 0.5, %v2510_v40  ;;  %v2385_v60 = vmul.f32 %v2285_v28, %v7647_v15  ;;  %vm2525_vm15 = vweird.f32 %v10626_v59  ;;  %v10753_v32 = vsub.f32 %v7324_v58, %v2004_v54 }
 0x2f8   : > { %v5471_v47 = vadd.f32 1.0, %v5407_v44  ;;  %v3282_v35 = vadd.f32 %v10609_v42, %v3215_v49  ;;  %v2383_v39 = vmul.f32 %v2279_v30, %v7647_v15  ;;  %v10760_v24 = vmul.f32 %v2897_v0, %v13927_v48  ;;  %vm10794_vm2 = vmor %vm2524_vm10, %vm2525_vm15 }
 0x2f9   : > { %13926 = vst [vmem:[#allocation28_spill] sm:$0xff] %v10753_v32  ;;  %v10757_v7 = vpop.eup %7032  ;;  %v5024_v34 = vsub.f32 0.0, %v10692_v33  ;;  %v10764_v57 = vadd.f32 %v10680_v1, %v1082_v13  ;;  %v10767_v45 = vmul.f32 %v10626_v59, %v2522_v63  ;;  %v10770_v36 = vsub.f32 %v7325_v18, %v2005_v55  ;;  %v1085_v0 = vpop.f32.mrf.mxu0 }
 0x2fa   : > { %v5535_v19 = vmul.f32 %v5471_v47, %v3743_v25  ;;  %v2529_v6 = vmul.f32 %v10746_v5, %v10667_v3  ;;  %v1190_v31 = vmul.f32 0.3275911, %v10743_v43  ;;  %6651 = vmatmul.msk.f32.gmra.mxu2 %vm1565_vm0, %v3282_v35  ;;  %v10777_v11 = vmul.f32 0.5, %v10630_v37  ;;  %v1795_v18 = vpop.xlane.xlu1 %1794 }
 0x2fb   : > { %13928 = vst [vmem:[#allocation42_spill] sm:$0xff] %v10770_v36  ;;  %7034 = vrcp.f32 %v10748_v46  ;;  %v2512_v38 = vsub.f32 1.5, %v2511_v10  ;;  %v10781_v40 = vadd.f32 1e-05, %v2385_v60  ;;  %vm3872_vm9 = vcmp.ge.f32.partialorder %v10649_v4, 0.0 }
 0x2fc   : > { %6708 = vmatmul.msk.f32.gmra.mxu3 %vm577_vm1, %v5535_v19  ;;  %v2909_v25 = vmul.f32 %v10757_v7, %v10695_v9  ;;  %v10786_v20 = vadd.f32 1e-05, %v2383_v39  ;;  %v2132_v21 = vmul.f32 %v10753_v32, %v10753_v32  ;;  %v5088_v54 = vmul.f32 %v5024_v34, %v10692_v33 }
 0x2fd   : > { %v10801_v28 = vmul.f32 %v8807_v27, %v10764_v57  ;;  %v2095_v16 = vmul.f32 %v10735_v17, %v10735_v17  ;;  %v2348_v55 = vmul.f32 %v2174_v51, %v7647_v15  ;;  %v2530_v44 = vmul.f32 %v10746_v5, %v2529_v6 }
 0x2fe   : > { %vm2515_vm3 = vweird.f32 %v10697_v26  ;;  %v10808_v2 = vadd.f32 1.0, %v1190_v31  ;;  %7036 = vrsqrt.f32 %v10786_v20  ;;  %v2513_v13 = vmul.f32 %v10697_v26, %v2512_v38 }
 0x2ff   : > { %7038 = vrsqrt.f32 %v10781_v40  ;;  %v2292_v33 = vsel %vm1565_vm0, %v2132_v21, 0.0  ;;  %v2181_v30 = vsel %vm1565_vm0, %v2095_v16, 0.0  ;;  %v2910_v49 = vmul.f32 %v10757_v7, %v2909_v25 }
 0x300   : > { %2293 = vadd.xlane.f32.xlu1 %v2292_v33  ;;  %2182 = vadd.xlane.f32.xlu0 %v2181_v30  ;;  %v10820_v47 = vadd.f32 1e-05, %v2348_v55  ;;  %v3216_v10 = vmul.f32 %v10600_v14, %v10730_v8  ;;  %v10827_v58 = vsel %vm3872_vm9, 1.0, %v13766_v61  ;;  %vm2514_vm4 = vweird.f32 %v10637_v53 }
 0x301   : > { %v7035_v60 = vpop.eup %7034  ;;  %v10831_v35 = vmul.f32 0.5, %v10683_v22  ;;  %v10834_v39 = vand.u32 2147483647, %v10801_v28  ;;  %vm10838_vm5 = vmor %vm2514_vm4, %vm2515_vm3  ;;  %7040 = vrcp.f32 %v10808_v2  ;;  %v1430_v4 = vsub.f32 0.0, %v10743_v43 }
 0x302   : > { %v3283_v8 = vadd.f32 %v10609_v42, %v3216_v10  ;;  %v10846_v53 = vadd.f32 %v10680_v1, %v1085_v0  ;;  %v5186_v22 = vmul.f32 1.442695, %v5088_v54  ;;  %v2531_v34 = vmul.f32 0.5, %v2530_v44  ;;  %v13933_v44 = vld [vmem:[#allocation44_spill] sm:$0xff] }
 0x303   : > { %v2517_v19 = vsel %vm10838_vm5, %v10697_v26, %v2513_v13  ;;  %v2133_v6 = vmul.f32 %v10770_v36, %v10770_v36  ;;  %v4256_v51 = vmul.f32 %v7035_v60, %v10748_v46  ;;  %vm2534_vm6 = vweird.f32 %v10667_v3  ;;  %v7326_v10 = vld [vmem:[%s7480_s28 + $0x190] sm:$0xff] }
 0x304   : > { %v10853_v31 = vpop.eup %7036  ;;  %v2911_v38 = vmul.f32 0.5, %v2910_v49  ;;  %vm2914_vm7 = vweird.f32 %v10695_v9  ;;  %7042 = vrsqrt.f32 %v10820_v47  ;;  %6652 = vmatmul.msk.f32.gmra.mxu2 %vm1565_vm0, %v3283_v8  ;;  %vm1142_vm11 = vcmp.ge.f32.partialorder %v10715_v41, 0.0  ;;  %v7328_v9 = vld [vmem:[%s7480_s28 + $0x68] sm:$0xff] }
 0x305   : > { %v10860_v25 = vpop.eup %7038  ;;  %v2006_v26 = vmul.f32 %v7647_v15, %v10645_v29  ;;  %v1191_v21 = vmul.f32 0.3275911, %v10834_v39  ;;  %v2295_v46 = vsel %vm1565_vm0, %v2133_v6, 0.0  ;;  %v1446_v54 = vmul.f32 %v1430_v4, %v10743_v43 }
 0x306   : > { %v10870_v16 = vmul.f32 %v8807_v27, %v10846_v53  ;;  %v1968_v55 = vmul.f32 %v7647_v15, %v1795_v18  ;;  %v3112_v13 = vmul.f32 %v2517_v19, %v13933_v44  ;;  %7044 = vpow2.f32 %v5186_v22  ;;  %v10889_v22 = vpop.xlane.xlu2 %1914 }
 0x307   : > { %v2532_v41 = vsub.f32 1.5, %v2531_v34  ;;  %vm2535_vm8 = vweird.f32 %v10746_v5  ;;  %v2899_v29 = vmul.f32 %v10853_v31, %v10786_v20  ;;  %v7041_v33 = vpop.eup %7040  ;;  %v4320_v30 = vsub.f32 2.0, %v4256_v51  ;;  %v7327_v51 = vld [vmem:[%s7480_s28 + $0x60] sm:$0xff] }
 0x308   : > { %v2912_v0 = vsub.f32 1.5, %v2911_v38  ;;  %v10878_v43 = vsel %vm1142_vm11, 1.0, %v13766_v61  ;;  %v2919_v49 = vmul.f32 %v10860_v25, %v10781_v40  ;;  %2296 = vadd.xlane.f32.xlu1 %v2295_v46  ;;  %v10883_v48 = vsub.f32 %v7326_v10, %v2006_v26  ;;  %v3623_v26 = vpop.f32.mrf.mxu2  ;;  %vm10941_vm14 = vmor %vm2534_vm6, %vm2535_vm8 }
 0x309   : > { %v1969_v4 = vmul.f32 %v7647_v15, %v10706_v50  ;;  %v10887_v8 = vadd.f32 1.0, %v1191_v21  ;;  %v3179_v34 = vmul.f32 %v10600_v14, %v3112_v13  ;;  %vm2915_vm12 = vweird.f32 %v10757_v7 }
 0x30a   : > { %13934 = vst [vmem:[#allocation43_spill] sm:$0xff] %v10883_v48  ;;  %v10892_v19 = vpop.eup %7042  ;;  %v1474_v18 = vmul.f32 1.442695, %v1446_v54  ;;  %v10896_v6 = vand.u32 2147483647, %v10870_v16  ;;  %v10899_v38 = vsub.f32 %v7327_v51, %v1968_v55  ;;  %v10902_v50 = vmul.f32 %v10746_v5, %v2532_v41  ;;  %vm10918_vm13 = vmor %vm2914_vm7, %vm2915_vm12 }
 0x30b   : > { %v1238_v21 = vmul.f32 %v7041_v33, %v10808_v2  ;;  %v2900_v46 = vmul.f32 %v10853_v31, %v2899_v29  ;;  %v3246_v44 = vadd.f32 %v10609_v42, %v3179_v34  ;;  %v10907_v13 = vmul.f32 %v7035_v60, %v4320_v30  ;;  %v2171_v30 = vpop.xlane.xlu1 %2170 }
 0x30c   : > { %13935 = vst [vmem:[#allocation22_spill] sm:$0xff] %v10899_v38  ;;  %v2913_v54 = vmul.f32 %v10757_v7, %v2912_v0  ;;  %v1431_v10 = vsub.f32 0.0, %v10834_v39  ;;  %v2920_v55 = vmul.f32 %v10860_v25, %v2919_v49  ;;  %v10912_v51 = vpop.eup %7044  ;;  %7046 = vrcp.f32 %v10887_v8 }
 0x30d   : > { %v2549_v60 = vmul.f32 %v10892_v19, %v10820_v47  ;;  %6615 = vmatmul.msk.f32.gmra.mxu0 %vm1565_vm0, %v3246_v44  ;;  %v10927_v41 = vadd.f32 %v10335_v52, %v3623_v26  ;;  %v3217_v29 = vmul.f32 %v10600_v14, %v10760_v24  ;;  %7048 = vpow2.f32 %v1474_v18  ;;  %v7332_v52 = vld [vmem:[%s7480_s28 + $0x70] sm:$0xff] }
 0x30e   : > { %v10932_v0 = vsub.f32 %v7328_v9, %v1969_v4  ;;  %v1192_v49 = vmul.f32 0.3275911, %v10896_v6  ;;  %v2096_v34 = vmul.f32 %v10899_v38, %v10899_v38  ;;  %v1254_v26 = vsub.f32 2.0, %v1238_v21 }
 0x30f   : > { %vm1143_vm10 = vcmp.ge.f32.partialorder %v10801_v28, 0.0  ;;  %v2901_v24 = vmul.f32 0.5, %v2900_v46  ;;  %v3284_v4 = vadd.f32 %v10609_v42, %v3217_v29  ;;  %v2917_v18 = vsel %vm10918_vm13, %v10757_v7, %v2913_v54  ;;  %v13942_v28 = vld [vmem:[#allocation25_spill] sm:$0xff] }
 0x310   : > { %13938 = vst [vmem:[#allocation36_spill] sm:$0xff] %v10932_v0  ;;  %v1447_v44 = vmul.f32 %v1431_v10, %v10834_v39  ;;  %v2921_v9 = vmul.f32 0.5, %v2920_v55  ;;  %v2347_v63 = vmul.f32 %v2171_v30, %v7647_v15  ;;  %v2550_v3 = vmul.f32 %v10892_v19, %v2549_v60  ;;  %v13941_v55 = vld [vmem:[#allocation38_spill] sm:$0xff]  ;;  %v3626_v7 = vpop.f32.mrf.mxu2 }
 0x311   : > { %v10955_v38 = vmul.f32 %v10927_v41, %v8807_v27  ;;  %6653 = vmatmul.msk.f32.gmra.mxu2 %vm1565_vm0, %v3284_v4  ;;  %v2184_v21 = vsel %vm1565_vm0, %v2096_v34, 0.0  ;;  %v2134_v46 = vmul.f32 %v10883_v48, %v10883_v48  ;;  %v10966_v39 = vmul.f32 0.5, %v10764_v57  ;;  %v10981_v34 = vpop.xlane.xlu2 %1917 }
 0x312   : > { %vm2924_vm15 = vweird.f32 %v10781_v40  ;;  %v10969_v54 = vadd.f32 1.0, %v1192_v49  ;;  %2185 = vadd.xlane.f32.xlu0 %v2184_v21  ;;  %v7047_v10 = vpop.eup %7046  ;;  %v10972_v2 = vmul.f32 %v2917_v18, %v13941_v55  ;;  %v10974_v60 = vmul.f32 %v7041_v33, %v1254_v26 }
 0x313   : > { %v10979_v29 = vsel %vm1143_vm10, 1.0, %v13766_v61  ;;  %v2902_v30 = vsub.f32 1.5, %v2901_v24  ;;  %v10983_v57 = vpop.eup %7048  ;;  %v2922_v4 = vsub.f32 1.5, %v2921_v9  ;;  %vm2904_vm9 = vweird.f32 %v10786_v20  ;;  %v1088_v9 = vpop.f32.mrf.mxu0 }
 0x314   : > { %v10986_v49 = vadd.f32 1e-05, %v2347_v63  ;;  %v2298_v18 = vsel %vm1565_vm0, %v2134_v46, 0.0  ;;  %v1476_v21 = vmul.f32 1.442695, %v1447_v44  ;;  %v2551_v33 = vmul.f32 0.5, %v2550_v3 }
 0x315   : > { %v4001_v26 = vand.u32 2147483647, %v10955_v38  ;;  %2299 = vadd.xlane.f32.xlu1 %v2298_v18  ;;  %v13943_v24 = vsel %vm10794_vm2, %v10626_v59, %v10767_v45  ;;  %v1239_v48 = vmul.f32 %v7047_v10, %v10887_v8  ;;  %vm2925_vm3 = vweird.f32 %v10860_v25  ;;  %v11011_v8 = vld [vmem:[%s13601_s11] ss:$0 sm:$0xff] }
 0x316   : > { %v3113_v55 = vmul.f32 %v13943_v24, %v13942_v28  ;;  %vm2554_vm4 = vweird.f32 %v10820_v47  ;;  %7050 = vrcp.f32 %v10969_v54  ;;  %v2903_v63 = vmul.f32 %v10853_v31, %v2902_v30  ;;  %vm11018_vm2 = vmor %vm2924_vm15, %vm2925_vm3 }
 0x317   : > { %vm2905_vm5 = vweird.f32 %v10853_v31  ;;  %v1432_v37 = vsub.f32 0.0, %v10896_v6  ;;  %v2923_v59 = vmul.f32 %v10860_v25, %v2922_v4  ;;  %v2008_v45 = vmul.f32 %v7647_v15, %v10889_v22 }
 0x318   : > { %v3180_v44 = vmul.f32 %v10600_v14, %v3113_v55  ;;  %7052 = vrsqrt.f32 %v10986_v49  ;;  %v11014_v3 = vadd.f32 %v11011_v8, %v3626_v7  ;;  %v2552_v30 = vsub.f32 1.5, %v2551_v33  ;;  %vm11029_vm6 = vmor %vm2904_vm9, %vm2905_vm5  ;;  %v7330_v55 = vld [vmem:[%s7480_s28 + $0x1a0] sm:$0xff] }
 0x319   : > { %v4065_v4 = vmul.f32 0.3275911, %v4001_v26  ;;  %v2097_v18 = vmul.f32 %v10932_v0, %v10932_v0  ;;  %v1255_v28 = vsub.f32 2.0, %v1239_v48  ;;  %7054 = vpow2.f32 %v1476_v21  ;;  %v1912_v21 = vpop.xlane.xlu1 %1911 }
 0x31a   : > { %v3247_v22 = vadd.f32 %v10609_v42, %v3180_v44  ;;  %vm1144_vm7 = vcmp.ge.f32.partialorder %v10870_v16, 0.0  ;;  %v11035_v7 = vadd.f32 %v10680_v1, %v1088_v9  ;;  %v2907_v33 = vsel %vm11029_vm6, %v10853_v31, %v2903_v63 }
 0x31b   : > { %vm2555_vm11 = vweird.f32 %v10892_v19  ;;  %v11042_v48 = vmul.f32 0.5, %v10846_v53  ;;  %v1448_v20 = vmul.f32 %v1432_v37, %v10896_v6  ;;  %v2927_v1 = vsel %vm11018_vm2, %v10860_v25, %v2923_v59  ;;  %v1801_v53 = vpop.xlane.xlu0 %1800  ;;  %v1921_v59 = vpop.xlane.xlu2 %1920 }
 0x31c   : > { %6616 = vmatmul.msk.f32.gmra.mxu0 %vm1565_vm0, %v3247_v22  ;;  %v11046_v24 = vpop.eup %7050  ;;  %v11052_v9 = vsub.f32 %v7330_v55, %v2008_v45  ;;  %v5025_v31 = vsub.f32 0.0, %v4001_v26  ;;  %v11056_v63 = vmul.f32 %v11014_v3, %v8807_v27  ;;  %v2553_v6 = vmul.f32 %v10892_v19, %v2552_v30  ;;  %v13949_v22 = vld [vmem:[#allocation20_spill] sm:$0xff]  ;;  %vm11076_vm8 = vmor %vm2554_vm4, %vm2555_vm11  ;;  %v3518_v55 = vpop.f32.mrf.mxu0 }
 0x31d   : > { %v11062_v37 = vsel %vm1144_vm7, 1.0, %v13766_v61  ;;  %v11064_v44 = vadd.f32 1.0, %v4065_v4  ;;  %v2187_v25 = vsel %vm1565_vm0, %v2097_v18, 0.0  ;;  %v11069_v46 = vmul.f32 %v7047_v10, %v1255_v28  ;;  %v13952_v18 = vld [vmem:[#allocation17_spill] sm:$0xff] }
 0x31e   : > { %13948 = vst [vmem:[#allocation39_spill] sm:$0xff] %v11052_v9  ;;  %v11067_v45 = vpop.eup %7052  ;;  %v3151_v40 = vmul.f32 %v2907_v33, %v13949_v22  ;;  %v11082_v16 = vmul.f32 %v8807_v27, %v11035_v7  ;;  %v2007_v4 = vmul.f32 %v7647_v15, %v1912_v21  ;;  %2188 = vadd.xlane.f32.xlu0 %v2187_v25  ;;  %v1478_v33 = vmul.f32 1.442695, %v1448_v20  ;;  %v13953_v20 = vld [vmem:[#allocation40_spill] sm:$0xff] }
 0x31f   : > { %v11086_v10 = vmul.f32 %v2927_v1, %v13952_v18  ;;  %v1240_v28 = vmul.f32 %v11046_v24, %v10969_v54  ;;  %v1970_v47 = vmul.f32 %v7647_v15, %v1801_v53  ;;  %v11091_v22 = vpop.eup %7054  ;;  %vm3873_vm12 = vcmp.ge.f32.partialorder %v10955_v38, 0.0 }
 0x320   : > { %v5089_v0 = vmul.f32 %v5025_v31, %v4001_v26  ;;  %v11095_v21 = vand.u32 2147483647, %v11056_v63  ;;  %v2010_v25 = vmul.f32 %v7647_v15, %v1921_v59  ;;  %v2557_v1 = vsel %vm11076_vm8, %v10892_v19, %v2553_v6  ;;  %v7331_v59 = vld [vmem:[%s7480_s28 + $0x198] sm:$0xff] }
 0x321   : > { %7056 = vrcp.f32 %v11064_v44  ;;  %v2539_v54 = vmul.f32 %v11067_v45, %v10986_v49  ;;  %v13954_v26 = vsel %vm10941_vm14, %v10746_v5, %v10902_v50  ;;  %v11111_v53 = vand.u32 2147483647, %v11082_v16 }
 0x322   : > { %v3114_v31 = vmul.f32 %v13954_v26, %v13953_v20  ;;  %v11114_v18 = vsub.f32 %v7331_v59, %v2007_v4  ;;  %v3218_v19 = vmul.f32 %v10600_v14, %v3151_v40  ;;  %v11118_v6 = vadd.f32 %v11011_v8, %v3518_v55  ;;  %v7333_v4 = vld [vmem:[%s7480_s28 + $0x1b0] sm:$0xff] }
 0x323   : > { %v1256_v30 = vsub.f32 2.0, %v1240_v28  ;;  %v2009_v36 = vmul.f32 %v7647_v15, %v10981_v34  ;;  %v11123_v32 = vsub.f32 %v7332_v52, %v1970_v47  ;;  %v5188_v50 = vmul.f32 1.442695, %v5089_v0  ;;  %v13958_v59 = vld [vmem:[#allocation8_spill] sm:$0xff]  ;;  %v7334_v52 = vld [vmem:[%s7480_s28 + $0x1a8] sm:$0xff] }
 0x324   : > { %13955 = vst [vmem:[#allocation6_spill] sm:$0xff] %v11114_v18  ;;  %v3181_v5 = vmul.f32 %v10600_v14, %v3114_v31  ;;  %v4066_v20 = vmul.f32 0.3275911, %v11095_v21  ;;  %v11128_v26 = vsub.f32 %v7333_v4, %v2010_v25  ;;  %v3285_v40 = vadd.f32 %v10609_v42, %v3218_v19  ;;  %v3521_v23 = vpop.f32.mrf.mxu0 }
 0x325   : > { %13956 = vst [vmem:[#allocation33_spill] sm:$0xff] %v11123_v32  ;;  %7058 = vpow2.f32 %v1478_v33  ;;  %v11132_v28 = vmul.f32 0.5, %v10927_v41  ;;  %v11137_v47 = vmul.f32 %v11118_v6, %v8807_v27  ;;  %v11142_v0 = vsel %vm3873_vm12, 1.0, %v13766_v61  ;;  %v2288_v33 = vpop.xlane.xlu1 %2287 }
 0x326   : > { %13957 = vst [vmem:[#allocation37_spill] sm:$0xff] %v11128_v26  ;;  %v3248_v34 = vadd.f32 %v10609_v42, %v3181_v5  ;;  %v2540_v55 = vmul.f32 %v11067_v45, %v2539_v54  ;;  %v1193_v25 = vmul.f32 0.3275911, %v11111_v53  ;;  %6654 = vmatmul.msk.f32.gmra.mxu2 %vm1565_vm0, %v3285_v40  ;;  %v2135_v41 = vmul.f32 %v11114_v18, %v11114_v18 }
 0x327   : > { %v11149_v31 = vpop.eup %7056  ;;  %v11152_v19 = vmul.f32 %v2557_v1, %v13958_v59  ;;  %v11155_v5 = vsub.f32 %v7334_v52, %v2009_v36  ;;  %v11159_v38 = vand.u32 2147483647, %v11137_v47  ;;  %v2098_v54 = vmul.f32 %v11123_v32, %v11123_v32  ;;  %v3629_v59 = vpop.f32.mrf.mxu2 }
 0x328   : > { %6617 = vmatmul.msk.f32.gmra.mxu0 %vm1565_vm0, %v3248_v34  ;;  %v11164_v4 = vmul.f32 %v11046_v24, %v1256_v30  ;;  %7060 = vpow2.f32 %v5188_v50  ;;  %v11166_v40 = vadd.f32 1.0, %v4066_v20  ;;  %v2138_v1 = vmul.f32 %v11128_v26, %v11128_v26 }
 0x329   : > { %13959 = vst [vmem:[#allocation46_spill] sm:$0xff] %v11155_v5  ;;  %v11171_v36 = vmul.f32 0.5, %v11014_v3  ;;  %v5026_v34 = vsub.f32 0.0, %v11095_v21  ;;  %v4030_v52 = vmul.f32 0.3275911, %v11159_v38  ;;  %v2386_v18 = vmul.f32 %v2288_v33, %v7647_v15 }
 0x32a   : > { %v2541_v32 = vmul.f32 0.5, %v2540_v55  ;;  %v11177_v24 = vmul.f32 0.5, %v11035_v7  ;;  %v11179_v30 = vadd.f32 1.0, %v1193_v25  ;;  %v2301_v50 = vsel %vm1565_vm0, %v2135_v41, 0.0 }
 0x32b   : > { %13960 = vst [vmem:[#allocation12_spill] sm:$0xff] %v11171_v36  ;;  %v11182_v20 = vpop.eup %7058  ;;  %v4257_v3 = vmul.f32 %v11149_v31, %v11064_v44  ;;  %vm3874_vm13 = vcmp.ge.f32.partialorder %v11056_v63, 0.0  ;;  %v4094_v26 = vadd.f32 1.0, %v4030_v52  ;;  %2302 = vadd.xlane.f32.xlu1 %v2301_v50  ;;  %v2190_v17 = vsel %vm1565_vm0, %v2098_v54, 0.0 }
 0x32c   : > { %13961 = vst [vmem:[#allocation41_spill] sm:$0xff] %v11177_v24  ;;  %vm2544_vm14 = vweird.f32 %v10986_v49  ;;  %7062 = vrcp.f32 %v11166_v40  ;;  %v1433_v7 = vsub.f32 0.0, %v11111_v53  ;;  %v3630_v55 = vadd.f32 %v11011_v8, %v3629_v59  ;;  %2191 = vadd.xlane.f32.xlu0 %v2190_v17 }
 0x32d   : > { %v2310_v25 = vsel %vm1565_vm0, %v2138_v1, 0.0  ;;  %v5090_v44 = vmul.f32 %v5026_v34, %v11095_v21  ;;  %7064 = vrcp.f32 %v4094_v26  ;;  %v11194_v33 = vadd.f32 1e-05, %v2386_v18  ;;  %v1740_v34 = vld [vmem:[%s7480_s28 + $0x1e8] sm:$0xff] }
 0x32e   : > { %2311 = vadd.xlane.f32.xlu2 %v2310_v25  ;;  %v4448_v41 = vmul.f32 1.0614054, %v10907_v13  ;;  %v11197_v54 = vpop.eup %7060  ;;  %v2542_v52 = vsub.f32 1.5, %v2541_v32  ;;  %7066 = vrcp.f32 %v11179_v30  ;;  %v3219_v59 = vmul.f32 %v10600_v14, %v10972_v2 }
 0x32f   : > { %v2136_v17 = vmul.f32 %v11052_v9, %v11052_v9  ;;  %v4321_v1 = vsub.f32 2.0, %v4257_v3  ;;  %vm1145_vm10 = vcmp.ge.f32.partialorder %v11082_v16, 0.0  ;;  %v2137_v18 = vmul.f32 %v11155_v5, %v11155_v5 }
 0x330   : > { %v4512_v21 = vadd.f32 -1.4531521, %v4448_v41  ;;  %v1449_v50 = vmul.f32 %v1433_v7, %v11111_v53  ;;  %v3811_v32 = vmul.f32 %v3630_v55, %v8807_v27  ;;  %v3286_v25 = vadd.f32 %v10609_v42, %v3219_v59 }
 0x331   : > { %v2304_v2 = vsel %vm1565_vm0, %v2136_v17, 0.0  ;;  %v5190_v12 = vmul.f32 1.442695, %v5090_v44  ;;  %7068 = vrsqrt.f32 %v11194_v33  ;;  %v2307_v41 = vsel %vm1565_vm0, %v2137_v18, 0.0 }
 0x332   : > { %v4576_v3 = vmul.f32 %v4512_v21, %v10907_v13  ;;  %v11215_v9 = vpop.eup %7062  ;;  %v2543_v5 = vmul.f32 %v11067_v45, %v2542_v52  ;;  %vm2545_vm15 = vweird.f32 %v11067_v45  ;;  %v11222_v53 = vsel %vm3874_vm13, 1.0, %v13766_v61  ;;  %6655 = vmatmul.msk.f32.gmra.mxu2 %vm1565_vm0, %v3286_v25  ;;  %v1924_v52 = vpop.xlane.xlu2 %1923 }
 0x333   : > { %v1940_v7 = vsel %vm1565_vm0, %v1740_v34, 0.0  ;;  %v7065_v44 = vpop.eup %7064  ;;  %v11227_v59 = vmul.f32 %v11149_v31, %v4321_v1  ;;  %v11232_v17 = vsel %vm1145_vm10, 1.0, %v13766_v61  ;;  %v11235_v18 = vadd.f32 %v11011_v8, %v3521_v23  ;;  %2305 = vadd.xlane.f32.xlu1 %v2304_v2  ;;  %vm11244_vm3 = vmor %vm2544_vm14, %vm2545_vm15 }
 0x334   : > { %v4640_v21 = vadd.f32 1.4214138, %v4576_v3  ;;  %v11237_v63 = vpop.eup %7066  ;;  %vm3875_vm9 = vcmp.ge.f32.partialorder %v3811_v32, 0.0  ;;  %v4003_v25 = vand.u32 2147483647, %v3811_v32  ;;  %v4222_v34 = vmul.f32 %v7065_v44, %v4094_v26  ;;  %2308 = vadd.xlane.f32.xlu0 %v2307_v41  ;;  %v13968_v32 = vld [vmem:[#allocation31_spill] sm:$0xff] }
 0x335   : > { %v1286_v31 = vmul.f32 1.0614054, %v10974_v60  ;;  %v4258_v23 = vmul.f32 %v11215_v9, %v11166_v40  ;;  %7070 = vpow2.f32 %v5190_v12  ;;  %v1480_v1 = vmul.f32 1.442695, %v1449_v50 }
 0x336   : > { %v4704_v2 = vmul.f32 %v4640_v21, %v10907_v13  ;;  %1941 = vadd.xlane.f32.xlu2 %v1940_v7  ;;  %v2547_v26 = vsel %vm11244_vm3, %v11067_v45, %v2543_v5  ;;  %v11254_v3 = vmul.f32 0.5, %v3630_v55  ;;  %v11257_v49 = vmul.f32 0.5, %v11118_v6  ;;  %v3632_v45 = vpop.f32.mrf.mxu2 }
 0x337   : > { %v4286_v41 = vsub.f32 2.0, %v4222_v34  ;;  %v11259_v62 = vpop.eup %7068  ;;  %v1241_v40 = vmul.f32 %v11237_v63, %v11179_v30  ;;  %v11265_v12 = vsel %vm3875_vm9, 1.0, %v13766_v61  ;;  %v11269_v7 = vmul.f32 %v11235_v18, %v8807_v27 }
 0x338   : > { %13964 = vst [vmem:[#allocation45_spill] sm:$0xff] %v11254_v3  ;;  %v4768_v50 = vadd.f32 -0.28449672, %v4704_v2  ;;  %v4067_v5 = vmul.f32 0.3275911, %v4003_v25  ;;  %vm3838_vm4 = vcmp.ge.f32.partialorder %v11137_v47, 0.0  ;;  %v3115_v16 = vmul.f32 %v2547_v26, %v13968_v32 }
 0x339   : > { %13965 = vst [vmem:[#allocation2_spill] sm:$0xff] %v11257_v49  ;;  %v11272_v6 = vmul.f32 %v7065_v44, %v4286_v41  ;;  %v1302_v55 = vadd.f32 -1.4531521, %v1286_v31  ;;  %v4322_v21 = vsub.f32 2.0, %v4258_v23  ;;  %v5027_v34 = vsub.f32 0.0, %v4003_v25  ;;  %v1738_v26 = vld [vmem:[%s7480_s28 + $0x1d8] sm:$0xff] }
 0x33a   : > { %13966 = vst [vmem:[#allocation5_spill] sm:$0xff] %v11265_v12  ;;  %v4832_v30 = vmul.f32 %v4768_v50, %v10907_v13  ;;  %v4990_v2 = vsub.f32 0.0, %v11159_v38  ;;  %v2929_v3 = vmul.f32 %v11259_v62, %v11194_v33  ;;  %v11281_v49 = vadd.f32 %v11011_v8, %v3632_v45  ;;  %v1927_v24 = vpop.xlane.xlu2 %1926 }
 0x33b   : > { %13967 = vst [vmem:[#allocation48_spill] sm:$0xff] %v11269_v7  ;;  %v1318_v56 = vmul.f32 %v1302_v55, %v10974_v60  ;;  %v11283_v44 = vpop.eup %7070  ;;  %v1257_v31 = vsub.f32 2.0, %v1241_v40  ;;  %7072 = vpow2.f32 %v1480_v1  ;;  %v11286_v41 = vand.u32 2147483647, %v11269_v7 }
 0x33c   : > { %13969 = vst [vmem:[#allocation10_spill] sm:$0xff] %v11281_v49  ;;  %v4896_v23 = vadd.f32 0.2548296, %v4832_v30  ;;  %v11289_v50 = vadd.f32 1.0, %v4067_v5  ;;  %v4414_v32 = vmul.f32 1.0614054, %v11272_v6  ;;  %v3182_v55 = vmul.f32 %v10600_v14, %v3115_v16 }
 0x33d   : > { %v1334_v12 = vadd.f32 1.4214138, %v1318_v56  ;;  %v5091_v36 = vmul.f32 %v5027_v34, %v4003_v25  ;;  %v11296_v40 = vmul.f32 %v11281_v49, %v8807_v27  ;;  %v3220_v1 = vmul.f32 %v10600_v14, %v11086_v10  ;;  %v1739_v30 = vld [vmem:[%s7480_s28 + $0x1e0] sm:$0xff] }
 0x33e   : > { %v4960_v45 = vmul.f32 %v4896_v23, %v10907_v13  ;;  %v2930_v5 = vmul.f32 %v11259_v62, %v2929_v3  ;;  %v3249_v56 = vadd.f32 %v10609_v42, %v3182_v55  ;;  %v1934_v16 = vsel %vm1565_vm0, %v1738_v26, 0.0 }
 0x33f   : > { %v1350_v7 = vmul.f32 %v1334_v12, %v10974_v60  ;;  %v2011_v25 = vmul.f32 %v7647_v15, %v1924_v52  ;;  %v4031_v34 = vmul.f32 0.3275911, %v11286_v41  ;;  %v3287_v23 = vadd.f32 %v10609_v42, %v3220_v1  ;;  %1935 = vadd.xlane.f32.xlu1 %v1934_v16 }
 0x340   : > { %v5280_v13 = vmul.f32 %v10912_v51, %v4960_v45  ;;  %v11312_v10 = vsel %vm3838_vm4, 1.0, %v13766_v61  ;;  %v4478_v3 = vadd.f32 -1.4531521, %v4414_v32  ;;  %6618 = vmatmul.msk.f32.gmra.mxu0 %vm1565_vm0, %v3249_v56  ;;  %v1937_v26 = vsel %vm1565_vm0, %v1739_v30, 0.0 }
 0x341   : > { %v1366_v12 = vadd.f32 -0.28449672, %v1350_v7  ;;  %v11316_v52 = vpop.eup %7072  ;;  %v11319_v51 = vmul.f32 %v11215_v9, %v4322_v21  ;;  %v5054_v55 = vmul.f32 %v4990_v2, %v11159_v38  ;;  %v11323_v1 = vand.u32 2147483647, %v11296_v40  ;;  %6656 = vmatmul.msk.f32.gmra.mxu2 %vm1565_vm0, %v3287_v23  ;;  %1938 = vadd.xlane.f32.xlu0 %v1937_v26  ;;  %v7335_v9 = vld [vmem:[%s7480_s28 + $0x1b8] sm:$0xff] }
 0x342   : > { %v5344_v45 = vsub.f32 1.0, %v5280_v13  ;;  %v11327_v47 = vmul.f32 %v11237_v63, %v1257_v31  ;;  %7074 = vrcp.f32 %v11289_v50  ;;  %v2931_v7 = vmul.f32 0.5, %v2930_v5  ;;  %v3635_v31 = vpop.f32.mrf.mxu2  ;;  %v1930_v26 = vpop.xlane.xlu2 %1929 }
 0x343   : > { %v1382_v32 = vmul.f32 %v1366_v12, %v10974_v60  ;;  %v5192_v30 = vmul.f32 1.442695, %v5091_v36  ;;  %v11332_v21 = vsub.f32 %v7335_v9, %v2011_v25  ;;  %v4095_v2 = vadd.f32 1.0, %v4031_v34  ;;  %v3524_v25 = vpop.f32.mrf.mxu0 }
 0x344   : > { %v5408_v38 = vmul.f32 %v5344_v45, %v10827_v58  ;;  %v4542_v56 = vmul.f32 %v4478_v3, %v11272_v6  ;;  %vm2934_vm5 = vweird.f32 %v11194_v33  ;;  %vm2935_vm2 = vweird.f32 %v11259_v62  ;;  %v7336_v33 = vld [vmem:[%s7480_s28 + $0x1c0] sm:$0xff] }
 0x345   : > { %v1398_v63 = vadd.f32 0.2548296, %v1382_v32  ;;  %v2012_v5 = vmul.f32 %v7647_v15, %v1927_v24  ;;  %v4068_v13 = vmul.f32 0.3275911, %v11323_v1  ;;  %v1287_v36 = vmul.f32 1.0614054, %v11069_v46  ;;  %vm11371_vm6 = vmor %vm2934_vm5, %vm2935_vm2 }
 0x346   : > { %v5472_v16 = vadd.f32 1.0, %v5408_v38  ;;  %v2932_v23 = vsub.f32 1.5, %v2931_v7  ;;  %v4991_v58 = vsub.f32 0.0, %v11286_v41  ;;  %v3183_v3 = vmul.f32 %v10600_v14, %v11152_v19 }
 0x347   : > { %v1414_v34 = vmul.f32 %v1398_v63, %v10974_v60  ;;  %7076 = vrcp.f32 %v4095_v2  ;;  %v1303_v45 = vadd.f32 -1.4531521, %v1287_v36  ;;  %v11347_v24 = vadd.f32 %v11011_v8, %v3635_v31 }
 0x348   : > { %v5536_v12 = vmul.f32 %v5472_v16, %v10777_v11  ;;  %v7075_v32 = vpop.eup %7074  ;;  %v4606_v9 = vadd.f32 1.4214138, %v4542_v56  ;;  %v3250_v7 = vadd.f32 %v10609_v42, %v3183_v3  ;;  %v11352_v49 = vadd.f32 %v11011_v8, %v3524_v25 }
 0x349   : > { %v1494_v38 = vmul.f32 %v10983_v57, %v1414_v34  ;;  %v11355_v14 = vadd.f32 1.0, %v4068_v13  ;;  %v1319_v11 = vmul.f32 %v1303_v45, %v11069_v46  ;;  %v11360_v60 = vmul.f32 %v11347_v24, %v8807_v27 }
 0x34a   : > { %6709 = vmatmul.msk.f32.gmra.mxu3 %vm577_vm1, %v5536_v12  ;;  %v2139_v19 = vmul.f32 %v11332_v21, %v11332_v21  ;;  %v5118_v57 = vmul.f32 1.442695, %v5054_v55  ;;  %v2933_v42 = vmul.f32 %v11259_v62, %v2932_v23  ;;  %v2013_v63 = vmul.f32 %v7647_v15, %v1930_v26  ;;  %6619 = vmatmul.msk.f32.gmra.mxu0 %vm1565_vm0, %v3250_v7 }
 0x34b   : > { %v1510_v56 = vsub.f32 1.0, %v1494_v38  ;;  %v1335_v16 = vadd.f32 1.4214138, %v1319_v11  ;;  %v11376_v13 = vand.u32 2147483647, %v11360_v60  ;;  %v11380_v55 = vmul.f32 %v11352_v49, %v8807_v27 }
 0x34c   : > { %v2313_v36 = vsel %vm1565_vm0, %v2139_v19, 0.0  ;;  %v4259_v25 = vmul.f32 %v7075_v32, %v11289_v50  ;;  %v5055_v23 = vmul.f32 %v4991_v58, %v11286_v41  ;;  %v11386_v34 = vsub.f32 %v7336_v33, %v2012_v5  ;;  %v7337_v5 = vld [vmem:[%s7480_s28 + $0x1c8] sm:$0xff] }
 0x34d   : > { %v1526_v3 = vmul.f32 %v1510_v56, %v10878_v43  ;;  %2314 = vadd.xlane.f32.xlu1 %v2313_v36  ;;  %v7077_v12 = vpop.eup %7076  ;;  %v4670_v26 = vmul.f32 %v4606_v9, %v11272_v6  ;;  %7078 = vrcp.f32 %v11355_v14  ;;  %v1351_v45 = vmul.f32 %v1335_v16, %v11069_v46 }
 0x34e   : > { %v4069_v38 = vmul.f32 0.3275911, %v11376_v13  ;;  %7080 = vpow2.f32 %v5192_v30  ;;  %v2937_v41 = vsel %vm11371_vm6, %v11259_v62, %v2933_v42  ;;  %v11397_v58 = vsub.f32 %v7337_v5, %v2013_v63  ;;  %v13972_v42 = vld [vmem:[#allocation24_spill] sm:$0xff] }
 0x34f   : > { %v1542_v50 = vadd.f32 1.0, %v1526_v3  ;;  %v5028_v43 = vsub.f32 0.0, %v11323_v1  ;;  %v1367_v7 = vadd.f32 -0.28449672, %v1351_v45  ;;  %v11403_v9 = vand.u32 2147483647, %v11380_v55 }
 0x350   : > { %v11400_v11 = vadd.f32 1.0, %v4069_v38  ;;  %v4323_v19 = vsub.f32 2.0, %v4259_v25  ;;  %v4223_v56 = vmul.f32 %v7077_v12, %v4095_v2  ;;  %v2140_v31 = vmul.f32 %v11386_v34, %v11386_v34 }
 0x351   : > { %v1558_v30 = vmul.f32 %v1542_v50, %v10831_v35  ;;  %v4734_v62 = vadd.f32 -0.28449672, %v4670_v26  ;;  %v3154_v63 = vmul.f32 %v2937_v41, %v13972_v42  ;;  %v5120_v16 = vmul.f32 1.442695, %v5055_v23 }
 0x352   : > { %v1383_v36 = vmul.f32 %v1367_v7, %v11069_v46  ;;  %7082 = vpow2.f32 %v5118_v57  ;;  %v4032_v33 = vmul.f32 0.3275911, %v11403_v9  ;;  %v2316_v25 = vsel %vm1565_vm0, %v2140_v31, 0.0  ;;  %v1741_v57 = vld [vmem:[%s7480_s28 + $0x1f0] sm:$0xff]  ;;  %v1933_v7 = vpop.xlane.xlu2 %1932 }
 0x353   : > { %6607 = vmatmul.msk.f32.gmra.mxu1 %vm1565_vm0, %v1558_v30  ;;  %v2141_v35 = vmul.f32 %v11397_v58, %v11397_v58  ;;  %v7079_v2 = vpop.eup %7078  ;;  %v11416_v3 = vmul.f32 0.5, %v11235_v18  ;;  %v5092_v26 = vmul.f32 %v5028_v43, %v11323_v1  ;;  %7084 = vrcp.f32 %v11400_v11  ;;  %2317 = vadd.xlane.f32.xlu0 %v2316_v25  ;;  %v11432_v43 = vld [vmem:[%s13598_s8] ss:$0 sm:$0xff] }
 0x354   : > { %v1399_v45 = vadd.f32 0.2548296, %v1383_v36  ;;  %v11421_v23 = vpop.eup %7080  ;;  %v11423_v38 = vmul.f32 %v7075_v32, %v4323_v19  ;;  %v4287_v41 = vsub.f32 2.0, %v4223_v56  ;;  %v1288_v5 = vmul.f32 1.0614054, %v11164_v4  ;;  %v1742_v19 = vld [vmem:[%s7480_s28 + $0x1f8] sm:$0xff] }
 0x355   : > { %v2319_v50 = vsel %vm1565_vm0, %v2141_v35, 0.0  ;;  %v4798_v18 = vmul.f32 %v4734_v62, %v11272_v6  ;;  %7086 = vpow2.f32 %v5120_v16  ;;  %v3221_v32 = vmul.f32 %v11432_v43, %v3154_v63  ;;  %v11444_v16 = vld [vmem:[%s13599_s9] ss:$0 sm:$0xff] }
 0x356   : > { %v1415_v1 = vmul.f32 %v1399_v45, %v11069_v46  ;;  %2320 = vadd.xlane.f32.xlu2 %v2319_v50  ;;  %v4260_v56 = vmul.f32 %v7079_v2, %v11355_v14  ;;  %v11437_v30 = vadd.f32 1.0, %v4032_v33  ;;  %v1304_v31 = vadd.f32 -1.4531521, %v1288_v5  ;;  %v7340_v50 = vld [vmem:[%s7480_s28 + $0x1d0] sm:$0xff] }
 0x357   : > { %v1943_v42 = vsel %vm1565_vm0, %v1741_v57, 0.0  ;;  %v5194_v62 = vmul.f32 1.442695, %v5092_v26  ;;  %v3288_v36 = vadd.f32 %v11444_v16, %v3221_v32  ;;  %v2014_v63 = vmul.f32 %v7647_v15, %v1933_v7 }
 0x358   : > { %v1495_v46 = vmul.f32 %v11091_v22, %v1415_v1  ;;  %1944 = vadd.xlane.f32.xlu1 %v1943_v42  ;;  %v7083_v14 = vpop.eup %7082  ;;  %v11448_v33 = vmul.f32 %v7077_v12, %v4287_v41  ;;  %v1320_v25 = vmul.f32 %v1304_v31, %v11164_v4  ;;  %v1946_v35 = vsel %vm1565_vm0, %v1742_v19, 0.0 }
 0x359   : > { %v4449_v26 = vmul.f32 1.0614054, %v11227_v59  ;;  %v11453_v22 = vpop.eup %7084  ;;  %v4862_v45 = vadd.f32 0.2548296, %v4798_v18  ;;  %6657 = vmatmul.msk.f32.gmra.mxu2 %vm1565_vm0, %v3288_v36  ;;  %v11457_v5 = vsub.f32 %v7340_v50, %v2014_v63  ;;  %v4450_v7 = vmul.f32 1.0614054, %v11319_v51 }
 0x35a   : > { %v1511_v57 = vsub.f32 1.0, %v1495_v46  ;;  %v4324_v1 = vsub.f32 2.0, %v4260_v56  ;;  %7088 = vrcp.f32 %v11437_v30  ;;  %v1336_v12 = vadd.f32 1.4214138, %v1320_v25 }
 0x35b   : > { %13973 = vst [vmem:[#allocation18_spill] sm:$0xff] %v11457_v5  ;;  %v4513_v41 = vadd.f32 -1.4531521, %v4449_v26  ;;  %v11461_v32 = vpop.eup %7086  ;;  %1947 = vadd.xlane.f32.xlu0 %v1946_v35  ;;  %v2142_v18 = vmul.f32 %v11457_v5, %v11457_v5  ;;  %v4514_v31 = vadd.f32 -1.4531521, %v4450_v7  ;;  %7090 = vpow2.f32 %v5194_v62 }
 0x35c   : > { %v1527_v19 = vmul.f32 %v1511_v57, %v10979_v29  ;;  %v1289_v42 = vmul.f32 1.0614054, %v11327_v47  ;;  %v4261_v46 = vmul.f32 %v11453_v22, %v11400_v11  ;;  %v1352_v56 = vmul.f32 %v1336_v12, %v11164_v4 }
 0x35d   : > { %v4577_v36 = vmul.f32 %v4513_v41, %v11227_v59  ;;  %v2322_v25 = vsel %vm1565_vm0, %v2142_v18, 0.0  ;;  %v4578_v29 = vmul.f32 %v4514_v31, %v11319_v51  ;;  %v4926_v26 = vmul.f32 %v4862_v45, %v11272_v6 }
 0x35e   : > { %v1543_v63 = vadd.f32 1.0, %v1527_v19  ;;  %v1305_v35 = vadd.f32 -1.4531521, %v1289_v42  ;;  %v11474_v57 = vmul.f32 %v7079_v2, %v4324_v1  ;;  %v1368_v50 = vadd.f32 -0.28449672, %v1352_v56 }
 0x35f   : > { %v4641_v7 = vadd.f32 1.4214138, %v4577_v36  ;;  %v4642_v11 = vadd.f32 1.4214138, %v4578_v29  ;;  %v4451_v41 = vmul.f32 1.0614054, %v11423_v38  ;;  %v5246_v36 = vmul.f32 %v7083_v14, %v4926_v26 }
 0x360   : > { %v1559_v62 = vmul.f32 %v1543_v63, %v10966_v39  ;;  %2323 = vadd.xlane.f32.xlu1 %v2322_v25  ;;  %v1321_v12 = vmul.f32 %v1305_v35, %v11327_v47  ;;  %v11479_v19 = vpop.eup %7088  ;;  %v1384_v31 = vmul.f32 %v1368_v50, %v11164_v4  ;;  %v4415_v2 = vmul.f32 1.0614054, %v11448_v33 }
 0x361   : > { %v4705_v6 = vmul.f32 %v4641_v7, %v11227_v59  ;;  %v4325_v45 = vsub.f32 2.0, %v4261_v46  ;;  %v4706_v39 = vmul.f32 %v4642_v11, %v11319_v51  ;;  %v4515_v42 = vadd.f32 -1.4531521, %v4451_v41  ;;  %v11487_v56 = vpop.eup %7090 }
 0x362   : > { %6608 = vmatmul.msk.f32.gmra.mxu1 %vm1565_vm0, %v1559_v62  ;;  %v1337_v1 = vadd.f32 1.4214138, %v1321_v12  ;;  %v1400_v63 = vadd.f32 0.2548296, %v1384_v31  ;;  %v4479_v29 = vadd.f32 -1.4531521, %v4415_v2  ;;  %v4224_v46 = vmul.f32 %v11479_v19, %v11437_v30  ;;  %v2291_v12 = vpop.xlane.xlu1 %2290 }
 0x363   : > { %v4769_v25 = vadd.f32 -0.28449672, %v4705_v6  ;;  %v4770_v35 = vadd.f32 -0.28449672, %v4706_v39  ;;  %v4579_v7 = vmul.f32 %v4515_v42, %v11423_v38  ;;  %v4452_v18 = vmul.f32 1.0614054, %v11474_v57 }
 0x364   : > { %v1353_v50 = vmul.f32 %v1337_v1, %v11327_v47  ;;  %v1416_v62 = vmul.f32 %v1400_v63, %v11164_v4  ;;  %v4543_v14 = vmul.f32 %v4479_v29, %v11448_v33  ;;  %v2387_v6 = vmul.f32 %v2291_v12, %v7647_v15 }
 0x365   : > { %v4833_v11 = vmul.f32 %v4769_v25, %v11227_v59  ;;  %v4834_v26 = vmul.f32 %v4770_v35, %v11319_v51  ;;  %v4643_v31 = vadd.f32 1.4214138, %v4579_v7  ;;  %v4516_v42 = vadd.f32 -1.4531521, %v4452_v18 }
 0x366   : > { %v1369_v41 = vadd.f32 -0.28449672, %v1353_v50  ;;  %v1496_v2 = vmul.f32 %v11182_v20, %v1416_v62  ;;  %v4607_v1 = vadd.f32 1.4214138, %v4543_v14  ;;  %v11502_v63 = vadd.f32 1e-05, %v2387_v6 }
 0x367   : > { %v4897_v39 = vadd.f32 0.2548296, %v4833_v11  ;;  %v4898_v5 = vadd.f32 0.2548296, %v4834_v26  ;;  %v4707_v4 = vmul.f32 %v4643_v31, %v11423_v38  ;;  %v4580_v50 = vmul.f32 %v4516_v42, %v11474_v57 }
 0x368   : > { %v1385_v30 = vmul.f32 %v1369_v41, %v11327_v47  ;;  %v1512_v25 = vsub.f32 1.0, %v1496_v2  ;;  %v4671_v35 = vmul.f32 %v4607_v1, %v11448_v33  ;;  %7092 = vrsqrt.f32 %v11502_v63 }
 0x369   : > { %v4961_v29 = vmul.f32 %v4897_v39, %v11227_v59  ;;  %v4962_v7 = vmul.f32 %v4898_v5, %v11319_v51  ;;  %v4771_v62 = vadd.f32 -0.28449672, %v4707_v4  ;;  %v5310_v18 = vsub.f32 1.0, %v5246_v36  ;;  %v2177_v39 = vpop.xlane.xlu0 %2176 }
 0x36a   : > { %v1401_v20 = vadd.f32 0.2548296, %v1385_v30  ;;  %v11510_v11 = vmul.f32 %v11453_v22, %v4325_v45  ;;  %v1528_v12 = vmul.f32 %v1512_v25, %v11062_v37  ;;  %v4288_v26 = vsub.f32 2.0, %v4224_v46 }
 0x36b   : > { %v5281_v14 = vmul.f32 %v11197_v54, %v4961_v29  ;;  %v5282_v59 = vmul.f32 %v11283_v44, %v4962_v7  ;;  %v4835_v31 = vmul.f32 %v4771_v62, %v11423_v38  ;;  %v4735_v6 = vadd.f32 -0.28449672, %v4671_v35 }
 0x36c   : > { %v1417_v41 = vmul.f32 %v1401_v20, %v11327_v47  ;;  %v1544_v51 = vadd.f32 1.0, %v1528_v12  ;;  %v4644_v2 = vadd.f32 1.4214138, %v4580_v50  ;;  %v2349_v37 = vmul.f32 %v2177_v39, %v7647_v15 }
 0x36d   : > { %v5345_v5 = vsub.f32 1.0, %v5281_v14  ;;  %v5346_v36 = vsub.f32 1.0, %v5282_v59  ;;  %v4899_v45 = vadd.f32 0.2548296, %v4835_v31  ;;  %v5374_v54 = vmul.f32 %v5310_v18, %v11312_v10 }
 0x36e   : > { %v1497_v22 = vmul.f32 %v11316_v52, %v1417_v41  ;;  %v1560_v46 = vmul.f32 %v1544_v51, %v11042_v48  ;;  %v4799_v47 = vmul.f32 %v4735_v6, %v11448_v33  ;;  %v7093_v1 = vpop.eup %7092  ;;  %v4708_v25 = vmul.f32 %v4644_v2, %v11474_v57 }
 0x36f   : > { %v5409_v44 = vmul.f32 %v5345_v5, %v11142_v0  ;;  %v5410_v42 = vmul.f32 %v5346_v36, %v11222_v53  ;;  %v4963_v4 = vmul.f32 %v4899_v45, %v11423_v38  ;;  %v2939_v29 = vmul.f32 %v7093_v1, %v11502_v63  ;;  %v11559_v45 = vpop.f32.mrf.mxu1 }
 0x370   : > { %v1513_v30 = vsub.f32 1.0, %v1497_v22  ;;  %6609 = vmatmul.msk.f32.gmra.mxu1 %vm1565_vm0, %v1560_v46  ;;  %v4863_v10 = vadd.f32 0.2548296, %v4799_v47  ;;  %v11528_v35 = vadd.f32 1e-05, %v2349_v37  ;;  %v11531_v48 = vmul.f32 %v11479_v19, %v4288_v26  ;;  %13979 = vst [vmem:[#allocation49_spill] sm:$0xff] %v11559_v45 }
 0x371   : > { %v5473_v52 = vadd.f32 1.0, %v5409_v44  ;;  %v5283_v53 = vmul.f32 %v11421_v23, %v4963_v4  ;;  %v4453_v50 = vmul.f32 1.0614054, %v11510_v11  ;;  %v2940_v7 = vmul.f32 %v7093_v1, %v2939_v29  ;;  %v13974_v23 = vld [vmem:[#allocation48_spill] sm:$0xff]  ;;  %v2180_v6 = vpop.xlane.xlu0 %2179  ;;  %v13981_v46 = vld [vmem:[#allocation5_spill] sm:$0xff] }
 0x372   : > { %v1529_v0 = vmul.f32 %v1513_v30, %v11232_v17  ;;  %vm2944_vm7 = vweird.f32 %v11502_v63  ;;  %v4927_v20 = vmul.f32 %v4863_v10, %v11448_v33  ;;  %v5474_v62 = vadd.f32 1.0, %v5410_v42 }
 0x373   : > { %v5537_v38 = vmul.f32 %v5473_v52, %v11132_v28  ;;  %vm2945_vm11 = vweird.f32 %v7093_v1  ;;  %v4772_v12 = vadd.f32 -0.28449672, %v4708_v25  ;;  %v5347_v19 = vsub.f32 1.0, %v5283_v53  ;;  %v13975_v28 = vld [vmem:[#allocation41_spill] sm:$0xff]  ;;  %v13982_v53 = vld [vmem:[#allocation2_spill] sm:$0xff] }
 0x374   : > { %v1545_v18 = vadd.f32 1.0, %v1529_v0  ;;  %v2941_v14 = vmul.f32 0.5, %v2940_v7  ;;  %v5247_v17 = vmul.f32 %v11461_v32, %v4927_v20  ;;  %7094 = vrsqrt.f32 %v11528_v35  ;;  %vm11554_vm13 = vmor %vm2944_vm7, %vm2945_vm11 }
 0x375   : > { %6710 = vmatmul.msk.f32.gmra.mxu3 %vm577_vm1, %v5537_v38  ;;  %vm3839_vm8 = vcmp.ge.f32.partialorder %v13974_v23, 0.0  ;;  %v4836_v59 = vmul.f32 %v4772_v12, %v11474_v57  ;;  %v4517_v41 = vadd.f32 -1.4531521, %v4453_v50  ;;  %vm3876_vm12 = vcmp.ge.f32.partialorder %v11296_v40, 0.0 }
 0x376   : > { %v1561_v26 = vmul.f32 %v1545_v18, %v13975_v28  ;;  %v13976_v33 = vsub.f32 0.0, %v11376_v13  ;;  %v2942_v51 = vsub.f32 1.5, %v2941_v14  ;;  %v4416_v5 = vmul.f32 1.0614054, %v11531_v48 }
 0x377   : > { %v5438_v32 = vadd.f32 1.0, %v5374_v54  ;;  %v4992_v2 = vsub.f32 0.0, %v11403_v9  ;;  %v4900_v36 = vadd.f32 0.2548296, %v4836_v59  ;;  %v4581_v22 = vmul.f32 %v4517_v41, %v11510_v11 }
 0x378   : > { %v5093_v31 = vmul.f32 %v13976_v33, %v11376_v13  ;;  %v13980_v13 = vld [vmem:[#allocation12_spill] sm:$0xff]  ;;  %6610 = vmatmul.msk.f32.gmra.mxu1 %vm1565_vm0, %v1561_v26  ;;  %v5411_v54 = vmul.f32 %v5347_v19, %v13981_v46  ;;  %v2943_v44 = vmul.f32 %v7093_v1, %v2942_v51  ;;  %v5311_v47 = vsub.f32 1.0, %v5247_v17 }
 0x379   : > { %v5538_v37 = vmul.f32 %v5474_v62, %v13980_v13  ;;  %v4964_v42 = vmul.f32 %v4900_v36, %v11474_v57  ;;  %v4645_v63 = vadd.f32 1.4214138, %v4581_v22  ;;  %v4480_v30 = vadd.f32 -1.4531521, %v4416_v5  ;;  %v13983_v57 = vld [vmem:[#allocation35_spill] sm:$0xff]  ;;  %v3527_v62 = vpop.f32.mrf.mxu0  ;;  %v13985_v5 = vld [vmem:[#allocation45_spill] sm:$0xff]  ;;  %v2183_v22 = vpop.xlane.xlu0 %2182 }
 0x37a   : > { %v2350_v4 = vmul.f32 %v2180_v6, %v7647_v15  ;;  %v7095_v25 = vpop.eup %7094  ;;  %v3903_v52 = vsel %vm3839_vm8, 1.0, %v13766_v61  ;;  %v3940_v29 = vsel %vm3876_vm12, 1.0, %v13766_v61  ;;  %v5196_v10 = vmul.f32 1.442695, %v5093_v31  ;;  %v11589_v31 = vpop.f32.mrf.mxu1  ;;  %v13986_v13 = vld [vmem:[#allocation10_spill] sm:$0xff] }
 0x37b   : > { %v2947_v0 = vsel %vm11554_vm13, %v7093_v1, %v2943_v44  ;;  %v5502_v50 = vmul.f32 %v5438_v32, %v13982_v53  ;;  %v5284_v7 = vmul.f32 %v11487_v56, %v4964_v42  ;;  %v2559_v20 = vmul.f32 %v7095_v25, %v11528_v35  ;;  %13984 = vst [vmem:[#allocation16_spill] sm:$0xff] %v11589_v31 }
 0x37c   : > { %v3155_v38 = vmul.f32 %v2947_v0, %v13983_v57  ;;  %v5056_v18 = vmul.f32 %v4992_v2, %v11403_v9  ;;  %v5475_v12 = vadd.f32 1.0, %v5411_v54  ;;  %v5375_v40 = vmul.f32 %v5311_v47, %v3903_v52  ;;  %v2294_v9 = vpop.xlane.xlu1 %2293  ;;  %v13987_v57 = vld [vmem:[#allocation47_spill] sm:$0xff] }
 0x37d   : > { %6711 = vmatmul.msk.f32.gmra.mxu3 %vm577_vm1, %v5538_v37  ;;  %v4709_v19 = vmul.f32 %v4645_v63, %v11510_v11  ;;  %v5348_v14 = vsub.f32 1.0, %v5284_v7  ;;  %v2560_v17 = vmul.f32 %v7095_v25, %v2559_v20  ;;  %v4544_v1 = vmul.f32 %v4480_v30, %v11531_v48 }
 0x37e   : > { %v11582_v23 = vadd.f32 1e-05, %v2350_v4  ;;  %7096 = vpow2.f32 %v5196_v10  ;;  %v11585_v56 = vadd.f32 %v11011_v8, %v3527_v62  ;;  %v3222_v26 = vmul.f32 %v11432_v43, %v3155_v38 }
 0x37f   : > { %v4773_v28 = vadd.f32 -0.28449672, %v4709_v19  ;;  %v5412_v59 = vmul.f32 %v5348_v14, %v3940_v29  ;;  %v2561_v41 = vmul.f32 0.5, %v2560_v17  ;;  %v4608_v33 = vadd.f32 1.4214138, %v4544_v1 }
 0x380   : > { %7098 = vrsqrt.f32 %v11582_v23  ;;  %v5122_v51 = vmul.f32 1.442695, %v5056_v18  ;;  %v5539_v6 = vmul.f32 %v5475_v12, %v13985_v5  ;;  %6675 = vmatmul.msk.f32.vlgmr.msrb.gmra.mxu1 %vm577_vm1, %v5502_v50  ;;  %v5439_v32 = vadd.f32 1.0, %v5375_v40  ;;  %v3638_v50 = vpop.f32.mrf.mxu2  ;;  %v11630_v14 = vld [vmem:[%s13601_s11] ss:$0 sm:$0xff] }
 0x381   : > { %v4837_v2 = vmul.f32 %v4773_v28, %v11510_v11  ;;  %v2562_v8 = vsub.f32 1.5, %v2561_v41  ;;  %vm2565_vm14 = vweird.f32 %v7095_v25  ;;  %v4672_v39 = vmul.f32 %v4608_v33, %v11531_v48 }
 0x382   : > { %v3289_v36 = vadd.f32 %v11444_v16, %v3222_v26  ;;  %v3748_v37 = vmul.f32 0.5, %v13986_v13  ;;  %vm2564_vm10 = vweird.f32 %v11528_v35  ;;  %v11600_v54 = vmul.f32 %v11585_v56, %v8807_v27 }
 0x383   : > { %v4901_v46 = vadd.f32 0.2548296, %v4837_v2  ;;  %v5476_v44 = vadd.f32 1.0, %v5412_v59  ;;  %v2563_v47 = vmul.f32 %v7095_v25, %v2562_v8  ;;  %v4736_v42 = vadd.f32 -0.28449672, %v4672_v39  ;;  %vm2566_vm15 = vmor %vm2564_vm10, %vm2565_vm14 }
 0x384   : > { %6658 = vmatmul.msk.f32.gmra.mxu2 %vm1565_vm0, %v3289_v36  ;;  %v2388_v63 = vmul.f32 %v2294_v9, %v7647_v15  ;;  %v7097_v30 = vpop.eup %7096  ;;  %7100 = vpow2.f32 %v5122_v51  ;;  %v5503_v4 = vmul.f32 %v5439_v32, %v11416_v3  ;;  %v2351_v52 = vmul.f32 %v2183_v22, %v7647_v15  ;;  %v2297_v40 = vpop.xlane.xlu1 %2296 }
 0x385   : > { %6712 = vmatmul.msk.f32.gmra.mxu3 %vm577_vm1, %v5539_v6  ;;  %v4965_v35 = vmul.f32 %v4901_v46, %v11510_v11  ;;  %vm3877_vm9 = vcmp.ge.f32.partialorder %v11360_v60, 0.0  ;;  %v2567_v10 = vsel %vm2566_vm15, %v7095_v25, %v2563_v47  ;;  %v4800_v0 = vmul.f32 %v4736_v42, %v11531_v48  ;;  %v11640_v9 = vpop.f32.mrf.mxu1  ;;  %v13989_v60 = vld [vmem:[#allocation32_spill] sm:$0xff]  ;;  %v11659_v22 = vpop.f32.mrf.mxu3 }
 0x386   : > { %v11609_v29 = vpop.eup %7098  ;;  %v11613_v53 = vadd.f32 1e-05, %v2388_v63  ;;  %v3117_v38 = vmul.f32 %v2567_v10, %v13987_v57  ;;  %v11617_v3 = vand.u32 2147483647, %v11600_v54  ;;  %v5540_v20 = vmul.f32 %v5476_v44, %v3748_v37  ;;  %13988 = vst [vmem:[#allocation7_spill] sm:$0xff] %v11640_v9 }
 0x387   : > { %v5285_v7 = vmul.f32 %v7097_v30, %v4965_v35  ;;  %v2569_v11 = vmul.f32 %v11609_v29, %v11582_v23  ;;  %v4864_v62 = vadd.f32 0.2548296, %v4800_v0  ;;  %v11622_v18 = vadd.f32 1e-05, %v2351_v52 }
 0x388   : > { %7102 = vrsqrt.f32 %v11613_v53  ;;  %6676 = vmatmul.msk.f32.gmra.mxu1 %vm577_vm1, %v5503_v4  ;;  %v3184_v19 = vmul.f32 %v11432_v43, %v3117_v38  ;;  %v11633_v17 = vadd.f32 %v11630_v14, %v3638_v50  ;;  %v3941_v1 = vsel %vm3877_vm9, 1.0, %v13766_v61 }
 0x389   : > { %v5349_v25 = vsub.f32 1.0, %v5285_v7  ;;  %v2570_v12 = vmul.f32 %v11609_v29, %v2569_v11  ;;  %v4928_v28 = vmul.f32 %v4864_v62, %v11531_v48  ;;  %7104 = vrsqrt.f32 %v11622_v18 }
 0x38a   : > { %v7101_v26 = vpop.eup %7100  ;;  %v4033_v41 = vmul.f32 0.3275911, %v11617_v3  ;;  %vm3840_vm3 = vcmp.ge.f32.partialorder %v11380_v55, 0.0  ;;  %v2389_v5 = vmul.f32 %v2297_v40, %v7647_v15  ;;  %v3251_v6 = vadd.f32 %v11444_v16, %v3184_v19 }
 0x38b   : > { %v5413_v59 = vmul.f32 %v5349_v25, %v3941_v1  ;;  %v2571_v33 = vmul.f32 0.5, %v2570_v12  ;;  %v5248_v51 = vmul.f32 %v7101_v26, %v4928_v28  ;;  %v11648_v32 = vmul.f32 %v13989_v60, %v8807_v27  ;;  %v13993_v25 = vld [vmem:[#allocation30_spill] sm:$0xff] }
 0x38c   : > { %v11653_v8 = vmul.f32 %v11633_v17, %v8807_v27  ;;  %v3749_v55 = vmul.f32 0.5, %v11347_v24  ;;  %6620 = vmatmul.msk.f32.gmra.mxu0 %vm1565_vm0, %v3251_v6  ;;  %v3904_v13 = vsel %vm3840_vm3, 1.0, %v13766_v61  ;;  %v4097_v37 = vadd.f32 1.0, %v4033_v41 }
 0x38d   : > { %13990 = vst [vmem:[#allocation50_spill] sm:$0xff] %v11648_v32  ;;  %6713 = vmatmul.msk.f32.gmra.mxu3 %vm577_vm1, %v5540_v20  ;;  %v5477_v48 = vadd.f32 1.0, %v5413_v59  ;;  %v2572_v2 = vsub.f32 1.5, %v2571_v33  ;;  %v5312_v36 = vsub.f32 1.0, %v5248_v51  ;;  %vm2575_vm4 = vweird.f32 %v11609_v29  ;;  %v11684_v62 = vpop.f32.mrf.mxu1  ;;  %v11690_v28 = vpop.f32.mrf.mxu3 }
 0x38e   : > { %v11655_v39 = vpop.eup %7102  ;;  %v11666_v63 = vadd.f32 1e-05, %v2389_v5  ;;  %v11669_v24 = vand.u32 2147483647, %v11653_v8  ;;  %v11672_v30 = vand.u32 2147483647, %v11648_v32  ;;  %vm2574_vm5 = vweird.f32 %v11582_v23  ;;  %v2186_v59 = vpop.xlane.xlu0 %2185 }
 0x38f   : > { %v2949_v46 = vmul.f32 %v11655_v39, %v11613_v53  ;;  %v7105_v44 = vpop.eup %7104  ;;  %v5376_v47 = vmul.f32 %v5312_v36, %v3904_v13  ;;  %v2573_v42 = vmul.f32 %v11609_v29, %v2572_v2  ;;  %v5541_v4 = vmul.f32 %v5477_v48, %v3749_v55  ;;  %vm2576_vm2 = vmor %vm2574_vm5, %vm2575_vm4  ;;  %13992 = vst [vmem:[#allocation21_spill] sm:$0xff] %v11684_v62  ;;  %v2300_v2 = vpop.xlane.xlu1 %2299  ;;  %v13995_v36 = vld [vmem:[#allocation27_spill] sm:$0xff] }
 0x390   : > { %13991 = vst [vmem:[#allocation11_spill] sm:$0xff] %v11672_v30  ;;  %v2579_v52 = vmul.f32 %v7105_v44, %v11622_v18  ;;  %v3712_v10 = vmul.f32 0.5, %v11352_v49  ;;  %7106 = vrcp.f32 %v4097_v37  ;;  %v4070_v57 = vmul.f32 0.3275911, %v11669_v24 }
 0x391   : > { %v2950_v35 = vmul.f32 %v11655_v39, %v2949_v46  ;;  %v5440_v0 = vadd.f32 1.0, %v5376_v47  ;;  %v2577_v7 = vsel %vm2576_vm2, %v11609_v29, %v2573_v42  ;;  %7108 = vrsqrt.f32 %v11666_v63  ;;  %13994 = vst [vmem:[#allocation15_spill] sm:$0xff] %v11690_v28 }
 0x392   : > { %v2580_v50 = vmul.f32 %v7105_v44, %v2579_v52  ;;  %v4045_v20 = vmul.f32 0.3275911, %v11672_v30  ;;  %v4134_v23 = vadd.f32 1.0, %v4070_v57  ;;  %vm2584_vm6 = vweird.f32 %v11622_v18  ;;  %v7344_v30 = vld [vmem:[%s7480_s28 + $0x1e8] sm:$0xff] }
 0x393   : > { %v5504_v38 = vmul.f32 %v5440_v0, %v3712_v10  ;;  %v2951_v11 = vmul.f32 0.5, %v2950_v35  ;;  %v3118_v12 = vmul.f32 %v2577_v7, %v13993_v25  ;;  %vm2585_vm7 = vweird.f32 %v7105_v44 }
 0x394   : > { %v2581_v49 = vmul.f32 0.5, %v2580_v50  ;;  %7110 = vrcp.f32 %v4134_v23  ;;  %v4109_v1 = vadd.f32 1.0, %v4045_v20  ;;  %vm2586_vm11 = vmor %vm2584_vm6, %vm2585_vm7  ;;  %vm2955_vm8 = vweird.f32 %v11655_v39 }
 0x395   : > { %6714 = vmatmul.msk.f32.gmra.mxu3 %vm577_vm1, %v5541_v4  ;;  %6677 = vmatmul.msk.f32.gmra.mxu1 %vm577_vm1, %v5504_v38  ;;  %v2952_v29 = vsub.f32 1.5, %v2951_v11  ;;  %v3185_v51 = vmul.f32 %v11432_v43, %v3118_v12  ;;  %vm2954_vm12 = vweird.f32 %v11613_v53  ;;  %v11702_v47 = vpop.f32.mrf.mxu1  ;;  %v2390_v53 = vmul.f32 %v2300_v2, %v7647_v15  ;;  %v11719_v7 = vpop.f32.mrf.mxu3  ;;  %v13998_v11 = vld [vmem:[#allocation28_spill] sm:$0xff] }
 0x396   : > { %v2582_v40 = vsub.f32 1.5, %v2581_v49  ;;  %v7107_v19 = vpop.eup %7106  ;;  %7112 = vrcp.f32 %v4109_v1  ;;  %13996 = vst [vmem:[#allocation14_spill] sm:$0xff] %v11702_v47  ;;  %vm2956_vm13 = vmor %vm2954_vm12, %vm2955_vm8  ;;  %v2189_v25 = vpop.xlane.xlu0 %2188  ;;  %vm3841_vm14 = vcmp.ge.f32.partialorder %v11600_v54, 0.0  ;;  %vm2964_vm15 = vweird.f32 %v11666_v63 }
 0x397   : > { %v11692_v41 = vpop.eup %7108  ;;  %v4225_v5 = vmul.f32 %v7107_v19, %v4097_v37  ;;  %v2953_v18 = vmul.f32 %v11655_v39, %v2952_v29  ;;  %v3252_v55 = vadd.f32 %v11444_v16, %v3185_v51  ;;  %v2352_v37 = vmul.f32 %v2186_v59, %v7647_v15  ;;  %13997 = vst [vmem:[#allocation23_spill] sm:$0xff] %v11719_v7 }
 0x398   : > { %v2583_v26 = vmul.f32 %v7105_v44, %v2582_v40  ;;  %v2959_v48 = vmul.f32 %v11692_v41, %v11666_v63  ;;  %v11731_v29 = vadd.f32 1e-05, %v2390_v53  ;;  %v4993_v59 = vsub.f32 0.0, %v11617_v3 }
 0x399   : > { %6621 = vmatmul.msk.f32.gmra.mxu0 %vm1565_vm0, %v3252_v55  ;;  %v4289_v4 = vsub.f32 2.0, %v4225_v5  ;;  %v2957_v35 = vsel %vm2956_vm13, %v11655_v39, %v2953_v18  ;;  %v5030_v39 = vsub.f32 0.0, %v11669_v24  ;;  %v11723_v49 = vadd.f32 1e-05, %v2352_v37 }
 0x39a   : > { %v2587_v33 = vsel %vm2586_vm11, %v7105_v44, %v2583_v26  ;;  %v7111_v6 = vpop.eup %7110  ;;  %v3641_v44 = vpop.f32.mrf.mxu2  ;;  %v2960_v10 = vmul.f32 %v11692_v41, %v2959_v48  ;;  %v3156_v20 = vmul.f32 %v2957_v35, %v13998_v11  ;;  %v2353_v48 = vmul.f32 %v2189_v25, %v7647_v15 }
 0x39b   : > { %v3119_v13 = vmul.f32 %v2587_v33, %v13995_v36  ;;  %v4262_v46 = vmul.f32 %v7111_v6, %v4134_v23  ;;  %v11707_v42 = vadd.f32 %v11630_v14, %v3641_v44  ;;  %v11728_v12 = vmul.f32 %v7107_v19, %v4289_v4 }
 0x39c   : > { %v7113_v38 = vpop.eup %7112  ;;  %v2961_v33 = vmul.f32 0.5, %v2960_v10  ;;  %v5094_v2 = vmul.f32 %v5030_v39, %v11669_v24  ;;  %7114 = vrsqrt.f32 %v11723_v49  ;;  %v3223_v55 = vmul.f32 %v11432_v43, %v3156_v20 }
 0x39d   : > { %v4326_v52 = vsub.f32 2.0, %v4262_v46  ;;  %v11714_v0 = vmul.f32 %v11707_v42, %v8807_v27  ;;  %v3186_v57 = vmul.f32 %v11432_v43, %v3119_v13  ;;  %v4237_v5 = vmul.f32 %v7113_v38, %v4109_v1  ;;  %v11744_v46 = vpop.f32.mrf.mxu1  ;;  %v11760_v39 = vpop.f32.mrf.mxu3 }
 0x39e   : > { %7116 = vrsqrt.f32 %v11731_v29  ;;  %v4417_v1 = vmul.f32 1.0614054, %v11728_v12  ;;  %13999 = vst [vmem:[#allocation26_spill] sm:$0xff] %v11744_v46  ;;  %v5057_v44 = vmul.f32 %v4993_v59, %v11617_v3  ;;  %v2962_v37 = vsub.f32 1.5, %v2961_v33 }
 0x39f   : > { %v11716_v50 = vmul.f32 %v7111_v6, %v4326_v52  ;;  %v11726_v23 = vand.u32 2147483647, %v11714_v0  ;;  %v3253_v26 = vadd.f32 %v11444_v16, %v3186_v57  ;;  %v3530_v6 = vpop.f32.mrf.mxu0  ;;  %v4301_v4 = vsub.f32 2.0, %v4237_v5  ;;  %14000 = vst [vmem:[#allocation19_spill] sm:$0xff] %v11760_v39  ;;  %v2192_v47 = vpop.xlane.xlu0 %2191 }
 0x3a0   : > { %v11748_v24 = vadd.f32 %v11630_v14, %v3530_v6  ;;  %v11750_v52 = vadd.f32 1e-05, %v2353_v48  ;;  %v5198_v53 = vmul.f32 1.442695, %v5094_v2  ;;  %v3290_v57 = vadd.f32 %v11444_v16, %v3223_v55 }
 0x3a1   : > { %v4454_v40 = vmul.f32 1.0614054, %v11716_v50  ;;  %v4071_v51 = vmul.f32 0.3275911, %v11726_v23  ;;  %6622 = vmatmul.msk.f32.gmra.mxu0 %vm1565_vm0, %v3253_v26  ;;  %v4481_v3 = vadd.f32 -1.4531521, %v4417_v1  ;;  %vm2965_vm10 = vweird.f32 %v11692_v41 }
 0x3a2   : > { %v3644_v13 = vpop.f32.mrf.mxu2  ;;  %v11758_v20 = vpop.eup %7114  ;;  %v5124_v25 = vmul.f32 1.442695, %v5057_v44  ;;  %v11766_v26 = vmul.f32 %v11748_v24, %v8807_v27  ;;  %6659 = vmatmul.msk.f32.gmra.mxu2 %vm1565_vm0, %v3290_v57  ;;  %v11771_v33 = vmul.f32 %v7113_v38, %v4301_v4  ;;  %v11779_v6 = vmul.f32 0.5, %v11585_v56  ;;  %vm11787_vm9 = vmor %vm2964_vm15, %vm2965_vm10  ;;  %v14005_v38 = vld [vmem:[#allocation42_spill] sm:$0xff] }
 0x3a3   : > { %v4518_v18 = vadd.f32 -1.4531521, %v4454_v40  ;;  %v4135_v19 = vadd.f32 1.0, %v4071_v51  ;;  %v11753_v10 = vadd.f32 %v11630_v14, %v3644_v13  ;;  %v2963_v40 = vmul.f32 %v11692_v41, %v2962_v37 }
 0x3a4   : > { %v11769_v59 = vpop.eup %7116  ;;  %14001 = vst [vmem:[#allocation4_spill] sm:$0xff] %v11771_v33  ;;  %v11784_v48 = vsel %vm3841_vm14, 1.0, %v13766_v61  ;;  %vm3878_vm3 = vcmp.ge.f32.partialorder %v11653_v8, 0.0  ;;  %v4545_v56 = vmul.f32 %v4481_v3, %v11728_v12  ;;  %v2589_v63 = vmul.f32 %v11758_v20, %v11723_v49 }
 0x3a5   : > { %v4582_v36 = vmul.f32 %v4518_v18, %v11716_v50  ;;  %7118 = vrcp.f32 %v4135_v19  ;;  %v11776_v5 = vmul.f32 %v11753_v10, %v8807_v27  ;;  %v2967_v54 = vsel %vm11787_vm9, %v11692_v41, %v2963_v40  ;;  %v11807_v37 = vpop.f32.mrf.mxu1 }
 0x3a6   : > { %7120 = vrsqrt.f32 %v11750_v52  ;;  %v11800_v13 = vand.u32 2147483647, %v11766_v26  ;;  %v2969_v8 = vmul.f32 %v11769_v59, %v11731_v29  ;;  %14004 = vst [vmem:[#allocation34_spill] sm:$0xff] %v11807_v37  ;;  %v3750_v4 = vmul.f32 0.5, %v11633_v17 }
 0x3a7   : > { %v4646_v35 = vadd.f32 1.4214138, %v4582_v36  ;;  %7122 = vpow2.f32 %v5198_v53  ;;  %v3533_v36 = vpop.f32.mrf.mxu0  ;;  %v3942_v41 = vsel %vm3878_vm3, 1.0, %v13766_v61  ;;  %v4609_v40 = vadd.f32 1.4214138, %v4545_v56 }
 0x3a8   : > { %7124 = vpow2.f32 %v5124_v25  ;;  %v11813_v53 = vadd.f32 %v11630_v14, %v3533_v36  ;;  %v2590_v17 = vmul.f32 %v11758_v20, %v2589_v63  ;;  %vm3879_vm4 = vcmp.ge.f32.partialorder %v11714_v0, 0.0 }
 0x3a9   : > { %v4710_v11 = vmul.f32 %v4646_v35, %v11716_v50  ;;  %v5031_v35 = vsub.f32 0.0, %v11726_v23  ;;  %v2970_v37 = vmul.f32 %v11769_v59, %v2969_v8  ;;  %v11832_v56 = vmul.f32 0.5, %v11707_v42  ;;  %v2303_v8 = vpop.xlane.xlu1 %2302 }
 0x3aa   : > { %v11847_v42 = vsel %vm3879_vm4, 1.0, %v13766_v61  ;;  %vm2974_vm5 = vweird.f32 %v11731_v29  ;;  %vm2594_vm2 = vweird.f32 %v11723_v49  ;;  %vm2595_vm6 = vweird.f32 %v11758_v20 }
 0x3ab   : > { %v4774_v51 = vadd.f32 -0.28449672, %v4710_v11  ;;  %v7119_v18 = vpop.eup %7118  ;;  %v2971_v9 = vmul.f32 0.5, %v2970_v37  ;;  %v2354_v37 = vmul.f32 %v2192_v47, %v7647_v15  ;;  %vm2975_vm7 = vweird.f32 %v11769_v59  ;;  %vm11905_vm12 = vmor %vm2594_vm2, %vm2595_vm6 }
 0x3ac   : > { %v4263_v55 = vmul.f32 %v7119_v18, %v4135_v19  ;;  %v11805_v19 = vand.u32 2147483647, %v11776_v5  ;;  %v11815_v57 = vpop.eup %7120  ;;  %vm3842_vm11 = vcmp.ge.f32.partialorder %v11766_v26, 0.0  ;;  %vm2604_vm8 = vweird.f32 %v11750_v52  ;;  %vm11918_vm13 = vmor %vm2974_vm5, %vm2975_vm7 }
 0x3ad   : > { %v4838_v2 = vmul.f32 %v4774_v51, %v11716_v50  ;;  %v7123_v51 = vpop.eup %7122  ;;  %v2599_v63 = vmul.f32 %v11815_v57, %v11750_v52  ;;  %v2972_v31 = vsub.f32 1.5, %v2971_v9  ;;  %v11876_v60 = vadd.f32 1e-05, %v2354_v37 }
 0x3ae   : > { %v4327_v44 = vsub.f32 2.0, %v4263_v55  ;;  %v4072_v25 = vmul.f32 0.3275911, %v11805_v19  ;;  %v4034_v55 = vmul.f32 0.3275911, %v11800_v13  ;;  %vm2605_vm14 = vweird.f32 %v11815_v57 }
 0x3af   : > { %v4902_v1 = vadd.f32 0.2548296, %v4838_v2  ;;  %v3157_v2 = vmul.f32 %v2967_v54, %v14005_v38  ;;  %v5095_v54 = vmul.f32 %v5031_v35, %v11726_v23  ;;  %v2591_v38 = vmul.f32 0.5, %v2590_v17  ;;  %vm11961_vm15 = vmor %vm2604_vm8, %vm2605_vm14 }
 0x3b0   : > { %v11818_v3 = vmul.f32 %v7119_v18, %v4327_v44  ;;  %v11827_v18 = vpop.eup %7124  ;;  %v11839_v44 = vmul.f32 %v11813_v53, %v8807_v27  ;;  %v11850_v23 = vmul.f32 0.5, %v11748_v24  ;;  %v11852_v35 = vadd.f32 1.0, %v4034_v55 }
 0x3b1   : > { %v4966_v11 = vmul.f32 %v4902_v1, %v11716_v50  ;;  %v4136_v50 = vadd.f32 1.0, %v4072_v25  ;;  %v11829_v1 = vpop.f32.mrf.mxu3  ;;  %v11842_v25 = vmul.f32 %v4609_v40, %v11728_v12  ;;  %v2391_v40 = vmul.f32 %v2303_v8, %v7647_v15  ;;  %v2306_v26 = vpop.xlane.xlu1 %2305 }
 0x3b2   : > { %v4455_v46 = vmul.f32 1.0614054, %v11818_v3  ;;  %14006 = vst [vmem:[#allocation3_spill] sm:$0xff] %v11829_v1  ;;  %v5200_v0 = vmul.f32 1.442695, %v5095_v54  ;;  %v2600_v17 = vmul.f32 %v11815_v57, %v2599_v63  ;;  %v4994_v54 = vsub.f32 0.0, %v11800_v13 }
 0x3b3   : > { %v5286_v36 = vmul.f32 %v7123_v51, %v4966_v11  ;;  %7126 = vrcp.f32 %v4136_v50  ;;  %v11861_v24 = vand.u32 2147483647, %v11839_v44  ;;  %vm3880_vm10 = vcmp.ge.f32.partialorder %v11776_v5, 0.0 }
 0x3b4   : > { %v4519_v51 = vadd.f32 -1.4531521, %v4455_v46  ;;  %7128 = vrcp.f32 %v11852_v35  ;;  %vm3843_vm9 = vcmp.ge.f32.partialorder %v11839_v44, 0.0  ;;  %vm2614_vm3 = vweird.f32 %v11876_v60 }
 0x3b5   : > { %v5350_v11 = vsub.f32 1.0, %v5286_v36  ;;  %v4035_v47 = vmul.f32 0.3275911, %v11861_v24  ;;  %7130 = vpow2.f32 %v5200_v0  ;;  %v11890_v0 = vsel %vm3842_vm11, 1.0, %v13766_v61 }
 0x3b6   : > { %v4583_v46 = vmul.f32 %v4519_v51, %v11818_v3  ;;  %v2592_v51 = vsub.f32 1.5, %v2591_v38 }
 0x3b7   : > { %v5414_v62 = vmul.f32 %v5350_v11, %v3942_v41  ;;  %v3224_v41 = vmul.f32 %v11432_v43, %v3157_v2  ;;  %v11865_v11 = vpop.f32.mrf.mxu1  ;;  %v11899_v37 = vadd.f32 1.0, %v4035_v47 }
 0x3b8   : > { %v4647_v36 = vadd.f32 1.4214138, %v4583_v46  ;;  %14007 = vst [vmem:[#allocation29_spill] sm:$0xff] %v11865_v11  ;;  %v2312_v46 = vpop.xlane.xlu2 %2311  ;;  %v2601_v11 = vmul.f32 0.5, %v2600_v17 }
 0x3b9   : > { %v5478_v55 = vadd.f32 1.0, %v5414_v62  ;;  %v7127_v8 = vpop.eup %7126  ;;  %v11871_v62 = vadd.f32 1e-05, %v2391_v40  ;;  %v3291_v2 = vadd.f32 %v11444_v16, %v3224_v41  ;;  %v11879_v9 = vpop.f32.mrf.mxu3  ;;  %v5058_v40 = vmul.f32 %v4994_v54, %v11800_v13 }
 0x3ba   : > { %v4711_v45 = vmul.f32 %v4647_v36, %v11818_v3  ;;  %v4264_v43 = vmul.f32 %v7127_v8, %v4136_v50  ;;  %14008 = vst [vmem:[#allocation9_spill] sm:$0xff] %v11879_v9  ;;  %v2394_v50 = vmul.f32 %v2312_v46, %v7647_v15  ;;  %v2973_v16 = vmul.f32 %v11769_v59, %v2972_v31  ;;  %v7129_v17 = vpop.eup %7128  ;;  %v3536_v31 = vpop.f32.mrf.mxu0 }
 0x3bb   : > { %v5542_v63 = vmul.f32 %v5478_v55, %v3750_v4  ;;  %v2593_v4 = vmul.f32 %v11758_v20, %v2592_v51  ;;  %6660 = vmatmul.msk.f32.gmra.mxu2 %vm1565_vm0, %v3291_v2  ;;  %7132 = vrsqrt.f32 %v11871_v62  ;;  %v11895_v13 = vmul.f32 0.5, %v11753_v10  ;;  %v7131_v46 = vpop.eup %7130 }
 0x3bc   : > { %v4775_v38 = vadd.f32 -0.28449672, %v4711_v45  ;;  %v4328_v55 = vsub.f32 2.0, %v4264_v43  ;;  %v2602_v51 = vsub.f32 1.5, %v2601_v11  ;;  %v5032_v54 = vsub.f32 0.0, %v11805_v19 }
 0x3bd   : > { %6715 = vmatmul.msk.f32.gmra.mxu3 %vm577_vm1, %v5542_v63  ;;  %7134 = vrsqrt.f32 %v11876_v60  ;;  %v2597_v10 = vsel %vm11905_vm12, %v11758_v20, %v2593_v4  ;;  %v11923_v11 = vadd.f32 1e-05, %v2394_v50  ;;  %v2977_v43 = vsel %vm11918_vm13, %v11769_v59, %v2973_v16  ;;  %v14015_v16 = vld [vmem:[#allocation43_spill] sm:$0xff] }
 0x3be   : > { %v4839_v45 = vmul.f32 %v4775_v38, %v11818_v3  ;;  %v11897_v36 = vmul.f32 %v7127_v8, %v4328_v55  ;;  %v5126_v8 = vmul.f32 1.442695, %v5058_v40  ;;  %v4226_v47 = vmul.f32 %v7129_v17, %v11852_v35  ;;  %v14014_v55 = vld [vmem:[#allocation22_spill] sm:$0xff] }
 0x3bf   : > { %v11931_v29 = vadd.f32 %v11630_v14, %v3536_v31  ;;  %v11933_v2 = vpop.f32.mrf.mxu1  ;;  %7136 = vrcp.f32 %v11899_v37  ;;  %v2603_v59 = vmul.f32 %v11815_v57, %v2602_v51  ;;  %v4995_v35 = vsub.f32 0.0, %v11861_v24 }
 0x3c0   : > { %v4903_v41 = vadd.f32 0.2548296, %v4839_v45  ;;  %v4456_v63 = vmul.f32 1.0614054, %v11897_v36  ;;  %14013 = vst [vmem:[#allocation13_spill] sm:$0xff] %v11933_v2  ;;  %v3120_v50 = vmul.f32 %v2597_v10, %v14014_v55  ;;  %v11945_v45 = vmul.f32 %v2977_v43, %v14015_v16  ;;  %v1942_v2 = vpop.xlane.xlu2 %1941 }
 0x3c1   : > { %v11938_v4 = vpop.eup %7132  ;;  %7138 = vrsqrt.f32 %v11923_v11  ;;  %v11955_v51 = vpop.f32.mrf.mxu3  ;;  %v11968_v10 = vsel %vm3880_vm10, 1.0, %v13766_v61  ;;  %v2607_v52 = vsel %vm11961_vm15, %v11815_v57, %v2603_v59  ;;  %v11982_v55 = vmul.f32 0.5, %v11813_v53 }
 0x3c2   : > { %v4967_v20 = vmul.f32 %v4903_v41, %v11818_v3  ;;  %v4520_v38 = vadd.f32 -1.4531521, %v4456_v63  ;;  %v5096_v3 = vmul.f32 %v5032_v54, %v11805_v19  ;;  %v4290_v63 = vsub.f32 2.0, %v4226_v47  ;;  %14016 = vst [vmem:[#allocation44_spill] sm:$0xff] %v11955_v51 }
 0x3c3   : > { %v11949_v41 = vpop.eup %7134  ;;  %7140 = vpow2.f32 %v5126_v8  ;;  %v11953_v19 = vmul.f32 %v11931_v29, %v8807_v27  ;;  %v5059_v47 = vmul.f32 %v4995_v35, %v11861_v24  ;;  %v11990_v57 = vsel %vm3843_vm9, 1.0, %v13766_v61 }
 0x3c4   : > { %v5287_v40 = vmul.f32 %v7131_v46, %v4967_v20  ;;  %v4584_v31 = vmul.f32 %v4520_v38, %v11897_v36  ;;  %v2979_v46 = vmul.f32 %v11938_v4, %v11871_v62  ;;  %v5202_v20 = vmul.f32 1.442695, %v5096_v3  ;;  %v2309_v38 = vpop.xlane.xlu0 %2308  ;;  %v14019_v3 = vld [vmem:[#allocation36_spill] sm:$0xff] }
 0x3c5   : > { %v2609_v44 = vmul.f32 %v11949_v41, %v11876_v60  ;;  %v3972_v24 = vand.u32 2147483647, %v11953_v19  ;;  %v11996_v35 = vmul.f32 %v2607_v52, %v14019_v3  ;;  %v2393_v54 = vmul.f32 %v2309_v38, %v7647_v15 }
 0x3c6   : > { %v5351_v49 = vsub.f32 1.0, %v5287_v40  ;;  %v4648_v8 = vadd.f32 1.4214138, %v4584_v31  ;;  %v11978_v40 = vpop.eup %7136  ;;  %v11987_v31 = vmul.f32 %v7129_v17, %v4290_v63  ;;  %7142 = vpow2.f32 %v5202_v20 }
 0x3c7   : > { %v11993_v59 = vpop.eup %7138  ;;  %v12005_v63 = vmul.f32 %v11978_v40, %v11899_v37  ;;  %v12009_v52 = vpop.f32.mrf.mxu1  ;;  %v4737_v3 = vadd.f32 -0.28449672, %v11842_v25  ;;  %v4036_v20 = vmul.f32 0.3275911, %v3972_v24  ;;  %v12021_v37 = vld [vmem:[%s13598_s8] ss:$0 sm:$0xff]  ;;  %v2017_v25 = vmul.f32 %v7647_v15, %v1942_v2 }
 0x3c8   : > { %v5415_v43 = vmul.f32 %v5351_v49, %v11847_v42  ;;  %v4712_v5 = vmul.f32 %v4648_v8, %v11897_v36  ;;  %v2392_v42 = vmul.f32 %v2306_v26, %v7647_v15  ;;  %v2980_v49 = vmul.f32 %v11938_v4, %v2979_v46  ;;  %v3647_v8 = vpop.f32.mrf.mxu2  ;;  %14020 = vst [vmem:[#allocation38_spill] sm:$0xff] %v12009_v52  ;;  %v12031_v52 = vpop.xlane.xlu1 %1935 }
 0x3c9   : > { %v12000_v26 = vpop.eup %7140  ;;  %v2610_v46 = vmul.f32 %v11949_v41, %v2609_v44  ;;  %v4996_v32 = vsub.f32 0.0, %v3972_v24  ;;  %v4801_v9 = vmul.f32 %v4737_v3, %v11728_v12  ;;  %v12051_v51 = vadd.f32 1.0, %v4036_v20 }
 0x3ca   : > { %v5479_v16 = vadd.f32 1.0, %v5415_v43  ;;  %v4776_v53 = vadd.f32 -0.28449672, %v4712_v5  ;;  %v12007_v43 = vmul.f32 1.442695, %v5059_v47  ;;  %v3187_v47 = vmul.f32 %v12021_v37, %v3120_v50 }
 0x3cb   : > { %v12013_v38 = vadd.f32 1e-05, %v2392_v42  ;;  %v2981_v42 = vmul.f32 0.5, %v2980_v49  ;;  %v12038_v50 = vld [vmem:[%s13599_s9] ss:$0 sm:$0xff]  ;;  %v5060_v39 = vmul.f32 %v4996_v32, %v3972_v24  ;;  %v12061_v7 = vsub.f32 %v7344_v30, %v2017_v25 }
 0x3cc   : > { %v5543_v17 = vmul.f32 %v5479_v16, %v11832_v56  ;;  %v4840_v5 = vmul.f32 %v4776_v53, %v11897_v36  ;;  %v3009_v56 = vmul.f32 %v11993_v59, %v11923_v11  ;;  %v12025_v16 = vadd.f32 %v11630_v14, %v3647_v8  ;;  %v1939_v1 = vpop.xlane.xlu0 %1938 }
 0x3cd   : > { %v12028_v53 = vadd.f32 1e-05, %v2393_v54  ;;  %v3254_v8 = vadd.f32 %v12038_v50, %v3187_v47  ;;  %v2611_v54 = vmul.f32 0.5, %v2610_v46  ;;  %7144 = vrsqrt.f32 %v12013_v38  ;;  %14022 = vst [vmem:[#allocation20_spill] sm:$0xff] %v12061_v7 }
 0x3ce   : > { %6716 = vmatmul.msk.f32.gmra.mxu3 %vm577_vm1, %v5543_v17  ;;  %v4904_v44 = vadd.f32 0.2548296, %v4840_v5  ;;  %v12041_v17 = vpop.f32.mrf.mxu3  ;;  %v12048_v2 = vmul.f32 %v12025_v16, %v8807_v27  ;;  %v7143_v5 = vpop.eup %7142  ;;  %v3010_v3 = vmul.f32 %v11993_v59, %v3009_v56  ;;  %v4865_v47 = vadd.f32 0.2548296, %v4801_v9 }
 0x3cf   : > { %14021 = vst [vmem:[#allocation25_spill] sm:$0xff] %v12041_v17  ;;  %6623 = vmatmul.msk.f32.gmra.mxu0 %vm1565_vm0, %v3254_v8  ;;  %7146 = vrsqrt.f32 %v12028_v53  ;;  %vm2985_vm4 = vweird.f32 %v11938_v4  ;;  %vm3014_vm5 = vweird.f32 %v11923_v11  ;;  %vm2984_vm2 = vweird.f32 %v11871_v62  ;;  %v12075_v25 = vpop.f32.mrf.mxu1 }
 0x3d0   : > { %v4968_v49 = vmul.f32 %v4904_v44, %v11897_v36  ;;  %v3225_v36 = vmul.f32 %v12021_v37, %v11945_v45  ;;  %v2982_v44 = vsub.f32 1.5, %v2981_v42  ;;  %v12058_v17 = vand.u32 2147483647, %v12048_v2  ;;  %14023 = vst [vmem:[#allocation17_spill] sm:$0xff] %v12075_v25  ;;  %vm12144_vm8 = vmor %vm2984_vm2, %vm2985_vm4 }
 0x3d1   : > { %v4929_v56 = vmul.f32 %v4865_v47, %v11728_v12  ;;  %v2612_v45 = vsub.f32 1.5, %v2611_v54  ;;  %vm2615_vm6 = vweird.f32 %v11949_v41  ;;  %v3011_v32 = vmul.f32 0.5, %v3010_v3  ;;  %v3650_v3 = vpop.f32.mrf.mxu2 }
 0x3d2   : > { %v5288_v46 = vmul.f32 %v7143_v5, %v4968_v49  ;;  %v3292_v9 = vadd.f32 %v12038_v50, %v3225_v36  ;;  %v4073_v42 = vmul.f32 0.3275911, %v12058_v17  ;;  %v2016_v12 = vmul.f32 %v7647_v15, %v1939_v1  ;;  %vm12109_vm11 = vmor %vm2614_vm3, %vm2615_vm6 }
 0x3d3   : > { %v5249_v30 = vmul.f32 %v11827_v18, %v4929_v56  ;;  %v12073_v24 = vpop.eup %7144  ;;  %vm3015_vm7 = vweird.f32 %v11993_v59  ;;  %7148 = vrcp.f32 %v12051_v51  ;;  %v12081_v54 = vmul.f32 %v11938_v4, %v2982_v44 }
 0x3d4   : > { %v5352_v20 = vsub.f32 1.0, %v5288_v46  ;;  %6661 = vmatmul.msk.f32.gmra.mxu2 %vm1565_vm0, %v3292_v9  ;;  %v4137_v49 = vadd.f32 1.0, %v4073_v42  ;;  %v5130_v18 = vmul.f32 1.442695, %v5060_v39  ;;  %v2145_v1 = vmul.f32 %v12061_v7, %v12061_v7  ;;  %v3539_v9 = vpop.f32.mrf.mxu0  ;;  %vm12167_vm12 = vmor %vm3014_vm5, %vm3015_vm7 }
 0x3d5   : > { %v5313_v5 = vsub.f32 1.0, %v5249_v30  ;;  %v12085_v47 = vpop.eup %7146  ;;  %v2613_v46 = vmul.f32 %v11949_v41, %v2612_v45  ;;  %v3012_v42 = vsub.f32 1.5, %v3011_v32  ;;  %v2989_v39 = vmul.f32 %v12073_v24, %v12013_v38 }
 0x3d6   : > { %v5416_v8 = vmul.f32 %v5352_v20, %v11968_v10  ;;  %7150 = vrcp.f32 %v4137_v49  ;;  %v7345_v10 = vld [vmem:[%s7480_s28 + $0x1e0] sm:$0xff]  ;;  %v2315_v20 = vpop.xlane.xlu1 %2314  ;;  %v2331_v30 = vsel %vm1565_vm0, %v2145_v1, 0.0  ;;  %v12095_v25 = vpop.f32.mrf.mxu3  ;;  %v2015_v45 = vmul.f32 %v7647_v15, %v12031_v52 }
 0x3d7   : > { %v12089_v56 = vsub.f32 %v7345_v10, %v2016_v12  ;;  %v5377_v44 = vmul.f32 %v5313_v5, %v11784_v48  ;;  %14025 = vst [vmem:[#allocation8_spill] sm:$0xff] %v12095_v25  ;;  %2332 = vadd.xlane.f32.xlu1 %v2331_v30  ;;  %v3188_v12 = vmul.f32 %v12021_v37, %v11996_v35  ;;  %7152 = vpow2.f32 %v12007_v43 }
 0x3d8   : > { %v5480_v36 = vadd.f32 1.0, %v5416_v8  ;;  %v12103_v32 = vadd.f32 %v11630_v14, %v3650_v3  ;;  %v12116_v52 = vadd.f32 %v11630_v14, %v3539_v9  ;;  %v2395_v35 = vmul.f32 %v2315_v20, %v7647_v15 }
 0x3d9   : > { %14024 = vst [vmem:[#allocation40_spill] sm:$0xff] %v12089_v56  ;;  %v5441_v5 = vadd.f32 1.0, %v5377_v44  ;;  %v12119_v1 = vpop.eup %7148  ;;  %v2617_v60 = vsel %vm12109_vm11, %v11949_v41, %v2613_v46  ;;  %v3255_v3 = vadd.f32 %v12038_v50, %v3188_v12  ;;  %v2144_v10 = vmul.f32 %v12089_v56, %v12089_v56 }
 0x3da   : > { %v5544_v8 = vmul.f32 %v5480_v36, %v11895_v13  ;;  %v2999_v13 = vmul.f32 %v12085_v47, %v12028_v53  ;;  %14028 = vst [vmem:[#allocation31_spill] sm:$0xff] %v12116_v52  ;;  %v12127_v36 = vmul.f32 %v12103_v32, %v8807_v27  ;;  %v3013_v9 = vmul.f32 %v11993_v59, %v3012_v42  ;;  %v7346_v42 = vld [vmem:[%s7480_s28 + $0x1d8] sm:$0xff] }
 0x3db   : > { %v5505_v20 = vmul.f32 %v5441_v5, %v11779_v6  ;;  %v12136_v44 = vmul.f32 %v12116_v52, %v8807_v27  ;;  %v12138_v41 = vadd.f32 1e-05, %v2395_v35  ;;  %v12150_v12 = vsub.f32 %v7346_v42, %v2015_v45  ;;  %6624 = vmatmul.msk.f32.gmra.mxu0 %vm1565_vm0, %v3255_v3  ;;  %v14037_v3 = vld [vmem:[#allocation33_spill] sm:$0xff] }
 0x3dc   : > { %6717 = vmatmul.msk.f32.gmra.mxu3 %vm577_vm1, %v5544_v8  ;;  %v7151_v46 = vpop.eup %7150  ;;  %v2990_v8 = vmul.f32 %v12073_v24, %v2989_v39  ;;  %v12154_v6 = vand.u32 2147483647, %v12127_v36  ;;  %v2328_v48 = vsel %vm1565_vm0, %v2144_v10, 0.0  ;;  %v14033_v5 = vsub.f32 2.0, %v12005_v63  ;;  %v12173_v63 = vpop.f32.mrf.mxu1 }
 0x3dd   : > { %14029 = vst [vmem:[#allocation24_spill] sm:$0xff] %v12136_v44  ;;  %v3000_v45 = vmul.f32 %v12085_v47, %v2999_v13  ;;  %6678 = vmatmul.msk.f32.gmra.mxu1 %vm577_vm1, %v5505_v20  ;;  %v4265_v35 = vmul.f32 %v7151_v46, %v4137_v49  ;;  %2329 = vadd.xlane.f32.xlu0 %v2328_v48  ;;  %7154 = vpow2.f32 %v5130_v18  ;;  %v12184_v20 = vand.u32 2147483647, %v12136_v44  ;;  %v2318_v48 = vpop.xlane.xlu0 %2317 }
 0x3de   : > { %14032 = vst [vmem:[#allocation48_spill] sm:$0xff] %v12150_v12  ;;  %v12160_v62 = vmul.f32 %v11978_v40, %v14033_v5  ;;  %v2987_v40 = vsel %vm12144_vm8, %v11938_v4, %v12081_v54  ;;  %v4228_v11 = vmul.f32 %v12119_v1, %v12051_v51  ;;  %v4074_v43 = vmul.f32 0.3275911, %v12154_v6  ;;  %v14038_v54 = vld [vmem:[#allocation6_spill] sm:$0xff]  ;;  %v3653_v5 = vpop.f32.mrf.mxu2 }
 0x3df   : > { %14036 = vst [vmem:[#allocation41_spill] sm:$0xff] %v12173_v63  ;;  %v3122_v10 = vmul.f32 %v2617_v60, %v14037_v3  ;;  %v4329_v13 = vsub.f32 2.0, %v4265_v35  ;;  %7156 = vrsqrt.f32 %v12138_v41  ;;  %v3017_v49 = vsel %vm12167_vm12, %v11993_v59, %v3013_v9  ;;  %v12197_v35 = vpop.f32.mrf.mxu3 }
 0x3e0   : > { %v2991_v30 = vmul.f32 0.5, %v2990_v8  ;;  %v4138_v4 = vadd.f32 1.0, %v4074_v43  ;;  %v2143_v51 = vmul.f32 %v12150_v12, %v12150_v12  ;;  %v3159_v18 = vmul.f32 %v2987_v40, %v14038_v54  ;;  %14039 = vst [vmem:[#allocation12_spill] sm:$0xff] %v12197_v35  ;;  %v2321_v8 = vpop.xlane.xlu2 %2320  ;;  %v12202_v40 = vpop.eup %7152 }
 0x3e1   : > { %vm2995_vm13 = vweird.f32 %v12073_v24  ;;  %v3001_v60 = vmul.f32 0.5, %v3000_v45  ;;  %vm3004_vm14 = vweird.f32 %v12028_v53  ;;  %v12195_v42 = vmul.f32 %v7151_v46, %v4329_v13  ;;  %v14040_v45 = vld [vmem:[#allocation37_spill] sm:$0xff] }
 0x3e2   : > { %v4292_v39 = vsub.f32 2.0, %v4228_v11  ;;  %vm2994_vm10 = vweird.f32 %v12013_v38  ;;  %v5033_v59 = vsub.f32 0.0, %v12058_v17  ;;  %7158 = vrcp.f32 %v4138_v4 }
 0x3e3   : > { %v2325_v9 = vsel %vm1565_vm0, %v2143_v51, 0.0  ;;  %v12205_v43 = vmul.f32 %v3017_v49, %v14040_v45  ;;  %vm3005_vm15 = vweird.f32 %v12085_v47  ;;  %v4457_v46 = vmul.f32 1.0614054, %v12195_v42  ;;  %v12210_v11 = vpop.eup %7154  ;;  %vm12258_vm3 = vmor %vm2994_vm10, %vm2995_vm13 }
 0x3e4   : > { %v4037_v3 = vmul.f32 0.3275911, %v12184_v20  ;;  %2326 = vadd.xlane.f32.xlu2 %v2325_v9  ;;  %v2992_v13 = vsub.f32 1.5, %v2991_v30  ;;  %v2396_v54 = vmul.f32 %v2318_v48, %v7647_v15  ;;  %v3189_v51 = vmul.f32 %v12021_v37, %v3122_v10  ;;  %v12227_v48 = vpop.f32.mrf.mxu1  ;;  %vm12276_vm4 = vmor %vm3004_vm14, %vm3005_vm15 }
 0x3e5   : > { %v12215_v63 = vadd.f32 %v11630_v14, %v3653_v5  ;;  %v12217_v35 = vpop.eup %7156  ;;  %v3002_v49 = vsub.f32 1.5, %v3001_v60  ;;  %v12220_v45 = vmul.f32 0.5, %v12025_v16  ;;  %v4521_v25 = vadd.f32 -1.4531521, %v4457_v46  ;;  %14041 = vst [vmem:[#allocation5_spill] sm:$0xff] %v12227_v48 }
 0x3e6   : > { %v2397_v56 = vmul.f32 %v2321_v8, %v7647_v15  ;;  %v12224_v9 = vmul.f32 %v12119_v1, %v4292_v39  ;;  %v5097_v30 = vmul.f32 %v5033_v59, %v12058_v17  ;;  %v5034_v10 = vsub.f32 0.0, %v12154_v6 }
 0x3e7   : > { %v3256_v5 = vadd.f32 %v12038_v50, %v3189_v51  ;;  %vm3881_vm9 = vcmp.ge.f32.partialorder %v12048_v2, 0.0  ;;  %v4585_v60 = vmul.f32 %v4521_v25, %v12195_v42  ;;  %v12233_v16 = vadd.f32 1.0, %v4037_v3  ;;  %v3542_v51 = vpop.f32.mrf.mxu0  ;;  %v14050_v2 = vld [vmem:[#allocation46_spill] sm:$0xff] }
 0x3e8   : > { %v12237_v8 = vmul.f32 %v12215_v63, %v8807_v27  ;;  %v7159_v1 = vpop.eup %7158  ;;  %v2993_v39 = vmul.f32 %v12073_v24, %v2992_v13  ;;  %v3019_v17 = vmul.f32 %v12217_v35, %v12138_v41  ;;  %v12242_v59 = vadd.f32 1e-05, %v2396_v54 }
 0x3e9   : > { %6625 = vmatmul.msk.f32.gmra.mxu0 %vm1565_vm0, %v3256_v5  ;;  %v3226_v46 = vmul.f32 %v12021_v37, %v3159_v18  ;;  %v3003_v25 = vmul.f32 %v12085_v47, %v3002_v49  ;;  %v4649_v3 = vadd.f32 1.4214138, %v4585_v60  ;;  %v4266_v48 = vmul.f32 %v7159_v1, %v4138_v4  ;;  %v12267_v49 = vpop.f32.mrf.mxu3 }
 0x3ea   : > { %v12247_v12 = vadd.f32 1e-05, %v2397_v56  ;;  %v5204_v7 = vmul.f32 1.442695, %v5097_v30  ;;  %v5098_v52 = vmul.f32 %v5034_v10, %v12154_v6  ;;  %v12251_v13 = vand.u32 2147483647, %v12237_v8 }
 0x3eb   : > { %v3293_v54 = vadd.f32 %v12038_v50, %v3226_v46  ;;  %v4713_v4 = vmul.f32 %v4649_v3, %v12195_v42  ;;  %v4330_v56 = vsub.f32 2.0, %v4266_v48  ;;  %7160 = vrcp.f32 %v12233_v16  ;;  %14045 = vst [vmem:[#allocation35_spill] sm:$0xff] %v12267_v49 }
 0x3ec   : > { %v12265_v6 = vadd.f32 %v11630_v14, %v3542_v51  ;;  %v2997_v30 = vsel %vm12258_vm3, %v12073_v24, %v2993_v39  ;;  %v3020_v48 = vmul.f32 %v12217_v35, %v3019_v17  ;;  %7162 = vrsqrt.f32 %v12242_v59  ;;  %v1945_v39 = vpop.xlane.xlu1 %1944  ;;  %v1948_v51 = vpop.xlane.xlu0 %1947 }
 0x3ed   : > { %v4075_v14 = vmul.f32 0.3275911, %v12251_v13  ;;  %6662 = vmatmul.msk.f32.gmra.mxu2 %vm1565_vm0, %v3293_v54  ;;  %v3007_v24 = vsel %vm12276_vm4, %v12085_v47, %v3003_v25  ;;  %v4777_v10 = vadd.f32 -0.28449672, %v4713_v4  ;;  %v12287_v5 = vmul.f32 %v7159_v1, %v4330_v56  ;;  %v14049_v25 = vld [vmem:[#allocation39_spill] sm:$0xff]  ;;  %v12305_v18 = vpop.f32.mrf.mxu1 }
 0x3ee   : > { %14044 = vst [vmem:[#allocation2_spill] sm:$0xff] %v12265_v6  ;;  %7164 = vrsqrt.f32 %v12247_v12  ;;  %v3945_v53 = vsel %vm3881_vm9, 1.0, %v13766_v61  ;;  %vm3882_vm5 = vcmp.ge.f32.partialorder %v12127_v36, 0.0  ;;  %v4997_v60 = vsub.f32 0.0, %v12184_v20 }
 0x3ef   : > { %7166 = vpow2.f32 %v5204_v7  ;;  %v4841_v17 = vmul.f32 %v4777_v10, %v12195_v42  ;;  %v4458_v46 = vmul.f32 1.0614054, %v12287_v5  ;;  %v5206_v47 = vmul.f32 1.442695, %v5098_v52  ;;  %14051 = vst [vmem:[#allocation10_spill] sm:$0xff] %v12305_v18 }
 0x3f0   : > { %v12299_v1 = vmul.f32 %v12265_v6, %v8807_v27  ;;  %v3160_v3 = vmul.f32 %v2997_v30, %v14049_v25  ;;  %v12303_v54 = vmul.f32 %v3007_v24, %v14050_v2  ;;  %v3021_v7 = vmul.f32 0.5, %v3020_v48 }
 0x3f1   : > { %v4139_v4 = vadd.f32 1.0, %v4075_v14  ;;  %v12307_v56 = vpop.eup %7160  ;;  %v4905_v38 = vadd.f32 0.2548296, %v4841_v17  ;;  %v12310_v10 = vmul.f32 0.5, %v12103_v32  ;;  %v12315_v52 = vsel %vm3882_vm5, 1.0, %v13766_v61  ;;  %v12342_v2 = vpop.f32.mrf.mxu3 }
 0x3f2   : > { %14048 = vst [vmem:[#allocation45_spill] sm:$0xff] %v12299_v1  ;;  %v4522_v49 = vadd.f32 -1.4531521, %v4458_v46  ;;  %v12317_v30 = vpop.eup %7162  ;;  %v12320_v24 = vmul.f32 %v4997_v60, %v12184_v20  ;;  %v2018_v48 = vmul.f32 %v7647_v15, %v1945_v39  ;;  %v2019_v14 = vmul.f32 %v7647_v15, %v1948_v51 }
 0x3f3   : > { %7168 = vrcp.f32 %v4139_v4  ;;  %v4969_v32 = vmul.f32 %v4905_v38, %v12195_v42  ;;  %v12329_v46 = vand.u32 2147483647, %v12299_v1  ;;  %v12333_v20 = vmul.f32 %v12307_v56, %v12233_v16  ;;  %14052 = vst [vmem:[#allocation47_spill] sm:$0xff] %v12342_v2  ;;  %v7347_v16 = vld [vmem:[%s7480_s28 + $0x1f0] sm:$0xff] }
 0x3f4   : > { %v12324_v17 = vpop.eup %7164  ;;  %v4586_v36 = vmul.f32 %v4522_v49, %v12287_v5  ;;  %7170 = vpow2.f32 %v5206_v47  ;;  %v3022_v60 = vsub.f32 1.5, %v3021_v7  ;;  %v12336_v39 = vmul.f32 0.5, %v12215_v63  ;;  %v7348_v7 = vld [vmem:[%s7480_s28 + $0x1f8] sm:$0xff] }
 0x3f5   : > { %v7167_v25 = vpop.eup %7166  ;;  %vm3883_vm2 = vcmp.ge.f32.partialorder %v12237_v8, 0.0  ;;  %v3029_v49 = vmul.f32 %v12317_v30, %v12242_v59  ;;  %v4038_v47 = vmul.f32 0.3275911, %v12329_v46  ;;  %v3039_v38 = vmul.f32 %v12324_v17, %v12247_v12 }
 0x3f6   : > { %v5289_v51 = vmul.f32 %v7167_v25, %v4969_v32  ;;  %v4650_v42 = vadd.f32 1.4214138, %v4586_v36  ;;  %v12347_v18 = vsub.f32 %v7347_v16, %v2018_v48  ;;  %v12350_v63 = vsub.f32 %v7348_v7, %v2019_v14 }
 0x3f7   : > { %v3227_v6 = vmul.f32 %v12021_v37, %v3160_v3  ;;  %vm3024_vm6 = vweird.f32 %v12138_v41  ;;  %vm3025_vm7 = vweird.f32 %v12217_v35  ;;  %v12359_v25 = vsel %vm3883_vm2, 1.0, %v13766_v61 }
 0x3f8   : > { %14053 = vst [vmem:[#allocation30_spill] sm:$0xff] %v12347_v18  ;;  %v5353_v32 = vsub.f32 1.0, %v5289_v51  ;;  %v4714_v36 = vmul.f32 %v4650_v42, %v12287_v5  ;;  %v4102_v2 = vadd.f32 1.0, %v4038_v47  ;;  %v12363_v14 = vmul.f32 %v12217_v35, %v3022_v60  ;;  %v2324_v42 = vpop.xlane.xlu1 %2323  ;;  %v12369_v47 = vpop.f32.mrf.mxu1  ;;  %vm12417_vm14 = vmor %vm3024_vm6, %vm3025_vm7 }
 0x3f9   : > { %14054 = vst [vmem:[#allocation27_spill] sm:$0xff] %v12350_v63  ;;  %v7169_v48 = vpop.eup %7168  ;;  %v5035_v3 = vsub.f32 0.0, %v12251_v13  ;;  %v3294_v51 = vadd.f32 %v12038_v50, %v3227_v6  ;;  %v3030_v44 = vmul.f32 %v12317_v30, %v3029_v49  ;;  %v3040_v33 = vmul.f32 %v12324_v17, %v3039_v38 }
 0x3fa   : > { %v7171_v7 = vpop.eup %7170  ;;  %v5417_v28 = vmul.f32 %v5353_v32, %v3945_v53  ;;  %v4778_v1 = vadd.f32 -0.28449672, %v4714_v36  ;;  %v4267_v8 = vmul.f32 %v7169_v48, %v4139_v4  ;;  %7172 = vrcp.f32 %v4102_v2  ;;  %14055 = vst [vmem:[#allocation28_spill] sm:$0xff] %v12369_v47  ;;  %v3656_v4 = vpop.f32.mrf.mxu2 }
 0x3fb   : > { %6663 = vmatmul.msk.f32.gmra.mxu2 %vm1565_vm0, %v3294_v51  ;;  %v2147_v60 = vmul.f32 %v12350_v63, %v12350_v63  ;;  %v2146_v6 = vmul.f32 %v12347_v18, %v12347_v18  ;;  %v2398_v49 = vmul.f32 %v2324_v42, %v7647_v15  ;;  %vm3034_vm11 = vweird.f32 %v12242_v59 }
 0x3fc   : > { %v5481_v16 = vadd.f32 1.0, %v5417_v28  ;;  %v4842_v53 = vmul.f32 %v4778_v1, %v12287_v5  ;;  %v4331_v32 = vsub.f32 2.0, %v4267_v8  ;;  %vm3035_vm8 = vweird.f32 %v12317_v30 }
 0x3fd   : > { %v5099_v38 = vmul.f32 %v5035_v3, %v12251_v13  ;;  %v2337_v36 = vsel %vm1565_vm0, %v2147_v60, 0.0  ;;  %v2334_v51 = vsel %vm1565_vm0, %v2146_v6, 0.0  ;;  %v4418_v47 = vmul.f32 1.0614054, %v11987_v31  ;;  %v12392_v13 = vld [vmem:[%s13601_s11] ss:$0 sm:$0xff]  ;;  %v12404_v60 = vpop.f32.mrf.mxu3  ;;  %vm12445_vm10 = vmor %vm3034_vm11, %vm3035_vm8 }
 0x3fe   : > { %v5545_v28 = vmul.f32 %v5481_v16, %v12220_v45  ;;  %v4906_v63 = vadd.f32 0.2548296, %v4842_v53  ;;  %v3031_v1 = vmul.f32 0.5, %v3030_v44  ;;  %v12385_v8 = vmul.f32 %v7169_v48, %v4331_v32  ;;  %2338 = vadd.xlane.f32.xlu0 %v2337_v36  ;;  %2335 = vadd.xlane.f32.xlu2 %v2334_v51  ;;  %14056 = vst [vmem:[#allocation42_spill] sm:$0xff] %v12404_v60 }
 0x3ff   : > { %v12387_v42 = vadd.f32 1e-05, %v2398_v49  ;;  %v4482_v18 = vadd.f32 -1.4531521, %v4418_v47  ;;  %v12395_v3 = vadd.f32 %v12392_v13, %v3656_v4  ;;  %v3228_v45 = vmul.f32 %v12021_v37, %v12303_v54 }
 0x400   : > { %v4970_v44 = vmul.f32 %v4906_v63, %v12287_v5  ;;  %v3041_v48 = vmul.f32 0.5, %v3040_v33  ;;  %vm3044_vm12 = vweird.f32 %v12247_v12  ;;  %vm3045_vm13 = vweird.f32 %v12324_v17  ;;  %6718 = vmatmul.msk.f32.gmra.mxu3 %vm577_vm1, %v5545_v28  ;;  %v7173_v47 = vpop.eup %7172 }
 0x401   : > { %v4459_v16 = vmul.f32 1.0614054, %v12385_v8  ;;  %v4546_v6 = vmul.f32 %v4482_v18, %v11987_v31  ;;  %v12409_v53 = vmul.f32 %v12395_v3, %v8807_v27  ;;  %v3295_v5 = vadd.f32 %v12038_v50, %v3228_v45  ;;  %vm12470_vm15 = vmor %vm3044_vm12, %vm3045_vm13 }
 0x402   : > { %v4419_v33 = vmul.f32 1.0614054, %v12160_v62  ;;  %v5290_v54 = vmul.f32 %v7171_v7, %v4970_v44  ;;  %v5208_v32 = vmul.f32 1.442695, %v5099_v38  ;;  %v4230_v49 = vmul.f32 %v7173_v47, %v4102_v2  ;;  %v12426_v7 = vpop.f32.mrf.mxu1 }
 0x403   : > { %v4523_v63 = vadd.f32 -1.4531521, %v4459_v16  ;;  %v3032_v18 = vsub.f32 1.5, %v3031_v1  ;;  %7174 = vrsqrt.f32 %v12387_v42  ;;  %v4610_v36 = vadd.f32 1.4214138, %v4546_v6  ;;  %6664 = vmatmul.msk.f32.gmra.mxu2 %vm1565_vm0, %v3295_v5  ;;  %14059 = vst [vmem:[#allocation22_spill] sm:$0xff] %v12426_v7 }
 0x404   : > { %v12423_v51 = vand.u32 2147483647, %v12409_v53  ;;  %v5354_v2 = vsub.f32 1.0, %v5290_v54  ;;  %v3027_v41 = vsel %vm12417_vm14, %v12217_v35, %v12363_v14  ;;  %v4294_v28 = vsub.f32 2.0, %v4230_v49 }
 0x405   : > { %v4587_v38 = vmul.f32 %v4523_v63, %v12385_v8  ;;  %v3042_v1 = vsub.f32 1.5, %v3041_v48  ;;  %v4674_v45 = vmul.f32 %v4610_v36, %v11987_v31  ;;  %v4483_v16 = vadd.f32 -1.4531521, %v4419_v33 }
 0x406   : > { %v4076_v44 = vmul.f32 0.3275911, %v12423_v51  ;;  %v5418_v6 = vmul.f32 %v5354_v2, %v12315_v52  ;;  %7176 = vpow2.f32 %v5208_v32  ;;  %v12436_v7 = vmul.f32 %v7173_v47, %v4294_v28 }
 0x407   : > { %v4651_v5 = vadd.f32 1.4214138, %v4587_v38  ;;  %v3033_v54 = vmul.f32 %v12317_v30, %v3032_v18  ;;  %v4738_v60 = vadd.f32 -0.28449672, %v4674_v45  ;;  %v3229_v35 = vmul.f32 %v12021_v37, %v12205_v43  ;;  %v12461_v38 = vpop.f32.mrf.mxu3 }
 0x408   : > { %v4140_v4 = vadd.f32 1.0, %v4076_v44  ;;  %v5482_v14 = vadd.f32 1.0, %v5418_v6  ;;  %v4422_v47 = vmul.f32 1.0614054, %v12436_v7  ;;  %v4998_v33 = vsub.f32 0.0, %v12329_v46 }
 0x409   : > { %v4715_v52 = vmul.f32 %v4651_v5, %v12385_v8  ;;  %v12452_v63 = vpop.eup %7174  ;;  %v3163_v32 = vmul.f32 %v3027_v41, %v11332_v21  ;;  %v4802_v43 = vmul.f32 %v4738_v60, %v11987_v31  ;;  %v4547_v49 = vmul.f32 %v4483_v16, %v12160_v62 }
 0x40a   : > { %7178 = vrcp.f32 %v4140_v4  ;;  %v5546_v59 = vmul.f32 %v5482_v14, %v12310_v10  ;;  %v12459_v18 = vmul.f32 %v12324_v17, %v3042_v1  ;;  %v4486_v2 = vadd.f32 -1.4531521, %v4422_v47  ;;  %v5778_v14 = vpop.f32.mrf.mxu1 }
 0x40b   : > { %v4779_v36 = vadd.f32 -0.28449672, %v4715_v52  ;;  %v3037_v28 = vsel %vm12445_vm10, %v12317_v30, %v3033_v54  ;;  %v4866_v10 = vadd.f32 0.2548296, %v4802_v43  ;;  %v4611_v60 = vadd.f32 1.4214138, %v4547_v49 }
 0x40c   : > { %v3296_v41 = vadd.f32 %v12038_v50, %v3229_v35  ;;  %v7177_v1 = vpop.eup %7176  ;;  %v4550_v44 = vmul.f32 %v4486_v2, %v12436_v7  ;;  %v5062_v16 = vmul.f32 %v4998_v33, %v12329_v46  ;;  %v3049_v30 = vmul.f32 %v12452_v63, %v12387_v42  ;;  %6719 = vmatmul.msk.f32.gmra.mxu3 %vm577_vm1, %v5546_v59 }
 0x40d   : > { %v4843_v45 = vmul.f32 %v4779_v36, %v12385_v8  ;;  %v14064_v12 = vsub.f32 2.0, %v12333_v20  ;;  %v4930_v5 = vmul.f32 %v4866_v10, %v11987_v31  ;;  %v4675_v54 = vmul.f32 %v4611_v60, %v12160_v62  ;;  %v12498_v31 = vld [vmem:[%s13603_s13] ss:$0 sm:$0xff] }
 0x40e   : > { %6665 = vmatmul.msk.f32.gmra.mxu2 %vm1565_vm0, %v3296_v41  ;;  %v4420_v35 = vmul.f32 1.0614054, %v12224_v9  ;;  %v3164_v46 = vmul.f32 %v3037_v28, %v11386_v34  ;;  %v3047_v48 = vsel %vm12470_vm15, %v12324_v17, %v12459_v18  ;;  %v4614_v52 = vadd.f32 1.4214138, %v4550_v44 }
 0x40f   : > { %v12484_v6 = vmul.f32 %v12307_v56, %v14064_v12  ;;  %v4907_v20 = vadd.f32 0.2548296, %v4843_v45  ;;  %v5250_v47 = vmul.f32 %v12000_v26, %v4930_v5  ;;  %v4739_v33 = vadd.f32 -0.28449672, %v4675_v54  ;;  %v12516_v12 = vpop.f32.mrf.mxu3 }
 0x410   : > { %v7179_v56 = vpop.eup %7178  ;;  %v4484_v43 = vadd.f32 -1.4531521, %v4420_v35  ;;  %v3230_v49 = vmul.f32 %v12021_v37, %v3163_v32  ;;  %v12503_v59 = vmul.f32 1.442695, %v5062_v16  ;;  %v3050_v17 = vmul.f32 %v12452_v63, %v3049_v30 }
 0x411   : > { %v4971_v34 = vmul.f32 %v4907_v20, %v12385_v8  ;;  %v4268_v18 = vmul.f32 %v7179_v56, %v4140_v4  ;;  %v5314_v36 = vsub.f32 1.0, %v5250_v47  ;;  %v4803_v2 = vmul.f32 %v4739_v33, %v12160_v62 }
 0x412   : > { %v4548_v28 = vmul.f32 %v4484_v43, %v12224_v9  ;;  %v5779_v21 = vadd.f32 %v12498_v31, %v5778_v14  ;;  %v4678_v26 = vmul.f32 %v4614_v52, %v12436_v7  ;;  %vm3054_vm9 = vweird.f32 %v12387_v42  ;;  %v5781_v52 = vpop.f32.mrf.mxu1 }
 0x413   : > { %v5291_v10 = vmul.f32 %v7177_v1, %v4971_v34  ;;  %v4332_v32 = vsub.f32 2.0, %v4268_v18  ;;  %v5378_v8 = vmul.f32 %v5314_v36, %v11890_v0  ;;  %v4867_v60 = vadd.f32 0.2548296, %v4803_v2 }
 0x414   : > { %v4612_v41 = vadd.f32 1.4214138, %v4548_v28  ;;  %v3297_v45 = vadd.f32 %v12038_v50, %v3230_v49  ;;  %5970 = vxpose.xlu1.b32.start [1/8] (short) (narrow) %v5779_v21, 16  ;;  %v3051_v44 = vmul.f32 0.5, %v3050_v17  ;;  %v5036_v30 = vsub.f32 0.0, %v12423_v51  ;;  %v3659_v21 = vpop.f32.mrf.mxu2 }
 0x415   : > { %v5355_v4 = vsub.f32 1.0, %v5291_v10  ;;  %v12513_v16 = vmul.f32 %v7179_v56, %v4332_v32  ;;  %v5442_v1 = vadd.f32 1.0, %v5378_v8  ;;  %v4931_v5 = vmul.f32 %v4867_v60, %v12160_v62 }
 0x416   : > { %v4676_v54 = vmul.f32 %v4612_v41, %v12224_v9  ;;  %6666 = vmatmul.msk.f32.gmra.mxu2 %vm1565_vm0, %v3297_v45  ;;  %v4421_v0 = vmul.f32 1.0614054, %v12484_v6  ;;  %v4742_v14 = vadd.f32 -0.28449672, %v4678_v26  ;;  %vm3055_vm3 = vweird.f32 %v12452_v63 }
 0x417   : > { %v5419_v35 = vmul.f32 %v5355_v4, %v12359_v25  ;;  %v4460_v20 = vmul.f32 1.0614054, %v12513_v16  ;;  %vm3844_vm4 = vcmp.ge.f32.partialorder %v11953_v19, 0.0  ;;  %v5506_v56 = vmul.f32 %v5442_v1, %v11850_v23  ;;  %vm12547_vm5 = vmor %vm3054_vm9, %vm3055_vm3  ;;  %v12559_v1 = vpop.f32.mrf.mxu3 }
 0x418   : > { %v5251_v62 = vmul.f32 %v12202_v40, %v4931_v5  ;;  %v4740_v47 = vadd.f32 -0.28449672, %v4676_v54  ;;  %v3231_v33 = vmul.f32 %v12021_v37, %v3164_v46  ;;  %v3052_v49 = vsub.f32 1.5, %v3051_v44 }
 0x419   : > { %v5483_v43 = vadd.f32 1.0, %v5419_v35  ;;  %v4524_v34 = vadd.f32 -1.4531521, %v4460_v20  ;;  %v4485_v17 = vadd.f32 -1.4531521, %v4421_v0  ;;  %6679 = vmatmul.msk.f32.gmra.mxu1 %vm577_vm1, %v5506_v56  ;;  %v5100_v25 = vmul.f32 %v5036_v30, %v12423_v51 }
 0x41a   : > { %v5315_v18 = vsub.f32 1.0, %v5251_v62  ;;  %v4804_v36 = vmul.f32 %v4740_v47, %v12224_v9  ;;  %v5782_v2 = vadd.f32 %v12498_v31, %v5781_v52  ;;  %v4806_v40 = vmul.f32 %v4742_v14, %v12436_v7  ;;  %v5784_v30 = vpop.f32.mrf.mxu1  ;;  %v14067_v47 = vld [vmem:[#allocation18_spill] sm:$0xff] }
 0x41b   : > { %v5547_v23 = vmul.f32 %v5483_v43, %v12336_v39  ;;  %v4588_v28 = vmul.f32 %v4524_v34, %v12513_v16  ;;  %v4549_v46 = vmul.f32 %v4485_v17, %v12484_v6  ;;  %v3165_v10 = vmul.f32 %v3047_v48, %v11397_v58 }
 0x41c   : > { %v5379_v26 = vmul.f32 %v5315_v18, %v11990_v57  ;;  %v4868_v32 = vadd.f32 0.2548296, %v4804_v36  ;;  %v3298_v51 = vadd.f32 %v12038_v50, %v3231_v33  ;;  %5971 = vxpose.xlu1.b32.cont [2/8] (short) (narrow) %v5782_v2, 16  ;;  %v5132_v8 = vmul.f32 1.442695, %v12320_v24 }
 0x41d   : > { %v3053_v60 = vmul.f32 %v12452_v63, %v3052_v49  ;;  %v4652_v39 = vadd.f32 1.4214138, %v4588_v28  ;;  %v4613_v41 = vadd.f32 1.4214138, %v4549_v46  ;;  %6720 = vmatmul.msk.f32.gmra.mxu3 %vm577_vm1, %v5547_v23  ;;  %v5210_v57 = vmul.f32 1.442695, %v5100_v25 }
 0x41e   : > { %v5443_v48 = vadd.f32 1.0, %v5379_v26  ;;  %v4932_v45 = vmul.f32 %v4868_v32, %v12224_v9  ;;  %6667 = vmatmul.msk.f32.gmra.mxu2 %vm1565_vm0, %v3298_v51  ;;  %v12554_v24 = vadd.f32 %v12392_v13, %v3659_v21  ;;  %v4870_v4 = vadd.f32 0.2548296, %v4806_v40 }
 0x41f   : > { %7180 = vpow2.f32 %v12503_v59  ;;  %v4716_v44 = vmul.f32 %v4652_v39, %v12513_v16  ;;  %v4677_v42 = vmul.f32 %v4613_v41, %v12484_v6  ;;  %v3232_v9 = vmul.f32 %v12021_v37, %v3165_v10  ;;  %v14068_v10 = vld [vmem:[#allocation4_spill] sm:$0xff] }
 0x420   : > { %v5507_v5 = vmul.f32 %v5443_v48, %v11982_v55  ;;  %v5252_v54 = vmul.f32 %v12210_v11, %v4932_v45  ;;  %v12566_v0 = vmul.f32 %v12554_v24, %v8807_v27  ;;  %7182 = vpow2.f32 %v5132_v8 }
 0x421   : > { %v3057_v59 = vsel %vm12547_vm5, %v12452_v63, %v3053_v60  ;;  %v4780_v35 = vadd.f32 -0.28449672, %v4716_v44  ;;  %v4741_v14 = vadd.f32 -0.28449672, %v4677_v42  ;;  %7184 = vpow2.f32 %v5210_v57  ;;  %v12595_v60 = vpop.f32.mrf.mxu3  ;;  %v14071_v44 = vld [vmem:[#allocation15_spill] sm:$0xff] }
 0x422   : > { %6680 = vmatmul.msk.f32.gmra.mxu1 %vm577_vm1, %v5507_v5  ;;  %v5316_v20 = vsub.f32 1.0, %v5252_v54  ;;  %v5785_v55 = vadd.f32 %v12498_v31, %v5784_v30  ;;  %v12574_v11 = vand.u32 2147483647, %v12566_v0  ;;  %v3908_v52 = vsel %vm3844_vm4, 1.0, %v13766_v61  ;;  %v14072_v30 = vld [vmem:[#allocation31_spill] sm:$0xff] }
 0x423   : > { %v4934_v56 = vmul.f32 %v4870_v4, %v12436_v7  ;;  %v4844_v62 = vmul.f32 %v4780_v35, %v12513_v16  ;;  %v4805_v63 = vmul.f32 %v4741_v14, %v12484_v6  ;;  %v3166_v33 = vmul.f32 %v3057_v59, %v14067_v47 }
 0x424   : > { %v5380_v43 = vmul.f32 %v5316_v20, %v3908_v52  ;;  %v3299_v49 = vadd.f32 %v12038_v50, %v3232_v9  ;;  %5972 = vxpose.xlu1.b32.cont [3/8] (short) (narrow) %v5785_v55, 16  ;;  %v4077_v34 = vmul.f32 0.3275911, %v12574_v11  ;;  %v5827_v19 = vadd.f32 %v12498_v31, %v11659_v22  ;;  %v14069_v22 = vld [vmem:[#allocation24_spill] sm:$0xff] }
 0x425   : > { %v7181_v17 = vpop.eup %7180  ;;  %v4908_v25 = vadd.f32 0.2548296, %v4844_v62  ;;  %v4869_v18 = vadd.f32 0.2548296, %v4805_v63  ;;  %v3716_v7 = vmul.f32 0.5, %v11931_v29  ;;  %v3233_v51 = vmul.f32 %v12021_v37, %v3166_v33 }
 0x426   : > { %v5444_v36 = vadd.f32 1.0, %v5380_v43  ;;  %6668 = vmatmul.msk.f32.gmra.mxu2 %vm1565_vm0, %v3299_v49  ;;  %v4141_v2 = vadd.f32 1.0, %v4077_v34  ;;  %v7183_v23 = vpop.eup %7182  ;;  %v5254_v40 = vmul.f32 %v7181_v17, %v4934_v56  ;;  %v4429_v26 = vmul.f32 1.0614054, %v14068_v10 }
 0x427   : > { %v4972_v28 = vmul.f32 %v4908_v25, %v12513_v16  ;;  %v4933_v46 = vmul.f32 %v4869_v18, %v12484_v6  ;;  %v7185_v21 = vpop.eup %7184  ;;  %6034 = vxpose.xlu0.b32.start [1/8] (short) (narrow) %v5827_v19, 16  ;;  %vm3845_vm2 = vcmp.ge.f32.partialorder %v14069_v22, 0.0  ;;  %vm3884_vm6 = vcmp.ge.f32.partialorder %v12409_v53, 0.0  ;;  %v14070_v16 = vld [vmem:[#allocation45_spill] sm:$0xff]  ;;  %v14073_v25 = vld [vmem:[#allocation2_spill] sm:$0xff] }
 0x428   : > { %v5508_v32 = vmul.f32 %v5444_v36, %v3716_v7  ;;  %7186 = vrcp.f32 %v4141_v2  ;;  %vm3846_vm7 = vcmp.ge.f32.partialorder %v14070_v16, 0.0  ;;  %v5318_v6 = vsub.f32 1.0, %v5254_v40  ;;  %v14074_v7 = vld [vmem:[#allocation23_spill] sm:$0xff] }
 0x429   : > { %v5292_v29 = vmul.f32 %v7185_v21, %v4972_v28  ;;  %v5253_v8 = vmul.f32 %v7183_v23, %v4933_v46  ;;  %v3909_v58 = vsel %vm3845_vm2, 1.0, %v13766_v61  ;;  %v3948_v37 = vsel %vm3884_vm6, 1.0, %v13766_v61  ;;  %v12618_v43 = vpop.f32.mrf.mxu3 }
 0x42a   : > { %6681 = vmatmul.msk.f32.gmra.mxu1 %vm577_vm1, %v5508_v32  ;;  %v3300_v57 = vadd.f32 %v12038_v50, %v3233_v51  ;;  %v4493_v48 = vadd.f32 -1.4531521, %v4429_v26  ;;  %v5830_v42 = vadd.f32 %v12498_v31, %v14071_v44  ;;  %v3717_v5 = vmul.f32 0.5, %v14072_v30  ;;  %v3545_v50 = vpop.f32.mrf.mxu0  ;;  %v14075_v32 = vld [vmem:[#allocation11_spill] sm:$0xff] }
 0x42b   : > { %v5356_v39 = vsub.f32 1.0, %v5292_v29  ;;  %v5317_v41 = vsub.f32 1.0, %v5253_v8  ;;  %v3910_v54 = vsel %vm3846_vm7, 1.0, %v13766_v61  ;;  %v3756_v9 = vmul.f32 0.5, %v12395_v3 }
 0x42c   : > { %v5382_v59 = vmul.f32 %v5318_v6, %v3910_v54  ;;  %v12609_v55 = vadd.f32 %v12392_v13, %v3545_v50  ;;  %v4557_v52 = vmul.f32 %v4493_v48, %v14068_v10  ;;  %v5037_v49 = vsub.f32 0.0, %v12574_v11 }
 0x42d   : > { %v5420_v45 = vmul.f32 %v5356_v39, %v3948_v37  ;;  %v5381_v53 = vmul.f32 %v5317_v41, %v3909_v58  ;;  %v3718_v18 = vmul.f32 0.5, %v14073_v25  ;;  %v5833_v36 = vadd.f32 %v12498_v31, %v14074_v7  ;;  %v14076_v41 = vld [vmem:[#allocation19_spill] sm:$0xff] }
 0x42e   : > { %v7187_v4 = vpop.eup %7186  ;;  %6669 = vmatmul.msk.f32.gmra.mxu2 %vm1565_vm0, %v3300_v57  ;;  %v12614_v47 = vmul.f32 %v12609_v55, %v8807_v27  ;;  %v5446_v3 = vadd.f32 1.0, %v5382_v59  ;;  %v4621_v17 = vadd.f32 1.4214138, %v4557_v52  ;;  %v5101_v28 = vmul.f32 %v5037_v49, %v12574_v11 }
 0x42f   : > { %v5484_v35 = vadd.f32 1.0, %v5420_v45  ;;  %v5445_v14 = vadd.f32 1.0, %v5381_v53  ;;  %v4269_v20 = vmul.f32 %v7187_v4, %v4141_v2  ;;  %6035 = vxpose.xlu0.b32.cont [2/8] (short) (narrow) %v5830_v42, 16  ;;  %v5005_v51 = vsub.f32 0.0, %v14075_v32 }
 0x430   : > { %v3975_v34 = vand.u32 2147483647, %v12614_v47  ;;  %v5510_v23 = vmul.f32 %v5446_v3, %v3718_v18  ;;  %v4685_v21 = vmul.f32 %v4621_v17, %v14068_v10  ;;  %v5212_v8 = vmul.f32 1.442695, %v5101_v28 }
 0x431   : > { %v5548_v56 = vmul.f32 %v5484_v35, %v3756_v9  ;;  %v5509_v62 = vmul.f32 %v5445_v14, %v3717_v5  ;;  %v4333_v63 = vsub.f32 2.0, %v4269_v20  ;;  %v12629_v29 = vpop.f32.mrf.mxu3  ;;  %v5069_v39 = vmul.f32 %v5005_v51, %v14075_v32  ;;  %v14077_v20 = vld [vmem:[#allocation3_spill] sm:$0xff] }
 0x432   : > { %v4039_v2 = vmul.f32 0.3275911, %v3975_v34  ;;  %v4749_v16 = vadd.f32 -0.28449672, %v4685_v21  ;;  %v5836_v11 = vadd.f32 %v12498_v31, %v14076_v41  ;;  %v3548_v53 = vpop.f32.mrf.mxu0  ;;  %v5839_v50 = vadd.f32 %v12498_v31, %v14077_v20  ;;  %v3662_v41 = vpop.f32.mrf.mxu2 }
 0x433   : > { %6682 = vmatmul.msk.f32.gmra.mxu1 %vm577_vm1, %v5509_v62  ;;  %v4397_v33 = vmul.f32 %v7187_v4, %v4333_v63  ;;  %6721 = vmatmul.msk.f32.gmra.mxu3 %vm577_vm1, %v5548_v56  ;;  %v5148_v4 = vmul.f32 1.442695, %v5069_v39  ;;  %v12636_v44 = vadd.f32 %v12392_v13, %v3548_v53  ;;  %v4999_v52 = vsub.f32 0.0, %v3975_v34 }
 0x434   : > { %v4103_v46 = vadd.f32 1.0, %v4039_v2  ;;  %v4813_v57 = vmul.f32 %v4749_v16, %v14068_v10  ;;  %vm3885_vm11 = vcmp.ge.f32.partialorder %v12566_v0, 0.0  ;;  %v3757_v28 = vmul.f32 0.5, %v12554_v24 }
 0x435   : > { %v4461_v19 = vmul.f32 1.0614054, %v4397_v33  ;;  %v12642_v54 = vmul.f32 %v12636_v44, %v8807_v27  ;;  %v3949_v25 = vsel %vm3885_vm11, 1.0, %v13766_v61  ;;  %v5063_v18 = vmul.f32 %v4999_v52, %v3975_v34 }
 0x436   : > { %7188 = vrcp.f32 %v4103_v46  ;;  %v4877_v9 = vadd.f32 0.2548296, %v4813_v57  ;;  %vm3847_vm12 = vcmp.ge.f32.partialorder %v12614_v47, 0.0 }
 0x437   : > { %v4525_v40 = vadd.f32 -1.4531521, %v4461_v19  ;;  %6036 = vxpose.xlu0.b32.cont [3/8] (short) (narrow) %v5833_v36, 16  ;;  %7190 = vpow2.f32 %v5212_v8  ;;  %v12647_v56 = vand.u32 2147483647, %v12642_v54  ;;  %vm3848_vm13 = vcmp.ge.f32.partialorder %v12642_v54, 0.0 }
 0x438   : > { %7192 = vpow2.f32 %v5148_v4  ;;  %v4941_v49 = vmul.f32 %v4877_v9, %v14068_v10  ;;  %v14078_v10 = vld [vmem:[#allocation9_spill] sm:$0xff]  ;;  %v5136_v34 = vmul.f32 1.442695, %v5063_v18 }
 0x439   : > { %v4589_v26 = vmul.f32 %v4525_v40, %v4397_v33  ;;  %v12638_v5 = vpop.f32.mrf.mxu3  ;;  %v4040_v3 = vmul.f32 0.3275911, %v12647_v56  ;;  %v5000_v20 = vsub.f32 0.0, %v12647_v56 }
 0x43a   : > { %v3551_v2 = vpop.f32.mrf.mxu0 }
 0x43b   : > { %6683 = vmatmul.msk.f32.gmra.mxu1 %vm577_vm1, %v5510_v23  ;;  %v4653_v22 = vadd.f32 1.4214138, %v4589_v26  ;;  %v4104_v19 = vadd.f32 1.0, %v4040_v3  ;;  %v12654_v0 = vadd.f32 %v12392_v13, %v3551_v2  ;;  %v5842_v26 = vadd.f32 %v12498_v31, %v14078_v10  ;;  %v14081_v2 = vld [vmem:[#allocation25_spill] sm:$0xff] }
 0x43c   : > { %v7189_v37 = vpop.eup %7188  ;;  %v3911_v10 = vsel %vm3847_vm12, 1.0, %v13766_v61 }
 0x43d   : > { %v4717_v6 = vmul.f32 %v4653_v22, %v4397_v33  ;;  %v4231_v45 = vmul.f32 %v7189_v37, %v4103_v46  ;;  %v7191_v14 = vpop.eup %7190  ;;  %7194 = vrcp.f32 %v4104_v19  ;;  %v12663_v51 = vmul.f32 %v12654_v0, %v8807_v27 }
 0x43e   : > { %v7193_v23 = vpop.eup %7192  ;;  %7196 = vpow2.f32 %v5136_v34  ;;  %v3665_v18 = vpop.f32.mrf.mxu2 }
 0x43f   : > { %v4781_v58 = vadd.f32 -0.28449672, %v4717_v6  ;;  %6037 = vxpose.xlu0.b32.cont [4/8] (short) (narrow) %v5836_v11, 16  ;;  %v4295_v30 = vsub.f32 2.0, %v4231_v45  ;;  %v5261_v40 = vmul.f32 %v7193_v23, %v4941_v49  ;;  %v12666_v16 = vand.u32 2147483647, %v12663_v51 }
 0x440   : > { %v14079_v6 = vld [vmem:[#allocation50_spill] sm:$0xff]  ;;  %v5848_v23 = vadd.f32 %v12498_v31, %v14081_v2  ;;  %vm3849_vm14 = vcmp.ge.f32.partialorder %v12663_v51, 0.0 }
 0x441   : > { %v4845_v48 = vmul.f32 %v4781_v58, %v4397_v33  ;;  %v4359_v35 = vmul.f32 %v7189_v37, %v4295_v30  ;;  %v12659_v32 = vpop.f32.mrf.mxu3  ;;  %vm3853_vm8 = vcmp.ge.f32.partialorder %v14079_v6, 0.0  ;;  %v5325_v24 = vsub.f32 1.0, %v5261_v40 }
 0x442   : > { %v4041_v58 = vmul.f32 0.3275911, %v12666_v16  ;;  %v12672_v37 = vadd.f32 %v12392_v13, %v3662_v41  ;;  %v3917_v45 = vsel %vm3853_vm8, 1.0, %v13766_v61  ;;  %v12700_v40 = vadd.f32 %v12498_v31, %v12595_v60 }
 0x443   : > { %v4909_v42 = vadd.f32 0.2548296, %v4845_v48  ;;  %v4423_v63 = vmul.f32 1.0614054, %v4359_v35  ;;  %v7195_v11 = vpop.eup %7194 }
 0x444   : > { %v4232_v48 = vmul.f32 %v7195_v11, %v4104_v19  ;;  %v4105_v53 = vadd.f32 1.0, %v4041_v58  ;;  %v12677_v4 = vmul.f32 %v12672_v37, %v8807_v27  ;;  %v3719_v58 = vmul.f32 0.5, %v12609_v55 }
 0x445   : > { %v4973_v59 = vmul.f32 %v4909_v42, %v4397_v33  ;;  %v4487_v17 = vadd.f32 -1.4531521, %v4423_v63  ;;  %v5389_v42 = vmul.f32 %v5325_v24, %v3917_v45  ;;  %v7197_v63 = vpop.eup %7196  ;;  %v12712_v24 = vadd.f32 %v12498_v31, %v12618_v43 }
 0x446   : > { %v4296_v9 = vsub.f32 2.0, %v4232_v48  ;;  %7198 = vrcp.f32 %v4105_v53  ;;  %v12727_v43 = vadd.f32 %v12498_v31, %v12638_v5  ;;  %v5001_v5 = vsub.f32 0.0, %v12666_v16 }
 0x447   : > { %v5293_v62 = vmul.f32 %v7191_v14, %v4973_v59  ;;  %6038 = vxpose.xlu0.b32.cont [5/8] (short) (narrow) %v5839_v50, 16  ;;  %v4551_v36 = vmul.f32 %v4487_v17, %v4359_v35  ;;  %v14080_v59 = vld [vmem:[#allocation44_spill] sm:$0xff]  ;;  %v12683_v50 = vand.u32 2147483647, %v12677_v4  ;;  %v12690_v19 = vadd.f32 1.0, %v5389_v42 }
 0x448   : > { %v5845_v14 = vadd.f32 %v12498_v31, %v14080_v59  ;;  %v12731_v42 = vadd.f32 %v12498_v31, %v12659_v32  ;;  %vm3886_vm10 = vcmp.ge.f32.partialorder %v12677_v4, 0.0 }
 0x449   : > { %v5357_v33 = vsub.f32 1.0, %v5293_v62  ;;  %v4615_v21 = vadd.f32 1.4214138, %v4551_v36  ;;  %v12685_v62 = vmul.f32 %v7195_v11, %v4296_v9  ;;  %v5889_v3 = vpop.f32.mrf.mxu3  ;;  %v4078_v49 = vmul.f32 0.3275911, %v12683_v50 }
 0x44b   : > { %v5421_v7 = vmul.f32 %v5357_v33, %v3949_v25  ;;  %v4679_v8 = vmul.f32 %v4615_v21, %v4359_v35  ;;  %v4424_v17 = vmul.f32 1.0614054, %v12685_v62  ;;  %v2333_v25 = vpop.xlane.xlu1 %2332  ;;  %v4142_v36 = vadd.f32 1.0, %v4078_v49 }
 0x44c   : > { %v7199_v21 = vpop.eup %7198 }
 0x44d   : > { %v5485_v46 = vadd.f32 1.0, %v5421_v7  ;;  %v4743_v39 = vadd.f32 -0.28449672, %v4679_v8  ;;  %v5064_v7 = vmul.f32 %v5000_v20, %v12647_v56  ;;  %7200 = vrcp.f32 %v4142_v36 }
 0x44e   : > { %v2401_v56 = vmul.f32 %v2333_v25, %v7647_v15  ;;  %v4233_v6 = vmul.f32 %v7199_v21, %v4105_v53  ;;  %v12723_v53 = vadd.f32 %v12498_v31, %v12629_v29 }
 0x44f   : > { %v5549_v22 = vmul.f32 %v5485_v46, %v3757_v28  ;;  %6039 = vxpose.xlu0.b32.cont [6/8] (short) (narrow) %v5842_v26, 16  ;;  %v4807_v57 = vmul.f32 %v4743_v39, %v4359_v35  ;;  %v4488_v28 = vadd.f32 -1.4531521, %v4424_v17  ;;  %v3554_v46 = vpop.f32.mrf.mxu0  ;;  %v5138_v39 = vmul.f32 1.442695, %v5064_v7 }
 0x450   : > { %v12718_v11 = vadd.f32 %v12392_v13, %v3554_v46  ;;  %v4297_v45 = vsub.f32 2.0, %v4233_v6  ;;  %v12737_v20 = vadd.f32 1e-05, %v2401_v56 }
 0x451   : > { %6722 = vmatmul.msk.f32.gmra.mxu3 %vm577_vm1, %v5549_v22  ;;  %v4871_v30 = vadd.f32 0.2548296, %v4807_v57  ;;  %v4552_v8 = vmul.f32 %v4488_v28, %v12685_v62  ;;  %v5892_v55 = vpop.f32.mrf.mxu3  ;;  %7202 = vpow2.f32 %v5138_v39 }
 0x452   : > { %v12745_v32 = vmul.f32 %v12718_v11, %v8807_v27  ;;  %v12750_v25 = vadd.f32 %v12498_v31, %v5892_v55  ;;  %v12790_v55 = vsel %vm3886_vm10, 1.0, %v13766_v61  ;;  %vm3084_vm3 = vweird.f32 %v12737_v20 }
 0x453   : > { %v4935_v52 = vmul.f32 %v4871_v30, %v4359_v35  ;;  %v12694_v35 = vadd.f32 %v12392_v13, %v3665_v18  ;;  %v4616_v48 = vadd.f32 1.4214138, %v4552_v8  ;;  %v7201_v29 = vpop.eup %7200 }
 0x454   : > { %v4270_v17 = vmul.f32 %v7201_v29, %v4142_v36  ;;  %v5065_v36 = vmul.f32 %v5001_v5, %v12666_v16  ;;  %v12762_v28 = vand.u32 2147483647, %v12745_v32  ;;  %vm3850_vm9 = vcmp.ge.f32.partialorder %v12745_v32, 0.0 }
 0x455   : > { %v5255_v33 = vmul.f32 %v7197_v63, %v4935_v52  ;;  %v12706_v26 = vmul.f32 %v12694_v35, %v8807_v27  ;;  %v4680_v59 = vmul.f32 %v4616_v48, %v12685_v62  ;;  %v12740_v52 = vadd.f32 %v12498_v31, %v5889_v3 }
 0x456   : > { %v12753_v3 = vmul.f32 0.5, %v12636_v44  ;;  %v4334_v2 = vsub.f32 2.0, %v4270_v17  ;;  %v3912_v44 = vsel %vm3848_vm13, 1.0, %v13766_v61  ;;  %v4042_v51 = vmul.f32 0.3275911, %v12762_v28 }
 0x457   : > { %6040 = vxpose.xlu0.b32.cont [7/8] (short) (narrow) %v5845_v14, 16  ;;  %v5319_v47 = vsub.f32 1.0, %v5255_v33  ;;  %v12715_v41 = vand.u32 2147483647, %v12706_v26  ;;  %v12735_v14 = vmul.f32 %v7199_v21, %v4297_v45  ;;  %v4744_v49 = vadd.f32 -0.28449672, %v4680_v59  ;;  %v7203_v56 = vpop.eup %7202  ;;  %v3668_v45 = vpop.f32.mrf.mxu2 }
 0x458   : > { %v12766_v21 = vmul.f32 %v7201_v29, %v4334_v2  ;;  %v5140_v39 = vmul.f32 1.442695, %v5065_v36  ;;  %v4106_v48 = vadd.f32 1.0, %v4042_v51  ;;  %vm3887_vm15 = vcmp.ge.f32.partialorder %v12706_v26, 0.0 }
 0x459   : > { %v5383_v22 = vmul.f32 %v5319_v47, %v3911_v10  ;;  %v4079_v30 = vmul.f32 0.3275911, %v12715_v41  ;;  %v4425_v33 = vmul.f32 1.0614054, %v12735_v14  ;;  %v4808_v18 = vmul.f32 %v4744_v49, %v12685_v62 }
 0x45a   : > { %v5787_v34 = vpop.f32.mrf.mxu1  ;;  %v5038_v47 = vsub.f32 0.0, %v12683_v50  ;;  %v12769_v10 = vmul.f32 0.5, %v12654_v0  ;;  %v4462_v6 = vmul.f32 1.0614054, %v12766_v21  ;;  %v5039_v36 = vsub.f32 0.0, %v12715_v41 }
 0x45b   : > { %v5788_v60 = vadd.f32 %v12498_v31, %v5787_v34  ;;  %v5447_v57 = vadd.f32 1.0, %v5383_v22  ;;  %v4143_v63 = vadd.f32 1.0, %v4079_v30  ;;  %v4489_v7 = vadd.f32 -1.4531521, %v4425_v33 }
 0x45c   : > { %v4872_v54 = vadd.f32 0.2548296, %v4808_v18  ;;  %v12777_v22 = vsel %vm3849_vm14, 1.0, %v13766_v61  ;;  %v12797_v33 = vadd.f32 %v12392_v13, %v3668_v45  ;;  %v12825_v45 = vsel %vm3887_vm15, 1.0, %v13766_v61 }
 0x45d   : > { %5973 = vxpose.xlu1.b32.cont [4/8] (short) (narrow) %v5788_v60, 16  ;;  %v5511_v9 = vmul.f32 %v5447_v57, %v3719_v58  ;;  %7204 = vrcp.f32 %v4143_v63  ;;  %v4553_v46 = vmul.f32 %v4489_v7, %v12735_v14  ;;  %v2330_v60 = vpop.xlane.xlu0 %2329  ;;  %v12781_v58 = vmul.f32 0.5, %v12672_v37 }
 0x45e   : > { %7206 = vrsqrt.f32 %v12737_v20  ;;  %v4936_v34 = vmul.f32 %v4872_v54, %v12685_v62  ;;  %v5102_v57 = vmul.f32 %v5038_v47, %v12683_v50  ;;  %v2400_v37 = vmul.f32 %v2330_v60, %v7647_v15 }
 0x45f   : > { %6041 = vxpose.xlu0.b32.end [8/8] (short) (narrow) %v5848_v23, 16  ;;  %6684 = vmatmul.msk.f32.gmra.mxu1 %vm577_vm1, %v5511_v9  ;;  %v2327_v23 = vpop.xlane.xlu2 %2326  ;;  %v4617_v8 = vadd.f32 1.4214138, %v4553_v46  ;;  %v4526_v9 = vadd.f32 -1.4531521, %v4462_v6  ;;  %7208 = vrcp.f32 %v4106_v48  ;;  %v3557_v6 = vpop.f32.mrf.mxu0 }
 0x460   : > { %v2399_v16 = vmul.f32 %v2327_v23, %v7647_v15  ;;  %v5256_v30 = vmul.f32 %v7203_v56, %v4936_v34  ;;  %7210 = vpow2.f32 %v5140_v39  ;;  %v5214_v17 = vmul.f32 1.442695, %v5102_v57 }
 0x461   : > { %v4681_v62 = vmul.f32 %v4617_v8, %v12735_v14  ;;  %v4590_v49 = vmul.f32 %v4526_v9, %v12766_v21  ;;  %v12807_v47 = vadd.f32 1e-05, %v2400_v37  ;;  %v12817_v34 = vmul.f32 0.5, %v12694_v35 }
 0x462   : > { %v12793_v29 = vadd.f32 1e-05, %v2399_v16  ;;  %v5320_v50 = vsub.f32 1.0, %v5256_v30 }
 0x463   : > { %v7205_v0 = vpop.eup %7204  ;;  %v4745_v5 = vadd.f32 -0.28449672, %v4681_v62  ;;  %v4654_v2 = vadd.f32 1.4214138, %v4590_v49  ;;  %v5103_v62 = vmul.f32 %v5039_v36, %v12715_v41  ;;  %v5002_v36 = vsub.f32 0.0, %v12762_v28 }
 0x464   : > { %v4271_v59 = vmul.f32 %v7205_v0, %v4143_v63  ;;  %v5384_v7 = vmul.f32 %v5320_v50, %v3912_v44  ;;  %7212 = vrsqrt.f32 %v12793_v29  ;;  %v12813_v44 = vmul.f32 %v12797_v33, %v8807_v27 }
 0x465   : > { %v4809_v63 = vmul.f32 %v4745_v5, %v12735_v14  ;;  %v4718_v51 = vmul.f32 %v4654_v2, %v12766_v21  ;;  %7214 = vpow2.f32 %v5214_v17  ;;  %v12840_v50 = vadd.f32 %v12392_v13, %v3557_v6 }
 0x466   : > { %v4335_v18 = vsub.f32 2.0, %v4271_v59  ;;  %v5448_v54 = vadd.f32 1.0, %v5384_v7  ;;  %v12829_v35 = vand.u32 2147483647, %v12813_v44  ;;  %v5895_v59 = vpop.f32.mrf.mxu3  ;;  %7216 = vrsqrt.f32 %v12807_v47 }
 0x467   : > { %6098 = vxpose.xlu0.b32.start [1/8] (short) (narrow) %v12700_v40, 16  ;;  %v12784_v40 = vpop.eup %7206  ;;  %v4873_v46 = vadd.f32 0.2548296, %v4809_v63  ;;  %v12846_v7 = vadd.f32 %v12498_v31, %v5895_v59  ;;  %v5216_v2 = vmul.f32 1.442695, %v5103_v62  ;;  %vm3074_vm6 = vweird.f32 %v12807_v47 }
 0x468   : > { %v3079_v4 = vmul.f32 %v12784_v40, %v12737_v20  ;;  %v12804_v23 = vmul.f32 %v7205_v0, %v4335_v18  ;;  %v7209_v16 = vpop.eup %7208  ;;  %v4782_v0 = vadd.f32 -0.28449672, %v4718_v51  ;;  %vm3085_vm4 = vweird.f32 %v12784_v40 }
 0x469   : > { %v4937_v60 = vmul.f32 %v4873_v46, %v12735_v14  ;;  %v4234_v39 = vmul.f32 %v7209_v16, %v4106_v48  ;;  %v7211_v57 = vpop.eup %7210  ;;  %vm12906_vm5 = vmor %vm3084_vm3, %vm3085_vm4  ;;  %vm3064_vm7 = vweird.f32 %v12793_v29  ;;  %vm3888_vm12 = vcmp.ge.f32.partialorder %v12813_v44, 0.0 }
 0x46a   : > { %v3080_v56 = vmul.f32 %v12784_v40, %v3079_v4  ;;  %v4463_v8 = vmul.f32 1.0614054, %v12804_v23  ;;  %v12831_v9 = vpop.eup %7212  ;;  %v4846_v14 = vmul.f32 %v4782_v0, %v12766_v21  ;;  %v4080_v4 = vmul.f32 0.3275911, %v12829_v35 }
 0x46b   : > { %v4298_v37 = vsub.f32 2.0, %v4234_v39  ;;  %v3059_v41 = vmul.f32 %v12831_v9, %v12793_v29  ;;  %v7215_v18 = vpop.eup %7214  ;;  %v5066_v0 = vmul.f32 %v5002_v36, %v12762_v28  ;;  %vm3065_vm2 = vweird.f32 %v12831_v9 }
 0x46c   : > { %v4527_v30 = vadd.f32 -1.4531521, %v4463_v8  ;;  %v3081_v26 = vmul.f32 0.5, %v3080_v56  ;;  %v4910_v49 = vadd.f32 0.2548296, %v4846_v14  ;;  %v4144_v51 = vadd.f32 1.0, %v4080_v4  ;;  %v12859_v8 = vpop.eup %7216  ;;  %vm12939_vm11 = vmor %vm3064_vm7, %vm3065_vm2 }
 0x46d   : > { %v12842_v17 = vmul.f32 %v7209_v16, %v4298_v37  ;;  %v12855_v56 = vmul.f32 0.5, %v12718_v11  ;;  %v3060_v31 = vmul.f32 %v12831_v9, %v3059_v41  ;;  %v3560_v11 = vpop.f32.mrf.mxu0  ;;  %v3069_v59 = vmul.f32 %v12859_v8, %v12807_v47 }
 0x46e   : > { %v4591_v48 = vmul.f32 %v4527_v30, %v12804_v23  ;;  %v4974_v13 = vmul.f32 %v4910_v49, %v12766_v21  ;;  %v12863_v21 = vmul.f32 %v12840_v50, %v8807_v27  ;;  %7218 = vrcp.f32 %v4144_v51 }
 0x46f   : > { %6099 = vxpose.xlu0.b32.cont [2/8] (short) (narrow) %v12712_v24, 16  ;;  %v5512_v24 = vmul.f32 %v5448_v54, %v12753_v3  ;;  %v5257_v3 = vmul.f32 %v7211_v57, %v4937_v60  ;;  %v4426_v46 = vmul.f32 1.0614054, %v12842_v17  ;;  %7220 = vpow2.f32 %v5216_v2 }
 0x470   : > { %v4655_v63 = vadd.f32 1.4214138, %v4591_v48  ;;  %v12874_v28 = vand.u32 2147483647, %v12863_v21  ;;  %v5142_v41 = vmul.f32 1.442695, %v5066_v0  ;;  %v3070_v36 = vmul.f32 %v12859_v8, %v3069_v59 }
 0x471   : > { %6685 = vmatmul.msk.f32.gmra.mxu1 %vm577_vm1, %v5512_v24  ;;  %v5321_v5 = vsub.f32 1.0, %v5257_v3  ;;  %v4490_v24 = vadd.f32 -1.4531521, %v4426_v46  ;;  %v3061_v3 = vmul.f32 0.5, %v3060_v31  ;;  %vm3075_vm8 = vweird.f32 %v12859_v8 }
 0x472   : > { %v4719_v16 = vmul.f32 %v4655_v63, %v12804_v23  ;;  %7222 = vpow2.f32 %v5142_v41  ;;  %v2339_v41 = vpop.xlane.xlu0 %2338  ;;  %vm12992_vm13 = vmor %vm3074_vm6, %vm3075_vm8  ;;  %vm3851_vm14 = vcmp.ge.f32.partialorder %v12863_v21, 0.0 }
 0x473   : > { %v5385_v54 = vmul.f32 %v5321_v5, %v12777_v22  ;;  %v3082_v22 = vsub.f32 1.5, %v3081_v26  ;;  %v4554_v30 = vmul.f32 %v4490_v24, %v12842_v17  ;;  %v5040_v24 = vsub.f32 0.0, %v12829_v35 }
 0x474   : > { %v4783_v60 = vadd.f32 -0.28449672, %v4719_v16  ;;  %v7219_v63 = vpop.eup %7218 }
 0x475   : > { %v5449_v6 = vadd.f32 1.0, %v5385_v54  ;;  %v4618_v37 = vadd.f32 1.4214138, %v4554_v30  ;;  %v3083_v49 = vmul.f32 %v12784_v40, %v3082_v22  ;;  %v3062_v54 = vsub.f32 1.5, %v3061_v3  ;;  %v7221_v46 = vpop.eup %7220 }
 0x476   : > { %v4847_v62 = vmul.f32 %v4783_v60, %v12804_v23  ;;  %v4272_v31 = vmul.f32 %v7219_v63, %v4144_v51  ;;  %v3671_v60 = vpop.f32.mrf.mxu2 }
 0x477   : > { %6100 = vxpose.xlu0.b32.cont [3/8] (short) (narrow) %v12723_v53, 16  ;;  %v5294_v53 = vmul.f32 %v7215_v18, %v4974_v13  ;;  %v5513_v39 = vmul.f32 %v5449_v6, %v12769_v10  ;;  %v12879_v10 = vld [vmem:[%s13601_s11] ss:$0 sm:$0xff]  ;;  %v4682_v4 = vmul.f32 %v4618_v37, %v12842_v17  ;;  %v4043_v18 = vmul.f32 0.3275911, %v12874_v28  ;;  %v2336_v13 = vpop.xlane.xlu2 %2335 }
 0x478   : > { %v12882_v26 = vadd.f32 %v12879_v10, %v3560_v11  ;;  %v4911_v48 = vadd.f32 0.2548296, %v4847_v62  ;;  %v4336_v0 = vsub.f32 2.0, %v4272_v31  ;;  %v2402_v20 = vmul.f32 %v2336_v13, %v7647_v15 }
 0x479   : > { %v5358_v57 = vsub.f32 1.0, %v5294_v53  ;;  %6686 = vmatmul.msk.f32.gmra.mxu1 %vm577_vm1, %v5513_v39  ;;  %v4107_v6 = vadd.f32 1.0, %v4043_v18  ;;  %v3087_v51 = vsel %vm12906_vm5, %v12784_v40, %v3083_v49  ;;  %v3071_v39 = vmul.f32 0.5, %v3070_v36  ;;  %v7223_v49 = vpop.eup %7222 }
 0x47a   : > { %v4975_v2 = vmul.f32 %v4911_v48, %v12804_v23  ;;  %v12899_v32 = vmul.f32 %v12882_v26, %v8807_v27  ;;  %v4746_v23 = vadd.f32 -0.28449672, %v4682_v4  ;;  %v3063_v62 = vmul.f32 %v12831_v9, %v3062_v54  ;;  %v14084_v4 = vld [vmem:[#allocation20_spill] sm:$0xff] }
 0x47b   : > { %v5422_v14 = vmul.f32 %v5358_v57, %v12790_v55  ;;  %v12889_v55 = vsel %vm3850_vm9, 1.0, %v13766_v61  ;;  %7224 = vrcp.f32 %v4107_v6  ;;  %v12923_v59 = vmul.f32 %v7219_v63, %v4336_v0 }
 0x47c   : > { %v5295_v53 = vmul.f32 %v7221_v46, %v4975_v2  ;;  %v12912_v22 = vand.u32 2147483647, %v12899_v32  ;;  %v12935_v18 = vmul.f32 %v3087_v51, %v14084_v4  ;;  %v3072_v63 = vsub.f32 1.5, %v3071_v39 }
 0x47d   : > { %v5486_v5 = vadd.f32 1.0, %v5422_v14  ;;  %v5104_v14 = vmul.f32 %v5040_v24, %v12829_v35  ;;  %v4464_v48 = vmul.f32 1.0614054, %v12923_v59  ;;  %v12947_v36 = vadd.f32 %v12879_v10, %v3671_v60 }
 0x47e   : > { %v5359_v11 = vsub.f32 1.0, %v5295_v53  ;;  %v4044_v57 = vmul.f32 0.3275911, %v12912_v22  ;;  %v3674_v60 = vpop.f32.mrf.mxu2  ;;  %v5004_v35 = vsub.f32 0.0, %v12912_v22  ;;  %vm3852_vm10 = vcmp.ge.f32.partialorder %v12899_v32, 0.0 }
 0x47f   : > { %6101 = vxpose.xlu0.b32.cont [4/8] (short) (narrow) %v12727_v43, 16  ;;  %v5550_v43 = vmul.f32 %v5486_v5, %v12781_v58  ;;  %v4810_v58 = vmul.f32 %v4746_v23, %v12842_v17  ;;  %v12932_v5 = vadd.f32 1e-05, %v2402_v20  ;;  %v4528_v2 = vadd.f32 -1.4531521, %v4464_v48 }
 0x480   : > { %v5423_v3 = vmul.f32 %v5359_v11, %v12825_v45  ;;  %v4108_v37 = vadd.f32 1.0, %v4044_v57  ;;  %v5218_v13 = vmul.f32 1.442695, %v5104_v14  ;;  %v12955_v31 = vmul.f32 %v12947_v36, %v8807_v27 }
 0x481   : > { %6723 = vmatmul.msk.f32.gmra.mxu3 %vm577_vm1, %v5550_v43  ;;  %v4874_v30 = vadd.f32 0.2548296, %v4810_v58  ;;  %v2403_v43 = vmul.f32 %v2339_v41, %v7647_v15  ;;  %v4592_v23 = vmul.f32 %v4528_v2, %v12923_v59  ;;  %v3073_v20 = vmul.f32 %v12859_v8, %v3072_v63 }
 0x482   : > { %v5487_v45 = vadd.f32 1.0, %v5423_v3  ;;  %7226 = vrcp.f32 %v4108_v37  ;;  %v12964_v58 = vand.u32 2147483647, %v12955_v31  ;;  %v12977_v14 = vadd.f32 %v12879_v10, %v3674_v60 }
 0x483   : > { %v4938_v40 = vmul.f32 %v4874_v30, %v12842_v17  ;;  %v3067_v17 = vsel %vm12939_vm11, %v12831_v9, %v3063_v62  ;;  %7228 = vrsqrt.f32 %v12932_v5  ;;  %v14087_v9 = vld [vmem:[#allocation48_spill] sm:$0xff]  ;;  %v12969_v11 = vadd.f32 1e-05, %v2403_v43 }
 0x484   : > { %v5551_v54 = vmul.f32 %v5487_v45, %v12817_v34  ;;  %v3167_v53 = vmul.f32 %v3067_v17, %v14087_v9  ;;  %v5003_v34 = vsub.f32 0.0, %v12874_v28  ;;  %7230 = vpow2.f32 %v5218_v13 }
 0x485   : > { %v5258_v29 = vmul.f32 %v7223_v49, %v4938_v40  ;;  %v4081_v30 = vmul.f32 0.3275911, %v12964_v58  ;;  %v12982_v40 = vld [vmem:[%s13598_s8] ss:$0 sm:$0xff]  ;;  %v3077_v45 = vsel %vm12992_vm13, %v12859_v8, %v3073_v20  ;;  %7232 = vrsqrt.f32 %v12969_v11 }
 0x486   : > { %v5067_v3 = vmul.f32 %v5003_v34, %v12874_v28  ;;  %v13013_v13 = vmul.f32 %v12977_v14, %v8807_v27  ;;  %v13023_v9 = vmul.f32 0.5, %v12840_v50  ;;  %v3677_v34 = vpop.f32.mrf.mxu2  ;;  %v3952_v60 = vsel %vm3888_vm12, 1.0, %v13766_v61  ;;  %v14090_v50 = vld [vmem:[#allocation40_spill] sm:$0xff] }
 0x487   : > { %6102 = vxpose.xlu0.b32.cont [5/8] (short) (narrow) %v12731_v42, 16  ;;  %v7225_v42 = vpop.eup %7224  ;;  %v5322_v16 = vsub.f32 1.0, %v5258_v29  ;;  %v4145_v4 = vadd.f32 1.0, %v4081_v30  ;;  %v3168_v20 = vmul.f32 %v3077_v45, %v14090_v50  ;;  %v5041_v32 = vsub.f32 0.0, %v12964_v58 }
 0x488   : > { %v4235_v46 = vmul.f32 %v7225_v42, %v4107_v6  ;;  %v4656_v6 = vadd.f32 1.4214138, %v4592_v23  ;;  %v7227_v0 = vpop.eup %7226  ;;  %v5144_v17 = vmul.f32 1.442695, %v5067_v3  ;;  %v3760_v23 = vmul.f32 0.5, %v12797_v33 }
 0x489   : > { %6724 = vmatmul.msk.f32.gmra.mxu3 %vm577_vm1, %v5551_v54  ;;  %v5386_v15 = vmul.f32 %v5322_v16, %v12889_v55  ;;  %v4236_v55 = vmul.f32 %v7227_v0, %v4108_v37  ;;  %v12985_v48 = vpop.eup %7228  ;;  %7234 = vrcp.f32 %v4145_v4  ;;  %vm3104_vm15 = vweird.f32 %v12969_v11 }
 0x48a   : > { %v4299_v24 = vsub.f32 2.0, %v4235_v46  ;;  %v4720_v57 = vmul.f32 %v4656_v6, %v12923_v59  ;;  %v3089_v8 = vmul.f32 %v12985_v48, %v12932_v5  ;;  %v13018_v46 = vld [vmem:[%s13599_s9] ss:$0 sm:$0xff]  ;;  %7236 = vpow2.f32 %v5144_v17 }
 0x48b   : > { %v5450_v39 = vadd.f32 1.0, %v5386_v15  ;;  %v4300_v49 = vsub.f32 2.0, %v4236_v55  ;;  %vm3094_vm9 = vweird.f32 %v12932_v5  ;;  %vm3095_vm3 = vweird.f32 %v12985_v48 }
 0x48c   : > { %v12967_v51 = vmul.f32 %v7225_v42, %v4299_v24  ;;  %v4784_v41 = vadd.f32 -0.28449672, %v4720_v57  ;;  %v7231_v42 = vpop.eup %7230  ;;  %v5068_v24 = vmul.f32 %v5004_v35, %v12912_v22  ;;  %v13047_v22 = vsel %vm3852_vm10, 1.0, %v13766_v61  ;;  %vm13109_vm5 = vmor %vm3094_vm9, %vm3095_vm3 }
 0x48d   : > { %v5514_v37 = vmul.f32 %v5450_v39, %v12855_v56  ;;  %v13003_v47 = vmul.f32 %v7227_v0, %v4300_v49  ;;  %v13032_v0 = vand.u32 2147483647, %v13013_v13  ;;  %v13035_v33 = vpop.eup %7232  ;;  %v3090_v55 = vmul.f32 %v12985_v48, %v3089_v8 }
 0x48e   : > { %v4427_v62 = vmul.f32 1.0614054, %v12967_v51  ;;  %v4848_v56 = vmul.f32 %v4784_v41, %v12923_v59  ;;  %v3099_v28 = vmul.f32 %v13035_v33, %v12969_v11  ;;  %vm3105_vm4 = vweird.f32 %v13035_v33 }
 0x48f   : > { %6103 = vxpose.xlu0.b32.cont [6/8] (short) (narrow) %v12740_v52, 16  ;;  %v3234_v52 = vmul.f32 %v12982_v40, %v3167_v53  ;;  %6687 = vmatmul.msk.f32.gmra.mxu1 %vm577_vm1, %v5514_v37  ;;  %v4428_v54 = vmul.f32 1.0614054, %v13003_v47  ;;  %v4082_v21 = vmul.f32 0.3275911, %v13032_v0  ;;  %vm13138_vm2 = vmor %vm3104_vm15, %vm3105_vm4  ;;  %vm3889_vm6 = vcmp.ge.f32.partialorder %v12955_v31, 0.0 }
 0x490   : > { %v4491_v63 = vadd.f32 -1.4531521, %v4427_v62  ;;  %v4912_v2 = vadd.f32 0.2548296, %v4848_v56  ;;  %v5146_v62 = vmul.f32 1.442695, %v5068_v24 }
 0x491   : > { %v3301_v43 = vadd.f32 %v13018_v46, %v3234_v52  ;;  %v4492_v6 = vadd.f32 -1.4531521, %v4428_v54  ;;  %v4146_v45 = vadd.f32 1.0, %v4082_v21  ;;  %v3680_v50 = vpop.f32.mrf.mxu2  ;;  %vm3890_vm7 = vcmp.ge.f32.partialorder %v13013_v13, 0.0 }
 0x492   : > { %v4555_v29 = vmul.f32 %v4491_v63, %v12967_v51  ;;  %v4976_v15 = vmul.f32 %v4912_v2, %v12923_v59  ;;  %v7235_v59 = vpop.eup %7234  ;;  %v13059_v63 = vld [vmem:[%s13603_s13] ss:$0 sm:$0xff]  ;;  %v3235_v2 = vmul.f32 %v12982_v40, %v3168_v20 }
 0x493   : > { %6670 = vmatmul.msk.f32.gmra.mxu2 %vm1565_vm0, %v3301_v43  ;;  %v4556_v57 = vmul.f32 %v4492_v6, %v13003_v47  ;;  %v4273_v3 = vmul.f32 %v7235_v59, %v4145_v4  ;;  %7238 = vrcp.f32 %v4146_v45  ;;  %v7237_v54 = vpop.eup %7236 }
 0x494   : > { %v4619_v53 = vadd.f32 1.4214138, %v4555_v29  ;;  %v5296_v39 = vmul.f32 %v7231_v42, %v4976_v15  ;;  %v3091_v42 = vmul.f32 0.5, %v3090_v55  ;;  %v13064_v29 = vadd.f32 %v12879_v10, %v3677_v34 }
 0x495   : > { %v4620_v37 = vadd.f32 1.4214138, %v4556_v57  ;;  %v4337_v49 = vsub.f32 2.0, %v4273_v3  ;;  %7240 = vpow2.f32 %v5146_v62  ;;  %v3302_v6 = vadd.f32 %v13018_v46, %v3235_v2 }
 0x496   : > { %v5790_v16 = vpop.f32.mrf.mxu1  ;;  %v4683_v44 = vmul.f32 %v4619_v53, %v12967_v51  ;;  %v5360_v52 = vsub.f32 1.0, %v5296_v39  ;;  %v13075_v15 = vmul.f32 %v13064_v29, %v8807_v27 }
 0x497   : > { %6104 = vxpose.xlu0.b32.cont [7/8] (short) (narrow) %v12750_v25, 16  ;;  %v13041_v25 = vsel %vm3851_vm14, 1.0, %v13766_v61  ;;  %v5791_v4 = vadd.f32 %v13059_v63, %v5790_v16  ;;  %v4684_v56 = vmul.f32 %v4620_v37, %v13003_v47  ;;  %v13066_v8 = vmul.f32 %v7235_v59, %v4337_v49 }
 0x498   : > { %v4747_v30 = vadd.f32 -0.28449672, %v4683_v44  ;;  %v5424_v35 = vmul.f32 %v5360_v52, %v3952_v60  ;;  %v3100_v16 = vmul.f32 %v13035_v33, %v3099_v28  ;;  %v3092_v44 = vsub.f32 1.5, %v3091_v42 }
 0x499   : > { %5974 = vxpose.xlu1.b32.cont [5/8] (short) (narrow) %v5791_v4, 16  ;;  %v4748_v53 = vadd.f32 -0.28449672, %v4684_v56  ;;  %v4465_v34 = vmul.f32 1.0614054, %v13066_v8  ;;  %v5105_v59 = vmul.f32 %v5041_v32, %v12964_v58  ;;  %v7239_v58 = vpop.eup %7238 }
 0x49a   : > { %v4811_v41 = vmul.f32 %v4747_v30, %v12967_v51  ;;  %v5488_v43 = vadd.f32 1.0, %v5424_v35  ;;  %v13081_v55 = vand.u32 2147483647, %v13075_v15  ;;  %v3101_v3 = vmul.f32 0.5, %v3100_v16 }
 0x49b   : > { %v4529_v57 = vadd.f32 -1.4531521, %v4465_v34  ;;  %6671 = vmatmul.msk.f32.gmra.mxu2 %vm1565_vm0, %v3302_v6  ;;  %v7241_v37 = vpop.eup %7240  ;;  %v3093_v32 = vmul.f32 %v12985_v48, %v3092_v44  ;;  %v5220_v56 = vmul.f32 1.442695, %v5105_v59  ;;  %v3236_v59 = vmul.f32 %v12982_v40, %v12935_v18 }
 0x49c   : > { %v4875_v17 = vadd.f32 0.2548296, %v4811_v41  ;;  %v5552_v20 = vmul.f32 %v5488_v43, %v3760_v23  ;;  %v13089_v23 = vadd.f32 %v12879_v10, %v3680_v50  ;;  %v4083_v52 = vmul.f32 0.3275911, %v13081_v55 }
 0x49d   : > { %v4593_v21 = vmul.f32 %v4529_v57, %v13066_v8  ;;  %v4274_v41 = vmul.f32 %v7239_v58, %v4146_v45  ;;  %v3102_v43 = vsub.f32 1.5, %v3101_v3  ;;  %v3097_v16 = vsel %vm13109_vm5, %v12985_v48, %v3093_v32  ;;  %v14094_v3 = vld [vmem:[#allocation32_spill] sm:$0xff] }
 0x49e   : > { %v4939_v60 = vmul.f32 %v4875_v17, %v12967_v51  ;;  %6725 = vmatmul.msk.f32.gmra.mxu3 %vm577_vm1, %v5552_v20  ;;  %v13098_v49 = vmul.f32 %v13089_v23, %v8807_v27  ;;  %v4147_v42 = vadd.f32 1.0, %v4083_v52  ;;  %v5042_v50 = vsub.f32 0.0, %v13032_v0 }
 0x49f   : > { %6105 = vxpose.xlu0.b32.end [8/8] (short) (narrow) %v12846_v7, 16  ;;  %v5793_v24 = vpop.f32.mrf.mxu1  ;;  %v4812_v7 = vmul.f32 %v4748_v53, %v13003_v47  ;;  %v4657_v35 = vadd.f32 1.4214138, %v4593_v21  ;;  %v4338_v2 = vsub.f32 2.0, %v4274_v41  ;;  %v3103_v48 = vmul.f32 %v13035_v33, %v3102_v43 }
 0x4a0   : > { %v5259_v39 = vmul.f32 %v7237_v54, %v4939_v60  ;;  %v5794_v51 = vadd.f32 %v13059_v63, %v5793_v24  ;;  %v13103_v54 = vand.u32 2147483647, %v13098_v49  ;;  %7242 = vrcp.f32 %v4147_v42 }
 0x4a1   : > { %v4876_v30 = vadd.f32 0.2548296, %v4812_v7  ;;  %v13117_v24 = vmul.f32 %v7239_v58, %v4338_v2  ;;  %7244 = vpow2.f32 %v5220_v56  ;;  %v3725_v21 = vmul.f32 0.5, %v14094_v3 }
 0x4a2   : > { %v5323_v62 = vsub.f32 1.0, %v5259_v39  ;;  %5975 = vxpose.xlu1.b32.cont [6/8] (short) (narrow) %v5794_v51, 16  ;;  %v4084_v60 = vmul.f32 0.3275911, %v13103_v54  ;;  %v14093_v39 = vld [vmem:[#allocation30_spill] sm:$0xff]  ;;  %v3724_v18 = vmul.f32 0.5, %v12882_v26 }
 0x4a3   : > { %v4940_v28 = vmul.f32 %v4876_v30, %v13003_v47  ;;  %v4466_v7 = vmul.f32 1.0614054, %v13117_v24  ;;  %v3170_v57 = vmul.f32 %v3097_v16, %v14093_v39  ;;  %v5517_v26 = vmul.f32 %v12690_v19, %v3725_v21 }
 0x4a4   : > { %v5387_v4 = vmul.f32 %v5323_v62, %v13041_v25  ;;  %v4721_v25 = vmul.f32 %v4657_v35, %v13066_v8  ;;  %v4148_v44 = vadd.f32 1.0, %v4084_v60  ;;  %v14097_v60 = vld [vmem:[#allocation27_spill] sm:$0xff]  ;;  %vm3892_vm11 = vcmp.ge.f32.partialorder %v13098_v49, 0.0 }
 0x4a5   : > { %v5260_v17 = vmul.f32 %v7241_v37, %v4940_v28  ;;  %v4530_v58 = vadd.f32 -1.4531521, %v4466_v7  ;;  %v5106_v28 = vmul.f32 %v5042_v50, %v13032_v0  ;;  %v3107_v0 = vsel %vm13138_vm2, %v13035_v33, %v3103_v48 }
 0x4a6   : > { %v5451_v47 = vadd.f32 1.0, %v5387_v4  ;;  %v4785_v5 = vadd.f32 -0.28449672, %v4721_v25  ;;  %7246 = vrcp.f32 %v4148_v44  ;;  %v7243_v62 = vpop.eup %7242  ;;  %v3683_v4 = vpop.f32.mrf.mxu2  ;;  %v3761_v25 = vmul.f32 0.5, %v12947_v36 }
 0x4a7   : > { %v5324_v53 = vsub.f32 1.0, %v5260_v17  ;;  %v5796_v34 = vpop.f32.mrf.mxu1  ;;  %v4594_v32 = vmul.f32 %v4530_v58, %v13117_v24  ;;  %v4275_v41 = vmul.f32 %v7243_v62, %v4147_v42  ;;  %v7245_v35 = vpop.eup %7244  ;;  %v13148_v17 = vadd.f32 %v12879_v10, %v3683_v4 }
 0x4a8   : > { %v5515_v6 = vmul.f32 %v5451_v47, %v13023_v9  ;;  %v4849_v51 = vmul.f32 %v4785_v5, %v13066_v8  ;;  %v5797_v9 = vadd.f32 %v13059_v63, %v5796_v34  ;;  %v3237_v42 = vmul.f32 %v12982_v40, %v3170_v57  ;;  %v5898_v5 = vpop.f32.mrf.mxu3 }
 0x4a9   : > { %v5388_v20 = vmul.f32 %v5324_v53, %v13047_v22  ;;  %v3303_v22 = vadd.f32 %v13018_v46, %v3236_v59  ;;  %v4658_v2 = vadd.f32 1.4214138, %v4594_v32  ;;  %v4339_v47 = vsub.f32 2.0, %v4275_v41 }
 0x4aa   : > { %6688 = vmatmul.msk.f32.gmra.mxu1 %vm577_vm1, %v5515_v6  ;;  %v4913_v37 = vadd.f32 0.2548296, %v4849_v51  ;;  %5976 = vxpose.xlu1.b32.cont [7/8] (short) (narrow) %v5797_v9, 16  ;;  %v5222_v45 = vmul.f32 1.442695, %v5106_v28  ;;  %v13157_v19 = vmul.f32 %v13148_v17, %v8807_v27  ;;  %v5043_v33 = vsub.f32 0.0, %v13081_v55 }
 0x4ab   : > { %v5452_v30 = vadd.f32 1.0, %v5388_v20  ;;  %6672 = vmatmul.msk.f32.gmra.mxu2 %vm1565_vm0, %v3303_v22  ;;  %v4722_v53 = vmul.f32 %v4658_v2, %v13117_v24  ;;  %v13161_v16 = vmul.f32 %v7243_v62, %v4339_v47  ;;  %v3171_v34 = vmul.f32 %v3107_v0, %v14097_v60 }
 0x4ac   : > { %v4977_v11 = vmul.f32 %v4913_v37, %v13066_v8  ;;  %v7247_v8 = vpop.eup %7246  ;;  %v13166_v50 = vand.u32 2147483647, %v13157_v19  ;;  %v3953_v20 = vsel %vm3889_vm6, 1.0, %v13766_v61  ;;  %v3304_v59 = vadd.f32 %v13018_v46, %v3237_v42 }
 0x4ad   : > { %v5516_v56 = vmul.f32 %v5452_v30, %v3724_v18  ;;  %v4276_v31 = vmul.f32 %v7247_v8, %v4148_v44  ;;  %v4786_v7 = vadd.f32 -0.28449672, %v4722_v53  ;;  %v4467_v36 = vmul.f32 1.0614054, %v13161_v16 }
 0x4ae   : > { %v5297_v43 = vmul.f32 %v7245_v35, %v4977_v11  ;;  %7248 = vpow2.f32 %v5222_v45  ;;  %v4085_v57 = vmul.f32 0.3275911, %v13166_v50  ;;  %v5107_v9 = vmul.f32 %v5043_v33, %v13081_v55  ;;  %v3686_v58 = vpop.f32.mrf.mxu2 }
 0x4af   : > { %v4340_v39 = vsub.f32 2.0, %v4276_v31  ;;  %v4850_v51 = vmul.f32 %v4786_v7, %v13117_v24  ;;  %v4531_v44 = vadd.f32 -1.4531521, %v4467_v36  ;;  %v5044_v30 = vsub.f32 0.0, %v13103_v54 }
 0x4b0   : > { %v5361_v6 = vsub.f32 1.0, %v5297_v43  ;;  %v5799_v22 = vpop.f32.mrf.mxu1  ;;  %v4149_v21 = vadd.f32 1.0, %v4085_v57  ;;  %v3238_v18 = vmul.f32 %v12982_v40, %v3171_v34  ;;  %v13182_v28 = vadd.f32 %v12879_v10, %v3686_v58 }
 0x4b1   : > { %v13177_v3 = vmul.f32 %v7247_v8, %v4340_v39  ;;  %v4914_v52 = vadd.f32 0.2548296, %v4850_v51  ;;  %v4595_v37 = vmul.f32 %v4531_v44, %v13161_v16  ;;  %v5800_v55 = vadd.f32 %v13059_v63, %v5799_v22 }
 0x4b2   : > { %6689 = vmatmul.msk.f32.gmra.mxu1 %vm577_vm1, %v5516_v56  ;;  %v5425_v48 = vmul.f32 %v5361_v6, %v3953_v20  ;;  %7250 = vrcp.f32 %v4149_v21  ;;  %v5224_v56 = vmul.f32 1.442695, %v5107_v9  ;;  %v13190_v40 = vmul.f32 %v13182_v28, %v8807_v27 }
 0x4b3   : > { %6673 = vmatmul.msk.f32.gmra.mxu2 %vm1565_vm0, %v3304_v59  ;;  %v4468_v41 = vmul.f32 1.0614054, %v13177_v3  ;;  %v4978_v4 = vmul.f32 %v4914_v52, %v13117_v24  ;;  %v4659_v35 = vadd.f32 1.4214138, %v4595_v37  ;;  %5977 = vxpose.xlu1.b32.end [8/8] (short) (narrow) %v5800_v55, 16  ;;  %v5108_v2 = vmul.f32 %v5044_v30, %v13103_v54 }
 0x4b4   : > { %v5489_v62 = vadd.f32 1.0, %v5425_v48  ;;  %v7249_v11 = vpop.eup %7248  ;;  %v13197_v24 = vand.u32 2147483647, %v13190_v40  ;;  %v3305_v43 = vadd.f32 %v13018_v46, %v3238_v18  ;;  %v5899_v45 = vadd.f32 %v13059_v63, %v5898_v5 }
 0x4b5   : > { %v4532_v0 = vadd.f32 -1.4531521, %v4468_v41  ;;  %v5298_v47 = vmul.f32 %v7249_v11, %v4978_v4  ;;  %v4723_v42 = vmul.f32 %v4659_v35, %v13161_v16  ;;  %v3954_v8 = vsel %vm3890_vm7, 1.0, %v13766_v61 }
 0x4b6   : > { %v5553_v32 = vmul.f32 %v5489_v62, %v3761_v25  ;;  %v5901_v25 = vpop.f32.mrf.mxu3  ;;  %7252 = vpow2.f32 %v5224_v56  ;;  %v3689_v60 = vpop.f32.mrf.mxu2  ;;  %v5226_v31 = vmul.f32 1.442695, %v5108_v2  ;;  %v3762_v48 = vmul.f32 0.5, %v12977_v14 }
 0x4b7   : > { %v4596_v54 = vmul.f32 %v4532_v0, %v13177_v3  ;;  %v5362_v53 = vsub.f32 1.0, %v5298_v47  ;;  %v4787_v33 = vadd.f32 -0.28449672, %v4723_v42  ;;  %v13208_v5 = vadd.f32 %v12879_v10, %v3689_v60 }
 0x4b8   : > { %6726 = vmatmul.msk.f32.gmra.mxu3 %vm577_vm1, %v5553_v32  ;;  %v5802_v34 = vpop.f32.mrf.mxu1  ;;  %v7251_v6 = vpop.eup %7250  ;;  %v5045_v18 = vsub.f32 0.0, %v13166_v50  ;;  %v5902_v56 = vadd.f32 %v13059_v63, %v5901_v25  ;;  %vm3893_vm8 = vcmp.ge.f32.partialorder %v13157_v19, 0.0  ;;  %vm3894_vm12 = vcmp.ge.f32.partialorder %v13190_v40, 0.0 }
 0x4b9   : > { %v4660_v46 = vadd.f32 1.4214138, %v4596_v54  ;;  %v5803_v13 = vadd.f32 %v13059_v63, %v5802_v34  ;;  %v5426_v20 = vmul.f32 %v5362_v53, %v3954_v8  ;;  %v4851_v7 = vmul.f32 %v4787_v33, %v13161_v16 }
 0x4ba   : > { %6690 = vmatmul.msk.f32.gmra.mxu1 %vm577_vm1, %v5517_v26  ;;  %v4086_v26 = vmul.f32 0.3275911, %v13197_v24  ;;  %v4277_v36 = vmul.f32 %v7251_v6, %v4149_v21  ;;  %v13216_v57 = vmul.f32 %v13208_v5, %v8807_v27  ;;  %v5109_v42 = vmul.f32 %v5045_v18, %v13166_v50 }
 0x4bb   : > { %6674 = vmatmul.msk.f32.gmra.mxu2 %vm1565_vm0, %v3305_v43  ;;  %v4724_v39 = vmul.f32 %v4660_v46, %v13177_v3  ;;  %6002 = vxpose.xlu2.b32.start [1/8] (short) (narrow) %v5803_v13, 16  ;;  %v5490_v51 = vadd.f32 1.0, %v5426_v20  ;;  %v4915_v44 = vadd.f32 0.2548296, %v4851_v7  ;;  %vm3891_vm0 = vcmp.ge.f32.partialorder %v13075_v15, 0.0 }
 0x4bc   : > { %v4150_v59 = vadd.f32 1.0, %v4086_v26  ;;  %v4341_v9 = vsub.f32 2.0, %v4277_v36  ;;  %6130 = vxpose.xlu1.b32.start [1/8] (short) (narrow) %v5899_v45, 16  ;;  %v7253_v58 = vpop.eup %7252  ;;  %v13225_v52 = vand.u32 2147483647, %v13216_v57  ;;  %v3955_v11 = vsel %vm3891_vm0, 1.0, %v13766_v61 }
 0x4bd   : > { %v4788_v30 = vadd.f32 -0.28449672, %v4724_v39  ;;  %v5554_v22 = vmul.f32 %v5490_v51, %v3762_v48  ;;  %v4979_v62 = vmul.f32 %v4915_v44, %v13161_v16  ;;  %v3956_v34 = vsel %vm3892_vm11, 1.0, %v13766_v61 }
 0x4be   : > { %7254 = vrcp.f32 %v4150_v59  ;;  %v13219_v21 = vmul.f32 %v7251_v6, %v4341_v9  ;;  %v3692_v32 = vpop.f32.mrf.mxu2  ;;  %v5904_v41 = vpop.f32.mrf.mxu3  ;;  %v4087_v4 = vmul.f32 0.3275911, %v13225_v52  ;;  %v5228_v6 = vmul.f32 1.442695, %v5109_v42 }
 0x4bf   : > { %7256 = vpow2.f32 %v5226_v31  ;;  %v4852_v14 = vmul.f32 %v4788_v30, %v13177_v3  ;;  %v5299_v37 = vmul.f32 %v7253_v58, %v4979_v62  ;;  %v13231_v35 = vadd.f32 %v12879_v10, %v3692_v32 }
 0x4c0   : > { %v4469_v55 = vmul.f32 1.0614054, %v13219_v21  ;;  %6727 = vmatmul.msk.f32.gmra.mxu3 %vm577_vm1, %v5554_v22  ;;  %v4151_v45 = vadd.f32 1.0, %v4087_v4  ;;  %v5046_v20 = vsub.f32 0.0, %v13197_v24  ;;  %v5905_v48 = vadd.f32 %v13059_v63, %v5904_v41 }
 0x4c1   : > { %v4916_v16 = vadd.f32 0.2548296, %v4852_v14  ;;  %v5363_v0 = vsub.f32 1.0, %v5299_v37  ;;  %v13241_v53 = vmul.f32 %v13231_v35, %v8807_v27  ;;  %v3764_v9 = vmul.f32 0.5, %v13089_v23 }
 0x4c2   : > { %v4533_v2 = vadd.f32 -1.4531521, %v4469_v55  ;;  %7258 = vrcp.f32 %v4151_v45  ;;  %v5110_v62 = vmul.f32 %v5046_v20, %v13197_v24  ;;  %v3766_v40 = vmul.f32 0.5, %v13182_v28 }
 0x4c3   : > { %v4980_v47 = vmul.f32 %v4916_v16, %v13177_v3  ;;  %v5427_v54 = vmul.f32 %v5363_v0, %v3955_v11  ;;  %v3763_v3 = vmul.f32 0.5, %v13064_v29  ;;  %v13245_v60 = vand.u32 2147483647, %v13241_v53 }
 0x4c4   : > { %v7255_v15 = vpop.eup %7254  ;;  %v4597_v10 = vmul.f32 %v4533_v2, %v13219_v21  ;;  %6131 = vxpose.xlu1.b32.cont [2/8] (short) (narrow) %v5902_v56, 16  ;;  %7260 = vpow2.f32 %v5228_v6  ;;  %v5230_v4 = vmul.f32 1.442695, %v5110_v62  ;;  %v5047_v11 = vsub.f32 0.0, %v13225_v52 }
 0x4c5   : > { %v4278_v43 = vmul.f32 %v7255_v15, %v4150_v59  ;;  %v7257_v8 = vpop.eup %7256  ;;  %v5491_v26 = vadd.f32 1.0, %v5427_v54  ;;  %v4088_v7 = vmul.f32 0.3275911, %v13245_v60  ;;  %v3957_v54 = vsel %vm3893_vm8, 1.0, %v13766_v61 }
 0x4c6   : > { %v5300_v25 = vmul.f32 %v7257_v8, %v4980_v47  ;;  %v4661_v50 = vadd.f32 1.4214138, %v4597_v10  ;;  %v5907_v59 = vpop.f32.mrf.mxu3  ;;  %vm3895_vm13 = vcmp.ge.f32.partialorder %v13216_v57, 0.0  ;;  %vm3896_vm14 = vcmp.ge.f32.partialorder %v13241_v53, 0.0  ;;  %v6257_v53 = vld [vmem:[%s13605_s15 + $0x38] sm:$0xff] }
 0x4c7   : > { %v4342_v33 = vsub.f32 2.0, %v4278_v43  ;;  %v5555_v31 = vmul.f32 %v5491_v26, %v3763_v3  ;;  %v4152_v51 = vadd.f32 1.0, %v4088_v7  ;;  %v5908_v2 = vadd.f32 %v13059_v63, %v5907_v59  ;;  %6314 = vmatpush.msra.mxu1 %v6257_v53 }
 0x4c8   : > { %v5364_v49 = vsub.f32 1.0, %v5300_v25  ;;  %v4725_v13 = vmul.f32 %v4661_v50, %v13219_v21  ;;  %v7259_v44 = vpop.eup %7258  ;;  %v5111_v25 = vmul.f32 %v5047_v11, %v13225_v52  ;;  %v3765_v26 = vmul.f32 0.5, %v13148_v17 }
 0x4c9   : > { %v4406_v46 = vmul.f32 %v7255_v15, %v4342_v33  ;;  %6728 = vmatmul.msk.f32.gmra.mxu3 %vm577_vm1, %v5555_v31  ;;  %v4279_v14 = vmul.f32 %v7259_v44, %v4151_v45  ;;  %7262 = vrcp.f32 %v4152_v51  ;;  %v3959_v28 = vsel %vm3895_vm13, 1.0, %v13766_v61 }
 0x4ca   : > { %v5428_v36 = vmul.f32 %v5364_v49, %v3956_v34  ;;  %v4789_v39 = vadd.f32 -0.28449672, %v4725_v13  ;;  %v7261_v23 = vpop.eup %7260  ;;  %7264 = vpow2.f32 %v5230_v4  ;;  %v5048_v13 = vsub.f32 0.0, %v13245_v60 }
 0x4cb   : > { %v4470_v29 = vmul.f32 1.0614054, %v4406_v46  ;;  %v4343_v32 = vsub.f32 2.0, %v4279_v14 }
 0x4cc   : > { %v5492_v30 = vadd.f32 1.0, %v5428_v36  ;;  %v4853_v22 = vmul.f32 %v4789_v39, %v13219_v21  ;;  %6132 = vxpose.xlu1.b32.cont [3/8] (short) (narrow) %v5905_v48, 16  ;;  %v5232_v36 = vmul.f32 1.442695, %v5111_v25 }
 0x4cd   : > { %v4534_v58 = vadd.f32 -1.4531521, %v4470_v29  ;;  %v4407_v15 = vmul.f32 %v7259_v44, %v4343_v32 }
 0x4ce   : > { %v5556_v37 = vmul.f32 %v5492_v30, %v3764_v9  ;;  %v4917_v55 = vadd.f32 0.2548296, %v4853_v22  ;;  %v5910_v43 = vpop.f32.mrf.mxu3  ;;  %v5112_v9 = vmul.f32 %v5048_v13, %v13245_v60  ;;  %7266 = vpow2.f32 %v5232_v36  ;;  %v6256_v36 = vld [vmem:[%s13605_s15 + $0x30] sm:$0xff] }
 0x4cf   : > { %v4598_v18 = vmul.f32 %v4534_v58, %v4406_v46  ;;  %v7263_v0 = vpop.eup %7262  ;;  %v4471_v47 = vmul.f32 1.0614054, %v4407_v15  ;;  %v5911_v52 = vadd.f32 %v13059_v63, %v5910_v43  ;;  %v3958_v22 = vsel %vm3894_vm12, 1.0, %v13766_v61  ;;  %6315 = vmatpush.msra.mxu1 %v6256_v36 }
 0x4d0   : > { %v4981_v16 = vmul.f32 %v4917_v55, %v13219_v21  ;;  %v4280_v45 = vmul.f32 %v7263_v0, %v4152_v51  ;;  %v7265_v29 = vpop.eup %7264  ;;  %v5234_v55 = vmul.f32 1.442695, %v5112_v9  ;;  %v6253_v9 = vld [vmem:[%s13605_s15 + $0x18] sm:$0xff] }
 0x4d1   : > { %v4662_v41 = vadd.f32 1.4214138, %v4598_v18  ;;  %6729 = vmatmul.msk.f32.gmra.mxu3 %vm577_vm1, %v5556_v37  ;;  %v4535_v21 = vadd.f32 -1.4531521, %v4471_v47 }
 0x4d2   : > { %v5301_v24 = vmul.f32 %v7261_v23, %v4981_v16  ;;  %v4344_v33 = vsub.f32 2.0, %v4280_v45  ;;  %7268 = vpow2.f32 %v5234_v55  ;;  %v14098_v55 = vld [vmem:[#allocation49_spill] sm:$0xff] }
 0x4d3   : > { %v4726_v56 = vmul.f32 %v4662_v41, %v4406_v46  ;;  %v4599_v3 = vmul.f32 %v4535_v21, %v4407_v15 }
 0x4d4   : > { %v5365_v8 = vsub.f32 1.0, %v5301_v24  ;;  %6133 = vxpose.xlu1.b32.cont [4/8] (short) (narrow) %v5908_v2, 16  ;;  %v4408_v34 = vmul.f32 %v7263_v0, %v4344_v33  ;;  %v7267_v4 = vpop.eup %7266 }
 0x4d5   : > { %v4790_v42 = vadd.f32 -0.28449672, %v4726_v56  ;;  %v4663_v31 = vadd.f32 1.4214138, %v4599_v3  ;;  %v3960_v3 = vsel %vm3896_vm14, 1.0, %v13766_v61 }
 0x4d6   : > { %v5429_v19 = vmul.f32 %v5365_v8, %v3957_v54  ;;  %v4472_v59 = vmul.f32 1.0614054, %v4408_v34  ;;  %v3767_v8 = vmul.f32 0.5, %v13208_v5 }
 0x4d7   : > { %v4854_v10 = vmul.f32 %v4790_v42, %v4406_v46  ;;  %v4727_v39 = vmul.f32 %v4663_v31, %v4407_v15 }
 0x4d8   : > { %v5493_v6 = vadd.f32 1.0, %v5429_v19  ;;  %v4536_v51 = vadd.f32 -1.4531521, %v4472_v59  ;;  %v7269_v45 = vpop.eup %7268  ;;  %v6248_v59 = vld [vmem:[%s13604_s14 + $0x30] sm:$0xff] }
 0x4d9   : > { %v4918_v50 = vadd.f32 0.2548296, %v4854_v10  ;;  %v4791_v44 = vadd.f32 -0.28449672, %v4727_v39 }
 0x4da   : > { %v5557_v48 = vmul.f32 %v5493_v6, %v3765_v26  ;;  %v4600_v58 = vmul.f32 %v4536_v51, %v4408_v34  ;;  %v6249_v6 = vld [vmem:[%s13604_s14 + $0x38] sm:$0xff]  ;;  %v6246_v51 = vld [vmem:[%s13604_s14 + $0x20] sm:$0xff] }
 0x4db   : > { %v4982_v7 = vmul.f32 %v4918_v50, %v4406_v46  ;;  %v5913_v46 = vpop.f32.mrf.mxu3  ;;  %v4855_v62 = vmul.f32 %v4791_v44, %v4407_v15  ;;  %v3768_v50 = vmul.f32 0.5, %v13231_v35  ;;  %6427 = vmatpush.msra.mxu0 %v6249_v6  ;;  %v13294_v35 = vld [vmem:[%s13601_s11] ss:$0 sm:$0xff] }
 0x4dc   : > { %v5805_v49 = vpop.f32.mrf.mxu1  ;;  %6134 = vxpose.xlu1.b32.cont [5/8] (short) (narrow) %v5911_v52, 16  ;;  %6730 = vmatmul.msk.f32.gmra.mxu3 %vm577_vm1, %v5557_v48  ;;  %v4664_v18 = vadd.f32 1.4214138, %v4600_v58  ;;  %v5914_v60 = vadd.f32 %v13059_v63, %v5913_v46  ;;  %v6255_v48 = vld [vmem:[%s13605_s15 + $0x28] sm:$0xff]  ;;  %v13332_v46 = vld [vmem:[%s13597_s7] ss:$0 sm:$0xff] }
 0x4dd   : > { %v5806_v20 = vadd.f32 %v13059_v63, %v5805_v49  ;;  %v5302_v17 = vmul.f32 %v7265_v29, %v4982_v7  ;;  %v4919_v37 = vadd.f32 0.2548296, %v4855_v62  ;;  %6428 = vmatpush.msra.mxu0 %v6248_v59  ;;  %v6247_v52 = vld [vmem:[%s13604_s14 + $0x28] sm:$0xff]  ;;  %6316 = vmatpush.msra.mxu1 %v6255_v48  ;;  %v6244_v62 = vld [vmem:[%s13604_s14 + $0x10] sm:$0xff] }
 0x4de   : > { %v4728_v41 = vmul.f32 %v4664_v18, %v4408_v34  ;;  %v6251_v18 = vld [vmem:[%s13605_s15 + $0x8] sm:$0xff] }
 0x4df   : > { %6003 = vxpose.xlu2.b32.cont [2/8] (short) (narrow) %v5806_v20, 16  ;;  %v5366_v30 = vsub.f32 1.0, %v5302_v17  ;;  %v4983_v16 = vmul.f32 %v4919_v37, %v4407_v15  ;;  %6429 = vmatpush.msra.mxu0 %v6247_v52  ;;  %v6254_v17 = vld [vmem:[%s13605_s15 + $0x20] sm:$0xff]  ;;  %v6243_v37 = vld [vmem:[%s13604_s14 + $0x8] sm:$0xff] }
 0x4e0   : > { %v4792_v56 = vadd.f32 -0.28449672, %v4728_v41  ;;  %6317 = vmatpush.msra.mxu1 %v6254_v17  ;;  %v7357_v17 = vld [vmem:[%s7520_s18 + $0x10] sm:$0xff] }
 0x4e1   : > { %v5430_v14 = vmul.f32 %v5366_v30, %v3958_v22  ;;  %v5303_v11 = vmul.f32 %v7267_v4, %v4983_v16  ;;  %6430 = vmatpush.msra.mxu0 %v6246_v51  ;;  %v6245_v30 = vld [vmem:[%s13604_s14 + $0x18] sm:$0xff]  ;;  %v6252_v22 = vld [vmem:[%s13605_s15 + $0x10] sm:$0xff]  ;;  %v6250_v16 = vld [vmem:[%s13605_s15] sm:$0xff] }
 0x4e2   : > { %v4856_v0 = vmul.f32 %v4792_v56, %v4408_v34  ;;  %6318 = vmatpush.msra.mxu1 %v6253_v9  ;;  %v7355_v56 = vld [vmem:[%s7520_s18] sm:$0xff] }
 0x4e3   : > { %v5494_v32 = vadd.f32 1.0, %v5430_v14  ;;  %v5916_v24 = vpop.f32.mrf.mxu3  ;;  %v5367_v2 = vsub.f32 1.0, %v5303_v11  ;;  %6431 = vmatpush.msra.mxu0 %v6245_v30 }
 0x4e4   : > { %6135 = vxpose.xlu1.b32.cont [6/8] (short) (narrow) %v5914_v60, 16  ;;  %v4920_v47 = vadd.f32 0.2548296, %v4856_v0  ;;  %v5917_v57 = vadd.f32 %v13059_v63, %v5916_v24  ;;  %6319 = vmatpush.msra.mxu1 %v6252_v22  ;;  %v6242_v60 = vld [vmem:[%s13604_s14] sm:$0xff] }
 0x4e5   : > { %v5558_v23 = vmul.f32 %v5494_v32, %v3766_v40  ;;  %v5431_v42 = vmul.f32 %v5367_v2, %v3959_v28  ;;  %6432 = vmatpush.msra.mxu0 %v6244_v62  ;;  %v1632_v40 = vadd.f32 %v13332_v46, %v14098_v55 }
 0x4e6   : > { %v4984_v15 = vmul.f32 %v4920_v47, %v4408_v34  ;;  %6320 = vmatpush.msra.mxu1 %v6251_v18 }
 0x4e7   : > { %6731 = vmatmul.msk.f32.gmra.mxu3 %vm577_vm1, %v5558_v23  ;;  %v5495_v21 = vadd.f32 1.0, %v5431_v42  ;;  %6433 = vmatpush.msra.mxu0 %v6243_v37 }
 0x4e8   : > { %v5304_v10 = vmul.f32 %v7269_v45, %v4984_v15  ;;  %6321 = vmatpush.msra.mxu1 %v6250_v16  ;;  %v14099_v15 = vld [vmem:[#allocation16_spill] sm:$0xff] }
 0x4e9   : > { %v5559_v25 = vmul.f32 %v5495_v21, %v3767_v8  ;;  %6434 = vmatpush.msra.mxu0 %v6242_v60  ;;  %6739 = vmatmul.msk.f32.vlgmr.msra.gmra.mxu1 %vm577_vm1, %v7355_v56 }
 0x4ea   : > { %v5368_v33 = vsub.f32 1.0, %v5304_v10 }
 0x4eb   : > { %v5919_v19 = vpop.f32.mrf.mxu3 }
 0x4ec   : > { %6136 = vxpose.xlu1.b32.cont [7/8] (short) (narrow) %v5917_v57, 16  ;;  %v5432_v26 = vmul.f32 %v5368_v33, %v3960_v3  ;;  %v5920_v5 = vadd.f32 %v13059_v63, %v5919_v19 }
 0x4ee   : > { %v5808_v43 = vpop.f32.mrf.mxu1  ;;  %v5496_v34 = vadd.f32 1.0, %v5432_v26 }
 0x4ef   : > { %v5809_v54 = vadd.f32 %v13059_v63, %v5808_v43  ;;  %6732 = vmatmul.msk.f32.gmra.mxu3 %vm577_vm1, %v5559_v25  ;;  %v1635_v43 = vadd.f32 %v13332_v46, %v14099_v15  ;;  %v7356_v25 = vld [vmem:[%s7520_s18 + $0x8] sm:$0xff] }
 0x4f0   : > { %v5560_v49 = vmul.f32 %v5496_v34, %v3768_v50 }
 0x4f1   : > { %6004 = vxpose.xlu2.b32.cont [3/8] (short) (narrow) %v5809_v54, 16  ;;  %6740 = vmatmul.msk.f32.gmra.mxu1 %vm577_vm1, %v7356_v25 }
 0x4f4   : > { %6137 = vxpose.xlu1.b32.end [8/8] (short) (narrow) %v5920_v5, 16 }
 0x4f6   : > { %v5811_v13 = vpop.f32.mrf.mxu1 }
 0x4f7   : > { %6733 = vmatmul.msk.f32.gmra.mxu3 %vm577_vm1, %v5560_v49  ;;  %v5812_v7 = vadd.f32 %v13059_v63, %v5811_v13 }
 0x4f9   : > { %6005 = vxpose.xlu2.b32.cont [4/8] (short) (narrow) %v5812_v7, 16  ;;  %6741 = vmatmul.msk.f32.gmra.mxu1 %vm577_vm1, %v7357_v17 }
 0x504   : > { %v13364_v0 = vpop.f32.mrf.mxu3 }
 0x50c   : > { %v5814_v24 = vpop.f32.mrf.mxu1  ;;  %v13377_v49 = vpop.f32.mrf.mxu3 }
 0x50d   : > { %v5815_v28 = vadd.f32 %v13059_v63, %v5814_v24  ;;  %v7358_v24 = vld [vmem:[%s7520_s18 + $0x18] sm:$0xff] }
 0x50e   : > { %6742 = vmatmul.msk.f32.gmra.mxu1 %vm577_vm1, %v7358_v24 }
 0x50f   : > { %6006 = vxpose.xlu2.b32.cont [5/8] (short) (narrow) %v5815_v28, 16 }
 0x516   : > { %v3695_v31 = vpop.f32.mrf.mxu2 }
 0x517   : > { %v13297_v20 = vadd.f32 %v13294_v35, %v3695_v31 }
 0x519   : > { %v13308_v29 = vmul.f32 %v13297_v20, %v8807_v27 }
 0x51b   : > { %v4025_v39 = vand.u32 2147483647, %v13308_v29  ;;  %vm3897_vm10 = vcmp.ge.f32.partialorder %v13308_v29, 0.0 }
 0x51d   : > { %v4089_v44 = vmul.f32 0.3275911, %v4025_v39  ;;  %v5049_v54 = vsub.f32 0.0, %v4025_v39 }
 0x51e   : > { %v3698_v14 = vpop.f32.mrf.mxu2 }
 0x51f   : > { %v4153_v58 = vadd.f32 1.0, %v4089_v44  ;;  %v13349_v32 = vadd.f32 %v13294_v35, %v3698_v14  ;;  %v5986_v41 = vpop.trf.xlu1  ;;  %v5113_v34 = vmul.f32 %v5049_v54, %v4025_v39 }
 0x520   : > { %v6226_v23 = vadd.f32 %v5986_v41, %v1632_v40 }
 0x521   : > { %7270 = vrcp.f32 %v4153_v58  ;;  %v13359_v4 = vmul.f32 %v13349_v32, %v8807_v27  ;;  %v5236_v59 = vmul.f32 1.442695, %v5113_v34  ;;  %v13397_v40 = vpop.f32.mrf.mxu3 }
 0x522   : > { %6755 = vmatmul.msk.f32.vlgmr.msra.gmra.mxu0 %vm577_vm1, %v6226_v23 }
 0x523   : > { %v4026_v11 = vand.u32 2147483647, %v13359_v4  ;;  %vm3898_vm15 = vcmp.ge.f32.partialorder %v13359_v4, 0.0  ;;  %v13439_v4 = vld [vmem:[%s13603_s13] ss:$0 sm:$0xff] }
 0x525   : > { %v4090_v42 = vmul.f32 0.3275911, %v4026_v11  ;;  %v5050_v62 = vsub.f32 0.0, %v4026_v11 }
 0x527   : > { %v7271_v2 = vpop.eup %7270  ;;  %v4154_v8 = vadd.f32 1.0, %v4090_v42  ;;  %v5987_v21 = vpop.trf.xlu1  ;;  %v5114_v60 = vmul.f32 %v5050_v62, %v4026_v11 }
 0x528   : > { %v4281_v47 = vmul.f32 %v7271_v2, %v4153_v58  ;;  %v6227_v10 = vadd.f32 %v5987_v21, %v1635_v43  ;;  %v5817_v3 = vpop.f32.mrf.mxu1 }
 0x529   : > { %7272 = vrcp.f32 %v4154_v8  ;;  %v5818_v5 = vadd.f32 %v13059_v63, %v5817_v3  ;;  %v5238_v54 = vmul.f32 1.442695, %v5114_v60 }
 0x52a   : > { %v4345_v45 = vsub.f32 2.0, %v4281_v47  ;;  %6756 = vmatmul.msk.f32.gmra.mxu0 %vm577_vm1, %v6227_v10  ;;  %7274 = vpow2.f32 %v5236_v59  ;;  %v3769_v59 = vmul.f32 0.5, %v13297_v20 }
 0x52b   : > { %6007 = vxpose.xlu2.b32.cont [6/8] (short) (narrow) %v5818_v5, 16 }
 0x52c   : > { %v4409_v57 = vmul.f32 %v7271_v2, %v4345_v45 }
 0x52e   : > { %v4473_v33 = vmul.f32 1.0614054, %v4409_v57  ;;  %v3701_v19 = vpop.f32.mrf.mxu2 }
 0x52f   : > { %v13374_v26 = vadd.f32 %v13294_v35, %v3701_v19  ;;  %v7273_v6 = vpop.eup %7272 }
 0x530   : > { %v4537_v50 = vadd.f32 -1.4531521, %v4473_v33  ;;  %v4282_v13 = vmul.f32 %v7273_v6, %v4154_v8  ;;  %v5820_v44 = vpop.f32.mrf.mxu1  ;;  %v7275_v2 = vpop.eup %7274 }
 0x531   : > { %v13381_v53 = vmul.f32 %v13374_v26, %v8807_v27  ;;  %v5821_v14 = vadd.f32 %v13059_v63, %v5820_v44  ;;  %v14100_v44 = vld [vmem:[#allocation8_spill] sm:$0xff] }
 0x532   : > { %v4601_v31 = vmul.f32 %v4537_v50, %v4409_v57  ;;  %v4346_v48 = vsub.f32 2.0, %v4282_v13 }
 0x533   : > { %v13384_v7 = vand.u32 2147483647, %v13381_v53  ;;  %6008 = vxpose.xlu2.b32.cont [7/8] (short) (narrow) %v5821_v14, 16  ;;  %vm3899_vm9 = vcmp.ge.f32.partialorder %v13381_v53, 0.0  ;;  %v7363_v53 = vld [vmem:[%s7520_s18 + $0x38] sm:$0xff] }
 0x534   : > { %v4665_v36 = vadd.f32 1.4214138, %v4601_v31  ;;  %v4410_v9 = vmul.f32 %v7273_v6, %v4346_v48 }
 0x535   : > { %v4091_v52 = vmul.f32 0.3275911, %v13384_v7  ;;  %v5051_v13 = vsub.f32 0.0, %v13384_v7 }
 0x536   : > { %v4729_v39 = vmul.f32 %v4665_v36, %v4409_v57  ;;  %v3704_v51 = vpop.f32.mrf.mxu2  ;;  %v4474_v18 = vmul.f32 1.0614054, %v4410_v9  ;;  %v7359_v36 = vld [vmem:[%s7520_s18 + $0x20] sm:$0xff] }
 0x537   : > { %v4155_v30 = vadd.f32 1.0, %v4091_v52  ;;  %v13390_v58 = vadd.f32 %v13294_v35, %v3704_v51  ;;  %6743 = vmatmul.msk.f32.gmra.mxu1 %vm577_vm1, %v7359_v36 }
 0x538   : > { %v4793_v22 = vadd.f32 -0.28449672, %v4729_v39  ;;  %v4538_v41 = vadd.f32 -1.4531521, %v4474_v18  ;;  %v5823_v15 = vpop.f32.mrf.mxu1  ;;  %v5115_v18 = vmul.f32 %v5051_v13, %v13384_v7  ;;  %v3962_v7 = vsel %vm3898_vm15, 1.0, %v13766_v61 }
 0x539   : > { %7276 = vrcp.f32 %v4155_v30  ;;  %v13395_v55 = vmul.f32 %v13390_v58, %v8807_v27  ;;  %v5824_v11 = vadd.f32 %v13059_v63, %v5823_v15 }
 0x53a   : > { %v4857_v37 = vmul.f32 %v4793_v22, %v4409_v57  ;;  %v4602_v56 = vmul.f32 %v4538_v41, %v4410_v9 }
 0x53b   : > { %v13400_v23 = vand.u32 2147483647, %v13395_v55  ;;  %6009 = vxpose.xlu2.b32.end [8/8] (short) (narrow) %v5824_v11, 16  ;;  %v13414_v29 = vpop.f32.mrf.mxu3  ;;  %v14101_v11 = vld [vmem:[#allocation12_spill] sm:$0xff]  ;;  %vm3900_vm3 = vcmp.ge.f32.partialorder %v13395_v55, 0.0  ;;  %v3772_v55 = vmul.f32 0.5, %v13390_v58 }
 0x53c   : > { %v4921_v16 = vadd.f32 0.2548296, %v4857_v37  ;;  %v4666_v45 = vadd.f32 1.4214138, %v4602_v56  ;;  %v7365_v58 = vld [vmem:[%s7520_s18 + $0x48] sm:$0xff] }
 0x53d   : > { %v4092_v47 = vmul.f32 0.3275911, %v13400_v23 }
 0x53e   : > { %v4985_v28 = vmul.f32 %v4921_v16, %v4409_v57  ;;  %v3707_v42 = vpop.f32.mrf.mxu2  ;;  %v4730_v33 = vmul.f32 %v4666_v45, %v4410_v9 }
 0x53f   : > { %v7277_v43 = vpop.eup %7276  ;;  %v13407_v8 = vadd.f32 %v13294_v35, %v3707_v42  ;;  %v4156_v25 = vadd.f32 1.0, %v4092_v47  ;;  %v3961_v35 = vsel %vm3897_vm10, 1.0, %v13766_v61  ;;  %v5052_v42 = vsub.f32 0.0, %v13400_v23 }
 0x540   : > { %v5305_v21 = vmul.f32 %v7275_v2, %v4985_v28  ;;  %v4283_v10 = vmul.f32 %v7277_v43, %v4155_v30  ;;  %v4794_v5 = vadd.f32 -0.28449672, %v4730_v33  ;;  %v5851_v30 = vadd.f32 %v13059_v63, %v14100_v44  ;;  %v7360_v28 = vld [vmem:[%s7520_s18 + $0x28] sm:$0xff] }
 0x541   : > { %v13412_v57 = vmul.f32 %v13407_v8, %v8807_v27  ;;  %7278 = vrcp.f32 %v4156_v25  ;;  %v5240_v2 = vmul.f32 1.442695, %v5115_v18  ;;  %6744 = vmatmul.msk.f32.gmra.mxu1 %vm577_vm1, %v7360_v28  ;;  %v14102_v44 = vld [vmem:[#allocation35_spill] sm:$0xff]  ;;  %v3771_v28 = vmul.f32 0.5, %v13374_v26 }
 0x542   : > { %v5369_v19 = vsub.f32 1.0, %v5305_v21  ;;  %v4347_v3 = vsub.f32 2.0, %v4283_v10  ;;  %7280 = vpow2.f32 %v5238_v54  ;;  %v4858_v31 = vmul.f32 %v4794_v5, %v4410_v9 }
 0x543   : > { %v13418_v50 = vand.u32 2147483647, %v13412_v57  ;;  %6066 = vxpose.xlu2.b32.start [1/8] (short) (narrow) %v5851_v30, 16  ;;  %v13428_v20 = vpop.f32.mrf.mxu3  ;;  %v5854_v21 = vadd.f32 %v13439_v4, %v14101_v11  ;;  %v5857_v30 = vadd.f32 %v13439_v4, %v14102_v44  ;;  %vm3901_vm4 = vcmp.ge.f32.partialorder %v13412_v57, 0.0 }
 0x544   : > { %v5433_v34 = vmul.f32 %v5369_v19, %v3961_v35  ;;  %v4411_v6 = vmul.f32 %v7277_v43, %v4347_v3  ;;  %v4922_v17 = vadd.f32 0.2548296, %v4858_v31  ;;  %v5116_v35 = vmul.f32 %v5052_v42, %v13400_v23 }
 0x545   : > { %v4093_v27 = vmul.f32 0.3275911, %v13418_v50 }
 0x546   : > { %v5497_v48 = vadd.f32 1.0, %v5433_v34  ;;  %v4475_v52 = vmul.f32 1.0614054, %v4411_v6  ;;  %v4986_v14 = vmul.f32 %v4922_v17, %v4410_v9  ;;  %v5242_v17 = vmul.f32 1.442695, %v5116_v35 }
 0x547   : > { %v4157_v39 = vadd.f32 1.0, %v4093_v27  ;;  %v7279_v51 = vpop.eup %7278 }
 0x548   : > { %v5561_v22 = vmul.f32 %v5497_v48, %v3769_v59  ;;  %v4539_v62 = vadd.f32 -1.4531521, %v4475_v52  ;;  %v4284_v37 = vmul.f32 %v7279_v51, %v4156_v25  ;;  %v7281_v41 = vpop.eup %7280  ;;  %v3770_v25 = vmul.f32 0.5, %v13349_v32  ;;  %v7362_v32 = vld [vmem:[%s7520_s18 + $0x30] sm:$0xff] }
 0x549   : > { %7282 = vrcp.f32 %v4157_v39  ;;  %v5306_v60 = vmul.f32 %v7281_v41, %v4986_v14  ;;  %v5053_v48 = vsub.f32 0.0, %v13418_v50  ;;  %6745 = vmatmul.msk.f32.gmra.mxu1 %vm577_vm1, %v7362_v32  ;;  %v3965_v32 = vsel %vm3901_vm4, 1.0, %v13766_v61 }
 0x54a   : > { %v4603_v16 = vmul.f32 %v4539_v62, %v4411_v6  ;;  %6734 = vmatmul.msk.f32.gmra.mxu3 %vm577_vm1, %v5561_v22  ;;  %v4348_v56 = vsub.f32 2.0, %v4284_v37  ;;  %7284 = vpow2.f32 %v5240_v2 }
 0x54b   : > { %v5370_v24 = vsub.f32 1.0, %v5306_v60  ;;  %6067 = vxpose.xlu2.b32.cont [2/8] (short) (narrow) %v5854_v21, 16  ;;  %v5117_v18 = vmul.f32 %v5053_v48, %v13418_v50  ;;  %7286 = vpow2.f32 %v5242_v17 }
 0x54c   : > { %v4667_v63 = vadd.f32 1.4214138, %v4603_v16  ;;  %v4412_v9 = vmul.f32 %v7279_v51, %v4348_v56  ;;  %v13445_v34 = vpop.f32.mrf.mxu3  ;;  %v3963_v16 = vsel %vm3899_vm9, 1.0, %v13766_v61 }
 0x54d   : > { %v5434_v43 = vmul.f32 %v5370_v24, %v3962_v7  ;;  %v5244_v2 = vmul.f32 1.442695, %v5117_v18  ;;  %v7368_v18 = vld [vmem:[%s7520_s18 + $0x60] sm:$0xff] }
 0x54e   : > { %v4731_v47 = vmul.f32 %v4667_v63, %v4411_v6  ;;  %v4476_v45 = vmul.f32 1.0614054, %v4412_v9 }
 0x54f   : > { %v7283_v15 = vpop.eup %7282  ;;  %v5498_v33 = vadd.f32 1.0, %v5434_v43  ;;  %7288 = vpow2.f32 %v5244_v2 }
 0x550   : > { %v4795_v54 = vadd.f32 -0.28449672, %v4731_v47  ;;  %v4285_v10 = vmul.f32 %v7283_v15, %v4157_v39  ;;  %v4540_v19 = vadd.f32 -1.4531521, %v4476_v45  ;;  %v7285_v23 = vpop.eup %7284 }
 0x551   : > { %v5562_v31 = vmul.f32 %v5498_v33, %v3770_v25  ;;  %6746 = vmatmul.msk.f32.gmra.mxu1 %vm577_vm1, %v7363_v53  ;;  %v7287_v42 = vpop.eup %7286 }
 0x552   : > { %v4859_v3 = vmul.f32 %v4795_v54, %v4411_v6  ;;  %v4349_v5 = vsub.f32 2.0, %v4285_v10  ;;  %v4604_v13 = vmul.f32 %v4540_v19, %v4412_v9  ;;  %v7364_v19 = vld [vmem:[%s7520_s18 + $0x40] sm:$0xff] }
 0x553   : > { %6735 = vmatmul.msk.f32.gmra.mxu3 %vm577_vm1, %v5562_v31  ;;  %6068 = vxpose.xlu2.b32.cont [3/8] (short) (narrow) %v5857_v30, 16  ;;  %v14104_v31 = vld [vmem:[#allocation42_spill] sm:$0xff]  ;;  %v7366_v30 = vld [vmem:[%s7520_s18 + $0x50] sm:$0xff] }
 0x554   : > { %v4923_v27 = vadd.f32 0.2548296, %v4859_v3  ;;  %v4413_v36 = vmul.f32 %v7283_v15, %v4349_v5  ;;  %v4668_v59 = vadd.f32 1.4214138, %v4604_v13  ;;  %v14103_v15 = vld [vmem:[#allocation47_spill] sm:$0xff]  ;;  %v5863_v13 = vadd.f32 %v13439_v4, %v14104_v31 }
 0x555   : > { %v5860_v43 = vadd.f32 %v13439_v4, %v14103_v15  ;;  %v7289_v35 = vpop.eup %7288 }
 0x556   : > { %v4987_v52 = vmul.f32 %v4923_v27, %v4411_v6  ;;  %v4477_v39 = vmul.f32 1.0614054, %v4413_v36  ;;  %v4732_v51 = vmul.f32 %v4668_v59, %v4412_v9  ;;  %v13455_v6 = vpop.f32.mrf.mxu3 }
 0x558   : > { %v5307_v22 = vmul.f32 %v7285_v23, %v4987_v52  ;;  %v4541_v62 = vadd.f32 -1.4531521, %v4477_v39  ;;  %v4796_v14 = vadd.f32 -0.28449672, %v4732_v51  ;;  %v3773_v39 = vmul.f32 0.5, %v13407_v8 }
 0x559   : > { %6747 = vmatmul.msk.f32.gmra.mxu1 %vm577_vm1, %v7364_v19  ;;  %v5866_v23 = vadd.f32 %v13439_v4, %v12461_v38  ;;  %v5869_v8 = vadd.f32 %v13439_v4, %v12516_v12  ;;  %v5923_v12 = vadd.f32 %v13439_v4, %v13364_v0  ;;  %v5932_v0 = vadd.f32 %v13439_v4, %v13414_v29 }
 0x55a   : > { %v5371_v37 = vsub.f32 1.0, %v5307_v22  ;;  %v4605_v41 = vmul.f32 %v4541_v62, %v4413_v36  ;;  %v4860_v60 = vmul.f32 %v4796_v14, %v4412_v9  ;;  %v7367_v62 = vld [vmem:[%s7520_s18 + $0x58] sm:$0xff]  ;;  %v5872_v14 = vadd.f32 %v13439_v4, %v12559_v1 }
 0x55b   : > { %6069 = vxpose.xlu2.b32.cont [4/8] (short) (narrow) %v5860_v43, 16  ;;  %v5929_v1 = vadd.f32 %v13439_v4, %v13397_v40  ;;  %v5935_v29 = vadd.f32 %v13439_v4, %v13428_v20 }
 0x55c   : > { %v5435_v56 = vmul.f32 %v5371_v37, %v3963_v16  ;;  %v4669_v63 = vadd.f32 1.4214138, %v4605_v41  ;;  %v4924_v24 = vadd.f32 0.2548296, %v4860_v60  ;;  %v7369_v37 = vld [vmem:[%s7520_s18 + $0x68] sm:$0xff]  ;;  %v5926_v41 = vadd.f32 %v13439_v4, %v13377_v49  ;;  %v7370_v16 = vld [vmem:[%s7520_s18 + $0x70] sm:$0xff] }
 0x55d   : > { %v7371_v60 = vld [vmem:[%s7520_s18 + $0x78] sm:$0xff] }
 0x55e   : > { %v5499_v7 = vadd.f32 1.0, %v5435_v56  ;;  %v4733_v50 = vmul.f32 %v4669_v63, %v4413_v36  ;;  %v4988_v47 = vmul.f32 %v4924_v24, %v4412_v9  ;;  %v3964_v9 = vsel %vm3900_vm3, 1.0, %v13766_v61  ;;  %v14105_v56 = vld [vmem:[#allocation7_spill] sm:$0xff] }
 0x55f   : > { %v13465_v10 = vpop.f32.mrf.mxu3  ;;  %v1638_v63 = vadd.f32 %v13332_v46, %v14105_v56 }
 0x560   : > { %v5563_v45 = vmul.f32 %v5499_v7, %v3771_v28  ;;  %v4797_v11 = vadd.f32 -0.28449672, %v4733_v50  ;;  %v5308_v21 = vmul.f32 %v7287_v42, %v4988_v47  ;;  %v14106_v28 = vld [vmem:[#allocation21_spill] sm:$0xff] }
 0x561   : > { %6748 = vmatmul.msk.f32.gmra.mxu1 %vm577_vm1, %v7365_v58  ;;  %v1641_v7 = vadd.f32 %v13332_v46, %v14106_v28 }
 0x562   : > { %v4861_v54 = vmul.f32 %v4797_v11, %v4413_v36  ;;  %6736 = vmatmul.msk.f32.gmra.mxu3 %vm577_vm1, %v5563_v45  ;;  %v5372_v26 = vsub.f32 1.0, %v5308_v21  ;;  %v6050_v45 = vpop.trf.xlu0  ;;  %v5938_v11 = vadd.f32 %v13439_v4, %v13445_v34  ;;  %v14107_v21 = vld [vmem:[#allocation14_spill] sm:$0xff]  ;;  %v5944_v34 = vadd.f32 %v13439_v4, %v13465_v10  ;;  %v14110_v10 = vld [vmem:[#allocation29_spill] sm:$0xff] }
 0x563   : > { %6070 = vxpose.xlu2.b32.cont [5/8] (short) (narrow) %v5863_v13, 16 }
 0x564   : > { %v4925_v25 = vadd.f32 0.2548296, %v4861_v54  ;;  %v5436_v33 = vmul.f32 %v5372_v26, %v3964_v9  ;;  %v1644_v54 = vadd.f32 %v13332_v46, %v14107_v21  ;;  %v5941_v26 = vadd.f32 %v13439_v4, %v13455_v6  ;;  %v14109_v6 = vld [vmem:[#allocation34_spill] sm:$0xff] }
 0x565   : > { %v1650_v31 = vadd.f32 %v13332_v46, %v14109_v6 }
 0x566   : > { %v4989_v3 = vmul.f32 %v4925_v25, %v4413_v36  ;;  %v5500_v5 = vadd.f32 1.0, %v5436_v33  ;;  %v6323_v24 = vpop.f32.mrf.mxu1  ;;  %v6230_v20 = vadd.f32 %v6050_v45, %v1644_v54  ;;  %v14108_v25 = vld [vmem:[#allocation26_spill] sm:$0xff] }
 0x567   : > { %v1647_v33 = vadd.f32 %v13332_v46, %v14108_v25 }
 0x568   : > { %v5309_v27 = vmul.f32 %v7289_v35, %v4989_v3  ;;  %v5564_v59 = vmul.f32 %v5500_v5, %v3772_v55 }
 0x569   : > { %6749 = vmatmul.msk.f32.gmra.mxu1 %vm577_vm1, %v7366_v30 }
 0x56a   : > { %v5373_v48 = vsub.f32 1.0, %v5309_v27  ;;  %6737 = vmatmul.msk.f32.gmra.mxu3 %vm577_vm1, %v5564_v59  ;;  %v5946_v52 = vpop.f32.mrf.mxu3  ;;  %v6051_v9 = vpop.trf.xlu0 }
 0x56b   : > { %v5947_v17 = vadd.f32 %v13439_v4, %v5946_v52  ;;  %6071 = vxpose.xlu2.b32.cont [6/8] (short) (narrow) %v5866_v23, 16  ;;  %v6231_v19 = vadd.f32 %v6051_v9, %v1647_v33 }
 0x56c   : > { %v5437_v36 = vmul.f32 %v5373_v48, %v3965_v32  ;;  %v1653_v32 = vadd.f32 %v13332_v46, %v14110_v10 }
 0x56d   : > { %6194 = vxpose.xlu0.b32.start [1/8] (short) (narrow) %v5947_v17, 16 }
 0x56e   : > { %v5501_v57 = vadd.f32 1.0, %v5437_v36  ;;  %v6326_v50 = vpop.f32.mrf.mxu1 }
 0x570   : > { %v5565_v51 = vmul.f32 %v5501_v57, %v3773_v39  ;;  %v14111_v57 = vld [vmem:[#allocation13_spill] sm:$0xff] }
 0x571   : > { %6750 = vmatmul.msk.f32.gmra.mxu1 %vm577_vm1, %v7367_v62  ;;  %v1656_v23 = vadd.f32 %v13332_v46, %v14111_v57  ;;  %v6146_v62 = vpop.trf.xlu1 }
 0x572   : > { %6738 = vmatmul.msk.f32.gmra.mxu3 %vm577_vm1, %v5565_v51  ;;  %v5949_v61 = vpop.f32.mrf.mxu3  ;;  %v6114_v58 = vpop.trf.xlu0 }
 0x573   : > { %v5950_v44 = vadd.f32 %v13439_v4, %v5949_v61  ;;  %6072 = vxpose.xlu2.b32.cont [7/8] (short) (narrow) %v5869_v8, 16  ;;  %v6234_v51 = vadd.f32 %v6114_v58, %v1656_v23  ;;  %v14112_v8 = vld [vmem:[#allocation38_spill] sm:$0xff] }
 0x575   : > { %6195 = vxpose.xlu0.b32.cont [2/8] (short) (narrow) %v5950_v44, 16 }
 0x579   : > { %6751 = vmatmul.msk.f32.gmra.mxu1 %vm577_vm1, %v7368_v18 }
 0x57a   : > { %v5952_v22 = vpop.f32.mrf.mxu3  ;;  %v6115_v30 = vpop.trf.xlu0 }
 0x57b   : > { %v5953_v38 = vadd.f32 %v13439_v4, %v5952_v22  ;;  %6073 = vxpose.xlu2.b32.end [8/8] (short) (narrow) %v5872_v14, 16  ;;  %v1659_v22 = vadd.f32 %v13332_v46, %v14112_v8  ;;  %v14113_v14 = vld [vmem:[#allocation17_spill] sm:$0xff] }
 0x57c   : > { %v1662_v18 = vadd.f32 %v13332_v46, %v14113_v14 }
 0x57d   : > { %6196 = vxpose.xlu0.b32.cont [3/8] (short) (narrow) %v5953_v38, 16  ;;  %v6235_v38 = vadd.f32 %v6115_v30, %v1659_v22 }
 0x581   : > { %6752 = vmatmul.msk.f32.gmra.mxu1 %vm577_vm1, %v7369_v37  ;;  %v6147_v37 = vpop.trf.xlu1 }
 0x583   : > { %6162 = vxpose.xlu2.b32.start [1/8] (short) (narrow) %v5923_v12, 16  ;;  %v6236_v12 = vadd.f32 %v6146_v62, %v1662_v18 }
 0x589   : > { %6753 = vmatmul.msk.f32.gmra.mxu1 %vm577_vm1, %v7370_v16 }
 0x58b   : > { %6163 = vxpose.xlu2.b32.cont [2/8] (short) (narrow) %v5926_v41, 16  ;;  %v14114_v41 = vld [vmem:[#allocation41_spill] sm:$0xff] }
 0x591   : > { %6754 = vmatmul.msk.f32.gmra.mxu1 %vm577_vm1, %v7371_v60  ;;  %v14115_v60 = vld [vmem:[#allocation5_spill] sm:$0xff] }
 0x593   : > { %6164 = vxpose.xlu2.b32.cont [3/8] (short) (narrow) %v5929_v1, 16  ;;  %v6329_v1 = vpop.f32.mrf.mxu1 }
 0x59b   : > { %6165 = vxpose.xlu2.b32.cont [4/8] (short) (narrow) %v5932_v0, 16  ;;  %v1668_v0 = vadd.f32 %v13332_v46, %v14115_v60 }
 0x59c   : > { %v6018_v40 = vpop.trf.xlu2 }
 0x59d   : > { %v6228_v53 = vadd.f32 %v6018_v40, %v1638_v63  ;;  %v6332_v40 = vpop.f32.mrf.mxu1 }
 0x59f   : > { %v6436_v49 = vpop.f32.mrf.mxu0  ;;  %6757 = vmatmul.msk.f32.gmra.mxu0 %vm577_vm1, %v6228_v53 }
 0x5a0   : > { %v6437_v2 = vadd.f32 %v6436_v49, %v6323_v24 }
 0x5a2   : > { %6484 = vst [vmem:[%s13516_s17] sm:$0xff] %v6437_v2  ;;  %v14116_v2 = vld [vmem:[#allocation10_spill] sm:$0xff] }
 0x5a3   : > { %6166 = vxpose.xlu2.b32.cont [5/8] (short) (narrow) %v5935_v29, 16  ;;  %v1671_v53 = vadd.f32 %v13332_v46, %v14116_v2 }
 0x5a4   : > { %v6019_v42 = vpop.trf.xlu2 }
 0x5a5   : > { %v6229_v43 = vadd.f32 %v6019_v42, %v1641_v7 }
 0x5a7   : > { %v6439_v47 = vpop.f32.mrf.mxu0  ;;  %6758 = vmatmul.msk.f32.gmra.mxu0 %vm577_vm1, %v6229_v43 }
 0x5a8   : > { %v6440_v15 = vadd.f32 %v6439_v47, %v6326_v50 }
 0x5aa   : > { %6485 = vst [vmem:[%s13516_s17 + $0x8] sm:$0xff] %v6440_v15 }
 0x5ab   : > { %6167 = vxpose.xlu2.b32.cont [6/8] (short) (narrow) %v5938_v11, 16 }
 0x5af   : > { %6759 = vmatmul.msk.f32.gmra.mxu0 %vm577_vm1, %v6230_v20 }
 0x5b3   : > { %6168 = vxpose.xlu2.b32.cont [7/8] (short) (narrow) %v5941_v26, 16  ;;  %v14117_v26 = vld [vmem:[#allocation28_spill] sm:$0xff] }
 0x5b4   : > { %v6335_v47 = vpop.f32.mrf.mxu1  ;;  %v1674_v9 = vadd.f32 %v13332_v46, %v14117_v26 }
 0x5b7   : > { %6760 = vmatmul.msk.f32.gmra.mxu0 %vm577_vm1, %v6231_v19 }
 0x5bb   : > { %6169 = vxpose.xlu2.b32.end [8/8] (short) (narrow) %v5944_v34, 16 }
 0x5be   : > { %v6338_v43 = vpop.f32.mrf.mxu1 }
 0x5c6   : > { %v6341_v21 = vpop.f32.mrf.mxu1 }
 0x5cd   : > { %v5955_v3 = vpop.f32.mrf.mxu3 }
 0x5ce   : > { %v5956_v35 = vadd.f32 %v13439_v4, %v5955_v3  ;;  %v6344_v54 = vpop.f32.mrf.mxu1 }
 0x5d0   : > { %6197 = vxpose.xlu0.b32.cont [4/8] (short) (narrow) %v5956_v35, 16  ;;  %v14118_v35 = vld [vmem:[#allocation22_spill] sm:$0xff] }
 0x5d6   : > { %v5958_v55 = vpop.f32.mrf.mxu3  ;;  %v6347_v3 = vpop.f32.mrf.mxu1 }
 0x5d7   : > { %v5959_v5 = vadd.f32 %v13439_v4, %v5958_v55  ;;  %v1677_v55 = vadd.f32 %v13332_v46, %v14118_v35 }
 0x5d9   : > { %6198 = vxpose.xlu0.b32.cont [5/8] (short) (narrow) %v5959_v5, 16 }
 0x5dc   : > { %v6082_v13 = vpop.trf.xlu2 }
 0x5dd   : > { %v6232_v27 = vadd.f32 %v6082_v13, %v1650_v31 }
 0x5df   : > { %6761 = vmatmul.msk.f32.gmra.mxu0 %vm577_vm1, %v6232_v27 }
 0x5e4   : > { %v6083_v52 = vpop.trf.xlu2 }
 0x5e5   : > { %v5961_v59 = vpop.f32.mrf.mxu3  ;;  %v6233_v36 = vadd.f32 %v6083_v52, %v1653_v32 }
 0x5e6   : > { %v5962_v48 = vadd.f32 %v13439_v4, %v5961_v59  ;;  %v6350_v59 = vpop.f32.mrf.mxu1 }
 0x5e7   : > { %6762 = vmatmul.msk.f32.gmra.mxu0 %vm577_vm1, %v6233_v36 }
 0x5e8   : > { %6199 = vxpose.xlu0.b32.cont [6/8] (short) (narrow) %v5962_v48, 16 }
 0x5ed   : > { %v5964_v17 = vpop.f32.mrf.mxu3 }
 0x5ee   : > { %v5965_v39 = vadd.f32 %v13439_v4, %v5964_v17  ;;  %v6353_v32 = vpop.f32.mrf.mxu1 }
 0x5ef   : > { %6763 = vmatmul.msk.f32.gmra.mxu0 %vm577_vm1, %v6234_v51 }
 0x5f0   : > { %6200 = vxpose.xlu0.b32.cont [7/8] (short) (narrow) %v5965_v39, 16 }
 0x5f5   : > { %v5967_v61 = vpop.f32.mrf.mxu3 }
 0x5f6   : > { %v5968_v44 = vadd.f32 %v13439_v4, %v5967_v61  ;;  %v1665_v4 = vadd.f32 %v13332_v46, %v14114_v41  ;;  %v6356_v36 = vpop.f32.mrf.mxu1 }
 0x5f7   : > { %6764 = vmatmul.msk.f32.gmra.mxu0 %vm577_vm1, %v6235_v38 }
 0x5f8   : > { %6201 = vxpose.xlu0.b32.end [8/8] (short) (narrow) %v5968_v44, 16  ;;  %v6237_v16 = vadd.f32 %v6147_v37, %v1665_v4 }
 0x5fe   : > { %v6359_v39 = vpop.f32.mrf.mxu1 }
 0x5ff   : > { %6765 = vmatmul.msk.f32.gmra.mxu0 %vm577_vm1, %v6236_v12 }
 0x606   : > { %v6362_v51 = vpop.f32.mrf.mxu1 }
 0x607   : > { %6766 = vmatmul.msk.f32.gmra.mxu0 %vm577_vm1, %v6237_v16 }
 0x60e   : > { %v6365_v30 = vpop.f32.mrf.mxu1 }
 0x616   : > { %v6368_v38 = vpop.f32.mrf.mxu1 }
 0x61c   : > { %v6442_v56 = vpop.f32.mrf.mxu0  ;;  %v6178_v63 = vpop.trf.xlu2 }
 0x61d   : > { %v6443_v24 = vadd.f32 %v6442_v56, %v6329_v1  ;;  %v6238_v49 = vadd.f32 %v6178_v63, %v1668_v0 }
 0x61f   : > { %6486 = vst [vmem:[%s13516_s17 + $0x10] sm:$0xff] %v6443_v24  ;;  %6767 = vmatmul.msk.f32.gmra.mxu0 %vm577_vm1, %v6238_v49 }
 0x624   : > { %v6445_v29 = vpop.f32.mrf.mxu0  ;;  %v6179_v28 = vpop.trf.xlu2 }
 0x625   : > { %v6446_v7 = vadd.f32 %v6445_v29, %v6332_v40  ;;  %v6239_v50 = vadd.f32 %v6179_v28, %v1671_v53 }
 0x627   : > { %6487 = vst [vmem:[%s13516_s17 + $0x18] sm:$0xff] %v6446_v7  ;;  %6768 = vmatmul.msk.f32.gmra.mxu0 %vm577_vm1, %v6239_v50 }
 0x62c   : > { %v6448_v42 = vpop.f32.mrf.mxu0 }
 0x62d   : > { %v6449_v15 = vadd.f32 %v6448_v42, %v6335_v47 }
 0x62f   : > { %6488 = vst [vmem:[%s13516_s17 + $0x20] sm:$0xff] %v6449_v15 }
 0x634   : > { %v6451_v45 = vpop.f32.mrf.mxu0 }
 0x635   : > { %v6452_v11 = vadd.f32 %v6451_v45, %v6338_v43 }
 0x637   : > { %6489 = vst [vmem:[%s13516_s17 + $0x28] sm:$0xff] %v6452_v11 }
 0x65c   : > { %v6454_v20 = vpop.f32.mrf.mxu0 }
 0x65d   : > { %v6455_v25 = vadd.f32 %v6454_v20, %v6341_v21 }
 0x65f   : > { %6490 = vst [vmem:[%s13516_s17 + $0x30] sm:$0xff] %v6455_v25 }
 0x664   : > { %v6210_v33 = vpop.trf.xlu0  ;;  %v6457_v34 = vpop.f32.mrf.mxu0 }
 0x665   : > { %v6240_v19 = vadd.f32 %v6210_v33, %v1674_v9  ;;  %v6458_v5 = vadd.f32 %v6457_v34, %v6344_v54 }
 0x667   : > { %6769 = vmatmul.msk.f32.gmra.mxu0 %vm577_vm1, %v6240_v19  ;;  %6491 = vst [vmem:[%s13516_s17 + $0x38] sm:$0xff] %v6458_v5 }
 0x66c   : > { %v6211_v6 = vpop.trf.xlu0  ;;  %v6460_v13 = vpop.f32.mrf.mxu0 }
 0x66d   : > { %v6241_v31 = vadd.f32 %v6211_v6, %v1677_v55  ;;  %v6461_v27 = vadd.f32 %v6460_v13, %v6347_v3 }
 0x66f   : > { %6770 = vmatmul.msk.f32.gmra.mxu0 %vm577_vm1, %v6241_v31  ;;  %6492 = vst [vmem:[%s13516_s17 + $0x40] sm:$0xff] %v6461_v27 }
 0x674   : > { %v6463_v48 = vpop.f32.mrf.mxu0 }
 0x675   : > { %v6464_v10 = vadd.f32 %v6463_v48, %v6350_v59 }
 0x677   : > { %6493 = vst [vmem:[%s13516_s17 + $0x48] sm:$0xff] %v6464_v10 }
 0x67c   : > { %v6466_v52 = vpop.f32.mrf.mxu0 }
 0x67d   : > { %v6467_v46 = vadd.f32 %v6466_v52, %v6353_v32 }
 0x67f   : > { %6494 = vst [vmem:[%s13516_s17 + $0x50] sm:$0xff] %v6467_v46 }
 0x684   : > { %v6469_v17 = vpop.f32.mrf.mxu0 }
 0x685   : > { %v6470_v58 = vadd.f32 %v6469_v17, %v6356_v36 }
 0x687   : > { %6495 = vst [vmem:[%s13516_s17 + $0x58] sm:$0xff] %v6470_v58 }
 0x69c   : > { %v6472_v57 = vpop.f32.mrf.mxu0 }
 0x69d   : > { %v6473_v23 = vadd.f32 %v6472_v57, %v6359_v39 }
 0x69f   : > { %6496 = vst [vmem:[%s13516_s17 + $0x60] sm:$0xff] %v6473_v23 }
 0x6a4   : > { %v6475_v61 = vpop.f32.mrf.mxu0 }
 0x6a5   : > { %v6476_v44 = vadd.f32 %v6475_v61, %v6362_v51 }
 0x6a7   : > { %6497 = vst [vmem:[%s13516_s17 + $0x68] sm:$0xff] %v6476_v44 }
 0x6e4   : > { %v6478_v8 = vpop.f32.mrf.mxu0 }
 0x6e5   : > { %v6479_v22 = vadd.f32 %v6478_v8, %v6365_v30 }
 0x6e7   : > { %6498 = vst [vmem:[%s13516_s17 + $0x70] sm:$0xff] %v6479_v22 }
 0x6ec   : > { %v6481_v62 = vpop.f32.mrf.mxu0 }
 0x6ed   : > { %v6482_v14 = vadd.f32 %v6481_v62, %v6368_v38 }
 0x6ef   : > { %6499 = vst [vmem:[%s13516_s17 + $0x78] sm:$0xff] %v6482_v14 }
 0x6f0 PF: > { %s26_s21 = sadd.s32 1, %s7378_s21  }
 0x6f1   : > { %p23_p5 = scmp.ge.s32.totalorder %s26_s21, 4  }
 0x6f3   :  { %25 = sbr.rel (!%p23_p5) target bundleno = 2 (0x2), region = 117 }

</bundles_post_ra>
